<compile_context>
chip_gen: v5e
topology: v5e:2x2
jax: 0.10.0
libtpu: 0.0.40
codegen_flags: <defaults>
</compile_context>

<pallas_src>
import functools
import math

import jax
import jax.numpy as jnp
from jax.experimental import pallas as pl
from jax.experimental.pallas import tpu as pltpu

INDIM = 1024


def _round_up(x, m):
    return ((x + m - 1) // m) * m


# ----------------------------------------------------------------------------
# Pallas kernel: fused  matmul -> BN (scale/shift) -> GLU
#   a_ref:     (tm, Kp)        bf16
#   w_ref:     (Kp, 2*nhp)     bf16   columns = [value-half | gate-half], each nhp wide
#   scale_ref: (1, 2*nhp)      f32    folded BN scale
#   shift_ref: (1, 2*nhp)      f32    folded BN shift
#   o_ref:     (tm, nhp)       f32    = val * sigmoid(gate)
# ----------------------------------------------------------------------------
def _matmul_bn_glu_kernel(a_ref, w_ref, scale_ref, shift_ref, o_ref, *, nhp):
    acc = jnp.dot(a_ref[...], w_ref[...], preferred_element_type=jnp.float32)
    acc = acc * scale_ref[...] + shift_ref[...]
    val = acc[:, :nhp]            # lane-aligned split (nhp is a multiple of 128)
    gate = acc[:, nhp:]
    o_ref[...] = (val * (1.0 / (1.0 + jnp.exp(-gate)))).astype(o_ref.dtype)


def matmul_bn_glu(a, layer):
    """a: (M, Kp) bf16.  Returns (M, nhp) f32; real channels are the first n_half lanes."""
    w, scale, shift = layer["w"], layer["scale"], layer["shift"]
    nhp, tm_req, kp = layer["nhp"], layer["tm"], layer["kp"]
    M, Kp = a.shape
    assert Kp == kp and w.shape == (Kp, 2 * nhp)

    tm = min(tm_req, _round_up(M, 8))           # keep tiles sublane (8) aligned
    Mp = _round_up(M, tm)
    a_p = a if Mp == M else jnp.pad(a, ((0, Mp - M), (0, 0)))
    grid = (Mp // tm,)

    cost = pl.CostEstimate(
        flops=2 * Mp * Kp * (2 * nhp),
        transcendentals=Mp * nhp,
        bytes_accessed=Mp * Kp * 2 + w.size * 2 + (scale.size + shift.size) * 4
        + Mp * nhp * 4,
    )

    out = pl.pallas_call(
        functools.partial(_matmul_bn_glu_kernel, nhp=nhp),
        out_shape=jax.ShapeDtypeStruct((Mp, nhp), jnp.float32),
        grid=grid,
        in_specs=[
            pl.BlockSpec((tm, Kp), lambda i: (i, 0)),        # activation tile
            pl.BlockSpec((Kp, 2 * nhp), lambda i: (0, 0)),   # resident weight block
            pl.BlockSpec((1, 2 * nhp), lambda i: (0, 0)),    # BN scale
            pl.BlockSpec((1, 2 * nhp), lambda i: (0, 0)),    # BN shift
        ],
        out_specs=pl.BlockSpec((tm, nhp), lambda i: (i, 0)),
        compiler_params=pltpu.CompilerParams(
            dimension_semantics=("parallel",)),              # M tiles independent
        cost_estimate=cost,
    )(a_p, w, scale, shift)
    return out[:M] if Mp != M else out


# ----------------------------------------------------------------------------
# JAX glue: NHWC upsample / pad / im2col (patches emitted directly in (kh,kw,Cin)
# order, K zero-pad fused into the concat -> no big transpose, no extra pad pass)
# ----------------------------------------------------------------------------
def upsample2_nhwc(x):
    return jnp.repeat(jnp.repeat(x, 2, axis=1), 2, axis=2)


def conv3x3_bn_glu(x_nhwc, layer):
    """x_nhwc: (B, H, W, Cin) bf16 -> (B, H, W, n_half) f32 (conv3x3 + BN + GLU)."""
    B, H, W, C = x_nhwc.shape
    xp = jnp.pad(x_nhwc, ((0, 0), (1, 1), (1, 1), (0, 0)))
    taps = [xp[:, ki:ki + H, kj:kj + W, :] for ki in range(3) for kj in range(3)]
    k_real = 9 * C
    kp = layer["kp"]
    if kp > k_real:
        taps.append(jnp.zeros((B, H, W, kp - k_real), x_nhwc.dtype))
    cols = jnp.concatenate(taps, axis=-1).reshape(B * H * W, kp)
    out = matmul_bn_glu(cols, layer)                       # (B*H*W, nhp)
    cout = layer["n_half"]
    return out[:, :cout].reshape(B, H, W, cout)


# ----------------------------------------------------------------------------
# Parameter construction (PyTorch-default-like init, BN folded, weights pre-packed)
# ----------------------------------------------------------------------------
def _fold_bn(gamma, beta, mean, var, eps=1e-5):
    scale = gamma / jnp.sqrt(var + eps)
    shift = beta - mean * scale
    return scale, shift


def _pack_glu_layer(wmat, bn_scale, bn_shift, n_half, kp, tm):
    """wmat: (K, 2*n_half) f32, columns in torch output-channel order.
    Packs [value | gate] column blocks, each zero-padded to nhp=round_up(n_half,128)
    lanes, rows zero-padded to kp; weights cast to bf16 once here."""
    K = wmat.shape[0]
    nhp = _round_up(n_half, 128)

    def pad_block(m):
        return jnp.pad(m, ((0, kp - K), (0, nhp - n_half)))

    w = jnp.concatenate([pad_block(wmat[:, :n_half]),
                         pad_block(wmat[:, n_half:])], axis=1).astype(jnp.bfloat16)

    def pad_vec(v):
        return jnp.pad(v, (0, nhp - n_half))

    scale = jnp.concatenate([pad_vec(bn_scale[:n_half]), pad_vec(bn_scale[n_half:])])
    shift = jnp.concatenate([pad_vec(bn_shift[:n_half]), pad_vec(bn_shift[n_half:])])
    return dict(
        w=w,
        scale=scale.reshape(1, 2 * nhp).astype(jnp.float32),
        shift=shift.reshape(1, 2 * nhp).astype(jnp.float32),
        nhp=nhp, n_half=n_half, kp=kp, tm=tm,
    )


def _conv_wmat(w):
    """torch conv weight (Cout, Cin, 3, 3) -> (9*Cin, Cout), feature order (ki,kj,cin)
    matching the NHWC im2col above."""
    co, ci, kh, kw = w.shape
    return w.transpose(2, 3, 1, 0).reshape(kh * kw * ci, co)


def make_params(ngf=32, seed=0, in_dim=INDIM):
    keys = iter(jax.random.split(jax.random.PRNGKey(seed), 8))

    def uni(key, shape, fan_in):
        bound = 1.0 / math.sqrt(fan_in)
        return jax.random.uniform(key, shape, jnp.float32, -bound, bound)

    params = {"ngf": ngf}

    # fc: Linear(in_dim, ngf*4*4*2, bias=False) + BatchNorm1d + GLU
    n_fc = ngf * 4 * 4 * 2
    w_fc = uni(next(keys), (n_fc, in_dim), in_dim)          # torch layout (out, in)
    s, b = _fold_bn(jnp.ones((n_fc,)), jnp.zeros((n_fc,)),
                    jnp.zeros((n_fc,)), jnp.ones((n_fc,)))
    params["fc"] = _pack_glu_layer(w_fc.T, s, b, n_half=n_fc // 2,
                                   kp=_round_up(in_dim, 128), tm=8)

    # upBlock(in_planes, out_planes): conv3x3(in, out*2) + BN2d + GLU
    chans = [(ngf, ngf // 2), (ngf // 2, ngf // 4), (ngf // 4, ngf // 8)]
    tms = [128, 256, 512]                                   # divide M exactly (B=2)
    for idx, ((cin, cout), tm) in enumerate(zip(chans, tms), start=1):
        c2 = cout * 2
        w = uni(next(keys), (c2, cin, 3, 3), cin * 9)       # no bias (conv3x3)
        s, b = _fold_bn(jnp.ones((c2,)), jnp.zeros((c2,)),
                        jnp.zeros((c2,)), jnp.ones((c2,)))
        params[f"up{idx}"] = _pack_glu_layer(
            _conv_wmat(w), s, b, n_half=cout, kp=_round_up(9 * cin, 128), tm=tm)
    return params


# ----------------------------------------------------------------------------
# INIT_STAGE_G forward
# ----------------------------------------------------------------------------
def init_stage_g_forward(z_code, params):
    B = z_code.shape[0]
    ngf = params["ngf"]
    fc = params["fc"]

    zb = z_code.astype(jnp.bfloat16)
    if fc["kp"] > zb.shape[1]:
        zb = jnp.pad(zb, ((0, 0), (0, fc["kp"] - zb.shape[1])))
    h = matmul_bn_glu(zb, fc)[:, :fc["n_half"]]             # (B, ngf*16)

    # torch: out_code.view(-1, ngf, 4, 4)  (NCHW)  -> convert to NHWC for the conv path
    h = h.reshape(B, ngf, 4, 4).transpose(0, 2, 3, 1)        # (B, 4, 4, ngf)

    for name in ("up1", "up2", "up3"):
        h = upsample2_nhwc(h)
        h = conv3x3_bn_glu(h.astype(jnp.bfloat16), params[name])

    return h.transpose(0, 3, 1, 2)                           # NCHW, (B, ngf//8, 32, 32)


# ----------------------------------------------------------------------------
if __name__ == "__main__":
    NGF = 32           # module-level default ngf
    B = 2

    key = jax.random.PRNGKey(0)
    z = jax.random.normal(key, (B, INDIM), jnp.float32)

    params = make_params(ngf=NGF, seed=0)

    fwd = jax.jit(lambda zz: init_stage_g_forward(zz, params))
    out = fwd(z)
    jax.block_until_ready(out)

    assert out.shape == (B, NGF // 8, 32, 32), out.shape
    assert bool(jnp.all(jnp.isfinite(out)))
    print("KERNEL_OK")
</pallas_src>

<mosaic_0001>
module attributes {stable_mosaic.version = 11 : i64} {
  func.func @_matmul_bn_glu_kernel(%arg0: i32, %arg1: memref<8x1024xbf16, #tpu.memory_space<vmem>>, %arg2: memref<1024x1024xbf16, #tpu.memory_space<vmem>>, %arg3: memref<1x1024xf32, #tpu.memory_space<vmem>>, %arg4: memref<1x1024xf32, #tpu.memory_space<vmem>>, %arg5: memref<8x512xf32, #tpu.memory_space<vmem>>) attributes {dimension_semantics = [#tpu.dimension_semantics<parallel>], iteration_bounds = array<i64: 1>, scalar_prefetch = 0 : i64, scratch_operands = 0 : i64, tpu.core_type = #tpu.core_type<tc>, window_params = [{transform_indices = @transform_0, window_bounds = array<i64: 8, 1024>}, {pipeline_mode = #tpu.pipeline_mode<synchronous>, transform_indices = @transform_1, window_bounds = array<i64: 1024, 1024>}, {pipeline_mode = #tpu.pipeline_mode<synchronous>, transform_indices = @transform_2, window_bounds = array<i64: 1, 1024>}, {pipeline_mode = #tpu.pipeline_mode<synchronous>, transform_indices = @transform_3, window_bounds = array<i64: 1, 1024>}, {transform_indices = @transform_4, window_bounds = array<i64: 8, 512>}]} {
    %c0 = arith.constant 0 : index
    %c0_0 = arith.constant 0 : index
    %0 = vector.load %arg1[%c0, %c0_0] : memref<8x1024xbf16, #tpu.memory_space<vmem>>, vector<8x1024xbf16>
    %c0_1 = arith.constant 0 : index
    %c0_2 = arith.constant 0 : index
    %1 = vector.load %arg2[%c0_1, %c0_2] : memref<1024x1024xbf16, #tpu.memory_space<vmem>>, vector<1024x1024xbf16>
    %cst = arith.constant dense<0.000000e+00> : vector<8x1024xf32>
    %2 = tpu.matmul %0, %1, %cst {dimension_numbers = #tpu.dot_dimension_numbers<[1], [0], [0], [1], [0, 0, 1, 1], [], []>} : vector<8x1024xbf16>, vector<1024x1024xbf16>, vector<8x1024xf32> -> vector<8x1024xf32>
    %c0_3 = arith.constant 0 : index
    %c0_4 = arith.constant 0 : index
    %3 = vector.load %arg3[%c0_3, %c0_4] : memref<1x1024xf32, #tpu.memory_space<vmem>>, vector<1x1024xf32>
    %4 = vector.broadcast %3 : vector<1x1024xf32> to vector<8x1024xf32>
    %5 = arith.mulf %2, %4 : vector<8x1024xf32>
    %c0_5 = arith.constant 0 : index
    %c0_6 = arith.constant 0 : index
    %6 = vector.load %arg4[%c0_5, %c0_6] : memref<1x1024xf32, #tpu.memory_space<vmem>>, vector<1x1024xf32>
    %7 = vector.broadcast %6 : vector<1x1024xf32> to vector<8x1024xf32>
    %8 = arith.addf %5, %7 : vector<8x1024xf32>
    %9 = vector.extract_strided_slice %8 {offsets = [0, 0], sizes = [8, 512], strides = [1, 1]} : vector<8x1024xf32> to vector<8x512xf32>
    %10 = vector.extract_strided_slice %8 {offsets = [0, 512], sizes = [8, 512], strides = [1, 1]} : vector<8x1024xf32> to vector<8x512xf32>
    %cst_7 = arith.constant 0.000000e+00 : f32
    %11 = vector.broadcast %cst_7 : f32 to vector<8x512xf32>
    %12 = arith.subf %11, %10 : vector<8x512xf32>
    %13 = math.exp %12 : vector<8x512xf32>
    %cst_8 = arith.constant 1.000000e+00 : f32
    %14 = vector.broadcast %cst_8 : f32 to vector<8x512xf32>
    %15 = arith.addf %14, %13 : vector<8x512xf32>
    %cst_9 = arith.constant 1.000000e+00 : f32
    %16 = vector.broadcast %cst_9 : f32 to vector<8x512xf32>
    %17 = arith.divf %16, %15 : vector<8x512xf32>
    %18 = arith.mulf %9, %17 : vector<8x512xf32>
    %c0_10 = arith.constant 0 : index
    %c0_11 = arith.constant 0 : index
    %19 = vector.load %arg5[%c0_10, %c0_11] : memref<8x512xf32, #tpu.memory_space<vmem>>, vector<8x512xf32>
    tpu.vector_store %arg5[%c0_10, %c0_11], %18 {strides = array<i32>} : memref<8x512xf32, #tpu.memory_space<vmem>>, vector<8x512xf32>,
    return
  }
  func.func @transform_0(%arg0: i32) -> (i32, i32) {
    %c0_i32 = arith.constant 0 : i32
    %c0_i32_0 = arith.constant 0 : i32
    return %arg0, %c0_i32 : i32, i32
  }
  func.func @transform_1(%arg0: i32) -> (i32, i32) {
    %c0_i32 = arith.constant 0 : i32
    %c0_i32_0 = arith.constant 0 : i32
    %c0_i32_1 = arith.constant 0 : i32
    return %c0_i32, %c0_i32_0 : i32, i32
  }
  func.func @transform_2(%arg0: i32) -> (i32, i32) {
    %c0_i32 = arith.constant 0 : i32
    %c0_i32_0 = arith.constant 0 : i32
    %c0_i32_1 = arith.constant 0 : i32
    return %c0_i32, %c0_i32_0 : i32, i32
  }
  func.func @transform_3(%arg0: i32) -> (i32, i32) {
    %c0_i32 = arith.constant 0 : i32
    %c0_i32_0 = arith.constant 0 : i32
    %c0_i32_1 = arith.constant 0 : i32
    return %c0_i32, %c0_i32_0 : i32, i32
  }
  func.func @transform_4(%arg0: i32) -> (i32, i32) {
    %c0_i32 = arith.constant 0 : i32
    %c0_i32_0 = arith.constant 0 : i32
    return %arg0, %c0_i32 : i32, i32
  }
}

module attributes {stable_mosaic.version = 11 : i64} {
  func.func @_matmul_bn_glu_kernel(%arg0: i32, %arg1: memref<128x384xbf16, #tpu.memory_space<vmem>>, %arg2: memref<384x256xbf16, #tpu.memory_space<vmem>>, %arg3: memref<1x256xf32, #tpu.memory_space<vmem>>, %arg4: memref<1x256xf32, #tpu.memory_space<vmem>>, %arg5: memref<128x128xf32, #tpu.memory_space<vmem>>) attributes {dimension_semantics = [#tpu.dimension_semantics<parallel>], iteration_bounds = array<i64: 1>, scalar_prefetch = 0 : i64, scratch_operands = 0 : i64, tpu.core_type = #tpu.core_type<tc>, window_params = [{transform_indices = @transform_0, window_bounds = array<i64: 128, 384>}, {pipeline_mode = #tpu.pipeline_mode<synchronous>, transform_indices = @transform_1, window_bounds = array<i64: 384, 256>}, {pipeline_mode = #tpu.pipeline_mode<synchronous>, transform_indices = @transform_2, window_bounds = array<i64: 1, 256>}, {pipeline_mode = #tpu.pipeline_mode<synchronous>, transform_indices = @transform_3, window_bounds = array<i64: 1, 256>}, {transform_indices = @transform_4, window_bounds = array<i64: 128, 128>}]} {
    %c0 = arith.constant 0 : index
    %c0_0 = arith.constant 0 : index
    %0 = vector.load %arg1[%c0, %c0_0] : memref<128x384xbf16, #tpu.memory_space<vmem>>, vector<128x384xbf16>
    %c0_1 = arith.constant 0 : index
    %c0_2 = arith.constant 0 : index
    %1 = vector.load %arg2[%c0_1, %c0_2] : memref<384x256xbf16, #tpu.memory_space<vmem>>, vector<384x256xbf16>
    %cst = arith.constant dense<0.000000e+00> : vector<128x256xf32>
    %2 = tpu.matmul %0, %1, %cst {dimension_numbers = #tpu.dot_dimension_numbers<[1], [0], [0], [1], [0, 0, 1, 1], [], []>} : vector<128x384xbf16>, vector<384x256xbf16>, vector<128x256xf32> -> vector<128x256xf32>
    %c0_3 = arith.constant 0 : index
    %c0_4 = arith.constant 0 : index
    %3 = vector.load %arg3[%c0_3, %c0_4] : memref<1x256xf32, #tpu.memory_space<vmem>>, vector<1x256xf32>
    %4 = vector.broadcast %3 : vector<1x256xf32> to vector<128x256xf32>
    %5 = arith.mulf %2, %4 : vector<128x256xf32>
    %c0_5 = arith.constant 0 : index
    %c0_6 = arith.constant 0 : index
    %6 = vector.load %arg4[%c0_5, %c0_6] : memref<1x256xf32, #tpu.memory_space<vmem>>, vector<1x256xf32>
    %7 = vector.broadcast %6 : vector<1x256xf32> to vector<128x256xf32>
    %8 = arith.addf %5, %7 : vector<128x256xf32>
    %9 = vector.extract_strided_slice %8 {offsets = [0, 0], sizes = [128, 128], strides = [1, 1]} : vector<128x256xf32> to vector<128x128xf32>
    %10 = vector.extract_strided_slice %8 {offsets = [0, 128], sizes = [128, 128], strides = [1, 1]} : vector<128x256xf32> to vector<128x128xf32>
    %cst_7 = arith.constant 0.000000e+00 : f32
    %11 = vector.broadcast %cst_7 : f32 to vector<128x128xf32>
    %12 = arith.subf %11, %10 : vector<128x128xf32>
    %13 = math.exp %12 : vector<128x128xf32>
    %cst_8 = arith.constant 1.000000e+00 : f32
    %14 = vector.broadcast %cst_8 : f32 to vector<128x128xf32>
    %15 = arith.addf %14, %13 : vector<128x128xf32>
    %cst_9 = arith.constant 1.000000e+00 : f32
    %16 = vector.broadcast %cst_9 : f32 to vector<128x128xf32>
    %17 = arith.divf %16, %15 : vector<128x128xf32>
    %18 = arith.mulf %9, %17 : vector<128x128xf32>
    %c0_10 = arith.constant 0 : index
    %c0_11 = arith.constant 0 : index
    %19 = vector.load %arg5[%c0_10, %c0_11] : memref<128x128xf32, #tpu.memory_space<vmem>>, vector<128x128xf32>
    tpu.vector_store %arg5[%c0_10, %c0_11], %18 {strides = array<i32>} : memref<128x128xf32, #tpu.memory_space<vmem>>, vector<128x128xf32>,
    return
  }
  func.func @transform_0(%arg0: i32) -> (i32, i32) {
    %c0_i32 = arith.constant 0 : i32
    %c0_i32_0 = arith.constant 0 : i32
    return %arg0, %c0_i32 : i32, i32
  }
  func.func @transform_1(%arg0: i32) -> (i32, i32) {
    %c0_i32 = arith.constant 0 : i32
    %c0_i32_0 = arith.constant 0 : i32
    %c0_i32_1 = arith.constant 0 : i32
    return %c0_i32, %c0_i32_0 : i32, i32
  }
  func.func @transform_2(%arg0: i32) -> (i32, i32) {
    %c0_i32 = arith.constant 0 : i32
    %c0_i32_0 = arith.constant 0 : i32
    %c0_i32_1 = arith.constant 0 : i32
    return %c0_i32, %c0_i32_0 : i32, i32
  }
  func.func @transform_3(%arg0: i32) -> (i32, i32) {
    %c0_i32 = arith.constant 0 : i32
    %c0_i32_0 = arith.constant 0 : i32
    %c0_i32_1 = arith.constant 0 : i32
    return %c0_i32, %c0_i32_0 : i32, i32
  }
  func.func @transform_4(%arg0: i32) -> (i32, i32) {
    %c0_i32 = arith.constant 0 : i32
    %c0_i32_0 = arith.constant 0 : i32
    return %arg0, %c0_i32 : i32, i32
  }
}

module attributes {stable_mosaic.version = 11 : i64} {
  func.func @_matmul_bn_glu_kernel(%arg0: i32, %arg1: memref<256x256xbf16, #tpu.memory_space<vmem>>, %arg2: memref<256x256xbf16, #tpu.memory_space<vmem>>, %arg3: memref<1x256xf32, #tpu.memory_space<vmem>>, %arg4: memref<1x256xf32, #tpu.memory_space<vmem>>, %arg5: memref<256x128xf32, #tpu.memory_space<vmem>>) attributes {dimension_semantics = [#tpu.dimension_semantics<parallel>], iteration_bounds = array<i64: 2>, scalar_prefetch = 0 : i64, scratch_operands = 0 : i64, tpu.core_type = #tpu.core_type<tc>, window_params = [{transform_indices = @transform_0, window_bounds = array<i64: 256, 256>}, {pipeline_mode = #tpu.pipeline_mode<synchronous>, transform_indices = @transform_1, window_bounds = array<i64: 256, 256>}, {pipeline_mode = #tpu.pipeline_mode<synchronous>, transform_indices = @transform_2, window_bounds = array<i64: 1, 256>}, {pipeline_mode = #tpu.pipeline_mode<synchronous>, transform_indices = @transform_3, window_bounds = array<i64: 1, 256>}, {transform_indices = @transform_4, window_bounds = array<i64: 256, 128>}]} {
    %c0 = arith.constant 0 : index
    %c0_0 = arith.constant 0 : index
    %0 = vector.load %arg1[%c0, %c0_0] : memref<256x256xbf16, #tpu.memory_space<vmem>>, vector<256x256xbf16>
    %c0_1 = arith.constant 0 : index
    %c0_2 = arith.constant 0 : index
    %1 = vector.load %arg2[%c0_1, %c0_2] : memref<256x256xbf16, #tpu.memory_space<vmem>>, vector<256x256xbf16>
    %cst = arith.constant dense<0.000000e+00> : vector<256x256xf32>
    %2 = tpu.matmul %0, %1, %cst {dimension_numbers = #tpu.dot_dimension_numbers<[1], [0], [0], [1], [0, 0, 1, 1], [], []>} : vector<256x256xbf16>, vector<256x256xbf16>, vector<256x256xf32> -> vector<256x256xf32>
    %c0_3 = arith.constant 0 : index
    %c0_4 = arith.constant 0 : index
    %3 = vector.load %arg3[%c0_3, %c0_4] : memref<1x256xf32, #tpu.memory_space<vmem>>, vector<1x256xf32>
    %4 = vector.broadcast %3 : vector<1x256xf32> to vector<256x256xf32>
    %5 = arith.mulf %2, %4 : vector<256x256xf32>
    %c0_5 = arith.constant 0 : index
    %c0_6 = arith.constant 0 : index
    %6 = vector.load %arg4[%c0_5, %c0_6] : memref<1x256xf32, #tpu.memory_space<vmem>>, vector<1x256xf32>
    %7 = vector.broadcast %6 : vector<1x256xf32> to vector<256x256xf32>
    %8 = arith.addf %5, %7 : vector<256x256xf32>
    %9 = vector.extract_strided_slice %8 {offsets = [0, 0], sizes = [256, 128], strides = [1, 1]} : vector<256x256xf32> to vector<256x128xf32>
    %10 = vector.extract_strided_slice %8 {offsets = [0, 128], sizes = [256, 128], strides = [1, 1]} : vector<256x256xf32> to vector<256x128xf32>
    %cst_7 = arith.constant 0.000000e+00 : f32
    %11 = vector.broadcast %cst_7 : f32 to vector<256x128xf32>
    %12 = arith.subf %11, %10 : vector<256x128xf32>
    %13 = math.exp %12 : vector<256x128xf32>
    %cst_8 = arith.constant 1.000000e+00 : f32
    %14 = vector.broadcast %cst_8 : f32 to vector<256x128xf32>
    %15 = arith.addf %14, %13 : vector<256x128xf32>
    %cst_9 = arith.constant 1.000000e+00 : f32
    %16 = vector.broadcast %cst_9 : f32 to vector<256x128xf32>
    %17 = arith.divf %16, %15 : vector<256x128xf32>
    %18 = arith.mulf %9, %17 : vector<256x128xf32>
    %c0_10 = arith.constant 0 : index
    %c0_11 = arith.constant 0 : index
    %19 = vector.load %arg5[%c0_10, %c0_11] : memref<256x128xf32, #tpu.memory_space<vmem>>, vector<256x128xf32>
    tpu.vector_store %arg5[%c0_10, %c0_11], %18 {strides = array<i32>} : memref<256x128xf32, #tpu.memory_space<vmem>>, vector<256x128xf32>,
    return
  }
  func.func @transform_0(%arg0: i32) -> (i32, i32) {
    %c0_i32 = arith.constant 0 : i32
    %c0_i32_0 = arith.constant 0 : i32
    return %arg0, %c0_i32 : i32, i32
  }
  func.func @transform_1(%arg0: i32) -> (i32, i32) {
    %c0_i32 = arith.constant 0 : i32
    %c0_i32_0 = arith.constant 0 : i32
    %c0_i32_1 = arith.constant 0 : i32
    return %c0_i32, %c0_i32_0 : i32, i32
  }
  func.func @transform_2(%arg0: i32) -> (i32, i32) {
    %c0_i32 = arith.constant 0 : i32
    %c0_i32_0 = arith.constant 0 : i32
    %c0_i32_1 = arith.constant 0 : i32
    return %c0_i32, %c0_i32_0 : i32, i32
  }
  func.func @transform_3(%arg0: i32) -> (i32, i32) {
    %c0_i32 = arith.constant 0 : i32
    %c0_i32_0 = arith.constant 0 : i32
    %c0_i32_1 = arith.constant 0 : i32
    return %c0_i32, %c0_i32_0 : i32, i32
  }
  func.func @transform_4(%arg0: i32) -> (i32, i32) {
    %c0_i32 = arith.constant 0 : i32
    %c0_i32_0 = arith.constant 0 : i32
    return %arg0, %c0_i32 : i32, i32
  }
}

module attributes {stable_mosaic.version = 11 : i64} {
  func.func @_matmul_bn_glu_kernel(%arg0: i32, %arg1: memref<512x128xbf16, #tpu.memory_space<vmem>>, %arg2: memref<128x256xbf16, #tpu.memory_space<vmem>>, %arg3: memref<1x256xf32, #tpu.memory_space<vmem>>, %arg4: memref<1x256xf32, #tpu.memory_space<vmem>>, %arg5: memref<512x128xf32, #tpu.memory_space<vmem>>) attributes {dimension_semantics = [#tpu.dimension_semantics<parallel>], iteration_bounds = array<i64: 4>, scalar_prefetch = 0 : i64, scratch_operands = 0 : i64, tpu.core_type = #tpu.core_type<tc>, window_params = [{transform_indices = @transform_0, window_bounds = array<i64: 512, 128>}, {pipeline_mode = #tpu.pipeline_mode<synchronous>, transform_indices = @transform_1, window_bounds = array<i64: 128, 256>}, {pipeline_mode = #tpu.pipeline_mode<synchronous>, transform_indices = @transform_2, window_bounds = array<i64: 1, 256>}, {pipeline_mode = #tpu.pipeline_mode<synchronous>, transform_indices = @transform_3, window_bounds = array<i64: 1, 256>}, {transform_indices = @transform_4, window_bounds = array<i64: 512, 128>}]} {
    %c0 = arith.constant 0 : index
    %c0_0 = arith.constant 0 : index
    %0 = vector.load %arg1[%c0, %c0_0] : memref<512x128xbf16, #tpu.memory_space<vmem>>, vector<512x128xbf16>
    %c0_1 = arith.constant 0 : index
    %c0_2 = arith.constant 0 : index
    %1 = vector.load %arg2[%c0_1, %c0_2] : memref<128x256xbf16, #tpu.memory_space<vmem>>, vector<128x256xbf16>
    %cst = arith.constant dense<0.000000e+00> : vector<512x256xf32>
    %2 = tpu.matmul %0, %1, %cst {dimension_numbers = #tpu.dot_dimension_numbers<[1], [0], [0], [1], [0, 0, 1, 1], [], []>} : vector<512x128xbf16>, vector<128x256xbf16>, vector<512x256xf32> -> vector<512x256xf32>
    %c0_3 = arith.constant 0 : index
    %c0_4 = arith.constant 0 : index
    %3 = vector.load %arg3[%c0_3, %c0_4] : memref<1x256xf32, #tpu.memory_space<vmem>>, vector<1x256xf32>
    %4 = vector.broadcast %3 : vector<1x256xf32> to vector<512x256xf32>
    %5 = arith.mulf %2, %4 : vector<512x256xf32>
    %c0_5 = arith.constant 0 : index
    %c0_6 = arith.constant 0 : index
    %6 = vector.load %arg4[%c0_5, %c0_6] : memref<1x256xf32, #tpu.memory_space<vmem>>, vector<1x256xf32>
    %7 = vector.broadcast %6 : vector<1x256xf32> to vector<512x256xf32>
    %8 = arith.addf %5, %7 : vector<512x256xf32>
    %9 = vector.extract_strided_slice %8 {offsets = [0, 0], sizes = [512, 128], strides = [1, 1]} : vector<512x256xf32> to vector<512x128xf32>
    %10 = vector.extract_strided_slice %8 {offsets = [0, 128], sizes = [512, 128], strides = [1, 1]} : vector<512x256xf32> to vector<512x128xf32>
    %cst_7 = arith.constant 0.000000e+00 : f32
    %11 = vector.broadcast %cst_7 : f32 to vector<512x128xf32>
    %12 = arith.subf %11, %10 : vector<512x128xf32>
    %13 = math.exp %12 : vector<512x128xf32>
    %cst_8 = arith.constant 1.000000e+00 : f32
    %14 = vector.broadcast %cst_8 : f32 to vector<512x128xf32>
    %15 = arith.addf %14, %13 : vector<512x128xf32>
    %cst_9 = arith.constant 1.000000e+00 : f32
    %16 = vector.broadcast %cst_9 : f32 to vector<512x128xf32>
    %17 = arith.divf %16, %15 : vector<512x128xf32>
    %18 = arith.mulf %9, %17 : vector<512x128xf32>
    %c0_10 = arith.constant 0 : index
    %c0_11 = arith.constant 0 : index
    %19 = vector.load %arg5[%c0_10, %c0_11] : memref<512x128xf32, #tpu.memory_space<vmem>>, vector<512x128xf32>
    tpu.vector_store %arg5[%c0_10, %c0_11], %18 {strides = array<i32>} : memref<512x128xf32, #tpu.memory_space<vmem>>, vector<512x128xf32>,
    return
  }
  func.func @transform_0(%arg0: i32) -> (i32, i32) {
    %c0_i32 = arith.constant 0 : i32
    %c0_i32_0 = arith.constant 0 : i32
    return %arg0, %c0_i32 : i32, i32
  }
  func.func @transform_1(%arg0: i32) -> (i32, i32) {
    %c0_i32 = arith.constant 0 : i32
    %c0_i32_0 = arith.constant 0 : i32
    %c0_i32_1 = arith.constant 0 : i32
    return %c0_i32, %c0_i32_0 : i32, i32
  }
  func.func @transform_2(%arg0: i32) -> (i32, i32) {
    %c0_i32 = arith.constant 0 : i32
    %c0_i32_0 = arith.constant 0 : i32
    %c0_i32_1 = arith.constant 0 : i32
    return %c0_i32, %c0_i32_0 : i32, i32
  }
  func.func @transform_3(%arg0: i32) -> (i32, i32) {
    %c0_i32 = arith.constant 0 : i32
    %c0_i32_0 = arith.constant 0 : i32
    %c0_i32_1 = arith.constant 0 : i32
    return %c0_i32, %c0_i32_0 : i32, i32
  }
  func.func @transform_4(%arg0: i32) -> (i32, i32) {
    %c0_i32 = arith.constant 0 : i32
    %c0_i32_0 = arith.constant 0 : i32
    return %arg0, %c0_i32 : i32, i32
  }
}

</mosaic_0001>

<bundles_post_ra>
// kernel: _lambda_.5
= control target key start
LH: loop header
LB: loop body
LE: loop exit
PB: predicated region body
PF: predicated region fallthrough
CT: control target
= control target key end

     0   :  { %s2386_s1 = inlined_call_operand.vmem [shape: bf16[384,256], index: 1, kind: input, shape index: {}]   ;;  %s2387_s0 = inlined_call_operand.vmem [shape: bf16[128,384], index: 0, kind: input, shape index: {}]   ;;  %s2388_s2 = inlined_call_operand.vmem [shape: f32[1,256], index: 2, kind: input, shape index: {}]   ;;  %s2389_s3 = inlined_call_operand.vmem [shape: f32[1,256], index: 3, kind: input, shape index: {}]   ;;  %s2390_s4 = inlined_call_operand.vmem [shape: f32[128,128], index: 4, kind: output, shape index: {}]  }
   0x1   :  { %v1329_v0 = vld [vmem:[%s2386_s1 + $0x70] sm:$0xf]  ;;  %v1502_v1 = vld [vmem:[%s2386_s1 + $0x74] sm:$0xf0]  ;;  %v1321_v5 = vld [vmem:[%s2386_s1 + $0x60] sm:$0xf] }
   0x2   :  { %v1393_v2 = vld [vmem:[%s2386_s1 + $0xf0] sm:$0xf]  ;;  %v1330_v3 = vor.u32 %v1502_v1, %v1329_v0  ;;  %v1518_v4 = vld [vmem:[%s2386_s1 + $0xf4] sm:$0xf0]  ;;  %v1500_v6 = vld [vmem:[%s2386_s1 + $0x64] sm:$0xf0] }
   0x3   :  { %v1394_v7 = vor.u32 %v1518_v4, %v1393_v2  ;;  %v1385_v8 = vld [vmem:[%s2386_s1 + $0xe0] sm:$0xf]  ;;  %v1516_v9 = vld [vmem:[%s2386_s1 + $0xe4] sm:$0xf0]  ;;  %v1322_v10 = vor.u32 %v1500_v6, %v1321_v5  ;;  %v1313_v12 = vld [vmem:[%s2386_s1 + $0x50] sm:$0xf] }
   0x4   :  { %465 = vmatpush.bf16.msra.mxu0 %v1330_v3  ;;  %1535 = vmatpush.bf16.msra.mxu2 %v1330_v3  ;;  %v1386_v11 = vor.u32 %v1516_v9, %v1385_v8  ;;  %v1498_v13 = vld [vmem:[%s2386_s1 + $0x54] sm:$0xf0]  ;;  %v1377_v14 = vld [vmem:[%s2386_s1 + $0xd0] sm:$0xf]  ;;  %v1305_v18 = vld [vmem:[%s2386_s1 + $0x40] sm:$0xf] }
   0x5   :  { %514 = vmatpush.bf16.msra.mxu1 %v1394_v7  ;;  %1543 = vmatpush.bf16.msra.mxu3 %v1394_v7  ;;  %v1514_v15 = vld [vmem:[%s2386_s1 + $0xd4] sm:$0xf0]  ;;  %v1314_v16 = vor.u32 %v1498_v13, %v1313_v12  ;;  %v1496_v19 = vld [vmem:[%s2386_s1 + $0x44] sm:$0xf0]  ;;  %v1369_v20 = vld [vmem:[%s2386_s1 + $0xc0] sm:$0xf] }
   0x6   :  { %v1378_v17 = vor.u32 %v1514_v15, %v1377_v14  ;;  %v1512_v21 = vld [vmem:[%s2386_s1 + $0xc4] sm:$0xf0]  ;;  %v1306_v22 = vor.u32 %v1496_v19, %v1305_v18  ;;  %v1297_v24 = vld [vmem:[%s2386_s1 + $0x30] sm:$0xf]  ;;  %v1494_v25 = vld [vmem:[%s2386_s1 + $0x34] sm:$0xf0] }
   0x7   :  { %v1370_v23 = vor.u32 %v1512_v21, %v1369_v20  ;;  %v1361_v26 = vld [vmem:[%s2386_s1 + $0xb0] sm:$0xf]  ;;  %v1510_v27 = vld [vmem:[%s2386_s1 + $0xb4] sm:$0xf0]  ;;  %v1298_v28 = vor.u32 %v1494_v25, %v1297_v24  ;;  %v1289_v30 = vld [vmem:[%s2386_s1 + $0x20] sm:$0xf] }
   0x8   :  { %466 = vmatpush.bf16.msra.mxu0 %v1322_v10  ;;  %1536 = vmatpush.bf16.msra.mxu2 %v1322_v10  ;;  %v1362_v29 = vor.u32 %v1510_v27, %v1361_v26  ;;  %v1492_v31 = vld [vmem:[%s2386_s1 + $0x24] sm:$0xf0]  ;;  %v1353_v32 = vld [vmem:[%s2386_s1 + $0xa0] sm:$0xf]  ;;  %v1281_v36 = vld [vmem:[%s2386_s1 + $0x10] sm:$0xf] }
   0x9   :  { %515 = vmatpush.bf16.msra.mxu1 %v1386_v11  ;;  %1544 = vmatpush.bf16.msra.mxu3 %v1386_v11  ;;  %v1508_v33 = vld [vmem:[%s2386_s1 + $0xa4] sm:$0xf0]  ;;  %v1290_v34 = vor.u32 %v1492_v31, %v1289_v30  ;;  %v1490_v37 = vld [vmem:[%s2386_s1 + $0x14] sm:$0xf0]  ;;  %v1345_v38 = vld [vmem:[%s2386_s1 + $0x90] sm:$0xf] }
   0xa   :  { %v1354_v35 = vor.u32 %v1508_v33, %v1353_v32  ;;  %v1506_v39 = vld [vmem:[%s2386_s1 + $0x94] sm:$0xf0]  ;;  %v1282_v40 = vor.u32 %v1490_v37, %v1281_v36  ;;  %v1273_v41 = vld [vmem:[%s2386_s1] sm:$0xf]  ;;  %v1488_v43 = vld [vmem:[%s2386_s1 + $0x4] sm:$0xf0] }
   0xb   :  { %v1346_v42 = vor.u32 %v1506_v39, %v1345_v38  ;;  %v1337_v44 = vld [vmem:[%s2386_s1 + $0x80] sm:$0xf]  ;;  %v1504_v45 = vld [vmem:[%s2386_s1 + $0x84] sm:$0xf0]  ;;  %v1464_v47 = vld [vmem:[%s2387_s0 + $0x8] sm:$0xf0]  ;;  %v1274_v52 = vor.u32 %v1488_v43, %v1273_v41 }
   0xc   :  { %467 = vmatpush.bf16.msra.mxu0 %v1314_v16  ;;  %1537 = vmatpush.bf16.msra.mxu2 %v1314_v16  ;;  %v1177_v46 = vld [vmem:[%s2387_s0] sm:$0xf]  ;;  %v1501_v48 = vld [vmem:[%s2386_s1 + $0x74] sm:$0xf]  ;;  %v1331_v49 = vld [vmem:[%s2386_s1 + $0x78] sm:$0xf0]  ;;  %v1338_v56 = vor.u32 %v1504_v45, %v1337_v44 }
   0xd   :  { %516 = vmatpush.bf16.msra.mxu1 %v1378_v17  ;;  %1545 = vmatpush.bf16.msra.mxu3 %v1378_v17  ;;  %v1517_v50 = vld [vmem:[%s2386_s1 + $0xf4] sm:$0xf]  ;;  %v1395_v51 = vld [vmem:[%s2386_s1 + $0xf8] sm:$0xf0]  ;;  %v1225_v53 = vld [vmem:[%s2387_s0 + $0x60] sm:$0xf]  ;;  %v1334_v60 = vor.u32 %v1501_v48, %v1331_v49  ;;  %v1781_v1 = vor.u32 %v1464_v47, %v1177_v46 }
   0xe   :  { %v1476_v54 = vld [vmem:[%s2387_s0 + $0x68] sm:$0xf0]  ;;  %v1463_v55 = vld [vmem:[%s2387_s0 + $0x4] sm:$0xf]  ;;  %v1179_v57 = vld [vmem:[%s2387_s0 + $0xc] sm:$0xf0]  ;;  %v1398_v61 = vor.u32 %v1517_v50, %v1395_v51 }
   0xf   :  { %v1475_v58 = vld [vmem:[%s2387_s0 + $0x64] sm:$0xf]  ;;  %v1227_v59 = vld [vmem:[%s2387_s0 + $0x6c] sm:$0xf0]  ;;  %v1533_v63 = vld [vmem:[%s2386_s1 + $0x174] sm:$0xf]  ;;  %v1783_v2 = vor.u32 %v1476_v54, %v1225_v53  ;;  %v1794_v6 = vor.u32 %v1463_v55, %v1179_v57 }
  0x10   :  { %468 = vmatpush.bf16.msra.mxu0 %v1306_v22  ;;  %1538 = vmatpush.bf16.msra.mxu2 %v1306_v22  ;;  %v1499_v62 = vld [vmem:[%s2386_s1 + $0x64] sm:$0xf]  ;;  %v1459_v0 = vld [vmem:[%s2386_s1 + $0x178] sm:$0xf0]  ;;  %v1323_v3 = vld [vmem:[%s2386_s1 + $0x68] sm:$0xf0]  ;;  %v1796_v7 = vor.u32 %v1475_v58, %v1227_v59 }
  0x11   :  { %517 = vmatpush.bf16.msra.mxu1 %v1370_v23  ;;  %1546 = vmatpush.bf16.msra.mxu3 %v1370_v23  ;;  %v1515_v4 = vld [vmem:[%s2386_s1 + $0xe4] sm:$0xf]  ;;  %v1387_v5 = vld [vmem:[%s2386_s1 + $0xe8] sm:$0xf0]  ;;  %v1462_v8 = vor.u32 %v1533_v63, %v1459_v0  ;;  %v1497_v9 = vld [vmem:[%s2386_s1 + $0x54] sm:$0xf]  ;;  %v1326_v11 = vor.u32 %v1499_v62, %v1323_v3 }
  0x12   :  { %v1315_v10 = vld [vmem:[%s2386_s1 + $0x58] sm:$0xf0]  ;;  %v1390_v12 = vor.u32 %v1515_v4, %v1387_v5  ;;  %v1531_v13 = vld [vmem:[%s2386_s1 + $0x164] sm:$0xf]  ;;  %v1451_v14 = vld [vmem:[%s2386_s1 + $0x168] sm:$0xf0] }
  0x13   :  { %v1513_v15 = vld [vmem:[%s2386_s1 + $0xd4] sm:$0xf]  ;;  %v1379_v16 = vld [vmem:[%s2386_s1 + $0xd8] sm:$0xf0]  ;;  %v1457_v17 = vld [vmem:[%s2386_s1 + $0x170] sm:$0xf]  ;;  %v1454_v20 = vor.u32 %v1531_v13, %v1451_v14  ;;  %v1318_v23 = vor.u32 %v1497_v9, %v1315_v10 }
  0x14   :  { %469 = vmatpush.bf16.msra.mxu0 %v1298_v28  ;;  %1539 = vmatpush.bf16.msra.mxu2 %v1298_v28  ;;  %v1534_v18 = vld [vmem:[%s2386_s1 + $0x174] sm:$0xf0]  ;;  %v1449_v21 = vld [vmem:[%s2386_s1 + $0x160] sm:$0xf]  ;;  %v1532_v22 = vld [vmem:[%s2386_s1 + $0x164] sm:$0xf0]  ;;  %v1382_v24 = vor.u32 %v1513_v15, %v1379_v16 }
  0x15   :  { %518 = vmatpush.bf16.msra.mxu1 %v1362_v29  ;;  %1547 = vmatpush.bf16.msra.mxu3 %v1362_v29  ;;  %v1458_v19 = vor.u32 %v1534_v18, %v1457_v17  ;;  %v1495_v25 = vld [vmem:[%s2386_s1 + $0x44] sm:$0xf]  ;;  %v1529_v26 = vld [vmem:[%s2386_s1 + $0x154] sm:$0xf]  ;;  %v1443_v27 = vld [vmem:[%s2386_s1 + $0x158] sm:$0xf0]  ;;  %v1450_v31 = vor.u32 %v1532_v22, %v1449_v21 }
  0x16   :  { %v1307_v28 = vld [vmem:[%s2386_s1 + $0x48] sm:$0xf0]  ;;  %v1511_v29 = vld [vmem:[%s2386_s1 + $0xc4] sm:$0xf]  ;;  %v1441_v32 = vld [vmem:[%s2386_s1 + $0x150] sm:$0xf] }
  0x17   :  { %v1371_v30 = vld [vmem:[%s2386_s1 + $0xc8] sm:$0xf0]  ;;  %v1530_v33 = vld [vmem:[%s2386_s1 + $0x154] sm:$0xf0]  ;;  %v1467_v36 = vld [vmem:[%s2387_s0 + $0x20] sm:$0xf0]  ;;  %v1310_v39 = vor.u32 %v1495_v25, %v1307_v28 }
  0x18   :  { %470 = vmatpush.bf16.msra.mxu0 %v1290_v34  ;;  %1540 = vmatpush.bf16.msra.mxu2 %v1290_v34  ;;  %v1446_v34 = vor.u32 %v1529_v26, %v1443_v27  ;;  %v1237_v37 = vld [vmem:[%s2387_s0 + $0x78] sm:$0xf]  ;;  %v1479_v38 = vld [vmem:[%s2387_s0 + $0x80] sm:$0xf0]  ;;  %v1493_v41 = vld [vmem:[%s2386_s1 + $0x34] sm:$0xf]  ;;  %v1442_v47 = vor.u32 %v1530_v33, %v1441_v32 }
  0x19   :  { %519 = vmatpush.bf16.msra.mxu1 %v1354_v35  ;;  %1548 = vmatpush.bf16.msra.mxu3 %v1354_v35  ;;  %v1189_v35 = vld [vmem:[%s2387_s0 + $0x18] sm:$0xf]  ;;  %v1435_v43 = vld [vmem:[%s2386_s1 + $0x148] sm:$0xf0]  ;;  %v1299_v44 = vld [vmem:[%s2386_s1 + $0x38] sm:$0xf0] }
  0x1a   :  { %v1509_v45 = vld [vmem:[%s2386_s1 + $0xb4] sm:$0xf]  ;;  %v1363_v46 = vld [vmem:[%s2386_s1 + $0xb8] sm:$0xf0]  ;;  %v1191_v49 = vld [vmem:[%s2387_s0 + $0x24] sm:$0xf0]  ;;  %v1302_v55 = vor.u32 %v1493_v41, %v1299_v44 }
  0x1b   :  { %v1466_v48 = vld [vmem:[%s2387_s0 + $0x1c] sm:$0xf]  ;;  %v1239_v51 = vld [vmem:[%s2387_s0 + $0x84] sm:$0xf0]  ;;  %v1491_v53 = vld [vmem:[%s2386_s1 + $0x24] sm:$0xf] }
  0x1c   :  { %471 = vmatpush.bf16.msra.mxu0 %v1282_v40  ;;  %1541 = vmatpush.bf16.msra.mxu2 %v1282_v40  ;;  %v1374_v40 = vor.u32 %v1511_v29, %v1371_v30  ;;  %v1478_v50 = vld [vmem:[%s2387_s0 + $0x7c] sm:$0xf]  ;;  %v1525_v54 = vld [vmem:[%s2386_s1 + $0x134] sm:$0xf]  ;;  %v1433_v58 = vld [vmem:[%s2386_s1 + $0x140] sm:$0xf]  ;;  %v1926_v3 = vor.u32 %v1466_v48, %v1191_v49 }
  0x1d   :  { %520 = vmatpush.bf16.msra.mxu1 %v1346_v42  ;;  %1549 = vmatpush.bf16.msra.mxu3 %v1346_v42  ;;  %v1527_v42 = vld [vmem:[%s2386_s1 + $0x144] sm:$0xf]  ;;  %v1427_v57 = vld [vmem:[%s2386_s1 + $0x138] sm:$0xf0]  ;;  %v1528_v59 = vld [vmem:[%s2386_s1 + $0x144] sm:$0xf0]  ;;  %v1928_v4 = vor.u32 %v1478_v50, %v1239_v51 }
  0x1e   :  { %v1291_v62 = vld [vmem:[%s2386_s1 + $0x28] sm:$0xf0]  ;;  %v1507_v63 = vld [vmem:[%s2386_s1 + $0xa4] sm:$0xf]  ;;  %v1430_v5 = vor.u32 %v1525_v54, %v1427_v57  ;;  %v1489_v13 = vld [vmem:[%s2386_s1 + $0x14] sm:$0xf] }
  0x1f   :  { %v1355_v0 = vld [vmem:[%s2386_s1 + $0xa8] sm:$0xf0]  ;;  %v1294_v9 = vor.u32 %v1491_v53, %v1291_v62  ;;  %v1283_v14 = vld [vmem:[%s2386_s1 + $0x18] sm:$0xf0]  ;;  %v1523_v15 = vld [vmem:[%s2386_s1 + $0x124] sm:$0xf] }
  0x20   :  { %472 = vmatpush.bf16.msra.mxu0 %v1274_v52  ;;  %1542 = vmatpush.bf16.msra.mxu2 %v1274_v52  ;;  %v1438_v52 = vor.u32 %v1527_v42, %v1435_v43  ;;  %v1358_v10 = vor.u32 %v1507_v63, %v1355_v0  ;;  %v1419_v16 = vld [vmem:[%s2386_s1 + $0x128] sm:$0xf0]  ;;  %v1417_v18 = vld [vmem:[%s2386_s1 + $0x120] sm:$0xf]  ;;  %v1505_v22 = vld [vmem:[%s2386_s1 + $0x94] sm:$0xf] }
  0x21   :  { %521 = vmatpush.bf16.msra.mxu1 %v1338_v56  ;;  %1550 = vmatpush.bf16.msra.mxu3 %v1338_v56  ;;  %v1366_v56 = vor.u32 %v1509_v45, %v1363_v46  ;;  %v1422_v21 = vor.u32 %v1523_v15, %v1419_v16  ;;  %v1275_v26 = vld [vmem:[%s2386_s1 + $0x8] sm:$0xf0]  ;;  %v1521_v27 = vld [vmem:[%s2386_s1 + $0x114] sm:$0xf]  ;;  %v1411_v28 = vld [vmem:[%s2386_s1 + $0x118] sm:$0xf0] }
  0x22   :  { %v1414_v30 = vor.u32 %v1521_v27, %v1411_v28  ;;  %v1503_v32 = vld [vmem:[%s2386_s1 + $0x84] sm:$0xf]  ;;  %v1339_v33 = vld [vmem:[%s2386_s1 + $0x88] sm:$0xf0]  ;;  %v1249_v41 = vld [vmem:[%s2387_s0 + $0x90] sm:$0xf] }
  0x23   :  { %473 = vmatmul.bf16.vlgmr.msra.gmra.mxu0 %v1781_v1  ;;  %493 = vmatmul.bf16.vlgmr.msra.gmra.mxu2 %v1783_v2  ;;  %v1482_v42 = vld [vmem:[%s2387_s0 + $0x98] sm:$0xf0]  ;;  %v1469_v43 = vld [vmem:[%s2387_s0 + $0x34] sm:$0xf]  ;;  %v1203_v44 = vld [vmem:[%s2387_s0 + $0x3c] sm:$0xf0] }
  0x24   :  { %661 = vmatpush.bf16.msrb.mxu0 %v1398_v61  ;;  %522 = vmatmul.bf16.vlgmr.msra.gmra.mxu1 %v1794_v6  ;;  %v1915_v61 = vor.u32 %v1479_v38, %v1237_v37  ;;  %v1519_v37 = vld [vmem:[%s2386_s1 + $0x104] sm:$0xf]  ;;  %v1403_v38 = vld [vmem:[%s2386_s1 + $0x108] sm:$0xf0]  ;;  %v1481_v45 = vld [vmem:[%s2387_s0 + $0x94] sm:$0xf]  ;;  %v1206_v53 = vor.u32 %v1469_v43, %v1203_v44 }
  0x25   :  { %612 = vmatpush.bf16.msrb.mxu3 %v1334_v60  ;;  %710 = vmatpush.bf16.msrb.mxu1 %v1462_v8  ;;  %v1913_v60 = vor.u32 %v1467_v36, %v1189_v35  ;;  %v1434_v8 = vor.u32 %v1528_v59, %v1433_v58  ;;  %v1522_v35 = vld [vmem:[%s2386_s1 + $0x114] sm:$0xf0]  ;;  %v1342_v36 = vor.u32 %v1503_v32, %v1339_v33  ;;  %v1251_v46 = vld [vmem:[%s2387_s0 + $0x9c] sm:$0xf0]  ;;  %v1520_v50 = vld [vmem:[%s2386_s1 + $0x104] sm:$0xf0] }
  0x26   :  { %542 = vmatmul.bf16.vlgmr.msra.gmra.mxu3 %v1796_v7  ;;  %563 = vmatpush.bf16.msrb.mxu2 %v1458_v19  ;;  %v1524_v19 = vld [vmem:[%s2386_s1 + $0x124] sm:$0xf0]  ;;  %v1406_v48 = vor.u32 %v1519_v37, %v1403_v38  ;;  %v1401_v49 = vld [vmem:[%s2386_s1 + $0x100] sm:$0xf]  ;;  %v2026_v54 = vor.u32 %v1481_v45, %v1251_v46  ;;  %v1473_v57 = vld [vmem:[%s2387_s0 + $0x50] sm:$0xf0] }
  0x27   :  { %v1418_v29 = vor.u32 %v1524_v19, %v1417_v18  ;;  %v1261_v58 = vld [vmem:[%s2387_s0 + $0xa8] sm:$0xf]  ;;  %v1485_v59 = vld [vmem:[%s2387_s0 + $0xb0] sm:$0xf0]  ;;  %v1472_v62 = vld [vmem:[%s2387_s0 + $0x4c] sm:$0xf] }
  0x28   :  { %662 = vmatpush.bf16.msrb.mxu0 %v1390_v12  ;;  %v1526_v12 = vld [vmem:[%s2386_s1 + $0x134] sm:$0xf0]  ;;  %v1484_v0 = vld [vmem:[%s2387_s0 + $0xac] sm:$0xf]  ;;  %v1197_v15 = vld [vmem:[%s2387_s0 + $0x20] sm:$0xf] }
  0x29   :  { %613 = vmatpush.bf16.msrb.mxu3 %v1326_v11  ;;  %711 = vmatpush.bf16.msrb.mxu1 %v1454_v20  ;;  %v1425_v11 = vld [vmem:[%s2386_s1 + $0x130] sm:$0xf]  ;;  %v1286_v20 = vor.u32 %v1489_v13, %v1283_v14  ;;  %v1215_v63 = vld [vmem:[%s2387_s0 + $0x54] sm:$0xf0]  ;;  %v1465_v13 = vld [vmem:[%s2387_s0 + $0x10] sm:$0xf0] }
  0x2a   :  { %564 = vmatpush.bf16.msrb.mxu2 %v1450_v31  ;;  %v1426_v17 = vor.u32 %v1526_v12, %v1425_v11  ;;  %v1409_v31 = vld [vmem:[%s2386_s1 + $0x110] sm:$0xf]  ;;  %v1185_v12 = vld [vmem:[%s2387_s0 + $0x8] sm:$0xf]  ;;  %v1468_v16 = vld [vmem:[%s2387_s0 + $0x28] sm:$0xf0] }
  0x2b   :  { %v1186_v14 = vor.u32 %v1465_v13, %v1185_v12  ;;  %v1245_v32 = vld [vmem:[%s2387_s0 + $0x80] sm:$0xf]  ;;  %v1480_v33 = vld [vmem:[%s2387_s0 + $0x88] sm:$0xf0]  ;;  %v1257_v45 = vld [vmem:[%s2387_s0 + $0x98] sm:$0xf] }
  0x2c   :  { %663 = vmatpush.bf16.msrb.mxu0 %v1382_v24  ;;  %v1487_v24 = vld [vmem:[%s2386_s1 + $0x4] sm:$0xf] }
  0x2d   :  { %614 = vmatpush.bf16.msrb.mxu3 %v1318_v23  ;;  %712 = vmatpush.bf16.msrb.mxu1 %v1446_v34  ;;  %v1347_v23 = vld [vmem:[%s2386_s1 + $0x98] sm:$0xf0]  ;;  %v1278_v34 = vor.u32 %v1487_v24, %v1275_v26  ;;  %v1483_v46 = vld [vmem:[%s2387_s0 + $0xa0] sm:$0xf0] }
  0x2e   :  { %565 = vmatpush.bf16.msrb.mxu2 %v1442_v47  ;;  %v1350_v25 = vor.u32 %v1505_v22, %v1347_v23  ;;  %v1410_v47 = vor.u32 %v1522_v35, %v1409_v31 }
  0x30   :  { %664 = vmatpush.bf16.msrb.mxu0 %v1374_v40  ;;  %v1470_v40 = vld [vmem:[%s2387_s0 + $0x38] sm:$0xf0] }
  0x31   :  { %615 = vmatpush.bf16.msrb.mxu3 %v1310_v39  ;;  %713 = vmatpush.bf16.msrb.mxu1 %v1438_v52  ;;  %v1201_v39 = vld [vmem:[%s2387_s0 + $0x30] sm:$0xf]  ;;  %v2024_v52 = vor.u32 %v1482_v42, %v1249_v41 }
  0x32   :  { %566 = vmatpush.bf16.msrb.mxu2 %v1434_v8  ;;  %v1202_v51 = vor.u32 %v1470_v40, %v1201_v39 }
  0x33   :  { %478 = vmatmul.bf16.gmra.mxu0 %v1913_v60  ;;  %498 = vmatmul.bf16.gmra.mxu2 %v1915_v61 }
  0x34   :  { %665 = vmatpush.bf16.msrb.mxu0 %v1366_v56  ;;  %527 = vmatmul.bf16.gmra.mxu1 %v1926_v3  ;;  %v1213_v56 = vld [vmem:[%s2387_s0 + $0x48] sm:$0xf] }
  0x35   :  { %616 = vmatpush.bf16.msrb.mxu3 %v1302_v55  ;;  %714 = vmatpush.bf16.msrb.mxu1 %v1430_v5  ;;  %v1402_v55 = vor.u32 %v1520_v50, %v1401_v49  ;;  %v1263_v5 = vld [vmem:[%s2387_s0 + $0xb4] sm:$0xf0]  ;;  %v1214_v8 = vor.u32 %v1473_v57, %v1213_v56 }
  0x36   :  { %547 = vmatmul.bf16.gmra.mxu3 %v1928_v4  ;;  %567 = vmatpush.bf16.msrb.mxu2 %v1426_v17  ;;  %v2056_v11 = vor.u32 %v1484_v0, %v1263_v5  ;;  %v1198_v17 = vor.u32 %v1468_v16, %v1197_v15 }
  0x38   :  { %666 = vmatpush.bf16.msrb.mxu0 %v1358_v10  ;;  %v1218_v10 = vor.u32 %v1472_v62, %v1215_v63  ;;  %v1269_v62 = vld [vmem:[%s2387_s0 + $0xb0] sm:$0xf]  ;;  %v1486_v63 = vld [vmem:[%s2387_s0 + $0xb8] sm:$0xf0] }
  0x39   :  { %617 = vmatpush.bf16.msrb.mxu3 %v1294_v9  ;;  %715 = vmatpush.bf16.msrb.mxu1 %v1422_v21  ;;  %v2054_v9 = vor.u32 %v1485_v59, %v1261_v58  ;;  %v1477_v21 = vld [vmem:[%s2387_s0 + $0x70] sm:$0xf0] }
  0x3a   :  { %568 = vmatpush.bf16.msrb.mxu2 %v1418_v29 }
  0x3c   :  { %667 = vmatpush.bf16.msrb.mxu0 %v1350_v25 }
  0x3d   :  { %618 = vmatpush.bf16.msrb.mxu3 %v1286_v20  ;;  %716 = vmatpush.bf16.msrb.mxu1 %v1414_v30  ;;  %v1233_v20 = vld [vmem:[%s2387_s0 + $0x68] sm:$0xf] }
  0x3e   :  { %569 = vmatpush.bf16.msrb.mxu2 %v1410_v47  ;;  %v1234_v22 = vor.u32 %v1477_v21, %v1233_v20 }
  0x40   :  { %668 = vmatpush.bf16.msrb.mxu0 %v1342_v36 }
  0x41   :  { %619 = vmatpush.bf16.msrb.mxu3 %v1278_v34  ;;  %717 = vmatpush.bf16.msrb.mxu1 %v1406_v48 }
  0x42   :  { %570 = vmatpush.bf16.msrb.mxu2 %v1402_v55 }
  0x43   :  { %483 = vmatmul.bf16.gmra.mxu0 %v1202_v51  ;;  %503 = vmatmul.bf16.gmra.mxu2 %v2024_v52 }
  0x44   :  { %532 = vmatmul.bf16.gmra.mxu1 %v1206_v53 }
  0x46   :  { %552 = vmatmul.bf16.gmra.mxu3 %v2026_v54 }
  0x53   :  { %488 = vmatmul.bf16.gmra.mxu0 %v1214_v8  ;;  %508 = vmatmul.bf16.gmra.mxu2 %v2054_v9 }
  0x54   :  { %537 = vmatmul.bf16.gmra.mxu1 %v1218_v10 }
  0x56   :  { %557 = vmatmul.bf16.gmra.mxu3 %v2056_v11 }
  0x63   :  { %571 = vmatmul.bf16.vlgmr.msrb.gmra.mxu2 %v1186_v14  ;;  %669 = vmatmul.bf16.vlgmr.msrb.gmra.mxu0 %v1794_v6  ;;  %v1471_v6 = vld [vmem:[%s2387_s0 + $0x40] sm:$0xf0] }
  0x64   :  { %718 = vmatmul.bf16.vlgmr.msrb.gmra.mxu1 %v1186_v14 }
  0x66   :  { %620 = vmatmul.bf16.vlgmr.msrb.gmra.mxu3 %v1781_v1  ;;  %v1209_v1 = vld [vmem:[%s2387_s0 + $0x38] sm:$0xf] }
  0x67   :  { %v1210_v18 = vor.u32 %v1471_v6, %v1209_v1 }
  0x73   :  { %576 = vmatmul.bf16.gmra.mxu2 %v1198_v17  ;;  %674 = vmatmul.bf16.gmra.mxu0 %v1926_v3  ;;  %v1221_v3 = vld [vmem:[%s2387_s0 + $0x50] sm:$0xf] }
  0x74   :  { %723 = vmatmul.bf16.gmra.mxu1 %v1198_v17 }
  0x76   :  { %625 = vmatmul.bf16.gmra.mxu3 %v1913_v60  ;;  %v1474_v60 = vld [vmem:[%s2387_s0 + $0x58] sm:$0xf0] }
  0x77   :  { %v1222_v19 = vor.u32 %v1474_v60, %v1221_v3 }
  0x83   :  { %581 = vmatmul.bf16.gmra.mxu2 %v1210_v18  ;;  %679 = vmatmul.bf16.gmra.mxu0 %v1206_v53 }
  0x84   :  { %728 = vmatmul.bf16.gmra.mxu1 %v1210_v18 }
  0x86   :  { %630 = vmatmul.bf16.gmra.mxu3 %v1202_v51 }
  0x93   :  { %586 = vmatmul.bf16.gmra.mxu2 %v1222_v19  ;;  %684 = vmatmul.bf16.gmra.mxu0 %v1218_v10 }
  0x94   :  { %733 = vmatmul.bf16.gmra.mxu1 %v1222_v19 }
  0x96   :  { %635 = vmatmul.bf16.gmra.mxu3 %v1214_v8 }
  0xa0   :  { %v474_v23 = vpop.f32.mrf.mxu0 }
  0xa1   :  { %v523_v24 = vpop.f32.mrf.mxu1 }
  0xa2   :  { %v2094_v25 = vadd.f32 %v523_v24, %v474_v23  ;;  %v797_v24 = vld [vmem:[%s2389_s3] sm:$0x3] }
  0xa3   :  { %591 = vmatmul.bf16.gmra.mxu2 %v1234_v22  ;;  %689 = vmatmul.bf16.gmra.mxu0 %v1796_v7 }
  0xa4   :  { %738 = vmatmul.bf16.gmra.mxu1 %v1234_v22 }
  0xa6   :  { %640 = vmatmul.bf16.gmra.mxu3 %v1783_v2  ;;  %v494_v26 = vpop.f32.mrf.mxu2  ;;  %v1246_v2 = vor.u32 %v1480_v33, %v1245_v32 }
  0xa8   :  { %v476_v29 = vpop.f32.mrf.mxu0 }
  0xa9   :  { %v543_v27 = vpop.f32.mrf.mxu3  ;;  %v525_v30 = vpop.f32.mrf.mxu1 }
  0xaa   :  { %v2098_v28 = vadd.f32 %v543_v27, %v494_v26  ;;  %v2100_v31 = vadd.f32 %v525_v30, %v476_v29  ;;  %v2160_v29 = vperm.slane %v797_v24, 1 }
  0xae   :  { %v496_v7 = vpop.f32.mrf.mxu2 }
  0xb0   :  { %v479_v36 = vpop.f32.mrf.mxu0 }
  0xb1   :  { %v545_v34 = vpop.f32.mrf.mxu3  ;;  %v528_v37 = vpop.f32.mrf.mxu1 }
  0xb2   :  { %v2108_v35 = vadd.f32 %v545_v34, %v496_v7  ;;  %v2110_v38 = vadd.f32 %v528_v37, %v479_v36 }
  0xb3   :  { %596 = vmatmul.bf16.gmra.mxu2 %v1246_v2  ;;  %694 = vmatmul.bf16.gmra.mxu0 %v1928_v4 }
  0xb4   :  { %743 = vmatmul.bf16.gmra.mxu1 %v1246_v2 }
  0xb6   :  { %645 = vmatmul.bf16.gmra.mxu3 %v1915_v61  ;;  %v499_v39 = vpop.f32.mrf.mxu2  ;;  %v1258_v61 = vor.u32 %v1483_v46, %v1257_v45 }
  0xb8   :  { %v481_v42 = vpop.f32.mrf.mxu0 }
  0xb9   :  { %v548_v40 = vpop.f32.mrf.mxu3  ;;  %v530_v43 = vpop.f32.mrf.mxu1 }
  0xba   :  { %v2114_v41 = vadd.f32 %v548_v40, %v499_v39  ;;  %v2116_v44 = vadd.f32 %v530_v43, %v481_v42 }
  0xbe   :  { %v501_v4 = vpop.f32.mrf.mxu2 }
  0xc0   :  { %v484_v49 = vpop.f32.mrf.mxu0 }
  0xc1   :  { %v550_v47 = vpop.f32.mrf.mxu3  ;;  %v533_v50 = vpop.f32.mrf.mxu1 }
  0xc2   :  { %v2124_v48 = vadd.f32 %v550_v47, %v501_v4  ;;  %v2126_v51 = vadd.f32 %v533_v50, %v484_v49 }
  0xc3   :  { %601 = vmatmul.bf16.gmra.mxu2 %v1258_v61  ;;  %699 = vmatmul.bf16.gmra.mxu0 %v2026_v54 }
  0xc4   :  { %748 = vmatmul.bf16.gmra.mxu1 %v1258_v61 }
  0xc6   :  { %650 = vmatmul.bf16.gmra.mxu3 %v2024_v52  ;;  %v504_v53 = vpop.f32.mrf.mxu2  ;;  %v1270_v52 = vor.u32 %v1486_v63, %v1269_v62 }
  0xc8   :  { %v486_v57 = vpop.f32.mrf.mxu0 }
  0xc9   :  { %v553_v55 = vpop.f32.mrf.mxu3  ;;  %v535_v58 = vpop.f32.mrf.mxu1 }
  0xca   :  { %v2130_v56 = vadd.f32 %v553_v55, %v504_v53  ;;  %v2132_v59 = vadd.f32 %v535_v58, %v486_v57 }
  0xce   :  { %v506_v54 = vpop.f32.mrf.mxu2 }
  0xd0   :  { %v489_v8 = vpop.f32.mrf.mxu0 }
  0xd1   :  { %v555_v0 = vpop.f32.mrf.mxu3  ;;  %v538_v10 = vpop.f32.mrf.mxu1 }
  0xd2   :  { %v2140_v5 = vadd.f32 %v555_v0, %v506_v54  ;;  %v2142_v12 = vadd.f32 %v538_v10, %v489_v8 }
  0xd3   :  { %606 = vmatmul.bf16.gmra.mxu2 %v1270_v52  ;;  %704 = vmatmul.bf16.gmra.mxu0 %v2056_v11 }
  0xd4   :  { %753 = vmatmul.bf16.gmra.mxu1 %v1270_v52 }
  0xd6   :  { %655 = vmatmul.bf16.gmra.mxu3 %v2054_v9  ;;  %v509_v13 = vpop.f32.mrf.mxu2  ;;  %v759_v9 = vld [vmem:[%s2388_s2] sm:$0x3] }
  0xd7   :  { %v2155_v22 = vperm.slane %v759_v9, 1 }
  0xd8   :  { %v491_v16 = vpop.f32.mrf.mxu0 }
  0xd9   :  { %v558_v14 = vpop.f32.mrf.mxu3  ;;  %v540_v17 = vpop.f32.mrf.mxu1 }
  0xda   :  { %v2146_v15 = vadd.f32 %v558_v14, %v509_v13  ;;  %v2148_v1 = vadd.f32 %v540_v17, %v491_v16 }
  0xde   :  { %v511_v6 = vpop.f32.mrf.mxu2 }
  0xe0   :  { %v670_v60 = vpop.f32.mrf.mxu0 }
  0xe1   :  { %v560_v18 = vpop.f32.mrf.mxu3  ;;  %v719_v19 = vpop.f32.mrf.mxu1 }
  0xe2   :  { %v2150_v3 = vadd.f32 %v560_v18, %v511_v6  ;;  %v2171_v6 = vperm.slane %v759_v9, 0 }
  0xe6   :  { %v572_v20 = vpop.f32.mrf.mxu2 }
  0xe7   :  { %v573_v17 = vadd.f32 %v572_v20, %v2094_v25 }
  0xe8   :  { %v672_v23 = vpop.f32.mrf.mxu0 }
  0xe9   :  { %v621_v11 = vpop.f32.mrf.mxu3  ;;  %v721_v26 = vpop.f32.mrf.mxu1 }
  0xea   :  { %v671_v21 = vadd.f32 %v670_v60, %v621_v11 }
  0xec   :  { %v720_v27 = vadd.f32 %v719_v19, %v671_v21 }
  0xee   :  { %v766_v30 = vmul.f32 %v2155_v22, %v720_v27  ;;  %v574_v34 = vpop.f32.mrf.mxu2  ;;  %v2181_v27 = vperm.slane %v797_v24, 0 }
  0xf0   :  { %v804_v32 = vadd.f32 %v2160_v29, %v766_v30  ;;  %v675_v36 = vpop.f32.mrf.mxu0 }
  0xf1   :  { %v623_v33 = vpop.f32.mrf.mxu3  ;;  %v724_v37 = vpop.f32.mrf.mxu1 }
  0xf2   :  { %v835_v7 = vsub.f32 0.0, %v804_v32  ;;  %v673_v2 = vadd.f32 %v672_v23, %v623_v33 }
  0xf4   :  { %v851_v39 = vmul.f32 1.442695, %v835_v7  ;;  %v722_v40 = vadd.f32 %v721_v26, %v673_v2  ;;  %v765_v26 = vmul.f32 %v2171_v6, %v573_v17  ;;  %v575_v2 = vadd.f32 %v574_v34, %v2100_v31 }
  0xf6   :  { %1551 = vpow2.f32 %v851_v39  ;;  %v768_v42 = vmul.f32 %v2155_v22, %v722_v40  ;;  %v2166_v53 = vpop.f32.mrf.mxu2  ;;  %v803_v24 = vadd.f32 %v2181_v27, %v765_v26  ;;  %v767_v34 = vmul.f32 %v2171_v6, %v575_v2 }
  0xf8   :  { %v806_v43 = vadd.f32 %v2160_v29, %v768_v42  ;;  %v677_v47 = vpop.f32.mrf.mxu0 }
  0xf9   :  { %v626_v45 = vpop.f32.mrf.mxu3  ;;  %v726_v61 = vpop.f32.mrf.mxu1 }
  0xfa   :  { %v836_v46 = vsub.f32 0.0, %v806_v43  ;;  %v676_v4 = vadd.f32 %v675_v36, %v626_v45 }
  0xfc   :  { %v1552_v49 = vpop.eup %1551  ;;  %v853_v50 = vmul.f32 1.442695, %v836_v46  ;;  %v725_v55 = vadd.f32 %v724_v37, %v676_v4 }
  0xfd   :  { %v883_v57 = vadd.f32 1.0, %v1552_v49 }
  0xfe   :  { %1553 = vpow2.f32 %v853_v50  ;;  %v770_v58 = vmul.f32 %v2155_v22, %v725_v55  ;;  %v2175_v19 = vpop.f32.mrf.mxu2 }
  0xff   :  { %1555 = vrcp.f32 %v883_v57  ;;  %v908_v25 = vand.u32 2147483647, %v883_v57  ;;  %v910_v20 = vand.u32 2147483648, %v883_v57  ;;  %vm904_vm1 = vweird.f32 %v883_v57 }
 0x100   :  { %v808_v62 = vadd.f32 %v2160_v29, %v770_v58  ;;  %v680_v52 = vpop.f32.mrf.mxu0 }
 0x101   :  { %v628_v63 = vpop.f32.mrf.mxu3  ;;  %v729_v8 = vpop.f32.mrf.mxu1  ;;  %v911_v45 = vor.u32 1.1754944e-38, %v910_v20  ;;  %vm909_vm3 = vcmp.eq.f32.partialorder %v908_v25, 8.507059e+37 }
 0x102   :  { %v837_v54 = vsub.f32 0.0, %v808_v62  ;;  %v678_v0 = vadd.f32 %v677_v47, %v628_v63 }
 0x104   :  { %v1554_v10 = vpop.eup %1553  ;;  %v855_v13 = vmul.f32 1.442695, %v837_v54  ;;  %v727_v14 = vadd.f32 %v726_v61, %v678_v0 }
 0x105   :  { %v1556_v16 = vpop.eup %1555  ;;  %v2173_v18 = vadd.f32 1.0, %v1554_v10 }
 0x106   :  { %v900_v60 = vmul.f32 %v1556_v16, %v883_v57  ;;  %1557 = vpow2.f32 %v855_v13  ;;  %v772_v11 = vmul.f32 %v2155_v22, %v727_v14  ;;  %vm905_vm0 = vweird.f32 %v1556_v16  ;;  %v2190_v50 = vpop.f32.mrf.mxu2 }
 0x107   :  { %1559 = vrcp.f32 %v2173_v18  ;;  %vm906_vm2 = vmor %vm904_vm1, %vm905_vm0  ;;  %v923_v57 = vand.u32 2147483647, %v2173_v18  ;;  %v925_v58 = vand.u32 2147483648, %v2173_v18  ;;  %v805_v13 = vadd.f32 %v2181_v27, %v767_v34 }
 0x108   :  { %v901_v21 = vsub.f32 1.0, %v900_v60  ;;  %v810_v23 = vadd.f32 %v2160_v29, %v772_v11  ;;  %v682_v7 = vpop.f32.mrf.mxu0  ;;  %vm919_vm5 = vweird.f32 %v2173_v18  ;;  %v578_v11 = vadd.f32 %v2166_v53, %v2110_v38 }
 0x109   :  { %v631_v9 = vpop.f32.mrf.mxu3  ;;  %v731_v36 = vpop.f32.mrf.mxu1  ;;  %v926_v60 = vor.u32 1.1754944e-38, %v925_v58  ;;  %vm924_vm7 = vcmp.eq.f32.partialorder %v923_v57, 8.507059e+37 }
 0x10a   :  { %v902_v30 = vmul.f32 %v1556_v16, %v901_v21  ;;  %v838_v32 = vsub.f32 0.0, %v810_v23  ;;  %v681_v33 = vadd.f32 %v680_v52, %v631_v9 }
 0x10c   :  { %v1558_v37 = vpop.eup %1557  ;;  %v903_v39 = vadd.f32 %v1556_v16, %v902_v30  ;;  %v857_v40 = vmul.f32 1.442695, %v838_v32  ;;  %v730_v42 = vadd.f32 %v729_v8, %v681_v33  ;;  %v769_v32 = vmul.f32 %v2171_v6, %v578_v11 }
 0x10d   :  { %v1560_v43 = vpop.eup %1559  ;;  %v2185_v46 = vadd.f32 1.0, %v1558_v37 }
 0x10e   :  { %v907_v4 = vsel %vm906_vm2, %v1556_v16, %v903_v39  ;;  %v915_v47 = vmul.f32 %v1560_v43, %v2173_v18  ;;  %1561 = vpow2.f32 %v857_v40  ;;  %v774_v55 = vmul.f32 %v2155_v22, %v730_v42 }
 0x10f   :  { %v912_v61 = vsel %vm909_vm3, %v911_v45, %v907_v4  ;;  %1563 = vrcp.f32 %v2185_v46  ;;  %vm920_vm4 = vweird.f32 %v1560_v43  ;;  %v940_v33 = vand.u32 2147483648, %v2185_v46 }
 0x110   :  { %v1139_v31 = vmul.f32 %v912_v61, %v803_v24  ;;  %v916_v49 = vsub.f32 1.0, %v915_v47  ;;  %v812_v54 = vadd.f32 %v2160_v29, %v774_v55  ;;  %v685_v52 = vpop.f32.mrf.mxu0  ;;  %vm921_vm6 = vmor %vm919_vm5, %vm920_vm4  ;;  %v938_v2 = vand.u32 2147483647, %v2185_v46 }
 0x111   :  { %v633_v62 = vpop.f32.mrf.mxu3  ;;  %v734_v8 = vpop.f32.mrf.mxu1  ;;  %vm934_vm9 = vweird.f32 %v2185_v46  ;;  %v807_v4 = vadd.f32 %v2181_v27, %v769_v32  ;;  %v941_v47 = vor.u32 1.1754944e-38, %v940_v33  ;;  %v580_v61 = vadd.f32 %v2175_v19, %v2116_v44 }
 0x112   :  { %1155 = vst [vmem:[%s2390_s4] sm:$0xff] %v1139_v31  ;;  %v917_v63 = vmul.f32 %v1560_v43, %v916_v49  ;;  %v683_v0 = vadd.f32 %v682_v7, %v633_v62  ;;  %v839_v16 = vsub.f32 0.0, %v812_v54  ;;  %vm939_vm11 = vcmp.eq.f32.partialorder %v938_v2, 8.507059e+37 }
 0x113   :  { %v583_v32 = vadd.f32 %v2190_v50, %v2126_v51 }
 0x114   :  { %v1562_v10 = vpop.eup %1561  ;;  %v918_v14 = vadd.f32 %v1560_v43, %v917_v63  ;;  %v732_v23 = vadd.f32 %v731_v36, %v683_v0  ;;  %v859_v20 = vmul.f32 1.442695, %v839_v16  ;;  %v2214_v36 = vpop.f32.mrf.mxu2 }
 0x115   :  { %v1564_v17 = vpop.eup %1563  ;;  %v2203_v21 = vadd.f32 1.0, %v1562_v10  ;;  %v773_v51 = vmul.f32 %v2171_v6, %v583_v32 }
 0x116   :  { %v922_v26 = vsel %vm921_vm6, %v1560_v43, %v918_v14  ;;  %v930_v25 = vmul.f32 %v1564_v17, %v2185_v46  ;;  %v776_v38 = vmul.f32 %v2155_v22, %v732_v23  ;;  %vm935_vm8 = vweird.f32 %v1564_v17 }
 0x117   :  { %v927_v9 = vsel %vm924_vm7, %v926_v60, %v922_v26  ;;  %1565 = vrcp.f32 %v2203_v21  ;;  %vm936_vm10 = vmor %vm934_vm9, %vm935_vm8  ;;  %v953_v44 = vand.u32 2147483647, %v2203_v21  ;;  %v955_v19 = vand.u32 2147483648, %v2203_v21 }
 0x118   :  { %v1140_v30 = vmul.f32 %v927_v9, %v805_v13  ;;  %v931_v18 = vsub.f32 1.0, %v930_v25  ;;  %1567 = vpow2.f32 %v859_v20  ;;  %v687_v39 = vpop.f32.mrf.mxu0  ;;  %v814_v40 = vadd.f32 %v2160_v29, %v776_v38 }
 0x119   :  { %v636_v53 = vpop.f32.mrf.mxu3  ;;  %v736_v42 = vpop.f32.mrf.mxu1  ;;  %vm949_vm13 = vweird.f32 %v2203_v21  ;;  %v956_v26 = vor.u32 1.1754944e-38, %v955_v19  ;;  %vm954_vm15 = vcmp.eq.f32.partialorder %v953_v44, 8.507059e+37 }
 0x11a   :  { %1156 = vst [vmem:[%s2390_s4 + $0x8] sm:$0xff] %v1140_v30  ;;  %v932_v7 = vmul.f32 %v1564_v17, %v931_v18  ;;  %v686_v37 = vadd.f32 %v685_v52, %v636_v53  ;;  %v840_v31 = vsub.f32 0.0, %v814_v40  ;;  %v771_v52 = vmul.f32 %v2171_v6, %v580_v61 }
 0x11c   :  { %v933_v43 = vadd.f32 %v1564_v17, %v932_v7  ;;  %v735_v24 = vadd.f32 %v734_v8, %v686_v37  ;;  %v861_v46 = vmul.f32 1.442695, %v840_v31  ;;  %v587_v11 = vpop.f32.mrf.mxu2  ;;  %v809_v20 = vadd.f32 %v2181_v27, %v771_v52 }
 0x11d   :  { %v1566_v45 = vpop.eup %1565 }
 0x11e   :  { %v1568_v34 = vpop.eup %1567  ;;  %v937_v49 = vsel %vm936_vm10, %v1564_v17, %v933_v43  ;;  %v945_v55 = vmul.f32 %v1566_v45, %v2203_v21  ;;  %v778_v57 = vmul.f32 %v2155_v22, %v735_v24  ;;  %vm950_vm12 = vweird.f32 %v1566_v45 }
 0x11f   :  { %v942_v58 = vsel %vm939_vm11, %v941_v47, %v937_v49  ;;  %v2223_v62 = vadd.f32 1.0, %v1568_v34  ;;  %vm951_vm14 = vmor %vm949_vm13, %vm950_vm12 }
 0x120   :  { %v1141_v63 = vmul.f32 %v942_v58, %v807_v4  ;;  %v946_v54 = vsub.f32 1.0, %v945_v55  ;;  %v816_v0 = vadd.f32 %v2160_v29, %v778_v57  ;;  %v690_v14 = vpop.f32.mrf.mxu0  ;;  %v811_v58 = vadd.f32 %v2181_v27, %v773_v51 }
 0x121   :  { %1569 = vrcp.f32 %v2223_v62  ;;  %v638_v8 = vpop.f32.mrf.mxu3  ;;  %v739_v17 = vpop.f32.mrf.mxu1  ;;  %v968_v50 = vand.u32 2147483647, %v2223_v62  ;;  %v970_v43 = vand.u32 2147483648, %v2223_v62  ;;  %vm964_vm1 = vweird.f32 %v2223_v62 }
 0x122   :  { %1157 = vst [vmem:[%s2390_s4 + $0x10] sm:$0xff] %v1141_v63  ;;  %v947_v10 = vmul.f32 %v1566_v45, %v946_v54  ;;  %1571 = vpow2.f32 %v861_v46  ;;  %v841_v13 = vsub.f32 0.0, %v816_v0  ;;  %v688_v16 = vadd.f32 %v687_v39, %v638_v8 }
 0x123   :  { %v971_v46 = vor.u32 1.1754944e-38, %v970_v43  ;;  %v585_v63 = vadd.f32 %v2214_v36, %v2132_v59  ;;  %vm969_vm3 = vcmp.eq.f32.partialorder %v968_v50, 8.507059e+37 }
 0x124   :  { %v948_v60 = vadd.f32 %v1566_v45, %v947_v10  ;;  %v863_v23 = vmul.f32 1.442695, %v841_v13  ;;  %v737_v25 = vadd.f32 %v736_v42, %v688_v16  ;;  %v2252_v49 = vpop.f32.mrf.mxu2  ;;  %v588_v16 = vadd.f32 %v587_v11, %v2142_v12 }
 0x126   :  { %v952_v9 = vsel %vm951_vm14, %v1566_v45, %v948_v60  ;;  %1573 = vpow2.f32 %v863_v23  ;;  %v780_v33 = vmul.f32 %v2155_v22, %v737_v25  ;;  %v777_v11 = vmul.f32 %v2171_v6, %v588_v16 }
 0x127   :  { %v1570_v30 = vpop.eup %1569  ;;  %v957_v18 = vsel %vm954_vm15, %v956_v26, %v952_v9 }
 0x128   :  { %v1572_v38 = vpop.eup %1571  ;;  %v1142_v53 = vmul.f32 %v957_v18, %v809_v20  ;;  %v960_v21 = vmul.f32 %v1570_v30, %v2223_v62  ;;  %v818_v2 = vadd.f32 %v2160_v29, %v780_v33  ;;  %v692_v42 = vpop.f32.mrf.mxu0  ;;  %vm965_vm0 = vweird.f32 %v1570_v30 }
 0x129   :  { %v2239_v7 = vadd.f32 1.0, %v1572_v38  ;;  %v641_v37 = vpop.f32.mrf.mxu3  ;;  %v741_v24 = vpop.f32.mrf.mxu1  ;;  %vm966_vm2 = vmor %vm964_vm1, %vm965_vm0 }
 0x12a   :  { %1158 = vst [vmem:[%s2390_s4 + $0x18] sm:$0xff] %v1142_v53  ;;  %v961_v39 = vsub.f32 1.0, %v960_v21  ;;  %v691_v40 = vadd.f32 %v690_v14, %v641_v37  ;;  %v842_v47 = vsub.f32 0.0, %v818_v2  ;;  %v775_v14 = vmul.f32 %v2171_v6, %v585_v63 }
 0x12b   :  { %1575 = vrcp.f32 %v2239_v7  ;;  %v983_v60 = vand.u32 2147483647, %v2239_v7  ;;  %v985_v25 = vand.u32 2147483648, %v2239_v7  ;;  %vm979_vm5 = vweird.f32 %v2239_v7 }
 0x12c   :  { %v1574_v45 = vpop.eup %1573  ;;  %v962_v4 = vmul.f32 %v1570_v30, %v961_v39  ;;  %v740_v61 = vadd.f32 %v739_v17, %v691_v40  ;;  %v865_v55 = vmul.f32 1.442695, %v842_v47  ;;  %v813_v12 = vadd.f32 %v2181_v27, %v775_v14  ;;  %v592_v21 = vpop.f32.mrf.mxu2 }
 0x12d   :  { %v2249_v31 = vadd.f32 1.0, %v1574_v45  ;;  %vm984_vm6 = vcmp.eq.f32.partialorder %v983_v60, 8.507059e+37  ;;  %v986_v2 = vor.u32 1.1754944e-38, %v985_v25  ;;  %v815_v63 = vadd.f32 %v2181_v27, %v777_v11 }
 0x12e   :  { %v963_v34 = vadd.f32 %v1570_v30, %v962_v4  ;;  %v782_v57 = vmul.f32 %v2155_v22, %v740_v61 }
 0x12f   :  { %1577 = vrcp.f32 %v2249_v31  ;;  %v998_v37 = vand.u32 2147483647, %v2249_v31  ;;  %v1000_v39 = vand.u32 2147483648, %v2249_v31  ;;  %vm994_vm9 = vweird.f32 %v2249_v31 }
 0x130   :  { %v967_v54 = vsel %vm966_vm2, %v1570_v30, %v963_v34  ;;  %1579 = vpow2.f32 %v865_v55  ;;  %v820_v0 = vadd.f32 %v2160_v29, %v782_v57  ;;  %v695_v13 = vpop.f32.mrf.mxu0  ;;  %v590_v55 = vadd.f32 %v2252_v49, %v2148_v1 }
 0x131   :  { %v1576_v62 = vpop.eup %1575  ;;  %v972_v52 = vsel %vm969_vm3, %v971_v46, %v967_v54  ;;  %v643_v44 = vpop.f32.mrf.mxu3  ;;  %v1001_v34 = vor.u32 1.1754944e-38, %v1000_v39  ;;  %vm999_vm11 = vcmp.eq.f32.partialorder %v998_v37, 8.507059e+37 }
 0x132   :  { %v1143_v19 = vmul.f32 %v972_v52, %v811_v58  ;;  %v975_v8 = vmul.f32 %v1576_v62, %v2239_v7  ;;  %v843_v10 = vsub.f32 0.0, %v820_v0  ;;  %v693_v59 = vadd.f32 %v692_v42, %v643_v44  ;;  %v744_v36 = vpop.f32.mrf.mxu1 }
 0x133   :  { %vm980_vm4 = vweird.f32 %v1576_v62  ;;  %v779_v49 = vmul.f32 %v2171_v6, %v590_v55 }
 0x134   :  { %1159 = vst [vmem:[%s2390_s4 + $0x20] sm:$0xff] %v1143_v19  ;;  %v976_v17 = vsub.f32 1.0, %v975_v8  ;;  %v867_v23 = vmul.f32 1.442695, %v843_v10  ;;  %v742_v20 = vadd.f32 %v741_v24, %v693_v59  ;;  %vm981_vm7 = vmor %vm979_vm5, %vm980_vm4  ;;  %v594_v10 = vpop.f32.mrf.mxu2  ;;  %v593_v59 = vadd.f32 %v592_v21, %v2098_v28 }
 0x135   :  { %v1578_v26 = vpop.eup %1577 }
 0x136   :  { %v1580_v9 = vpop.eup %1579  ;;  %v977_v30 = vmul.f32 %v1576_v62, %v976_v17  ;;  %v990_v18 = vmul.f32 %v1578_v26, %v2249_v31  ;;  %1581 = vpow2.f32 %v867_v23  ;;  %v784_v33 = vmul.f32 %v2155_v22, %v742_v20 }
 0x137   :  { %v2271_v32 = vadd.f32 1.0, %v1580_v9  ;;  %vm995_vm8 = vweird.f32 %v1578_v26  ;;  %v781_v11 = vmul.f32 %v2171_v6, %v593_v59 }
 0x138   :  { %v978_v38 = vadd.f32 %v1576_v62, %v977_v30  ;;  %v991_v53 = vsub.f32 1.0, %v990_v18  ;;  %v822_v50 = vadd.f32 %v2160_v29, %v784_v33  ;;  %v697_v7 = vpop.f32.mrf.mxu0  ;;  %vm996_vm10 = vmor %vm994_vm9, %vm995_vm8 }
 0x139   :  { %1583 = vrcp.f32 %v2271_v32  ;;  %v646_v40 = vpop.f32.mrf.mxu3  ;;  %v1013_v14 = vand.u32 2147483647, %v2271_v32  ;;  %v1015_v16 = vand.u32 2147483648, %v2271_v32  ;;  %vm1009_vm13 = vweird.f32 %v2271_v32 }
 0x13a   :  { %v982_v42 = vsel %vm981_vm7, %v1576_v62, %v978_v38  ;;  %v992_v51 = vmul.f32 %v1578_v26, %v991_v53  ;;  %v696_v24 = vadd.f32 %v695_v13, %v646_v40  ;;  %v844_v61 = vsub.f32 0.0, %v822_v50  ;;  %v746_v46 = vpop.f32.mrf.mxu1 }
 0x13b   :  { %v987_v43 = vsel %vm984_vm6, %v986_v2, %v982_v42  ;;  %vm1014_vm15 = vcmp.eq.f32.partialorder %v1013_v14, 8.507059e+37  ;;  %v1016_v28 = vor.u32 1.1754944e-38, %v1015_v16 }
 0x13c   :  { %v1582_v45 = vpop.eup %1581  ;;  %v1144_v4 = vmul.f32 %v987_v43, %v813_v12  ;;  %v993_v47 = vadd.f32 %v1578_v26, %v992_v51  ;;  %v745_v58 = vadd.f32 %v744_v36, %v696_v24  ;;  %v869_v0 = vmul.f32 1.442695, %v844_v61 }
 0x13d   :  { %v2282_v57 = vadd.f32 1.0, %v1582_v45  ;;  %v819_v61 = vadd.f32 %v2181_v27, %v781_v11 }
 0x13e   :  { %1160 = vst [vmem:[%s2390_s4 + $0x28] sm:$0xff] %v1144_v4  ;;  %v997_v54 = vsel %vm996_vm10, %v1578_v26, %v993_v47  ;;  %v786_v44 = vmul.f32 %v2155_v22, %v745_v58  ;;  %v817_v26 = vadd.f32 %v2181_v27, %v779_v49 }
 0x13f   :  { %v1584_v31 = vpop.eup %1583  ;;  %v1002_v62 = vsel %vm999_vm11, %v1001_v34, %v997_v54  ;;  %1585 = vrcp.f32 %v2282_v57  ;;  %v1030_v40 = vand.u32 2147483648, %v2282_v57  ;;  %vm1024_vm1 = vweird.f32 %v2282_v57 }
 0x140   :  { %v1145_v52 = vmul.f32 %v1002_v62, %v815_v63  ;;  %v1005_v1 = vmul.f32 %v1584_v31, %v2271_v32  ;;  %1587 = vpow2.f32 %v869_v0  ;;  %v824_v36 = vadd.f32 %v2160_v29, %v786_v44  ;;  %v700_v20 = vpop.f32.mrf.mxu0 }
 0x141   :  { %v648_v19 = vpop.f32.mrf.mxu3  ;;  %vm1010_vm12 = vweird.f32 %v1584_v31  ;;  %v1028_v32 = vand.u32 2147483647, %v2282_v57  ;;  %v1031_v4 = vor.u32 1.1754944e-38, %v1030_v40 }
 0x142   :  { %1161 = vst [vmem:[%s2390_s4 + $0x30] sm:$0xff] %v1145_v52  ;;  %v1006_v8 = vsub.f32 1.0, %v1005_v1  ;;  %v698_v13 = vadd.f32 %v697_v7, %v648_v19  ;;  %v845_v25 = vsub.f32 0.0, %v824_v36  ;;  %vm1011_vm14 = vmor %vm1009_vm13, %vm1010_vm12  ;;  %v749_v38 = vpop.f32.mrf.mxu1  ;;  %v597_v7 = vpop.f32.mrf.mxu2 }
 0x143   :  { %vm1029_vm3 = vcmp.eq.f32.partialorder %v1028_v32, 8.507059e+37 }
 0x144   :  { %v1007_v17 = vmul.f32 %v1584_v31, %v1006_v8  ;;  %v747_v60 = vadd.f32 %v746_v46, %v698_v13  ;;  %v871_v33 = vmul.f32 1.442695, %v845_v25 }
 0x145   :  { %v1586_v23 = vpop.eup %1585 }
 0x146   :  { %v1008_v9 = vadd.f32 %v1584_v31, %v1007_v17  ;;  %v1020_v30 = vmul.f32 %v1586_v23, %v2282_v57  ;;  %v788_v18 = vmul.f32 %v2155_v22, %v747_v60  ;;  %v1588_v12 = vpop.eup %1587  ;;  %1589 = vpow2.f32 %v871_v33 }
 0x147   :  { %v2304_v2 = vadd.f32 1.0, %v1588_v12  ;;  %vm1025_vm0 = vweird.f32 %v1586_v23  ;;  %v598_v17 = vadd.f32 %v597_v7, %v2114_v41 }
 0x148   :  { %v1012_v53 = vsel %vm1011_vm14, %v1584_v31, %v1008_v9  ;;  %v1021_v21 = vsub.f32 1.0, %v1020_v30  ;;  %v826_v37 = vadd.f32 %v2160_v29, %v788_v18  ;;  %vm1026_vm2 = vmor %vm1024_vm1, %vm1025_vm0  ;;  %v702_v63 = vpop.f32.mrf.mxu0  ;;  %v595_v31 = vadd.f32 %v594_v10, %v2108_v35 }
 0x149   :  { %v1017_v39 = vsel %vm1014_vm15, %v1016_v28, %v1012_v53  ;;  %v651_v42 = vpop.f32.mrf.mxu3  ;;  %1591 = vrcp.f32 %v2304_v2  ;;  %v1043_v10 = vand.u32 2147483647, %v2304_v2  ;;  %v1045_v13 = vand.u32 2147483648, %v2304_v2 }
 0x14a   :  { %v1146_v51 = vmul.f32 %v1017_v39, %v817_v26  ;;  %v1022_v50 = vmul.f32 %v1586_v23, %v1021_v21  ;;  %v846_v43 = vsub.f32 0.0, %v826_v37  ;;  %v701_v45 = vadd.f32 %v700_v20, %v651_v42  ;;  %v751_v1 = vpop.f32.mrf.mxu1  ;;  %v599_v60 = vpop.f32.mrf.mxu2 }
 0x14b   :  { %v783_v35 = vmul.f32 %v2171_v6, %v595_v31  ;;  %vm1039_vm5 = vweird.f32 %v2304_v2  ;;  %v1046_v18 = vor.u32 1.1754944e-38, %v1045_v13  ;;  %vm1044_vm7 = vcmp.eq.f32.partialorder %v1043_v10, 8.507059e+37 }
 0x14c   :  { %1162 = vst [vmem:[%s2390_s4 + $0x38] sm:$0xff] %v1146_v51  ;;  %v1023_v24 = vadd.f32 %v1586_v23, %v1022_v50  ;;  %v873_v47 = vmul.f32 1.442695, %v846_v43  ;;  %v750_v55 = vadd.f32 %v749_v38, %v701_v45  ;;  %v1590_v58 = vpop.eup %1589  ;;  %v785_v21 = vmul.f32 %v2171_v6, %v598_v17 }
 0x14d   :  { %v2316_v62 = vadd.f32 1.0, %v1590_v58  ;;  %v821_v30 = vadd.f32 %v2181_v27, %v783_v35  ;;  %v600_v40 = vadd.f32 %v599_v60, %v2124_v48 }
 0x14e   :  { %v1027_v34 = vsel %vm1026_vm2, %v1586_v23, %v1023_v24  ;;  %1593 = vpow2.f32 %v873_v47  ;;  %v790_v57 = vmul.f32 %v2155_v22, %v750_v55 }
 0x14f   :  { %v1032_v46 = vsel %vm1029_vm3, %v1031_v4, %v1027_v34  ;;  %v1592_v54 = vpop.eup %1591  ;;  %1595 = vrcp.f32 %v2316_v62  ;;  %v1060_v32 = vand.u32 2147483648, %v2316_v62  ;;  %v1058_v50 = vand.u32 2147483647, %v2316_v62 }
 0x150   :  { %v1147_v0 = vmul.f32 %v1032_v46, %v819_v61  ;;  %v1035_v52 = vmul.f32 %v1592_v54, %v2304_v2  ;;  %v828_v19 = vadd.f32 %v2160_v29, %v790_v57  ;;  %vm1040_vm4 = vweird.f32 %v1592_v54  ;;  %v705_v28 = vpop.f32.mrf.mxu0 }
 0x151   :  { %v653_v49 = vpop.f32.mrf.mxu3  ;;  %vm1041_vm6 = vmor %vm1039_vm5, %vm1040_vm4  ;;  %v823_v4 = vadd.f32 %v2181_v27, %v785_v21  ;;  %vm1054_vm9 = vweird.f32 %v2316_v62  ;;  %v1061_v61 = vor.u32 1.1754944e-38, %v1060_v32  ;;  %vm1059_vm11 = vcmp.eq.f32.partialorder %v1058_v50, 8.507059e+37 }
 0x152   :  { %1163 = vst [vmem:[%s2390_s4 + $0x40] sm:$0xff] %v1147_v0  ;;  %v1036_v44 = vsub.f32 1.0, %v1035_v52  ;;  %v703_v8 = vadd.f32 %v702_v63, %v653_v49  ;;  %v847_v59 = vsub.f32 0.0, %v828_v19  ;;  %v754_v37 = vpop.f32.mrf.mxu1  ;;  %v602_v34 = vpop.f32.mrf.mxu2  ;;  %v787_v63 = vmul.f32 %v2171_v6, %v600_v40 }
 0x154   :  { %v1594_v14 = vpop.eup %1593  ;;  %v1037_v16 = vmul.f32 %v1592_v54, %v1036_v44  ;;  %v752_v36 = vadd.f32 %v751_v1, %v703_v8  ;;  %v875_v25 = vmul.f32 1.442695, %v847_v59 }
 0x155   :  { %v2329_v23 = vadd.f32 1.0, %v1594_v14  ;;  %v1596_v9 = vpop.eup %1595  ;;  %v825_v14 = vadd.f32 %v2181_v27, %v787_v63 }
 0x156   :  { %v1038_v26 = vadd.f32 %v1592_v54, %v1037_v16  ;;  %v792_v20 = vmul.f32 %v2155_v22, %v752_v36  ;;  %v1050_v41 = vmul.f32 %v1596_v9, %v2316_v62  ;;  %vm1055_vm8 = vweird.f32 %v1596_v9 }
 0x157   :  { %1597 = vrcp.f32 %v2329_v23  ;;  %vm1056_vm10 = vmor %vm1054_vm9, %vm1055_vm8  ;;  %v1073_v57 = vand.u32 2147483647, %v2329_v23  ;;  %v1075_v62 = vand.u32 2147483648, %v2329_v23  ;;  %vm1069_vm13 = vweird.f32 %v2329_v23 }
 0x158   :  { %v1042_v12 = vsel %vm1041_vm6, %v1592_v54, %v1038_v26  ;;  %1599 = vpow2.f32 %v875_v25  ;;  %v830_v38 = vadd.f32 %v2160_v29, %v792_v20  ;;  %v1051_v2 = vsub.f32 1.0, %v1050_v41  ;;  %v707_v44 = vpop.f32.mrf.mxu0 }
 0x159   :  { %v656_v11 = vpop.f32.mrf.mxu3  ;;  %v1047_v33 = vsel %vm1044_vm7, %v1046_v18, %v1042_v12  ;;  %v1076_v16 = vor.u32 1.1754944e-38, %v1075_v62  ;;  %vm1074_vm15 = vcmp.eq.f32.partialorder %v1073_v57, 8.507059e+37  ;;  %v603_v20 = vadd.f32 %v602_v34, %v2130_v56 }
 0x15a   :  { %v1148_v53 = vmul.f32 %v1047_v33, %v821_v30  ;;  %v706_v39 = vadd.f32 %v705_v28, %v656_v11  ;;  %v848_v42 = vsub.f32 0.0, %v830_v38  ;;  %v1052_v51 = vmul.f32 %v1596_v9, %v1051_v2  ;;  %v756_v10 = vpop.f32.mrf.mxu1  ;;  %v604_v18 = vpop.f32.mrf.mxu2 }
 0x15b   :  { %v789_v28 = vmul.f32 %v2171_v6, %v603_v20  ;;  %v605_v32 = vadd.f32 %v604_v18, %v2140_v5 }
 0x15c   :  { %1164 = vst [vmem:[%s2390_s4 + $0x48] sm:$0xff] %v1148_v53  ;;  %v755_v43 = vadd.f32 %v754_v37, %v706_v39  ;;  %v877_v7 = vmul.f32 1.442695, %v848_v42  ;;  %v1053_v47 = vadd.f32 %v1596_v9, %v1052_v51 }
 0x15d   :  { %v1598_v24 = vpop.eup %1597  ;;  %v827_v37 = vadd.f32 %v2181_v27, %v789_v28 }
 0x15e   :  { %v1600_v45 = vpop.eup %1599  ;;  %v1065_v48 = vmul.f32 %v1598_v24, %v2329_v23  ;;  %1601 = vpow2.f32 %v877_v7  ;;  %v794_v58 = vmul.f32 %v2155_v22, %v755_v43  ;;  %v1057_v46 = vsel %vm1056_vm10, %v1596_v9, %v1053_v47 }
 0x15f   :  { %v895_v55 = vadd.f32 1.0, %v1600_v45  ;;  %v1062_v31 = vsel %vm1059_vm11, %v1061_v61, %v1057_v46  ;;  %vm1070_vm12 = vweird.f32 %v1598_v24  ;;  %v791_v7 = vmul.f32 %v2171_v6, %v605_v32 }
 0x160   :  { %v1066_v54 = vsub.f32 1.0, %v1065_v48  ;;  %v1149_v52 = vmul.f32 %v1062_v31, %v823_v4  ;;  %v832_v49 = vadd.f32 %v2160_v29, %v794_v58  ;;  %vm1071_vm14 = vmor %vm1069_vm13, %vm1070_vm12 }
 0x161   :  { %v658_v0 = vpop.f32.mrf.mxu3  ;;  %1603 = vrcp.f32 %v895_v55  ;;  %v1090_v11 = vand.u32 2147483648, %v895_v55  ;;  %v1088_v56 = vand.u32 2147483647, %v895_v55  ;;  %vm1084_vm1 = vweird.f32 %v895_v55 }
 0x162   :  { %v1067_v1 = vmul.f32 %v1598_v24, %v1066_v54  ;;  %v708_v19 = vadd.f32 %v707_v44, %v658_v0  ;;  %1165 = vst [vmem:[%s2390_s4 + $0x50] sm:$0xff] %v1149_v52  ;;  %v849_v35 = vsub.f32 0.0, %v832_v49  ;;  %v607_v47 = vpop.f32.mrf.mxu2  ;;  %v829_v34 = vadd.f32 %v2181_v27, %v791_v7 }
 0x163   :  { %v1091_v39 = vor.u32 1.1754944e-38, %v1090_v11  ;;  %vm1089_vm3 = vcmp.eq.f32.partialorder %v1088_v56, 8.507059e+37  ;;  %v608_v0 = vadd.f32 %v607_v47, %v2146_v15 }
 0x164   :  { %v1068_v8 = vadd.f32 %v1598_v24, %v1067_v1  ;;  %v1602_v13 = vpop.eup %1601  ;;  %v757_v59 = vadd.f32 %v756_v10, %v708_v19  ;;  %v879_v60 = vmul.f32 1.442695, %v849_v35 }
 0x165   :  { %v896_v17 = vadd.f32 1.0, %v1602_v13  ;;  %v793_v52 = vmul.f32 %v2171_v6, %v608_v0 }
 0x166   :  { %v1072_v36 = vsel %vm1071_vm14, %v1598_v24, %v1068_v8  ;;  %v796_v9 = vmul.f32 %v2155_v22, %v757_v59 }
 0x167   :  { %v1604_v26 = vpop.eup %1603  ;;  %v1077_v25 = vsel %vm1074_vm15, %v1076_v16, %v1072_v36  ;;  %1605 = vrcp.f32 %v896_v17  ;;  %v1105_v24 = vand.u32 2147483648, %v896_v17  ;;  %v1103_v4 = vand.u32 2147483647, %v896_v17 }
 0x168   :  { %v1150_v30 = vmul.f32 %v1077_v25, %v825_v14  ;;  %v1080_v23 = vmul.f32 %v1604_v26, %v895_v55  ;;  %1607 = vpow2.f32 %v879_v60  ;;  %v834_v41 = vadd.f32 %v2160_v29, %v796_v9 }
 0x169   :  { %vm1085_vm0 = vweird.f32 %v1604_v26  ;;  %vm1099_vm5 = vweird.f32 %v896_v17  ;;  %v1106_v61 = vor.u32 1.1754944e-38, %v1105_v24  ;;  %vm1104_vm7 = vcmp.eq.f32.partialorder %v1103_v4, 8.507059e+37 }
 0x16a   :  { %1166 = vst [vmem:[%s2390_s4 + $0x58] sm:$0xff] %v1150_v30  ;;  %v1081_v12 = vsub.f32 1.0, %v1080_v23  ;;  %v850_v38 = vsub.f32 0.0, %v834_v41  ;;  %vm1086_vm2 = vmor %vm1084_vm1, %vm1085_vm0  ;;  %v609_v44 = vpop.f32.mrf.mxu2  ;;  %v831_v13 = vadd.f32 %v2181_v27, %v793_v52 }
 0x16b   :  { %v610_v15 = vadd.f32 %v609_v44, %v2150_v3 }
 0x16c   :  { %v1082_v33 = vmul.f32 %v1604_v26, %v1081_v12  ;;  %v881_v21 = vmul.f32 1.442695, %v850_v38 }
 0x16d   :  { %v1606_v22 = vpop.eup %1605  ;;  %v795_v60 = vmul.f32 %v2171_v6, %v610_v15 }
 0x16e   :  { %v1083_v53 = vadd.f32 %v1604_v26, %v1082_v33  ;;  %v1608_v2 = vpop.eup %1607  ;;  %v1095_v40 = vmul.f32 %v1606_v22, %v896_v17  ;;  %1609 = vpow2.f32 %v881_v21  ;;  %vm1100_vm4 = vweird.f32 %v1606_v22 }
 0x16f   :  { %v897_v42 = vadd.f32 1.0, %v1608_v2  ;;  %vm1101_vm6 = vmor %vm1099_vm5, %vm1100_vm4  ;;  %v833_v9 = vadd.f32 %v2181_v27, %v795_v60 }
 0x170   :  { %v1087_v29 = vsel %vm1086_vm2, %v1604_v26, %v1083_v53  ;;  %v1096_v50 = vsub.f32 1.0, %v1095_v40 }
 0x171   :  { %v1092_v51 = vsel %vm1089_vm3, %v1091_v39, %v1087_v29  ;;  %1611 = vrcp.f32 %v897_v42  ;;  %v1120_v62 = vand.u32 2147483648, %v897_v42  ;;  %v1118_v49 = vand.u32 2147483647, %v897_v42 }
 0x172   :  { %v1151_v43 = vmul.f32 %v1092_v51, %v827_v37  ;;  %v1097_v45 = vmul.f32 %v1606_v22, %v1096_v50  ;;  %vm1114_vm9 = vweird.f32 %v897_v42 }
 0x173   :  { %v1121_v35 = vor.u32 1.1754944e-38, %v1120_v62  ;;  %vm1119_vm11 = vcmp.eq.f32.partialorder %v1118_v49, 8.507059e+37 }
 0x174   :  { %1167 = vst [vmem:[%s2390_s4 + $0x60] sm:$0xff] %v1151_v43  ;;  %v1098_v5 = vadd.f32 %v1606_v22, %v1097_v45  ;;  %v1610_v48 = vpop.eup %1609 }
 0x175   :  { %v898_v58 = vadd.f32 1.0, %v1610_v48 }
 0x176   :  { %v1102_v55 = vsel %vm1101_vm6, %v1606_v22, %v1098_v5 }
 0x177   :  { %v1612_v46 = vpop.eup %1611  ;;  %v1107_v63 = vsel %vm1104_vm7, %v1106_v61, %v1102_v55  ;;  %1613 = vrcp.f32 %v898_v58  ;;  %v1135_v17 = vand.u32 2147483648, %v898_v58  ;;  %v1133_v25 = vand.u32 2147483647, %v898_v58 }
 0x178   :  { %v1152_v54 = vmul.f32 %v1107_v63, %v829_v34  ;;  %v1110_v31 = vmul.f32 %v1612_v46, %v897_v42  ;;  %vm1115_vm8 = vweird.f32 %v1612_v46  ;;  %vm1129_vm13 = vweird.f32 %v898_v58 }
 0x179   :  { %vm1116_vm10 = vmor %vm1114_vm9, %vm1115_vm8  ;;  %v1136_v3 = vor.u32 1.1754944e-38, %v1135_v17  ;;  %vm1134_vm15 = vcmp.eq.f32.partialorder %v1133_v25, 8.507059e+37 }
 0x17a   :  { %1168 = vst [vmem:[%s2390_s4 + $0x68] sm:$0xff] %v1152_v54  ;;  %v1111_v57 = vsub.f32 1.0, %v1110_v31 }
 0x17c   :  { %v1112_v1 = vmul.f32 %v1612_v46, %v1111_v57 }
 0x17d   :  { %v1614_v19 = vpop.eup %1613 }
 0x17e   :  { %v1113_v8 = vadd.f32 %v1612_v46, %v1112_v1  ;;  %v1125_v10 = vmul.f32 %v1614_v19, %v898_v58  ;;  %vm1130_vm12 = vweird.f32 %v1614_v19 }
 0x17f   :  { %vm1131_vm14 = vmor %vm1129_vm13, %vm1130_vm12 }
 0x180   :  { %v1117_v14 = vsel %vm1116_vm10, %v1612_v46, %v1113_v8  ;;  %v1126_v59 = vsub.f32 1.0, %v1125_v10 }
 0x181   :  { %v1122_v16 = vsel %vm1119_vm11, %v1121_v35, %v1117_v14 }
 0x182   :  { %v1153_v36 = vmul.f32 %v1122_v16, %v831_v13  ;;  %v1127_v26 = vmul.f32 %v1614_v19, %v1126_v59 }
 0x184   :  { %1169 = vst [vmem:[%s2390_s4 + $0x70] sm:$0xff] %v1153_v36  ;;  %v1128_v20 = vadd.f32 %v1614_v19, %v1127_v26 }
 0x186   :  { %v1132_v30 = vsel %vm1131_vm14, %v1614_v19, %v1128_v20 }
 0x187   :  { %v1137_v23 = vsel %vm1134_vm15, %v1136_v3, %v1132_v30 }
 0x188   :  { %v1154_v18 = vmul.f32 %v1137_v23, %v833_v9 }
 0x18a   :  { %1170 = vst [vmem:[%s2390_s4 + $0x78] sm:$0xff] %v1154_v18 }

// kernel: _lambda_.4
= control target key start
LH: loop header
LB: loop body
LE: loop exit
PB: predicated region body
PF: predicated region fallthrough
CT: control target
= control target key end

     0   :  { %9 = vsyncpa [#allocation3], 0  ;;  %s6715_s18 = smov [#allocation2]   ;;  %s6716_s20 = smov 512   ;;  %s6932_s0 = inlined_call_operand.vmem [shape: bf16[8,1024], index: 0, kind: input, shape index: {}]   ;;  %s6933_s1 = inlined_call_operand.hbm [shape: bf16[1024,1024], index: 1, kind: input, shape index: {}]   ;;  %s6934_s2 = inlined_call_operand.vmem [shape: f32[1,1024], index: 2, kind: input, shape index: {}]   ;;  %s6935_s3 = inlined_call_operand.vmem [shape: f32[1,1024], index: 3, kind: input, shape index: {}]   ;;  %s6936_s4 = inlined_call_operand.vmem [shape: f32[8,512], index: 4, kind: output, shape index: {}]  }
   0x1   :  { %s16_s17 = sshll.u32 %s6933_s1, 4  ;;  %s18_s19 = sshll.u32 %s6715_s18, 4  ;;  %s17_s17 = int_to_ptr.hbm [resolvable:$true] %s16_s17  ;;  %s19_s19 = int_to_ptr.vmem [resolvable:$true] %s18_s19 }
   0x2   :  { %s6717_s21 = smov 32  }
   0x3   :  { %24 = dma.hbm_to_vmem [thread:$0]  %s17_s17, 65536, %s19_s19, [#allocation3], %s6716_s20, %s6716_s20, %s6717_s21  }
   0x4   :  { %6713 = dma.done.wait [#allocation3], 65536  }
   0x5   :  { %6714 = vsyncadd [#allocation3], 4294901760  ;;  %v4336_v0 = vld [vmem:[#allocation2 + $0x1c0] sm:$0xf] }
   0x6   :  { %v6218_v1 = vld [vmem:[#allocation2 + $0x1dc] sm:$0xf0] }
   0x7   :  { %v4592_v2 = vld [vmem:[#allocation2 + $0x3c0] sm:$0xf]  ;;  %v4337_v3 = vor.u32 %v6218_v1, %v4336_v0 }
   0x8   :  { %v6282_v4 = vld [vmem:[#allocation2 + $0x3dc] sm:$0xf0] }
   0x9   :  { %v4848_v5 = vld [vmem:[#allocation2 + $0x5c0] sm:$0xf]  ;;  %v4593_v7 = vor.u32 %v6282_v4, %v4592_v2  ;;  %3137 = vmatpush.bf16.msra.mxu0 %v4337_v3 }
   0xa   :  { %v6346_v6 = vld [vmem:[#allocation2 + $0x5dc] sm:$0xf0] }
   0xb   :  { %v4849_v8 = vor.u32 %v6346_v6, %v4848_v5  ;;  %v5104_v9 = vld [vmem:[#allocation2 + $0x7c0] sm:$0xf]  ;;  %3150 = vmatpush.bf16.msra.mxu1 %v4593_v7 }
   0xc   :  { %v6410_v10 = vld [vmem:[#allocation2 + $0x7dc] sm:$0xf0] }
   0xd   :  { %v4304_v11 = vld [vmem:[#allocation2 + $0x180] sm:$0xf]  ;;  %v5105_v12 = vor.u32 %v6410_v10, %v5104_v9  ;;  %3163 = vmatpush.bf16.msra.mxu2 %v4849_v8 }
   0xe   :  { %v6210_v13 = vld [vmem:[#allocation2 + $0x19c] sm:$0xf0] }
   0xf   :  { %v4560_v14 = vld [vmem:[#allocation2 + $0x380] sm:$0xf]  ;;  %v4305_v16 = vor.u32 %v6210_v13, %v4304_v11  ;;  %3176 = vmatpush.bf16.msra.mxu3 %v5105_v12 }
  0x10   :  { %v6274_v15 = vld [vmem:[#allocation2 + $0x39c] sm:$0xf0] }
  0x11   :  { %v4561_v17 = vor.u32 %v6274_v15, %v4560_v14  ;;  %v4816_v18 = vld [vmem:[#allocation2 + $0x580] sm:$0xf]  ;;  %3138 = vmatpush.bf16.msra.mxu0 %v4305_v16 }
  0x12   :  { %v6338_v19 = vld [vmem:[#allocation2 + $0x59c] sm:$0xf0] }
  0x13   :  { %v5072_v20 = vld [vmem:[#allocation2 + $0x780] sm:$0xf]  ;;  %v4817_v21 = vor.u32 %v6338_v19, %v4816_v18  ;;  %3151 = vmatpush.bf16.msra.mxu1 %v4561_v17 }
  0x14   :  { %v6402_v22 = vld [vmem:[#allocation2 + $0x79c] sm:$0xf0] }
  0x15   :  { %v4272_v23 = vld [vmem:[#allocation2 + $0x140] sm:$0xf]  ;;  %v5073_v25 = vor.u32 %v6402_v22, %v5072_v20  ;;  %3164 = vmatpush.bf16.msra.mxu2 %v4817_v21 }
  0x16   :  { %v6202_v24 = vld [vmem:[#allocation2 + $0x15c] sm:$0xf0] }
  0x17   :  { %v4528_v26 = vld [vmem:[#allocation2 + $0x340] sm:$0xf]  ;;  %v4273_v29 = vor.u32 %v6202_v24, %v4272_v23  ;;  %3177 = vmatpush.bf16.msra.mxu3 %v5073_v25 }
  0x18   :  { %v6266_v27 = vld [vmem:[#allocation2 + $0x35c] sm:$0xf0] }
  0x19   :  { %v4784_v28 = vld [vmem:[#allocation2 + $0x540] sm:$0xf]  ;;  %v4529_v33 = vor.u32 %v6266_v27, %v4528_v26  ;;  %3139 = vmatpush.bf16.msra.mxu0 %v4273_v29 }
  0x1a   :  { %v6330_v30 = vld [vmem:[#allocation2 + $0x55c] sm:$0xf0] }
  0x1b   :  { %v5040_v31 = vld [vmem:[#allocation2 + $0x740] sm:$0xf]  ;;  %v4785_v34 = vor.u32 %v6330_v30, %v4784_v28  ;;  %3152 = vmatpush.bf16.msra.mxu1 %v4529_v33 }
  0x1c   :  { %v6394_v32 = vld [vmem:[#allocation2 + $0x75c] sm:$0xf0] }
  0x1d   :  { %v4240_v35 = vld [vmem:[#allocation2 + $0x100] sm:$0xf]  ;;  %v5041_v38 = vor.u32 %v6394_v32, %v5040_v31  ;;  %3165 = vmatpush.bf16.msra.mxu2 %v4785_v34 }
  0x1e   :  { %v6194_v36 = vld [vmem:[#allocation2 + $0x11c] sm:$0xf0] }
  0x1f   :  { %v4496_v37 = vld [vmem:[#allocation2 + $0x300] sm:$0xf]  ;;  %v4241_v44 = vor.u32 %v6194_v36, %v4240_v35  ;;  %3178 = vmatpush.bf16.msra.mxu3 %v5041_v38 }
  0x20   :  { %v6258_v39 = vld [vmem:[#allocation2 + $0x31c] sm:$0xf0] }
  0x21   :  { %v4752_v40 = vld [vmem:[#allocation2 + $0x500] sm:$0xf]  ;;  %v4497_v45 = vor.u32 %v6258_v39, %v4496_v37  ;;  %3140 = vmatpush.bf16.msra.mxu0 %v4241_v44 }
  0x22   :  { %v6322_v41 = vld [vmem:[#allocation2 + $0x51c] sm:$0xf0] }
  0x23   :  { %v5008_v42 = vld [vmem:[#allocation2 + $0x700] sm:$0xf]  ;;  %v4753_v46 = vor.u32 %v6322_v41, %v4752_v40  ;;  %3153 = vmatpush.bf16.msra.mxu1 %v4497_v45 }
  0x24   :  { %v6386_v43 = vld [vmem:[#allocation2 + $0x71c] sm:$0xf0] }
  0x25   :  { %v4208_v47 = vld [vmem:[#allocation2 + $0xc0] sm:$0xf]  ;;  %v5009_v50 = vor.u32 %v6386_v43, %v5008_v42  ;;  %3166 = vmatpush.bf16.msra.mxu2 %v4753_v46 }
  0x26   :  { %v6186_v48 = vld [vmem:[#allocation2 + $0xdc] sm:$0xf0] }
  0x27   :  { %v4464_v49 = vld [vmem:[#allocation2 + $0x2c0] sm:$0xf]  ;;  %v4209_v56 = vor.u32 %v6186_v48, %v4208_v47  ;;  %3179 = vmatpush.bf16.msra.mxu3 %v5009_v50 }
  0x28   :  { %v6250_v51 = vld [vmem:[#allocation2 + $0x2dc] sm:$0xf0] }
  0x29   :  { %v4720_v52 = vld [vmem:[#allocation2 + $0x4c0] sm:$0xf]  ;;  %v4465_v57 = vor.u32 %v6250_v51, %v4464_v49  ;;  %3141 = vmatpush.bf16.msra.mxu0 %v4209_v56 }
  0x2a   :  { %v6314_v53 = vld [vmem:[#allocation2 + $0x4dc] sm:$0xf0] }
  0x2b   :  { %v4976_v54 = vld [vmem:[#allocation2 + $0x6c0] sm:$0xf]  ;;  %v4721_v58 = vor.u32 %v6314_v53, %v4720_v52  ;;  %3154 = vmatpush.bf16.msra.mxu1 %v4465_v57 }
  0x2c   :  { %v6378_v55 = vld [vmem:[#allocation2 + $0x6dc] sm:$0xf0] }
  0x2d   :  { %v4176_v59 = vld [vmem:[#allocation2 + $0x80] sm:$0xf]  ;;  %v4977_v62 = vor.u32 %v6378_v55, %v4976_v54  ;;  %3167 = vmatpush.bf16.msra.mxu2 %v4721_v58  ;;  %v34_v58 = vld [vmem:[%s6932_s0 + $0x8] sm:$0xff] }
  0x2e   :  { %v6178_v60 = vld [vmem:[#allocation2 + $0x9c] sm:$0xf0] }
  0x2f   :  { %v4432_v61 = vld [vmem:[#allocation2 + $0x280] sm:$0xf]  ;;  %v4177_v4 = vor.u32 %v6178_v60, %v4176_v59  ;;  %3180 = vmatpush.bf16.msra.mxu3 %v4977_v62 }
  0x30   :  { %v6242_v63 = vld [vmem:[#allocation2 + $0x29c] sm:$0xf0] }
  0x31   :  { %v4688_v0 = vld [vmem:[#allocation2 + $0x480] sm:$0xf]  ;;  %v4433_v5 = vor.u32 %v6242_v63, %v4432_v61  ;;  %3142 = vmatpush.bf16.msra.mxu0 %v4177_v4  ;;  %v555_v63 = vunpack.c.l.b16 %v34_v58 }
  0x32   :  { %v6306_v1 = vld [vmem:[#allocation2 + $0x49c] sm:$0xf0] }
  0x33   :  { %v4944_v2 = vld [vmem:[#allocation2 + $0x680] sm:$0xf]  ;;  %v4689_v6 = vor.u32 %v6306_v1, %v4688_v0  ;;  %3155 = vmatpush.bf16.msra.mxu1 %v4433_v5  ;;  %v556_v0 = vunpack.c.h.b16 %v34_v58  ;;  %v6749_v4 = vpack.c.b16 %v555_v63, %v555_v63 }
  0x34   :  { %v6370_v3 = vld [vmem:[#allocation2 + $0x69c] sm:$0xf0] }
  0x35   :  { %v4144_v7 = vld [vmem:[#allocation2 + $0x40] sm:$0xf]  ;;  %v4945_v10 = vor.u32 %v6370_v3, %v4944_v2  ;;  %3168 = vmatpush.bf16.msra.mxu2 %v4689_v6  ;;  %v6754_v6 = vpack.c.b16 %v556_v0, %v556_v0 }
  0x36   :  { %v6170_v8 = vld [vmem:[#allocation2 + $0x5c] sm:$0xf0] }
  0x37   :  { %v4400_v9 = vld [vmem:[#allocation2 + $0x240] sm:$0xf]  ;;  %v4145_v16 = vor.u32 %v6170_v8, %v4144_v7  ;;  %3181 = vmatpush.bf16.msra.mxu3 %v4945_v10 }
  0x38   :  { %v6234_v11 = vld [vmem:[#allocation2 + $0x25c] sm:$0xf0] }
  0x39   :  { %v4656_v12 = vld [vmem:[#allocation2 + $0x440] sm:$0xf]  ;;  %v4401_v19 = vor.u32 %v6234_v11, %v4400_v9  ;;  %3143 = vmatpush.bf16.msra.mxu0 %v4145_v16 }
  0x3a   :  { %v6298_v13 = vld [vmem:[#allocation2 + $0x45c] sm:$0xf0] }
  0x3b   :  { %v4912_v14 = vld [vmem:[#allocation2 + $0x640] sm:$0xf]  ;;  %v4657_v20 = vor.u32 %v6298_v13, %v4656_v12  ;;  %3156 = vmatpush.bf16.msra.mxu1 %v4401_v19 }
  0x3c   :  { %v6362_v15 = vld [vmem:[#allocation2 + $0x65c] sm:$0xf0] }
  0x3d   :  { %v4112_v17 = vld [vmem:[#allocation2] sm:$0xf]  ;;  %v4913_v24 = vor.u32 %v6362_v15, %v4912_v14  ;;  %3169 = vmatpush.bf16.msra.mxu2 %v4657_v20 }
  0x3e   :  { %v6162_v18 = vld [vmem:[#allocation2 + $0x1c] sm:$0xf0] }
  0x3f   :  { %v4368_v21 = vld [vmem:[#allocation2 + $0x200] sm:$0xf]  ;;  %v4113_v31 = vor.u32 %v6162_v18, %v4112_v17  ;;  %3182 = vmatpush.bf16.msra.mxu3 %v4913_v24 }
  0x40   :  { %v6226_v22 = vld [vmem:[#allocation2 + $0x21c] sm:$0xf0] }
  0x41   :  { %v4624_v23 = vld [vmem:[#allocation2 + $0x400] sm:$0xf]  ;;  %v4369_v35 = vor.u32 %v6226_v22, %v4368_v21  ;;  %3144 = vmatpush.bf16.msra.mxu0 %v4113_v31 }
  0x42   :  { %v6290_v25 = vld [vmem:[#allocation2 + $0x41c] sm:$0xf0] }
  0x43   :  { %v4880_v26 = vld [vmem:[#allocation2 + $0x600] sm:$0xf]  ;;  %v4625_v36 = vor.u32 %v6290_v25, %v4624_v23  ;;  %3157 = vmatpush.bf16.msra.mxu1 %v4369_v35 }
  0x44   :  { %v6354_v27 = vld [vmem:[#allocation2 + $0x61c] sm:$0xf0] }
  0x45   :  { %v5360_v28 = vld [vmem:[#allocation2 + $0x9c0] sm:$0xf]  ;;  %v4881_v39 = vor.u32 %v6354_v27, %v4880_v26  ;;  %3170 = vmatpush.bf16.msra.mxu2 %v4625_v36 }
  0x46   :  { %v6474_v29 = vld [vmem:[#allocation2 + $0x9dc] sm:$0xf0] }
  0x47   :  { %v5616_v30 = vld [vmem:[#allocation2 + $0xbc0] sm:$0xf]  ;;  %v5361_v40 = vor.u32 %v6474_v29, %v5360_v28  ;;  %3183 = vmatpush.bf16.msra.mxu3 %v4881_v39 }
  0x48   :  { %v6538_v32 = vld [vmem:[#allocation2 + $0xbdc] sm:$0xf0]  ;;  %3171 = vmatmul.bf16.vlgmr.msra.gmra.mxu2 %v6749_v4 }
  0x49   :  { %v5872_v33 = vld [vmem:[#allocation2 + $0xdc0] sm:$0xf]  ;;  %v5617_v41 = vor.u32 %v6538_v32, %v5616_v30  ;;  %3189 = vmatpush.bf16.msrb.mxu0 %v5361_v40 }
  0x4a   :  { %v6602_v34 = vld [vmem:[#allocation2 + $0xddc] sm:$0xf0]  ;;  %3184 = vmatmul.bf16.vlgmr.msra.gmra.mxu3 %v6754_v6 }
  0x4b   :  { %v6128_v37 = vld [vmem:[#allocation2 + $0xfc0] sm:$0xf]  ;;  %v5873_v42 = vor.u32 %v6602_v34, %v5872_v33  ;;  %3202 = vmatpush.bf16.msrb.mxu1 %v5617_v41 }
  0x4c   :  { %v6666_v38 = vld [vmem:[#allocation2 + $0xfdc] sm:$0xf0] }
  0x4d   :  { %v5328_v43 = vld [vmem:[#allocation2 + $0x980] sm:$0xf]  ;;  %v6129_v46 = vor.u32 %v6666_v38, %v6128_v37  ;;  %3215 = vmatpush.bf16.msrb.mxu2 %v5873_v42 }
  0x4e   :  { %v6466_v44 = vld [vmem:[#allocation2 + $0x99c] sm:$0xf0] }
  0x4f   :  { %v5584_v45 = vld [vmem:[#allocation2 + $0xb80] sm:$0xf]  ;;  %v5329_v52 = vor.u32 %v6466_v44, %v5328_v43  ;;  %3228 = vmatpush.bf16.msrb.mxu3 %v6129_v46 }
  0x50   :  { %v6530_v47 = vld [vmem:[#allocation2 + $0xb9c] sm:$0xf0] }
  0x51   :  { %v5840_v48 = vld [vmem:[#allocation2 + $0xd80] sm:$0xf]  ;;  %v5585_v54 = vor.u32 %v6530_v47, %v5584_v45  ;;  %3190 = vmatpush.bf16.msrb.mxu0 %v5329_v52 }
  0x52   :  { %v6594_v49 = vld [vmem:[#allocation2 + $0xd9c] sm:$0xf0] }
  0x53   :  { %v6096_v50 = vld [vmem:[#allocation2 + $0xf80] sm:$0xf]  ;;  %v5841_v55 = vor.u32 %v6594_v49, %v5840_v48  ;;  %3203 = vmatpush.bf16.msrb.mxu1 %v5585_v54 }
  0x54   :  { %v6658_v51 = vld [vmem:[#allocation2 + $0xf9c] sm:$0xf0] }
  0x55   :  { %v5296_v53 = vld [vmem:[#allocation2 + $0x940] sm:$0xf]  ;;  %v6097_v59 = vor.u32 %v6658_v51, %v6096_v50  ;;  %3216 = vmatpush.bf16.msrb.mxu2 %v5841_v55 }
  0x56   :  { %v6458_v56 = vld [vmem:[#allocation2 + $0x95c] sm:$0xf0] }
  0x57   :  { %v5552_v57 = vld [vmem:[#allocation2 + $0xb40] sm:$0xf]  ;;  %v5297_v3 = vor.u32 %v6458_v56, %v5296_v53  ;;  %3229 = vmatpush.bf16.msrb.mxu3 %v6097_v59 }
  0x58   :  { %v6522_v60 = vld [vmem:[#allocation2 + $0xb5c] sm:$0xf0] }
  0x59   :  { %v5808_v61 = vld [vmem:[#allocation2 + $0xd40] sm:$0xf]  ;;  %v5553_v7 = vor.u32 %v6522_v60, %v5552_v57  ;;  %3191 = vmatpush.bf16.msrb.mxu0 %v5297_v3  ;;  %v36_v3 = vld [vmem:[%s6932_s0 + $0x18] sm:$0xff] }
  0x5a   :  { %v6586_v62 = vld [vmem:[#allocation2 + $0xd5c] sm:$0xf0] }
  0x5b   :  { %v6064_v1 = vld [vmem:[#allocation2 + $0xf40] sm:$0xf]  ;;  %v5809_v8 = vor.u32 %v6586_v62, %v5808_v61  ;;  %3204 = vmatpush.bf16.msrb.mxu1 %v5553_v7 }
  0x5c   :  { %v6650_v2 = vld [vmem:[#allocation2 + $0xf5c] sm:$0xf0] }
  0x5d   :  { %v33_v5 = vld [vmem:[%s6932_s0] sm:$0xff]  ;;  %v6065_v14 = vor.u32 %v6650_v2, %v6064_v1  ;;  %3217 = vmatpush.bf16.msrb.mxu2 %v5809_v8 }
  0x5e   :  { %v5264_v9 = vld [vmem:[#allocation2 + $0x900] sm:$0xf]  ;;  %v553_v12 = vunpack.c.l.b16 %v33_v5  ;;  %v554_v13 = vunpack.c.h.b16 %v33_v5 }
  0x5f   :  { %v6450_v10 = vld [vmem:[#allocation2 + $0x91c] sm:$0xf0]  ;;  %3230 = vmatpush.bf16.msrb.mxu3 %v6065_v14  ;;  %v4594_v14 = vld [vmem:[#allocation2 + $0x3e0] sm:$0xf0] }
  0x60   :  { %v5520_v11 = vld [vmem:[#allocation2 + $0xb00] sm:$0xf]  ;;  %v6757_v20 = vpack.c.b16 %v553_v12, %v553_v12  ;;  %v6760_v21 = vpack.c.b16 %v554_v13, %v554_v13  ;;  %v5265_v22 = vor.u32 %v6450_v10, %v5264_v9  ;;  %v35_v9 = vld [vmem:[%s6932_s0 + $0x10] sm:$0xff]  ;;  %v6214_v10 = vld [vmem:[#allocation2 + $0x1c4] sm:$0xf] }
  0x61   :  { %v6514_v15 = vld [vmem:[#allocation2 + $0xb1c] sm:$0xf0]  ;;  %v6278_v12 = vld [vmem:[#allocation2 + $0x3c4] sm:$0xf] }
  0x62   :  { %v5776_v16 = vld [vmem:[#allocation2 + $0xd00] sm:$0xf]  ;;  %v5521_v23 = vor.u32 %v6514_v15, %v5520_v11  ;;  %3145 = vmatmul.bf16.vlgmr.msra.gmra.mxu0 %v6757_v20  ;;  %3158 = vmatmul.bf16.vlgmr.msra.gmra.mxu1 %v6760_v21  ;;  %v4338_v11 = vld [vmem:[#allocation2 + $0x1e0] sm:$0xf0] }
  0x63   :  { %v6578_v17 = vld [vmem:[#allocation2 + $0xd1c] sm:$0xf0]  ;;  %3192 = vmatpush.bf16.msrb.mxu0 %v5265_v22  ;;  %v6342_v15 = vld [vmem:[#allocation2 + $0x5c4] sm:$0xf] }
  0x64   :  { %v6032_v18 = vld [vmem:[#allocation2 + $0xf00] sm:$0xf]  ;;  %v5777_v24 = vor.u32 %v6578_v17, %v5776_v16  ;;  %3205 = vmatpush.bf16.msrb.mxu1 %v5521_v23  ;;  %v4850_v16 = vld [vmem:[#allocation2 + $0x5e0] sm:$0xf0]  ;;  %v559_v17 = vunpack.c.l.b16 %v36_v3 }
  0x65   :  { %v6642_v19 = vld [vmem:[#allocation2 + $0xf1c] sm:$0xf0]  ;;  %v6406_v22 = vld [vmem:[#allocation2 + $0x7c4] sm:$0xf] }
  0x66   :  { %v5232_v25 = vld [vmem:[#allocation2 + $0x8c0] sm:$0xf]  ;;  %v6033_v28 = vor.u32 %v6642_v19, %v6032_v18  ;;  %3218 = vmatpush.bf16.msrb.mxu2 %v5777_v24  ;;  %v5106_v23 = vld [vmem:[#allocation2 + $0x7e0] sm:$0xf0]  ;;  %v557_v24 = vunpack.c.l.b16 %v35_v9 }
  0x67   :  { %v6442_v26 = vld [vmem:[#allocation2 + $0x8dc] sm:$0xf0] }
  0x68   :  { %v5488_v27 = vld [vmem:[#allocation2 + $0xac0] sm:$0xf]  ;;  %v5233_v34 = vor.u32 %v6442_v26, %v5232_v25  ;;  %3231 = vmatpush.bf16.msrb.mxu3 %v6033_v28  ;;  %v560_v25 = vunpack.c.h.b16 %v36_v3  ;;  %v558_v28 = vunpack.c.h.b16 %v35_v9  ;;  %v5010_v3 = vld [vmem:[#allocation2 + $0x720] sm:$0xf0] }
  0x69   :  { %v6506_v29 = vld [vmem:[#allocation2 + $0xadc] sm:$0xf0]  ;;  %v6182_v9 = vld [vmem:[#allocation2 + $0xc4] sm:$0xf] }
  0x6a   :  { %v5744_v30 = vld [vmem:[#allocation2 + $0xcc0] sm:$0xf]  ;;  %v5489_v35 = vor.u32 %v6506_v29, %v5488_v27  ;;  %3193 = vmatpush.bf16.msrb.mxu0 %v5233_v34  ;;  %v4341_v27 = vor.u32 %v6214_v10, %v4338_v11  ;;  %v4597_v29 = vor.u32 %v6278_v12, %v4594_v14  ;;  %v5109_v34 = vor.u32 %v6406_v22, %v5106_v23  ;;  %v4210_v10 = vld [vmem:[#allocation2 + $0xe0] sm:$0xf0] }
  0x6b   :  { %v6570_v31 = vld [vmem:[#allocation2 + $0xcdc] sm:$0xf0]  ;;  %v6246_v11 = vld [vmem:[#allocation2 + $0x2c4] sm:$0xf] }
  0x6c   :  { %v6000_v32 = vld [vmem:[#allocation2 + $0xec0] sm:$0xf]  ;;  %v5745_v36 = vor.u32 %v6570_v31, %v5744_v30  ;;  %3206 = vmatpush.bf16.msrb.mxu1 %v5489_v35  ;;  %v4853_v30 = vor.u32 %v6342_v15, %v4850_v16  ;;  %v6206_v31 = vld [vmem:[#allocation2 + $0x184] sm:$0xf] }
  0x6d   :  { %v6634_v33 = vld [vmem:[#allocation2 + $0xedc] sm:$0xf0]  ;;  %v4562_v35 = vld [vmem:[#allocation2 + $0x3a0] sm:$0xf0] }
  0x6e   :  { %v5200_v37 = vld [vmem:[#allocation2 + $0x880] sm:$0xf]  ;;  %v6001_v40 = vor.u32 %v6634_v33, %v6000_v32  ;;  %3219 = vmatpush.bf16.msrb.mxu2 %v5745_v36  ;;  %v4306_v32 = vld [vmem:[#allocation2 + $0x1a0] sm:$0xf0] }
  0x6f   :  { %v6434_v38 = vld [vmem:[#allocation2 + $0x89c] sm:$0xf0]  ;;  %v6270_v33 = vld [vmem:[#allocation2 + $0x384] sm:$0xf] }
  0x70   :  { %v5456_v39 = vld [vmem:[#allocation2 + $0xa80] sm:$0xf]  ;;  %v5201_v46 = vor.u32 %v6434_v38, %v5200_v37  ;;  %3232 = vmatpush.bf16.msrb.mxu3 %v6001_v40  ;;  %v6334_v36 = vld [vmem:[#allocation2 + $0x584] sm:$0xf]  ;;  %v6770_v38 = vpack.c.b16 %v559_v17, %v559_v17 }
  0x71   :  { %v6498_v41 = vld [vmem:[#allocation2 + $0xa9c] sm:$0xf0]  ;;  %v4818_v37 = vld [vmem:[#allocation2 + $0x5a0] sm:$0xf0] }
  0x72   :  { %v5712_v42 = vld [vmem:[#allocation2 + $0xc80] sm:$0xf]  ;;  %v5457_v47 = vor.u32 %v6498_v41, %v5456_v39  ;;  %3194 = vmatpush.bf16.msrb.mxu0 %v5201_v46  ;;  %v6398_v39 = vld [vmem:[#allocation2 + $0x784] sm:$0xf]  ;;  %v6772_v41 = vpack.c.b16 %v557_v24, %v557_v24  ;;  %v4821_v46 = vor.u32 %v6334_v36, %v4818_v37 }
  0x73   :  { %v6562_v43 = vld [vmem:[#allocation2 + $0xc9c] sm:$0xf0]  ;;  %v5074_v40 = vld [vmem:[#allocation2 + $0x7a0] sm:$0xf0] }
  0x74   :  { %v5968_v44 = vld [vmem:[#allocation2 + $0xe80] sm:$0xf]  ;;  %v5713_v48 = vor.u32 %v6562_v43, %v5712_v42  ;;  %3207 = vmatpush.bf16.msrb.mxu1 %v5457_v47  ;;  %v6774_v42 = vpack.c.b16 %v560_v25, %v560_v25  ;;  %v4309_v43 = vor.u32 %v6206_v31, %v4306_v32  ;;  %v6198_v47 = vld [vmem:[#allocation2 + $0x144] sm:$0xf] }
  0x75   :  { %v6626_v45 = vld [vmem:[#allocation2 + $0xe9c] sm:$0xf0]  ;;  %v6310_v14 = vld [vmem:[#allocation2 + $0x4c4] sm:$0xf] }
  0x76   :  { %v5168_v49 = vld [vmem:[#allocation2 + $0x840] sm:$0xf]  ;;  %v5969_v52 = vor.u32 %v6626_v45, %v5968_v44  ;;  %3220 = vmatpush.bf16.msrb.mxu2 %v5713_v48  ;;  %v6776_v44 = vpack.c.b16 %v558_v28, %v558_v28  ;;  %v4565_v45 = vor.u32 %v6270_v33, %v4562_v35  ;;  %v4274_v48 = vld [vmem:[#allocation2 + $0x160] sm:$0xf0] }
  0x77   :  { %v6426_v50 = vld [vmem:[#allocation2 + $0x85c] sm:$0xf0]  ;;  %v4722_v15 = vld [vmem:[#allocation2 + $0x4e0] sm:$0xf0] }
  0x78   :  { %v5424_v51 = vld [vmem:[#allocation2 + $0xa40] sm:$0xf]  ;;  %v5169_v59 = vor.u32 %v6426_v50, %v5168_v49  ;;  %3233 = vmatpush.bf16.msrb.mxu3 %v5969_v52  ;;  %v6262_v49 = vld [vmem:[#allocation2 + $0x344] sm:$0xf]  ;;  %v5077_v50 = vor.u32 %v6398_v39, %v5074_v40  ;;  %v4725_v22 = vor.u32 %v6310_v14, %v4722_v15 }
  0x79   :  { %v6490_v53 = vld [vmem:[#allocation2 + $0xa5c] sm:$0xf0]  ;;  %v6326_v52 = vld [vmem:[#allocation2 + $0x544] sm:$0xf] }
  0x7a   :  { %v5680_v54 = vld [vmem:[#allocation2 + $0xc40] sm:$0xf]  ;;  %v5425_v63 = vor.u32 %v6490_v53, %v5424_v51  ;;  %3195 = vmatpush.bf16.msrb.mxu0 %v5169_v59  ;;  %v4530_v51 = vld [vmem:[#allocation2 + $0x360] sm:$0xf0] }
  0x7b   :  { %v6554_v55 = vld [vmem:[#allocation2 + $0xc5c] sm:$0xf0]  ;;  %v4786_v53 = vld [vmem:[#allocation2 + $0x560] sm:$0xf0] }
  0x7c   :  { %v5936_v56 = vld [vmem:[#allocation2 + $0xe40] sm:$0xf]  ;;  %v5681_v0 = vor.u32 %v6554_v55, %v5680_v54  ;;  %3208 = vmatpush.bf16.msrb.mxu1 %v5425_v63  ;;  %v6390_v54 = vld [vmem:[#allocation2 + $0x744] sm:$0xf] }
  0x7d   :  { %v6618_v57 = vld [vmem:[#allocation2 + $0xe5c] sm:$0xf0]  ;;  %v5042_v55 = vld [vmem:[#allocation2 + $0x760] sm:$0xf0] }
  0x7e   :  { %v5136_v58 = vld [vmem:[#allocation2 + $0x800] sm:$0xf]  ;;  %v5937_v5 = vor.u32 %v6618_v57, %v5936_v56  ;;  %3221 = vmatpush.bf16.msrb.mxu2 %v5681_v0  ;;  %v4277_v56 = vor.u32 %v6198_v47, %v4274_v48  ;;  %v4533_v57 = vor.u32 %v6262_v49, %v4530_v51  ;;  %v6190_v59 = vld [vmem:[#allocation2 + $0x104] sm:$0xf] }
  0x7f   :  { %v6418_v60 = vld [vmem:[#allocation2 + $0x81c] sm:$0xf0]  ;;  %v4498_v63 = vld [vmem:[#allocation2 + $0x320] sm:$0xf0] }
  0x80   :  { %v5392_v61 = vld [vmem:[#allocation2 + $0xa00] sm:$0xf]  ;;  %v5137_v13 = vor.u32 %v6418_v60, %v5136_v58  ;;  %3234 = vmatpush.bf16.msrb.mxu3 %v5937_v5  ;;  %v4789_v58 = vor.u32 %v6326_v52, %v4786_v53  ;;  %v4242_v60 = vld [vmem:[#allocation2 + $0x120] sm:$0xf0] }
  0x81   :  { %v6482_v62 = vld [vmem:[#allocation2 + $0xa1c] sm:$0xf0]  ;;  %v6318_v0 = vld [vmem:[#allocation2 + $0x504] sm:$0xf]  ;;  %v4245_v5 = vor.u32 %v6190_v59, %v4242_v60 }
  0x82   :  { %v5648_v1 = vld [vmem:[#allocation2 + $0xc00] sm:$0xf]  ;;  %v5393_v18 = vor.u32 %v6482_v62, %v5392_v61  ;;  %3196 = vmatpush.bf16.msrb.mxu0 %v5137_v13  ;;  %v6254_v61 = vld [vmem:[#allocation2 + $0x304] sm:$0xf]  ;;  %v5045_v62 = vor.u32 %v6390_v54, %v5042_v55 }
  0x83   :  { %v6546_v2 = vld [vmem:[#allocation2 + $0xc1c] sm:$0xf0]  ;;  %v4466_v13 = vld [vmem:[#allocation2 + $0x2e0] sm:$0xf0] }
  0x84   :  { %v5904_v7 = vld [vmem:[#allocation2 + $0xe00] sm:$0xf]  ;;  %v5649_v19 = vor.u32 %v6546_v2, %v5648_v1  ;;  %3209 = vmatpush.bf16.msrb.mxu1 %v5393_v18  ;;  %v4754_v1 = vld [vmem:[#allocation2 + $0x520] sm:$0xf0]  ;;  %v4213_v18 = vor.u32 %v6182_v9, %v4210_v10 }
  0x85   :  { %v6610_v8 = vld [vmem:[#allocation2 + $0xe1c] sm:$0xf0]  ;;  %3197 = vmatmul.bf16.vlgmr.msrb.gmra.mxu0 %v6772_v41  ;;  %v6382_v2 = vld [vmem:[#allocation2 + $0x704] sm:$0xf] }
  0x86   :  { %v5905_v26 = vor.u32 %v6610_v8, %v5904_v7  ;;  %3222 = vmatpush.bf16.msrb.mxu2 %v5649_v19  ;;  %3241 = vmatpush.bf16.msra.mxu0 %v4341_v27  ;;  %v4501_v7 = vor.u32 %v6254_v61, %v4498_v63  ;;  %v4757_v8 = vor.u32 %v6318_v0, %v4754_v1  ;;  %v6374_v16 = vld [vmem:[#allocation2 + $0x6c4] sm:$0xf] }
  0x87   :  { %3210 = vmatmul.bf16.vlgmr.msrb.gmra.mxu1 %v6776_v44  ;;  %v5013_v12 = vor.u32 %v6382_v2, %v5010_v3  ;;  %v4978_v17 = vld [vmem:[#allocation2 + $0x6e0] sm:$0xf0]  ;;  %v4469_v19 = vor.u32 %v6246_v11, %v4466_v13 }
  0x88   :  { %3235 = vmatpush.bf16.msrb.mxu3 %v5905_v26  ;;  %3254 = vmatpush.bf16.msra.mxu1 %v4597_v29  ;;  %v6174_v23 = vld [vmem:[#allocation2 + $0x84] sm:$0xf]  ;;  %v4981_v26 = vor.u32 %v6374_v16, %v4978_v17 }
  0x89   :  { %3223 = vmatmul.bf16.vlgmr.msrb.gmra.mxu2 %v6770_v38  ;;  %v4178_v24 = vld [vmem:[#allocation2 + $0xa0] sm:$0xf0] }
  0x8a   :  { %3267 = vmatpush.bf16.msra.mxu2 %v4853_v30  ;;  %3242 = vmatpush.bf16.msra.mxu0 %v4309_v43  ;;  %v6238_v25 = vld [vmem:[#allocation2 + $0x284] sm:$0xf]  ;;  %v4181_v32 = vor.u32 %v6174_v23, %v4178_v24 }
  0x8b   :  { %3236 = vmatmul.bf16.vlgmr.msrb.gmra.mxu3 %v6774_v42  ;;  %v4434_v27 = vld [vmem:[#allocation2 + $0x2a0] sm:$0xf0] }
  0x8c   :  { %3280 = vmatpush.bf16.msra.mxu3 %v5109_v34  ;;  %3255 = vmatpush.bf16.msra.mxu1 %v4565_v45  ;;  %v6302_v28 = vld [vmem:[#allocation2 + $0x484] sm:$0xf]  ;;  %v4437_v33 = vor.u32 %v6238_v25, %v4434_v27 }
  0x8d   :  { %v4690_v29 = vld [vmem:[#allocation2 + $0x4a0] sm:$0xf0] }
  0x8e   :  { %3268 = vmatpush.bf16.msra.mxu2 %v4821_v46  ;;  %3243 = vmatpush.bf16.msra.mxu0 %v4277_v56  ;;  %v6366_v30 = vld [vmem:[#allocation2 + $0x684] sm:$0xf]  ;;  %v4693_v34 = vor.u32 %v6302_v28, %v4690_v29 }
  0x8f   :  { %v4946_v31 = vld [vmem:[#allocation2 + $0x6a0] sm:$0xf0] }
  0x90   :  { %3281 = vmatpush.bf16.msra.mxu3 %v5077_v50  ;;  %3256 = vmatpush.bf16.msra.mxu1 %v4533_v57  ;;  %v6166_v35 = vld [vmem:[#allocation2 + $0x44] sm:$0xf]  ;;  %v4949_v39 = vor.u32 %v6366_v30, %v4946_v31 }
  0x91   :  { %v4146_v36 = vld [vmem:[#allocation2 + $0x60] sm:$0xf0] }
  0x92   :  { %3269 = vmatpush.bf16.msra.mxu2 %v4789_v58  ;;  %3244 = vmatpush.bf16.msra.mxu0 %v4245_v5  ;;  %v6230_v37 = vld [vmem:[#allocation2 + $0x244] sm:$0xf]  ;;  %v4149_v48 = vor.u32 %v6166_v35, %v4146_v36 }
  0x93   :  { %v4402_v40 = vld [vmem:[#allocation2 + $0x260] sm:$0xf0] }
  0x94   :  { %3282 = vmatpush.bf16.msra.mxu3 %v5045_v62  ;;  %3257 = vmatpush.bf16.msra.mxu1 %v4501_v7  ;;  %v6294_v43 = vld [vmem:[#allocation2 + $0x444] sm:$0xf]  ;;  %v4405_v51 = vor.u32 %v6230_v37, %v4402_v40 }
  0x95   :  { %v4658_v45 = vld [vmem:[#allocation2 + $0x460] sm:$0xf0] }
  0x96   :  { %3270 = vmatpush.bf16.msra.mxu2 %v4757_v8  ;;  %3245 = vmatpush.bf16.msra.mxu0 %v4213_v18  ;;  %v6358_v46 = vld [vmem:[#allocation2 + $0x644] sm:$0xf]  ;;  %v4661_v52 = vor.u32 %v6294_v43, %v4658_v45 }
  0x97   :  { %v4914_v47 = vld [vmem:[#allocation2 + $0x660] sm:$0xf0] }
  0x98   :  { %3283 = vmatpush.bf16.msra.mxu3 %v5013_v12  ;;  %3258 = vmatpush.bf16.msra.mxu1 %v4469_v19  ;;  %v6158_v49 = vld [vmem:[#allocation2 + $0x4] sm:$0xf]  ;;  %v4917_v56 = vor.u32 %v6358_v46, %v4914_v47 }
  0x99   :  { %v4114_v50 = vld [vmem:[#allocation2 + $0x20] sm:$0xf0] }
  0x9a   :  { %3271 = vmatpush.bf16.msra.mxu2 %v4725_v22  ;;  %3246 = vmatpush.bf16.msra.mxu0 %v4181_v32  ;;  %v6222_v53 = vld [vmem:[#allocation2 + $0x204] sm:$0xf]  ;;  %v4117_v63 = vor.u32 %v6158_v49, %v4114_v50 }
  0x9b   :  { %v4370_v54 = vld [vmem:[#allocation2 + $0x220] sm:$0xf0] }
  0x9c   :  { %3284 = vmatpush.bf16.msra.mxu3 %v4981_v26  ;;  %3259 = vmatpush.bf16.msra.mxu1 %v4437_v33  ;;  %v6286_v55 = vld [vmem:[#allocation2 + $0x404] sm:$0xf]  ;;  %v4373_v3 = vor.u32 %v6222_v53, %v4370_v54 }
  0x9d   :  { %v4626_v57 = vld [vmem:[#allocation2 + $0x420] sm:$0xf0] }
  0x9e   :  { %3272 = vmatpush.bf16.msra.mxu2 %v4693_v34  ;;  %v6350_v58 = vld [vmem:[#allocation2 + $0x604] sm:$0xf]  ;;  %3247 = vmatpush.bf16.msra.mxu0 %v4149_v48  ;;  %v4629_v5 = vor.u32 %v6286_v55, %v4626_v57 }
  0x9f   :  { %v4882_v59 = vld [vmem:[#allocation2 + $0x620] sm:$0xf0] }
  0xa0   :  { %3285 = vmatpush.bf16.msra.mxu3 %v4949_v39  ;;  %v6470_v60 = vld [vmem:[#allocation2 + $0x9c4] sm:$0xf]  ;;  %3260 = vmatpush.bf16.msra.mxu1 %v4405_v51  ;;  %v4885_v9 = vor.u32 %v6350_v58, %v4882_v59 }
  0xa1   :  { %v5362_v61 = vld [vmem:[#allocation2 + $0x9e0] sm:$0xf0] }
  0xa2   :  { %v6534_v62 = vld [vmem:[#allocation2 + $0xbc4] sm:$0xf]  ;;  %3273 = vmatpush.bf16.msra.mxu2 %v4661_v52  ;;  %v5365_v10 = vor.u32 %v6470_v60, %v5362_v61  ;;  %3248 = vmatpush.bf16.msra.mxu0 %v4117_v63 }
  0xa3   :  { %v5618_v0 = vld [vmem:[#allocation2 + $0xbe0] sm:$0xf0] }
  0xa4   :  { %v6598_v1 = vld [vmem:[#allocation2 + $0xdc4] sm:$0xf]  ;;  %3286 = vmatpush.bf16.msra.mxu3 %v4917_v56  ;;  %v5621_v11 = vor.u32 %v6534_v62, %v5618_v0  ;;  %3261 = vmatpush.bf16.msra.mxu1 %v4373_v3 }
  0xa5   :  { %v5874_v2 = vld [vmem:[#allocation2 + $0xde0] sm:$0xf0]  ;;  %3249 = vmatmul.bf16.vlgmr.msra.gmra.mxu0 %v6757_v20 }
  0xa6   :  { %v6662_v7 = vld [vmem:[#allocation2 + $0xfc4] sm:$0xf]  ;;  %v5877_v12 = vor.u32 %v6598_v1, %v5874_v2  ;;  %3274 = vmatpush.bf16.msra.mxu2 %v4629_v5  ;;  %3293 = vmatpush.bf16.msrb.mxu0 %v5365_v10 }
  0xa7   :  { %v6130_v8 = vld [vmem:[#allocation2 + $0xfe0] sm:$0xf0]  ;;  %3262 = vmatmul.bf16.vlgmr.msra.gmra.mxu1 %v6760_v21 }
  0xa8   :  { %v6462_v13 = vld [vmem:[#allocation2 + $0x984] sm:$0xf]  ;;  %v6133_v16 = vor.u32 %v6662_v7, %v6130_v8  ;;  %3287 = vmatpush.bf16.msra.mxu3 %v4885_v9  ;;  %3306 = vmatpush.bf16.msrb.mxu1 %v5621_v11 }
  0xa9   :  { %v5330_v14 = vld [vmem:[#allocation2 + $0x9a0] sm:$0xf0]  ;;  %3275 = vmatmul.bf16.vlgmr.msra.gmra.mxu2 %v6749_v4 }
  0xaa   :  { %v6526_v15 = vld [vmem:[#allocation2 + $0xb84] sm:$0xf]  ;;  %v5333_v24 = vor.u32 %v6462_v13, %v5330_v14  ;;  %3319 = vmatpush.bf16.msrb.mxu2 %v5877_v12 }
  0xab   :  { %v5586_v17 = vld [vmem:[#allocation2 + $0xba0] sm:$0xf0]  ;;  %3288 = vmatmul.bf16.vlgmr.msra.gmra.mxu3 %v6754_v6 }
  0xac   :  { %v6590_v18 = vld [vmem:[#allocation2 + $0xd84] sm:$0xf]  ;;  %v5589_v25 = vor.u32 %v6526_v15, %v5586_v17  ;;  %3332 = vmatpush.bf16.msrb.mxu3 %v6133_v16  ;;  %3294 = vmatpush.bf16.msrb.mxu0 %v5333_v24 }
  0xad   :  { %v5842_v19 = vld [vmem:[#allocation2 + $0xda0] sm:$0xf0] }
  0xae   :  { %v6654_v22 = vld [vmem:[#allocation2 + $0xf84] sm:$0xf]  ;;  %v5845_v26 = vor.u32 %v6590_v18, %v5842_v19  ;;  %3307 = vmatpush.bf16.msrb.mxu1 %v5589_v25 }
  0xaf   :  { %v6098_v23 = vld [vmem:[#allocation2 + $0xfa0] sm:$0xf0] }
  0xb0   :  { %v6454_v27 = vld [vmem:[#allocation2 + $0x944] sm:$0xf]  ;;  %v6101_v30 = vor.u32 %v6654_v22, %v6098_v23  ;;  %3320 = vmatpush.bf16.msrb.mxu2 %v5845_v26 }
  0xb1   :  { %v5298_v28 = vld [vmem:[#allocation2 + $0x960] sm:$0xf0] }
  0xb2   :  { %v6518_v29 = vld [vmem:[#allocation2 + $0xb44] sm:$0xf]  ;;  %v5301_v36 = vor.u32 %v6454_v27, %v5298_v28  ;;  %3333 = vmatpush.bf16.msrb.mxu3 %v6101_v30 }
  0xb3   :  { %v5554_v31 = vld [vmem:[#allocation2 + $0xb60] sm:$0xf0] }
  0xb4   :  { %v6582_v32 = vld [vmem:[#allocation2 + $0xd44] sm:$0xf]  ;;  %v5557_v37 = vor.u32 %v6518_v29, %v5554_v31  ;;  %3295 = vmatpush.bf16.msrb.mxu0 %v5301_v36 }
  0xb5   :  { %v5810_v33 = vld [vmem:[#allocation2 + $0xd60] sm:$0xf0] }
  0xb6   :  { %v6646_v34 = vld [vmem:[#allocation2 + $0xf44] sm:$0xf]  ;;  %v5813_v39 = vor.u32 %v6582_v32, %v5810_v33  ;;  %3308 = vmatpush.bf16.msrb.mxu1 %v5557_v37 }
  0xb7   :  { %v6066_v35 = vld [vmem:[#allocation2 + $0xf60] sm:$0xf0] }
  0xb8   :  { %v6446_v40 = vld [vmem:[#allocation2 + $0x904] sm:$0xf]  ;;  %v6069_v46 = vor.u32 %v6646_v34, %v6066_v35  ;;  %3321 = vmatpush.bf16.msrb.mxu2 %v5813_v39 }
  0xb9   :  { %v5266_v43 = vld [vmem:[#allocation2 + $0x920] sm:$0xf0] }
  0xba   :  { %v6510_v45 = vld [vmem:[#allocation2 + $0xb04] sm:$0xf]  ;;  %v5269_v52 = vor.u32 %v6446_v40, %v5266_v43  ;;  %3334 = vmatpush.bf16.msrb.mxu3 %v6069_v46  ;;  %v4344_v43 = vld [vmem:[#allocation2 + $0x1c8] sm:$0xf] }
  0xbb   :  { %v5522_v47 = vld [vmem:[#allocation2 + $0xb20] sm:$0xf0]  ;;  %v4600_v46 = vld [vmem:[#allocation2 + $0x3c8] sm:$0xf] }
  0xbc   :  { %v6574_v48 = vld [vmem:[#allocation2 + $0xd04] sm:$0xf]  ;;  %v5525_v53 = vor.u32 %v6510_v45, %v5522_v47  ;;  %3296 = vmatpush.bf16.msrb.mxu0 %v5269_v52  ;;  %v6219_v45 = vld [vmem:[#allocation2 + $0x1e4] sm:$0xf0] }
  0xbd   :  { %v5778_v49 = vld [vmem:[#allocation2 + $0xd20] sm:$0xf0] }
  0xbe   :  { %v6638_v50 = vld [vmem:[#allocation2 + $0xf04] sm:$0xf]  ;;  %v5781_v54 = vor.u32 %v6574_v48, %v5778_v49  ;;  %3309 = vmatpush.bf16.msrb.mxu1 %v5525_v53  ;;  %v6283_v48 = vld [vmem:[#allocation2 + $0x3e4] sm:$0xf0] }
  0xbf   :  { %v6034_v51 = vld [vmem:[#allocation2 + $0xf20] sm:$0xf0]  ;;  %v4856_v49 = vld [vmem:[#allocation2 + $0x5c8] sm:$0xf] }
  0xc0   :  { %v6438_v55 = vld [vmem:[#allocation2 + $0x8c4] sm:$0xf]  ;;  %v6037_v58 = vor.u32 %v6638_v50, %v6034_v51  ;;  %3322 = vmatpush.bf16.msrb.mxu2 %v5781_v54  ;;  %v6347_v50 = vld [vmem:[#allocation2 + $0x5e4] sm:$0xf0] }
  0xc1   :  { %v5234_v56 = vld [vmem:[#allocation2 + $0x8e0] sm:$0xf0]  ;;  %v5112_v53 = vld [vmem:[#allocation2 + $0x7c8] sm:$0xf] }
  0xc2   :  { %v6502_v57 = vld [vmem:[#allocation2 + $0xac4] sm:$0xf]  ;;  %v5237_v0 = vor.u32 %v6438_v55, %v5234_v56  ;;  %3335 = vmatpush.bf16.msrb.mxu3 %v6037_v58  ;;  %v6411_v54 = vld [vmem:[#allocation2 + $0x7e4] sm:$0xf0]  ;;  %v4345_v56 = vor.u32 %v6219_v45, %v4344_v43  ;;  %v4857_v58 = vor.u32 %v6347_v50, %v4856_v49 }
  0xc3   :  { %v5490_v59 = vld [vmem:[#allocation2 + $0xae0] sm:$0xf0]  ;;  %v4728_v43 = vld [vmem:[#allocation2 + $0x4c8] sm:$0xf] }
  0xc4   :  { %v6566_v60 = vld [vmem:[#allocation2 + $0xcc4] sm:$0xf]  ;;  %v5493_v1 = vor.u32 %v6502_v57, %v5490_v59  ;;  %3297 = vmatpush.bf16.msrb.mxu0 %v5237_v0  ;;  %v4601_v57 = vor.u32 %v6283_v48, %v4600_v46  ;;  %v4312_v59 = vld [vmem:[#allocation2 + $0x188] sm:$0xf] }
  0xc5   :  { %v5746_v61 = vld [vmem:[#allocation2 + $0xce0] sm:$0xf0]  ;;  %v4824_v0 = vld [vmem:[#allocation2 + $0x588] sm:$0xf] }
  0xc6   :  { %v6630_v62 = vld [vmem:[#allocation2 + $0xec4] sm:$0xf]  ;;  %v5749_v2 = vor.u32 %v6566_v60, %v5746_v61  ;;  %3310 = vmatpush.bf16.msrb.mxu1 %v5493_v1  ;;  %v6211_v60 = vld [vmem:[#allocation2 + $0x1a4] sm:$0xf0] }
  0xc7   :  { %v6002_v63 = vld [vmem:[#allocation2 + $0xee0] sm:$0xf0]  ;;  %v4568_v61 = vld [vmem:[#allocation2 + $0x388] sm:$0xf] }
  0xc8   :  { %v6430_v3 = vld [vmem:[#allocation2 + $0x884] sm:$0xf]  ;;  %v6005_v8 = vor.u32 %v6630_v62, %v6002_v63  ;;  %3323 = vmatpush.bf16.msrb.mxu2 %v5749_v2  ;;  %v5113_v62 = vor.u32 %v6411_v54, %v5112_v53  ;;  %v6275_v63 = vld [vmem:[#allocation2 + $0x3a4] sm:$0xf0] }
  0xc9   :  { %v5202_v5 = vld [vmem:[#allocation2 + $0x8a0] sm:$0xf0]  ;;  %v6339_v1 = vld [vmem:[#allocation2 + $0x5a4] sm:$0xf0] }
  0xca   :  { %v6494_v7 = vld [vmem:[#allocation2 + $0xa84] sm:$0xf]  ;;  %v5205_v14 = vor.u32 %v6430_v3, %v5202_v5  ;;  %3336 = vmatpush.bf16.msrb.mxu3 %v6005_v8  ;;  %v5080_v2 = vld [vmem:[#allocation2 + $0x788] sm:$0xf]  ;;  %v4313_v5 = vor.u32 %v6211_v60, %v4312_v59  ;;  %v4825_v8 = vor.u32 %v6339_v1, %v4824_v0 }
  0xcb   :  { %v5458_v9 = vld [vmem:[#allocation2 + $0xaa0] sm:$0xf0]  ;;  %v6403_v3 = vld [vmem:[#allocation2 + $0x7a4] sm:$0xf0] }
  0xcc   :  { %v6558_v10 = vld [vmem:[#allocation2 + $0xc84] sm:$0xf]  ;;  %v5461_v15 = vor.u32 %v6494_v7, %v5458_v9  ;;  %3298 = vmatpush.bf16.msrb.mxu0 %v5205_v14  ;;  %v4569_v7 = vor.u32 %v6275_v63, %v4568_v61  ;;  %v4280_v9 = vld [vmem:[#allocation2 + $0x148] sm:$0xf] }
  0xcd   :  { %v5714_v11 = vld [vmem:[#allocation2 + $0xca0] sm:$0xf0]  ;;  %v4792_v14 = vld [vmem:[#allocation2 + $0x548] sm:$0xf] }
  0xce   :  { %v6622_v12 = vld [vmem:[#allocation2 + $0xe84] sm:$0xf]  ;;  %v5717_v16 = vor.u32 %v6558_v10, %v5714_v11  ;;  %3311 = vmatpush.bf16.msrb.mxu1 %v5461_v15  ;;  %v6203_v10 = vld [vmem:[#allocation2 + $0x164] sm:$0xf0] }
  0xcf   :  { %v5970_v13 = vld [vmem:[#allocation2 + $0xea0] sm:$0xf0]  ;;  %v4536_v11 = vld [vmem:[#allocation2 + $0x348] sm:$0xf] }
  0xd0   :  { %v6422_v17 = vld [vmem:[#allocation2 + $0x844] sm:$0xf]  ;;  %v5973_v22 = vor.u32 %v6622_v12, %v5970_v13  ;;  %3324 = vmatpush.bf16.msrb.mxu2 %v5717_v16  ;;  %v5081_v12 = vor.u32 %v6403_v3, %v5080_v2  ;;  %v6267_v13 = vld [vmem:[#allocation2 + $0x364] sm:$0xf0] }
  0xd1   :  { %v5170_v18 = vld [vmem:[#allocation2 + $0x860] sm:$0xf0]  ;;  %v6331_v15 = vld [vmem:[#allocation2 + $0x564] sm:$0xf0] }
  0xd2   :  { %v6486_v19 = vld [vmem:[#allocation2 + $0xa44] sm:$0xf]  ;;  %v5173_v28 = vor.u32 %v6422_v17, %v5170_v18  ;;  %3337 = vmatpush.bf16.msrb.mxu3 %v5973_v22  ;;  %v5048_v16 = vld [vmem:[#allocation2 + $0x748] sm:$0xf]  ;;  %v4281_v18 = vor.u32 %v6203_v10, %v4280_v9  ;;  %v4793_v22 = vor.u32 %v6331_v15, %v4792_v14 }
  0xd3   :  { %v5426_v23 = vld [vmem:[#allocation2 + $0xa60] sm:$0xf0]  ;;  %v6395_v17 = vld [vmem:[#allocation2 + $0x764] sm:$0xf0] }
  0xd4   :  { %v6550_v24 = vld [vmem:[#allocation2 + $0xc44] sm:$0xf]  ;;  %v5429_v31 = vor.u32 %v6486_v19, %v5426_v23  ;;  %3299 = vmatpush.bf16.msrb.mxu0 %v5173_v28  ;;  %v4537_v19 = vor.u32 %v6267_v13, %v4536_v11  ;;  %v4248_v23 = vld [vmem:[#allocation2 + $0x108] sm:$0xf] }
  0xd5   :  { %v5682_v25 = vld [vmem:[#allocation2 + $0xc60] sm:$0xf0]  ;;  %v4760_v28 = vld [vmem:[#allocation2 + $0x508] sm:$0xf] }
  0xd6   :  { %v6614_v26 = vld [vmem:[#allocation2 + $0xe44] sm:$0xf]  ;;  %v5685_v32 = vor.u32 %v6550_v24, %v5682_v25  ;;  %3312 = vmatpush.bf16.msrb.mxu1 %v5429_v31  ;;  %v6195_v24 = vld [vmem:[#allocation2 + $0x124] sm:$0xf0] }
  0xd7   :  { %v5938_v27 = vld [vmem:[#allocation2 + $0xe60] sm:$0xf0]  ;;  %v4504_v25 = vld [vmem:[#allocation2 + $0x308] sm:$0xf] }
  0xd8   :  { %v6414_v29 = vld [vmem:[#allocation2 + $0x804] sm:$0xf]  ;;  %v5941_v36 = vor.u32 %v6614_v26, %v5938_v27  ;;  %3325 = vmatpush.bf16.msrb.mxu2 %v5685_v32  ;;  %v5049_v26 = vor.u32 %v6395_v17, %v5048_v16  ;;  %v6259_v27 = vld [vmem:[#allocation2 + $0x324] sm:$0xf0]  ;;  %v4249_v32 = vor.u32 %v6195_v24, %v4248_v23 }
  0xd9   :  { %v5138_v30 = vld [vmem:[#allocation2 + $0x820] sm:$0xf0]  ;;  %v6387_v31 = vld [vmem:[#allocation2 + $0x724] sm:$0xf0] }
  0xda   :  { %v6478_v33 = vld [vmem:[#allocation2 + $0xa04] sm:$0xf]  ;;  %v5141_v47 = vor.u32 %v6414_v29, %v5138_v30  ;;  %3338 = vmatpush.bf16.msrb.mxu3 %v5941_v36  ;;  %v6323_v29 = vld [vmem:[#allocation2 + $0x524] sm:$0xf0] }
  0xdb   :  { %v5394_v34 = vld [vmem:[#allocation2 + $0xa20] sm:$0xf0]  ;;  %v5016_v30 = vld [vmem:[#allocation2 + $0x708] sm:$0xf] }
  0xdc   :  { %v6542_v35 = vld [vmem:[#allocation2 + $0xc04] sm:$0xf]  ;;  %v5397_v51 = vor.u32 %v6478_v33, %v5394_v34  ;;  %3300 = vmatpush.bf16.msrb.mxu0 %v5141_v47  ;;  %v4505_v33 = vor.u32 %v6259_v27, %v4504_v25  ;;  %v4761_v34 = vor.u32 %v6323_v29, %v4760_v28  ;;  %v6187_v36 = vld [vmem:[#allocation2 + $0xe4] sm:$0xf0] }
  0xdd   :  { %v5650_v37 = vld [vmem:[#allocation2 + $0xc20] sm:$0xf0]  ;;  %v6315_v45 = vld [vmem:[#allocation2 + $0x4e4] sm:$0xf0] }
  0xde   :  { %v6606_v39 = vld [vmem:[#allocation2 + $0xe04] sm:$0xf]  ;;  %v5653_v52 = vor.u32 %v6542_v35, %v5650_v37  ;;  %3313 = vmatpush.bf16.msrb.mxu1 %v5397_v51  ;;  %v4216_v35 = vld [vmem:[#allocation2 + $0xc8] sm:$0xf]  ;;  %v4729_v50 = vor.u32 %v6315_v45, %v4728_v43 }
  0xdf   :  { %v5906_v40 = vld [vmem:[#allocation2 + $0xe20] sm:$0xf0]  ;;  %3301 = vmatmul.bf16.vlgmr.msrb.gmra.mxu0 %v6772_v41  ;;  %v4472_v37 = vld [vmem:[#allocation2 + $0x2c8] sm:$0xf]  ;;  %v4217_v48 = vor.u32 %v6187_v36, %v4216_v35 }
  0xe0   :  { %v5909_v55 = vor.u32 %v6606_v39, %v5906_v40  ;;  %3326 = vmatpush.bf16.msrb.mxu2 %v5653_v52  ;;  %3345 = vmatpush.bf16.msra.mxu0 %v4345_v56  ;;  %v5017_v39 = vor.u32 %v6387_v31, %v5016_v30  ;;  %v6251_v40 = vld [vmem:[#allocation2 + $0x2e4] sm:$0xf0] }
  0xe1   :  { %3314 = vmatmul.bf16.vlgmr.msrb.gmra.mxu1 %v6776_v44  ;;  %v4984_v46 = vld [vmem:[#allocation2 + $0x6c8] sm:$0xf]  ;;  %v4473_v49 = vor.u32 %v6251_v40, %v4472_v37 }
  0xe2   :  { %3339 = vmatpush.bf16.msrb.mxu3 %v5909_v55  ;;  %3358 = vmatpush.bf16.msra.mxu1 %v4601_v57  ;;  %v6379_v47 = vld [vmem:[#allocation2 + $0x6e4] sm:$0xf0] }
  0xe3   :  { %3327 = vmatmul.bf16.vlgmr.msrb.gmra.mxu2 %v6770_v38  ;;  %v4184_v51 = vld [vmem:[#allocation2 + $0x88] sm:$0xf]  ;;  %v4985_v54 = vor.u32 %v6379_v47, %v4984_v46 }
  0xe4   :  { %3371 = vmatpush.bf16.msra.mxu2 %v4857_v58  ;;  %3346 = vmatpush.bf16.msra.mxu0 %v4313_v5  ;;  %v6179_v52 = vld [vmem:[#allocation2 + $0xa4] sm:$0xf0] }
  0xe5   :  { %3340 = vmatmul.bf16.vlgmr.msrb.gmra.mxu3 %v6774_v42  ;;  %v4440_v53 = vld [vmem:[#allocation2 + $0x288] sm:$0xf]  ;;  %v4185_v60 = vor.u32 %v6179_v52, %v4184_v51 }
  0xe6   :  { %3384 = vmatpush.bf16.msra.mxu3 %v5113_v62  ;;  %3359 = vmatpush.bf16.msra.mxu1 %v4569_v7  ;;  %v6243_v55 = vld [vmem:[#allocation2 + $0x2a4] sm:$0xf0] }
  0xe7   :  { %v4696_v56 = vld [vmem:[#allocation2 + $0x488] sm:$0xf]  ;;  %v4441_v61 = vor.u32 %v6243_v55, %v4440_v53 }
  0xe8   :  { %3372 = vmatpush.bf16.msra.mxu2 %v4825_v8  ;;  %3347 = vmatpush.bf16.msra.mxu0 %v4281_v18  ;;  %v6307_v57 = vld [vmem:[#allocation2 + $0x4a4] sm:$0xf0] }
  0xe9   :  { %v4952_v58 = vld [vmem:[#allocation2 + $0x688] sm:$0xf]  ;;  %v4697_v62 = vor.u32 %v6307_v57, %v4696_v56 }
  0xea   :  { %3385 = vmatpush.bf16.msra.mxu3 %v5081_v12  ;;  %3360 = vmatpush.bf16.msra.mxu1 %v4537_v19  ;;  %v6371_v59 = vld [vmem:[#allocation2 + $0x6a4] sm:$0xf0] }
  0xeb   :  { %v4152_v63 = vld [vmem:[#allocation2 + $0x48] sm:$0xf]  ;;  %v4953_v2 = vor.u32 %v6371_v59, %v4952_v58 }
  0xec   :  { %3373 = vmatpush.bf16.msra.mxu2 %v4793_v22  ;;  %3348 = vmatpush.bf16.msra.mxu0 %v4249_v32  ;;  %v6171_v0 = vld [vmem:[#allocation2 + $0x64] sm:$0xf0] }
  0xed   :  { %v4408_v1 = vld [vmem:[#allocation2 + $0x248] sm:$0xf]  ;;  %v4153_v10 = vor.u32 %v6171_v0, %v4152_v63 }
  0xee   :  { %3386 = vmatpush.bf16.msra.mxu3 %v5049_v26  ;;  %3361 = vmatpush.bf16.msra.mxu1 %v4505_v33  ;;  %v6235_v3 = vld [vmem:[#allocation2 + $0x264] sm:$0xf0] }
  0xef   :  { %v4664_v5 = vld [vmem:[#allocation2 + $0x448] sm:$0xf]  ;;  %v4409_v13 = vor.u32 %v6235_v3, %v4408_v1 }
  0xf0   :  { %3374 = vmatpush.bf16.msra.mxu2 %v4761_v34  ;;  %3349 = vmatpush.bf16.msra.mxu0 %v4217_v48  ;;  %v6299_v7 = vld [vmem:[#allocation2 + $0x464] sm:$0xf0] }
  0xf1   :  { %v4920_v8 = vld [vmem:[#allocation2 + $0x648] sm:$0xf]  ;;  %v4665_v14 = vor.u32 %v6299_v7, %v4664_v5 }
  0xf2   :  { %3387 = vmatpush.bf16.msra.mxu3 %v5017_v39  ;;  %3362 = vmatpush.bf16.msra.mxu1 %v4473_v49  ;;  %v6363_v9 = vld [vmem:[#allocation2 + $0x664] sm:$0xf0] }
  0xf3   :  { %v4120_v11 = vld [vmem:[#allocation2 + $0x8] sm:$0xf]  ;;  %v4921_v18 = vor.u32 %v6363_v9, %v4920_v8 }
  0xf4   :  { %3375 = vmatpush.bf16.msra.mxu2 %v4729_v50  ;;  %3350 = vmatpush.bf16.msra.mxu0 %v4185_v60  ;;  %v6163_v12 = vld [vmem:[#allocation2 + $0x24] sm:$0xf0] }
  0xf5   :  { %v4376_v15 = vld [vmem:[#allocation2 + $0x208] sm:$0xf]  ;;  %v4121_v27 = vor.u32 %v6163_v12, %v4120_v11 }
  0xf6   :  { %3388 = vmatpush.bf16.msra.mxu3 %v4985_v54  ;;  %3363 = vmatpush.bf16.msra.mxu1 %v4441_v61  ;;  %v6227_v16 = vld [vmem:[#allocation2 + $0x224] sm:$0xf0] }
  0xf7   :  { %v4632_v17 = vld [vmem:[#allocation2 + $0x408] sm:$0xf]  ;;  %v4377_v31 = vor.u32 %v6227_v16, %v4376_v15 }
  0xf8   :  { %3376 = vmatpush.bf16.msra.mxu2 %v4697_v62  ;;  %v6291_v19 = vld [vmem:[#allocation2 + $0x424] sm:$0xf0]  ;;  %3351 = vmatpush.bf16.msra.mxu0 %v4153_v10 }
  0xf9   :  { %v4888_v22 = vld [vmem:[#allocation2 + $0x608] sm:$0xf]  ;;  %v4633_v32 = vor.u32 %v6291_v19, %v4632_v17 }
  0xfa   :  { %3389 = vmatpush.bf16.msra.mxu3 %v4953_v2  ;;  %v6355_v23 = vld [vmem:[#allocation2 + $0x624] sm:$0xf0]  ;;  %3364 = vmatpush.bf16.msra.mxu1 %v4409_v13 }
  0xfb   :  { %v5368_v24 = vld [vmem:[#allocation2 + $0x9c8] sm:$0xf]  ;;  %v4889_v35 = vor.u32 %v6355_v23, %v4888_v22 }
  0xfc   :  { %v6475_v25 = vld [vmem:[#allocation2 + $0x9e4] sm:$0xf0]  ;;  %3377 = vmatpush.bf16.msra.mxu2 %v4665_v14  ;;  %3352 = vmatpush.bf16.msra.mxu0 %v4121_v27 }
  0xfd   :  { %v5624_v26 = vld [vmem:[#allocation2 + $0xbc8] sm:$0xf]  ;;  %v5369_v36 = vor.u32 %v6475_v25, %v5368_v24 }
  0xfe   :  { %v6539_v28 = vld [vmem:[#allocation2 + $0xbe4] sm:$0xf0]  ;;  %3390 = vmatpush.bf16.msra.mxu3 %v4921_v18  ;;  %3365 = vmatpush.bf16.msra.mxu1 %v4377_v31 }
  0xff   :  { %v5880_v29 = vld [vmem:[#allocation2 + $0xdc8] sm:$0xf]  ;;  %v5625_v37 = vor.u32 %v6539_v28, %v5624_v26  ;;  %3353 = vmatmul.bf16.vlgmr.msra.gmra.mxu0 %v6757_v20 }
 0x100   :  { %v6603_v30 = vld [vmem:[#allocation2 + $0xde4] sm:$0xf0]  ;;  %3378 = vmatpush.bf16.msra.mxu2 %v4633_v32  ;;  %3397 = vmatpush.bf16.msrb.mxu0 %v5369_v36 }
 0x101   :  { %v6136_v33 = vld [vmem:[#allocation2 + $0xfc8] sm:$0xf]  ;;  %v5881_v39 = vor.u32 %v6603_v30, %v5880_v29  ;;  %3366 = vmatmul.bf16.vlgmr.msra.gmra.mxu1 %v6760_v21 }
 0x102   :  { %v6667_v34 = vld [vmem:[#allocation2 + $0xfe4] sm:$0xf0]  ;;  %3391 = vmatpush.bf16.msra.mxu3 %v4889_v35  ;;  %3410 = vmatpush.bf16.msrb.mxu1 %v5625_v37 }
 0x103   :  { %v5336_v40 = vld [vmem:[#allocation2 + $0x988] sm:$0xf]  ;;  %v6137_v46 = vor.u32 %v6667_v34, %v6136_v33  ;;  %3379 = vmatmul.bf16.vlgmr.msra.gmra.mxu2 %v6749_v4 }
 0x104   :  { %v6467_v43 = vld [vmem:[#allocation2 + $0x9a4] sm:$0xf0]  ;;  %3423 = vmatpush.bf16.msrb.mxu2 %v5881_v39 }
 0x105   :  { %v5592_v45 = vld [vmem:[#allocation2 + $0xb88] sm:$0xf]  ;;  %v5337_v52 = vor.u32 %v6467_v43, %v5336_v40  ;;  %3392 = vmatmul.bf16.vlgmr.msra.gmra.mxu3 %v6754_v6  ;;  %v3146_v43 = vpop.f32.mrf.mxu0 }
 0x106   :  { %v6531_v47 = vld [vmem:[#allocation2 + $0xba4] sm:$0xf0]  ;;  %3436 = vmatpush.bf16.msrb.mxu3 %v6137_v46  ;;  %v3159_v46 = vpop.f32.mrf.mxu1 }
 0x107   :  { %v5848_v48 = vld [vmem:[#allocation2 + $0xd88] sm:$0xf]  ;;  %v5593_v53 = vor.u32 %v6531_v47, %v5592_v45  ;;  %3398 = vmatpush.bf16.msrb.mxu0 %v5337_v52  ;;  %v3160_v52 = vadd.f32 %v3159_v46, %v3146_v43  ;;  %v4826_v43 = vld [vmem:[#allocation2 + $0x5a8] sm:$0xf0] }
 0x108   :  { %v6595_v49 = vld [vmem:[#allocation2 + $0xda4] sm:$0xf0]  ;;  %v5082_v46 = vld [vmem:[#allocation2 + $0x7a8] sm:$0xf0] }
 0x109   :  { %v6104_v50 = vld [vmem:[#allocation2 + $0xf88] sm:$0xf]  ;;  %v5849_v54 = vor.u32 %v6595_v49, %v5848_v48  ;;  %3411 = vmatpush.bf16.msrb.mxu1 %v5593_v53  ;;  %v3172_v53 = vpop.f32.mrf.mxu2 }
 0x10a   :  { %v6659_v51 = vld [vmem:[#allocation2 + $0xfa4] sm:$0xf0] }
 0x10b   :  { %v5304_v55 = vld [vmem:[#allocation2 + $0x948] sm:$0xf]  ;;  %v6105_v58 = vor.u32 %v6659_v51, %v6104_v50  ;;  %3424 = vmatpush.bf16.msrb.mxu2 %v5849_v54 }
 0x10c   :  { %v6459_v56 = vld [vmem:[#allocation2 + $0x964] sm:$0xf0] }
 0x10d   :  { %v5560_v57 = vld [vmem:[#allocation2 + $0xb48] sm:$0xf]  ;;  %v5305_v0 = vor.u32 %v6459_v56, %v5304_v55  ;;  %3437 = vmatpush.bf16.msrb.mxu3 %v6105_v58  ;;  %v3185_v58 = vpop.f32.mrf.mxu3 }
 0x10e   :  { %v6523_v59 = vld [vmem:[#allocation2 + $0xb64] sm:$0xf0] }
 0x10f   :  { %v5816_v60 = vld [vmem:[#allocation2 + $0xd48] sm:$0xf]  ;;  %v5561_v1 = vor.u32 %v6523_v59, %v5560_v57  ;;  %3399 = vmatpush.bf16.msrb.mxu0 %v5305_v0 }
 0x110   :  { %v6587_v61 = vld [vmem:[#allocation2 + $0xd64] sm:$0xf0] }
 0x111   :  { %v6072_v62 = vld [vmem:[#allocation2 + $0xf48] sm:$0xf]  ;;  %v5817_v2 = vor.u32 %v6587_v61, %v5816_v60  ;;  %3412 = vmatpush.bf16.msrb.mxu1 %v5561_v1  ;;  %v3173_v61 = vadd.f32 %v3172_v53, %v3160_v52  ;;  %v6263_v52 = vld [vmem:[#allocation2 + $0x34c] sm:$0xf] }
 0x112   :  { %v6651_v63 = vld [vmem:[#allocation2 + $0xf64] sm:$0xf0] }
 0x113   :  { %v5272_v3 = vld [vmem:[#allocation2 + $0x908] sm:$0xf]  ;;  %v6073_v8 = vor.u32 %v6651_v63, %v6072_v62  ;;  %3425 = vmatpush.bf16.msrb.mxu2 %v5817_v2 }
 0x114   :  { %v6451_v5 = vld [vmem:[#allocation2 + $0x924] sm:$0xf0] }
 0x115   :  { %v5528_v7 = vld [vmem:[#allocation2 + $0xb08] sm:$0xf]  ;;  %v5273_v14 = vor.u32 %v6451_v5, %v5272_v3  ;;  %3438 = vmatpush.bf16.msrb.mxu3 %v6073_v8  ;;  %v6794_v8 = vadd.f32 %v3185_v58, %v3173_v61  ;;  %v5050_v58 = vld [vmem:[#allocation2 + $0x768] sm:$0xf0] }
 0x116   :  { %v6515_v9 = vld [vmem:[#allocation2 + $0xb24] sm:$0xf0] }
 0x117   :  { %v5784_v10 = vld [vmem:[#allocation2 + $0xd08] sm:$0xf]  ;;  %v5529_v15 = vor.u32 %v6515_v9, %v5528_v7  ;;  %3400 = vmatpush.bf16.msrb.mxu0 %v5273_v14  ;;  %v4346_v14 = vld [vmem:[#allocation2 + $0x1e8] sm:$0xf0] }
 0x118   :  { %v6579_v11 = vld [vmem:[#allocation2 + $0xd24] sm:$0xf0] }
 0x119   :  { %v6040_v12 = vld [vmem:[#allocation2 + $0xf08] sm:$0xf]  ;;  %v5785_v16 = vor.u32 %v6579_v11, %v5784_v10  ;;  %3413 = vmatpush.bf16.msrb.mxu1 %v5529_v15  ;;  %v6279_v15 = vld [vmem:[#allocation2 + $0x3cc] sm:$0xf] }
 0x11a   :  { %v6643_v13 = vld [vmem:[#allocation2 + $0xf24] sm:$0xf0] }
 0x11b   :  { %v5240_v17 = vld [vmem:[#allocation2 + $0x8c8] sm:$0xf]  ;;  %v6041_v22 = vor.u32 %v6643_v13, %v6040_v12  ;;  %3426 = vmatpush.bf16.msrb.mxu2 %v5785_v16  ;;  %v6215_v13 = vld [vmem:[#allocation2 + $0x1cc] sm:$0xf]  ;;  %v3148_v16 = vpop.f32.mrf.mxu0 }
 0x11c   :  { %v6443_v18 = vld [vmem:[#allocation2 + $0x8e4] sm:$0xf0]  ;;  %v6247_v16 = vld [vmem:[#allocation2 + $0x2cc] sm:$0xf] }
 0x11d   :  { %v5496_v19 = vld [vmem:[#allocation2 + $0xac8] sm:$0xf]  ;;  %v5241_v28 = vor.u32 %v6443_v18, %v5240_v17  ;;  %3439 = vmatpush.bf16.msrb.mxu3 %v6041_v22  ;;  %v4602_v18 = vld [vmem:[#allocation2 + $0x3e8] sm:$0xf0] }
 0x11e   :  { %v6507_v23 = vld [vmem:[#allocation2 + $0xae4] sm:$0xf0]  ;;  %v4858_v22 = vld [vmem:[#allocation2 + $0x5e8] sm:$0xf0] }
 0x11f   :  { %v5752_v24 = vld [vmem:[#allocation2 + $0xcc8] sm:$0xf]  ;;  %v5497_v29 = vor.u32 %v6507_v23, %v5496_v19  ;;  %3401 = vmatpush.bf16.msrb.mxu0 %v5241_v28  ;;  %v6343_v19 = vld [vmem:[#allocation2 + $0x5cc] sm:$0xf]  ;;  %v3161_v23 = vpop.f32.mrf.mxu1  ;;  %v3174_v28 = vpop.f32.mrf.mxu2 }
 0x120   :  { %v6571_v25 = vld [vmem:[#allocation2 + $0xce4] sm:$0xf0]  ;;  %v6311_v23 = vld [vmem:[#allocation2 + $0x4cc] sm:$0xf] }
 0x121   :  { %v6008_v26 = vld [vmem:[#allocation2 + $0xec8] sm:$0xf]  ;;  %v5753_v30 = vor.u32 %v6571_v25, %v5752_v24  ;;  %3414 = vmatpush.bf16.msrb.mxu1 %v5497_v29 }
 0x122   :  { %v6635_v27 = vld [vmem:[#allocation2 + $0xee4] sm:$0xf0] }
 0x123   :  { %v5208_v31 = vld [vmem:[#allocation2 + $0x888] sm:$0xf]  ;;  %v6009_v34 = vor.u32 %v6635_v27, %v6008_v26  ;;  %3427 = vmatpush.bf16.msrb.mxu2 %v5753_v30  ;;  %v6407_v26 = vld [vmem:[#allocation2 + $0x7cc] sm:$0xf]  ;;  %v4349_v30 = vor.u32 %v6215_v13, %v4346_v14 }
 0x124   :  { %v6435_v32 = vld [vmem:[#allocation2 + $0x8a4] sm:$0xf0]  ;;  %v5114_v27 = vld [vmem:[#allocation2 + $0x7e8] sm:$0xf0] }
 0x125   :  { %v5464_v33 = vld [vmem:[#allocation2 + $0xa88] sm:$0xf]  ;;  %v5209_v45 = vor.u32 %v6435_v32, %v5208_v31  ;;  %3440 = vmatpush.bf16.msrb.mxu3 %v6009_v34  ;;  %v3187_v31 = vpop.f32.mrf.mxu3  ;;  %v4605_v32 = vor.u32 %v6279_v15, %v4602_v18  ;;  %v6207_v34 = vld [vmem:[#allocation2 + $0x18c] sm:$0xf] }
 0x126   :  { %v6499_v35 = vld [vmem:[#allocation2 + $0xaa4] sm:$0xf0]  ;;  %v6183_v14 = vld [vmem:[#allocation2 + $0xcc] sm:$0xf] }
 0x127   :  { %v5720_v36 = vld [vmem:[#allocation2 + $0xc88] sm:$0xf]  ;;  %v5465_v47 = vor.u32 %v6499_v35, %v5464_v33  ;;  %3402 = vmatpush.bf16.msrb.mxu0 %v5209_v45  ;;  %v4861_v33 = vor.u32 %v6343_v19, %v4858_v22  ;;  %v4314_v35 = vld [vmem:[#allocation2 + $0x1a8] sm:$0xf0]  ;;  %v3211_v18 = vpop.f32.mrf.mxu1 }
 0x128   :  { %v6563_v37 = vld [vmem:[#allocation2 + $0xca4] sm:$0xf0]  ;;  %v6399_v45 = vld [vmem:[#allocation2 + $0x78c] sm:$0xf] }
 0x129   :  { %v5976_v39 = vld [vmem:[#allocation2 + $0xe88] sm:$0xf]  ;;  %v5721_v48 = vor.u32 %v6563_v37, %v5720_v36  ;;  %3415 = vmatpush.bf16.msrb.mxu1 %v5465_v47  ;;  %v6271_v36 = vld [vmem:[#allocation2 + $0x38c] sm:$0xf]  ;;  %v5117_v37 = vor.u32 %v6407_v26, %v5114_v27  ;;  %v4317_v47 = vor.u32 %v6207_v34, %v4314_v35  ;;  %v5085_v53 = vor.u32 %v6399_v45, %v5082_v46  ;;  %v3224_v34 = vpop.f32.mrf.mxu2 }
 0x12a   :  { %v6627_v40 = vld [vmem:[#allocation2 + $0xea4] sm:$0xf0]  ;;  %v4218_v15 = vld [vmem:[#allocation2 + $0xe8] sm:$0xf0] }
 0x12b   :  { %v5176_v49 = vld [vmem:[#allocation2 + $0x848] sm:$0xf]  ;;  %v5977_v54 = vor.u32 %v6627_v40, %v5976_v39  ;;  %3428 = vmatpush.bf16.msrb.mxu2 %v5721_v48  ;;  %v4570_v39 = vld [vmem:[#allocation2 + $0x3a8] sm:$0xf0]  ;;  %v4221_v28 = vor.u32 %v6183_v14, %v4218_v15 }
 0x12c   :  { %v6427_v50 = vld [vmem:[#allocation2 + $0x864] sm:$0xf0]  ;;  %v6335_v40 = vld [vmem:[#allocation2 + $0x58c] sm:$0xf]  ;;  %v4573_v48 = vor.u32 %v6271_v36, %v4570_v39 }
 0x12d   :  { %v5432_v51 = vld [vmem:[#allocation2 + $0xa48] sm:$0xf]  ;;  %v5177_v62 = vor.u32 %v6427_v50, %v5176_v49  ;;  %3441 = vmatpush.bf16.msrb.mxu3 %v5977_v54  ;;  %v4829_v49 = vor.u32 %v6335_v40, %v4826_v43  ;;  %v6199_v50 = vld [vmem:[#allocation2 + $0x14c] sm:$0xf]  ;;  %v3237_v40 = vpop.f32.mrf.mxu3 }
 0x12e   :  { %v6491_v55 = vld [vmem:[#allocation2 + $0xa64] sm:$0xf0]  ;;  %v4538_v54 = vld [vmem:[#allocation2 + $0x368] sm:$0xf0] }
 0x12f   :  { %v5688_v56 = vld [vmem:[#allocation2 + $0xc48] sm:$0xf]  ;;  %v5433_v1 = vor.u32 %v6491_v55, %v5432_v51  ;;  %3403 = vmatpush.bf16.msrb.mxu0 %v5177_v62  ;;  %v4282_v51 = vld [vmem:[#allocation2 + $0x168] sm:$0xf0] }
 0x130   :  { %v6555_v57 = vld [vmem:[#allocation2 + $0xc64] sm:$0xf0]  ;;  %v6327_v55 = vld [vmem:[#allocation2 + $0x54c] sm:$0xf] }
 0x131   :  { %v5944_v59 = vld [vmem:[#allocation2 + $0xe48] sm:$0xf]  ;;  %v5689_v2 = vor.u32 %v6555_v57, %v5688_v56  ;;  %3416 = vmatpush.bf16.msrb.mxu1 %v5433_v1  ;;  %v4794_v56 = vld [vmem:[#allocation2 + $0x568] sm:$0xf0] }
 0x132   :  { %v6619_v60 = vld [vmem:[#allocation2 + $0xe64] sm:$0xf0]  ;;  %v6391_v57 = vld [vmem:[#allocation2 + $0x74c] sm:$0xf]  ;;  %v4797_v61 = vor.u32 %v6327_v55, %v4794_v56 }
 0x133   :  { %v5144_v63 = vld [vmem:[#allocation2 + $0x808] sm:$0xf]  ;;  %v5945_v9 = vor.u32 %v6619_v60, %v5944_v59  ;;  %3429 = vmatpush.bf16.msrb.mxu2 %v5689_v2  ;;  %v4285_v59 = vor.u32 %v6199_v50, %v4282_v51  ;;  %v4541_v60 = vor.u32 %v6263_v52, %v4538_v54  ;;  %v6191_v62 = vld [vmem:[#allocation2 + $0x10c] sm:$0xf]  ;;  %v5053_v1 = vor.u32 %v6391_v57, %v5050_v58  ;;  %v3213_v54 = vpop.f32.mrf.mxu1 }
 0x134   :  { %v6419_v0 = vld [vmem:[#allocation2 + $0x824] sm:$0xf0]  ;;  %v4506_v2 = vld [vmem:[#allocation2 + $0x328] sm:$0xf0] }
 0x135   :  { %v5400_v3 = vld [vmem:[#allocation2 + $0xa08] sm:$0xf]  ;;  %v5145_v17 = vor.u32 %v6419_v0, %v5144_v63  ;;  %3442 = vmatpush.bf16.msrb.mxu3 %v5945_v9  ;;  %v4250_v63 = vld [vmem:[#allocation2 + $0x128] sm:$0xf0] }
 0x136   :  { %v6483_v5 = vld [vmem:[#allocation2 + $0xa24] sm:$0xf0]  ;;  %v6255_v0 = vld [vmem:[#allocation2 + $0x30c] sm:$0xf] }
 0x137   :  { %v5656_v7 = vld [vmem:[#allocation2 + $0xc08] sm:$0xf]  ;;  %v5401_v24 = vor.u32 %v6483_v5, %v5400_v3  ;;  %3404 = vmatpush.bf16.msrb.mxu0 %v5145_v17  ;;  %v6319_v3 = vld [vmem:[#allocation2 + $0x50c] sm:$0xf] }
 0x138   :  { %v6547_v10 = vld [vmem:[#allocation2 + $0xc24] sm:$0xf0]  ;;  %v4762_v5 = vld [vmem:[#allocation2 + $0x528] sm:$0xf0] }
 0x139   :  { %v5912_v11 = vld [vmem:[#allocation2 + $0xe08] sm:$0xf]  ;;  %v5657_v25 = vor.u32 %v6547_v10, %v5656_v7  ;;  %3417 = vmatpush.bf16.msrb.mxu1 %v5401_v24  ;;  %v6383_v7 = vld [vmem:[#allocation2 + $0x70c] sm:$0xf]  ;;  %v4253_v10 = vor.u32 %v6191_v62, %v4250_v63  ;;  %v4765_v13 = vor.u32 %v6319_v3, %v4762_v5 }
 0x13a   :  { %v6611_v12 = vld [vmem:[#allocation2 + $0xe24] sm:$0xf0]  ;;  %3405 = vmatmul.bf16.vlgmr.msrb.gmra.mxu0 %v6772_v41  ;;  %v5018_v9 = vld [vmem:[#allocation2 + $0x728] sm:$0xf0] }
 0x13b   :  { %v5913_v29 = vor.u32 %v6611_v12, %v5912_v11  ;;  %3430 = vmatpush.bf16.msrb.mxu2 %v5657_v25  ;;  %3449 = vmatpush.bf16.msra.mxu0 %v4349_v30  ;;  %v3198_v11 = vpop.f32.mrf.mxu0  ;;  %v4509_v12 = vor.u32 %v6255_v0, %v4506_v2  ;;  %v5021_v19 = vor.u32 %v6383_v7, %v5018_v9  ;;  %v4474_v22 = vld [vmem:[#allocation2 + $0x2e8] sm:$0xf0]  ;;  %v3226_v7 = vpop.f32.mrf.mxu2 }
 0x13c   :  { %3418 = vmatmul.bf16.vlgmr.msrb.gmra.mxu1 %v6776_v44  ;;  %v3199_v17 = vadd.f32 %v3198_v11, %v6794_v8  ;;  %v4730_v24 = vld [vmem:[#allocation2 + $0x4e8] sm:$0xf0] }
 0x13d   :  { %3443 = vmatpush.bf16.msrb.mxu3 %v5913_v29  ;;  %3462 = vmatpush.bf16.msra.mxu1 %v4605_v32  ;;  %v6375_v25 = vld [vmem:[#allocation2 + $0x6cc] sm:$0xf]  ;;  %v4477_v29 = vor.u32 %v6247_v16, %v4474_v22  ;;  %v4733_v30 = vor.u32 %v6311_v23, %v4730_v24 }
 0x13e   :  { %3431 = vmatmul.bf16.vlgmr.msrb.gmra.mxu2 %v6770_v38  ;;  %v4986_v26 = vld [vmem:[#allocation2 + $0x6e8] sm:$0xf0]  ;;  %v3212_v27 = vadd.f32 %v3211_v18, %v3199_v17 }
 0x13f   :  { %3475 = vmatpush.bf16.msra.mxu2 %v4861_v33  ;;  %3450 = vmatpush.bf16.msra.mxu0 %v4317_v47  ;;  %v6175_v31 = vld [vmem:[#allocation2 + $0x8c] sm:$0xf]  ;;  %v4989_v8 = vor.u32 %v6375_v25, %v4986_v26 }
 0x140   :  { %3444 = vmatmul.bf16.vlgmr.msrb.gmra.mxu3 %v6774_v42  ;;  %v4186_v32 = vld [vmem:[#allocation2 + $0xa8] sm:$0xf0]  ;;  %v3225_v39 = vadd.f32 %v3224_v34, %v3212_v27 }
 0x141   :  { %3488 = vmatpush.bf16.msra.mxu3 %v5117_v37  ;;  %3463 = vmatpush.bf16.msra.mxu1 %v4573_v48  ;;  %v6239_v33 = vld [vmem:[#allocation2 + $0x28c] sm:$0xf]  ;;  %v4189_v46 = vor.u32 %v6175_v31, %v4186_v32 }
 0x142   :  { %v4442_v35 = vld [vmem:[#allocation2 + $0x2a8] sm:$0xf0]  ;;  %v6801_v47 = vadd.f32 %v3237_v40, %v3225_v39 }
 0x143   :  { %3476 = vmatpush.bf16.msra.mxu2 %v4829_v49  ;;  %3451 = vmatpush.bf16.msra.mxu0 %v4285_v59  ;;  %v6303_v36 = vld [vmem:[#allocation2 + $0x48c] sm:$0xf]  ;;  %v3200_v48 = vpop.f32.mrf.mxu0  ;;  %v4445_v49 = vor.u32 %v6239_v33, %v4442_v35 }
 0x144   :  { %v4698_v37 = vld [vmem:[#allocation2 + $0x4a8] sm:$0xf0] }
 0x145   :  { %3489 = vmatpush.bf16.msra.mxu3 %v5085_v53  ;;  %3464 = vmatpush.bf16.msra.mxu1 %v4541_v60  ;;  %v6367_v43 = vld [vmem:[#allocation2 + $0x68c] sm:$0xf]  ;;  %v4701_v50 = vor.u32 %v6303_v36, %v4698_v37 }
 0x146   :  { %v4954_v45 = vld [vmem:[#allocation2 + $0x6a8] sm:$0xf0] }
 0x147   :  { %3477 = vmatpush.bf16.msra.mxu2 %v4797_v61  ;;  %3452 = vmatpush.bf16.msra.mxu0 %v4253_v10  ;;  %v6167_v51 = vld [vmem:[#allocation2 + $0x4c] sm:$0xf]  ;;  %v4957_v55 = vor.u32 %v6367_v43, %v4954_v45 }
 0x148   :  { %v4154_v52 = vld [vmem:[#allocation2 + $0x68] sm:$0xf0] }
 0x149   :  { %3490 = vmatpush.bf16.msra.mxu3 %v5053_v1  ;;  %3465 = vmatpush.bf16.msra.mxu1 %v4509_v12  ;;  %v6231_v53 = vld [vmem:[#allocation2 + $0x24c] sm:$0xf]  ;;  %v4157_v61 = vor.u32 %v6167_v51, %v4154_v52 }
 0x14a   :  { %v4410_v56 = vld [vmem:[#allocation2 + $0x268] sm:$0xf0] }
 0x14b   :  { %3478 = vmatpush.bf16.msra.mxu2 %v4765_v13  ;;  %3453 = vmatpush.bf16.msra.mxu0 %v4221_v28  ;;  %v6295_v57 = vld [vmem:[#allocation2 + $0x44c] sm:$0xf]  ;;  %v4413_v0 = vor.u32 %v6231_v53, %v4410_v56  ;;  %v3239_v13 = vpop.f32.mrf.mxu3  ;;  %v3250_v7 = vpop.f32.mrf.mxu0 }
 0x14c   :  { %v4666_v58 = vld [vmem:[#allocation2 + $0x468] sm:$0xf0] }
 0x14d   :  { %3491 = vmatpush.bf16.msra.mxu3 %v5021_v19  ;;  %3466 = vmatpush.bf16.msra.mxu1 %v4477_v29  ;;  %v6359_v59 = vld [vmem:[#allocation2 + $0x64c] sm:$0xf]  ;;  %v4669_v1 = vor.u32 %v6295_v57, %v4666_v58 }
 0x14e   :  { %v4922_v60 = vld [vmem:[#allocation2 + $0x668] sm:$0xf0] }
 0x14f   :  { %3479 = vmatpush.bf16.msra.mxu2 %v4733_v30  ;;  %3454 = vmatpush.bf16.msra.mxu0 %v4189_v46  ;;  %v6159_v62 = vld [vmem:[#allocation2 + $0xc] sm:$0xf]  ;;  %v4925_v9 = vor.u32 %v6359_v59, %v4922_v60 }
 0x150   :  { %v4122_v63 = vld [vmem:[#allocation2 + $0x28] sm:$0xf0] }
 0x151   :  { %3492 = vmatpush.bf16.msra.mxu3 %v4989_v8  ;;  %3467 = vmatpush.bf16.msra.mxu1 %v4445_v49  ;;  %v6223_v2 = vld [vmem:[#allocation2 + $0x20c] sm:$0xf]  ;;  %v4125_v17 = vor.u32 %v6159_v62, %v4122_v63 }
 0x152   :  { %v4378_v3 = vld [vmem:[#allocation2 + $0x228] sm:$0xf0] }
 0x153   :  { %3480 = vmatpush.bf16.msra.mxu2 %v4701_v50  ;;  %v6287_v5 = vld [vmem:[#allocation2 + $0x40c] sm:$0xf]  ;;  %3455 = vmatpush.bf16.msra.mxu0 %v4157_v61  ;;  %v4381_v23 = vor.u32 %v6223_v2, %v4378_v3 }
 0x154   :  { %v4634_v10 = vld [vmem:[#allocation2 + $0x428] sm:$0xf0] }
 0x155   :  { %3493 = vmatpush.bf16.msra.mxu3 %v4957_v55  ;;  %v6351_v11 = vld [vmem:[#allocation2 + $0x60c] sm:$0xf]  ;;  %3468 = vmatpush.bf16.msra.mxu1 %v4413_v0  ;;  %v4637_v24 = vor.u32 %v6287_v5, %v4634_v10 }
 0x156   :  { %v4890_v12 = vld [vmem:[#allocation2 + $0x628] sm:$0xf0] }
 0x157   :  { %v6471_v14 = vld [vmem:[#allocation2 + $0x9cc] sm:$0xf]  ;;  %3481 = vmatpush.bf16.msra.mxu2 %v4669_v1  ;;  %v4893_v27 = vor.u32 %v6351_v11, %v4890_v12  ;;  %3456 = vmatpush.bf16.msra.mxu0 %v4125_v17 }
 0x158   :  { %v5370_v15 = vld [vmem:[#allocation2 + $0x9e8] sm:$0xf0] }
 0x159   :  { %v6535_v16 = vld [vmem:[#allocation2 + $0xbcc] sm:$0xf]  ;;  %3494 = vmatpush.bf16.msra.mxu3 %v4925_v9  ;;  %v5373_v28 = vor.u32 %v6471_v14, %v5370_v15  ;;  %3469 = vmatpush.bf16.msra.mxu1 %v4381_v23  ;;  %v3263_v14 = vpop.f32.mrf.mxu1 }
 0x15a   :  { %v5626_v18 = vld [vmem:[#allocation2 + $0xbe8] sm:$0xf0]  ;;  %3457 = vmatmul.bf16.vlgmr.msra.gmra.mxu0 %v6757_v20 }
 0x15b   :  { %v6599_v19 = vld [vmem:[#allocation2 + $0xdcc] sm:$0xf]  ;;  %v5629_v29 = vor.u32 %v6535_v16, %v5626_v18  ;;  %3482 = vmatpush.bf16.msra.mxu2 %v4637_v24  ;;  %3501 = vmatpush.bf16.msrb.mxu0 %v5373_v28 }
 0x15c   :  { %v5882_v22 = vld [vmem:[#allocation2 + $0xde8] sm:$0xf0]  ;;  %3470 = vmatmul.bf16.vlgmr.msra.gmra.mxu1 %v6760_v21 }
 0x15d   :  { %v6663_v25 = vld [vmem:[#allocation2 + $0xfcc] sm:$0xf]  ;;  %v5885_v30 = vor.u32 %v6599_v19, %v5882_v22  ;;  %3495 = vmatpush.bf16.msra.mxu3 %v4893_v27  ;;  %3514 = vmatpush.bf16.msrb.mxu1 %v5629_v29  ;;  %v3264_v19 = vadd.f32 %v3263_v14, %v3250_v7 }
 0x15e   :  { %v6138_v26 = vld [vmem:[#allocation2 + $0xfe8] sm:$0xf0]  ;;  %3483 = vmatmul.bf16.vlgmr.msra.gmra.mxu2 %v6749_v4 }
 0x15f   :  { %v6463_v31 = vld [vmem:[#allocation2 + $0x98c] sm:$0xf]  ;;  %v6141_v34 = vor.u32 %v6663_v25, %v6138_v26  ;;  %3527 = vmatpush.bf16.msrb.mxu2 %v5885_v30  ;;  %v3276_v30 = vpop.f32.mrf.mxu2 }
 0x160   :  { %v5338_v32 = vld [vmem:[#allocation2 + $0x9a8] sm:$0xf0]  ;;  %3496 = vmatmul.bf16.vlgmr.msra.gmra.mxu3 %v6754_v6 }
 0x161   :  { %v6527_v33 = vld [vmem:[#allocation2 + $0xb8c] sm:$0xf]  ;;  %v5341_v40 = vor.u32 %v6463_v31, %v5338_v32  ;;  %3540 = vmatpush.bf16.msrb.mxu3 %v6141_v34 }
 0x162   :  { %v5594_v8 = vld [vmem:[#allocation2 + $0xba8] sm:$0xf0] }
 0x163   :  { %v6591_v35 = vld [vmem:[#allocation2 + $0xd8c] sm:$0xf]  ;;  %v5597_v43 = vor.u32 %v6527_v33, %v5594_v8  ;;  %3502 = vmatpush.bf16.msrb.mxu0 %v5341_v40  ;;  %v3277_v8 = vadd.f32 %v3276_v30, %v3264_v19  ;;  %v4576_v30 = vld [vmem:[#allocation2 + $0x390] sm:$0xf] }
 0x164   :  { %v5850_v36 = vld [vmem:[#allocation2 + $0xda8] sm:$0xf0] }
 0x165   :  { %v6655_v37 = vld [vmem:[#allocation2 + $0xf8c] sm:$0xf]  ;;  %v5853_v45 = vor.u32 %v6591_v35, %v5850_v36  ;;  %3515 = vmatpush.bf16.msrb.mxu1 %v5597_v43  ;;  %v3289_v35 = vpop.f32.mrf.mxu3  ;;  %v3252_v43 = vpop.f32.mrf.mxu0 }
 0x166   :  { %v6106_v39 = vld [vmem:[#allocation2 + $0xfa8] sm:$0xf0]  ;;  %v6807_v40 = vadd.f32 %v3289_v35, %v3277_v8  ;;  %v5088_v8 = vld [vmem:[#allocation2 + $0x790] sm:$0xf] }
 0x167   :  { %v6455_v46 = vld [vmem:[#allocation2 + $0x94c] sm:$0xf]  ;;  %v6109_v50 = vor.u32 %v6655_v37, %v6106_v39  ;;  %3528 = vmatpush.bf16.msrb.mxu2 %v5853_v45  ;;  %v6404_v35 = vld [vmem:[#allocation2 + $0x7ac] sm:$0xf0] }
 0x168   :  { %v5306_v48 = vld [vmem:[#allocation2 + $0x968] sm:$0xf0]  ;;  %v4288_v43 = vld [vmem:[#allocation2 + $0x150] sm:$0xf] }
 0x169   :  { %v6519_v49 = vld [vmem:[#allocation2 + $0xb4c] sm:$0xf]  ;;  %v5309_v56 = vor.u32 %v6455_v46, %v5306_v48  ;;  %3541 = vmatpush.bf16.msrb.mxu3 %v6109_v50 }
 0x16a   :  { %v5562_v51 = vld [vmem:[#allocation2 + $0xb68] sm:$0xf0] }
 0x16b   :  { %v6583_v52 = vld [vmem:[#allocation2 + $0xd4c] sm:$0xf]  ;;  %v5565_v57 = vor.u32 %v6519_v49, %v5562_v51  ;;  %3503 = vmatpush.bf16.msrb.mxu0 %v5309_v56  ;;  %v3265_v51 = vpop.f32.mrf.mxu1 }
 0x16c   :  { %v5818_v53 = vld [vmem:[#allocation2 + $0xd68] sm:$0xf0]  ;;  %v6332_v51 = vld [vmem:[#allocation2 + $0x56c] sm:$0xf0] }
 0x16d   :  { %v6647_v54 = vld [vmem:[#allocation2 + $0xf4c] sm:$0xf]  ;;  %v5821_v58 = vor.u32 %v6583_v52, %v5818_v53  ;;  %3516 = vmatpush.bf16.msrb.mxu1 %v5565_v57 }
 0x16e   :  { %v6074_v55 = vld [vmem:[#allocation2 + $0xf68] sm:$0xf0] }
 0x16f   :  { %v6447_v59 = vld [vmem:[#allocation2 + $0x90c] sm:$0xf]  ;;  %v6077_v62 = vor.u32 %v6647_v54, %v6074_v55  ;;  %3529 = vmatpush.bf16.msrb.mxu2 %v5821_v58 }
 0x170   :  { %v5274_v60 = vld [vmem:[#allocation2 + $0x928] sm:$0xf0] }
 0x171   :  { %v6511_v61 = vld [vmem:[#allocation2 + $0xb0c] sm:$0xf]  ;;  %v5277_v5 = vor.u32 %v6447_v59, %v5274_v60  ;;  %3542 = vmatpush.bf16.msrb.mxu3 %v6077_v62 }
 0x172   :  { %v5530_v63 = vld [vmem:[#allocation2 + $0xb28] sm:$0xf0] }
 0x173   :  { %v6575_v0 = vld [vmem:[#allocation2 + $0xd0c] sm:$0xf]  ;;  %v5533_v9 = vor.u32 %v6511_v61, %v5530_v63  ;;  %3504 = vmatpush.bf16.msrb.mxu0 %v5277_v5 }
 0x174   :  { %v5786_v1 = vld [vmem:[#allocation2 + $0xd28] sm:$0xf0] }
 0x175   :  { %v6639_v2 = vld [vmem:[#allocation2 + $0xf0c] sm:$0xf]  ;;  %v5789_v10 = vor.u32 %v6575_v0, %v5786_v1  ;;  %3517 = vmatpush.bf16.msrb.mxu1 %v5533_v9 }
 0x176   :  { %v6042_v3 = vld [vmem:[#allocation2 + $0xf28] sm:$0xf0] }
 0x177   :  { %v6439_v11 = vld [vmem:[#allocation2 + $0x8cc] sm:$0xf]  ;;  %v6045_v15 = vor.u32 %v6639_v2, %v6042_v3  ;;  %3530 = vmatpush.bf16.msrb.mxu2 %v5789_v10  ;;  %v3278_v2 = vpop.f32.mrf.mxu2  ;;  %v3291_v10 = vpop.f32.mrf.mxu3 }
 0x178   :  { %v5242_v12 = vld [vmem:[#allocation2 + $0x8e8] sm:$0xf0]  ;;  %v6188_v10 = vld [vmem:[#allocation2 + $0xec] sm:$0xf0] }
 0x179   :  { %v6503_v13 = vld [vmem:[#allocation2 + $0xacc] sm:$0xf]  ;;  %v5245_v24 = vor.u32 %v6439_v11, %v5242_v12  ;;  %3543 = vmatpush.bf16.msrb.mxu3 %v6045_v15  ;;  %v4352_v11 = vld [vmem:[#allocation2 + $0x1d0] sm:$0xf] }
 0x17a   :  { %v5498_v16 = vld [vmem:[#allocation2 + $0xae8] sm:$0xf0]  ;;  %v6220_v12 = vld [vmem:[#allocation2 + $0x1ec] sm:$0xf0] }
 0x17b   :  { %v6567_v17 = vld [vmem:[#allocation2 + $0xccc] sm:$0xf]  ;;  %v5501_v25 = vor.u32 %v6503_v13, %v5498_v16  ;;  %3505 = vmatpush.bf16.msrb.mxu0 %v5245_v24  ;;  %v4608_v13 = vld [vmem:[#allocation2 + $0x3d0] sm:$0xf] }
 0x17c   :  { %v5754_v18 = vld [vmem:[#allocation2 + $0xce8] sm:$0xf0]  ;;  %v6284_v15 = vld [vmem:[#allocation2 + $0x3ec] sm:$0xf0] }
 0x17d   :  { %v6631_v22 = vld [vmem:[#allocation2 + $0xecc] sm:$0xf]  ;;  %v5757_v26 = vor.u32 %v6567_v17, %v5754_v18  ;;  %3518 = vmatpush.bf16.msrb.mxu1 %v5501_v25  ;;  %v4864_v16 = vld [vmem:[#allocation2 + $0x5d0] sm:$0xf]  ;;  %v4353_v25 = vor.u32 %v6220_v12, %v4352_v11 }
 0x17e   :  { %v6010_v23 = vld [vmem:[#allocation2 + $0xee8] sm:$0xf0]  ;;  %v6348_v17 = vld [vmem:[#allocation2 + $0x5ec] sm:$0xf0] }
 0x17f   :  { %v6431_v27 = vld [vmem:[#allocation2 + $0x88c] sm:$0xf]  ;;  %v6013_v31 = vor.u32 %v6631_v22, %v6010_v23  ;;  %3531 = vmatpush.bf16.msrb.mxu2 %v5757_v26  ;;  %v5120_v22 = vld [vmem:[#allocation2 + $0x7d0] sm:$0xf]  ;;  %v4609_v26 = vor.u32 %v6284_v15, %v4608_v13  ;;  %v3315_v13 = vpop.f32.mrf.mxu1 }
 0x180   :  { %v5210_v28 = vld [vmem:[#allocation2 + $0x8a8] sm:$0xf0]  ;;  %v6412_v23 = vld [vmem:[#allocation2 + $0x7ec] sm:$0xf0] }
 0x181   :  { %v6495_v29 = vld [vmem:[#allocation2 + $0xa8c] sm:$0xf]  ;;  %v5213_v39 = vor.u32 %v6431_v27, %v5210_v28  ;;  %3544 = vmatpush.bf16.msrb.mxu3 %v6013_v31  ;;  %v4865_v27 = vor.u32 %v6348_v17, %v4864_v16  ;;  %v4320_v28 = vld [vmem:[#allocation2 + $0x190] sm:$0xf]  ;;  %v5121_v31 = vor.u32 %v6412_v23, %v5120_v22 }
 0x182   :  { %v5466_v32 = vld [vmem:[#allocation2 + $0xaa8] sm:$0xf0]  ;;  %v4480_v11 = vld [vmem:[#allocation2 + $0x2d0] sm:$0xf] }
 0x183   :  { %v6559_v33 = vld [vmem:[#allocation2 + $0xc8c] sm:$0xf]  ;;  %v5469_v45 = vor.u32 %v6495_v29, %v5466_v32  ;;  %3506 = vmatpush.bf16.msrb.mxu0 %v5213_v39  ;;  %v6212_v29 = vld [vmem:[#allocation2 + $0x1ac] sm:$0xf0] }
 0x184   :  { %v5722_v34 = vld [vmem:[#allocation2 + $0xca8] sm:$0xf0]  ;;  %v6276_v32 = vld [vmem:[#allocation2 + $0x3ac] sm:$0xf0] }
 0x185   :  { %v6623_v36 = vld [vmem:[#allocation2 + $0xe8c] sm:$0xf]  ;;  %v5725_v46 = vor.u32 %v6559_v33, %v5722_v34  ;;  %3519 = vmatpush.bf16.msrb.mxu1 %v5469_v45  ;;  %v4832_v33 = vld [vmem:[#allocation2 + $0x590] sm:$0xf] }
 0x186   :  { %v5978_v37 = vld [vmem:[#allocation2 + $0xea8] sm:$0xf0]  ;;  %v6340_v34 = vld [vmem:[#allocation2 + $0x5ac] sm:$0xf0] }
 0x187   :  { %v6423_v48 = vld [vmem:[#allocation2 + $0x84c] sm:$0xf]  ;;  %v5981_v52 = vor.u32 %v6623_v36, %v5978_v37  ;;  %3532 = vmatpush.bf16.msrb.mxu2 %v5725_v46  ;;  %v4321_v36 = vor.u32 %v6212_v29, %v4320_v28  ;;  %v4577_v37 = vor.u32 %v6276_v32, %v4576_v30  ;;  %v4833_v39 = vor.u32 %v6340_v34, %v4832_v33  ;;  %v6204_v45 = vld [vmem:[#allocation2 + $0x16c] sm:$0xf0]  ;;  %v3328_v29 = vpop.f32.mrf.mxu2  ;;  %v3341_v34 = vpop.f32.mrf.mxu3 }
 0x188   :  { %v5178_v49 = vld [vmem:[#allocation2 + $0x868] sm:$0xf0]  ;;  %v4544_v46 = vld [vmem:[#allocation2 + $0x350] sm:$0xf] }
 0x189   :  { %v6487_v50 = vld [vmem:[#allocation2 + $0xa4c] sm:$0xf]  ;;  %v5181_v58 = vor.u32 %v6423_v48, %v5178_v49  ;;  %3545 = vmatpush.bf16.msrb.mxu3 %v5981_v52  ;;  %v5089_v48 = vor.u32 %v6404_v35, %v5088_v8  ;;  %v6268_v49 = vld [vmem:[#allocation2 + $0x36c] sm:$0xf0] }
 0x18a   :  { %v5434_v53 = vld [vmem:[#allocation2 + $0xa68] sm:$0xf0]  ;;  %v5056_v52 = vld [vmem:[#allocation2 + $0x750] sm:$0xf] }
 0x18b   :  { %v6551_v54 = vld [vmem:[#allocation2 + $0xc4c] sm:$0xf]  ;;  %v5437_v61 = vor.u32 %v6487_v50, %v5434_v53  ;;  %3507 = vmatpush.bf16.msrb.mxu0 %v5181_v58  ;;  %v4800_v50 = vld [vmem:[#allocation2 + $0x550] sm:$0xf] }
 0x18c   :  { %v5690_v55 = vld [vmem:[#allocation2 + $0xc68] sm:$0xf0]  ;;  %v6396_v53 = vld [vmem:[#allocation2 + $0x76c] sm:$0xf0] }
 0x18d   :  { %v6615_v56 = vld [vmem:[#allocation2 + $0xe4c] sm:$0xf]  ;;  %v5693_v62 = vor.u32 %v6551_v54, %v5690_v55  ;;  %3520 = vmatpush.bf16.msrb.mxu1 %v5437_v61  ;;  %v4289_v54 = vor.u32 %v6204_v45, %v4288_v43  ;;  %v4545_v55 = vor.u32 %v6268_v49, %v4544_v46  ;;  %v6196_v58 = vld [vmem:[#allocation2 + $0x12c] sm:$0xf0] }
 0x18e   :  { %v5946_v57 = vld [vmem:[#allocation2 + $0xe68] sm:$0xf0]  ;;  %v6260_v61 = vld [vmem:[#allocation2 + $0x32c] sm:$0xf0] }
 0x18f   :  { %v6415_v59 = vld [vmem:[#allocation2 + $0x80c] sm:$0xf]  ;;  %v5949_v3 = vor.u32 %v6615_v56, %v5946_v57  ;;  %3533 = vmatpush.bf16.msrb.mxu2 %v5693_v62  ;;  %v4801_v56 = vor.u32 %v6332_v51, %v4800_v50  ;;  %v4256_v57 = vld [vmem:[#allocation2 + $0x110] sm:$0xf]  ;;  %v3317_v50 = vpop.f32.mrf.mxu1 }
 0x190   :  { %v5146_v60 = vld [vmem:[#allocation2 + $0x828] sm:$0xf0]  ;;  %v4768_v62 = vld [vmem:[#allocation2 + $0x510] sm:$0xf]  ;;  %v4257_v2 = vor.u32 %v6196_v58, %v4256_v57 }
 0x191   :  { %v6479_v63 = vld [vmem:[#allocation2 + $0xa0c] sm:$0xf]  ;;  %v5149_v14 = vor.u32 %v6415_v59, %v5146_v60  ;;  %3546 = vmatpush.bf16.msrb.mxu3 %v5949_v3  ;;  %v4512_v59 = vld [vmem:[#allocation2 + $0x310] sm:$0xf]  ;;  %v5057_v60 = vor.u32 %v6396_v53, %v5056_v52  ;;  %v3302_v3 = vpop.f32.mrf.mxu0 }
 0x192   :  { %v5402_v0 = vld [vmem:[#allocation2 + $0xa28] sm:$0xf0]  ;;  %v3303_v12 = vadd.f32 %v3302_v3, %v6807_v40  ;;  %v6252_v15 = vld [vmem:[#allocation2 + $0x2ec] sm:$0xf0] }
 0x193   :  { %v6543_v1 = vld [vmem:[#allocation2 + $0xc0c] sm:$0xf]  ;;  %v5405_v18 = vor.u32 %v6479_v63, %v5402_v0  ;;  %3508 = vmatpush.bf16.msrb.mxu0 %v5149_v14  ;;  %v6324_v63 = vld [vmem:[#allocation2 + $0x52c] sm:$0xf0] }
 0x194   :  { %v5658_v5 = vld [vmem:[#allocation2 + $0xc28] sm:$0xf0]  ;;  %v5024_v0 = vld [vmem:[#allocation2 + $0x710] sm:$0xf]  ;;  %v3316_v22 = vadd.f32 %v3315_v13, %v3303_v12 }
 0x195   :  { %v6607_v7 = vld [vmem:[#allocation2 + $0xe0c] sm:$0xf]  ;;  %v5661_v19 = vor.u32 %v6543_v1, %v5658_v5  ;;  %3521 = vmatpush.bf16.msrb.mxu1 %v5405_v18  ;;  %v6388_v1 = vld [vmem:[#allocation2 + $0x72c] sm:$0xf0]  ;;  %v4513_v5 = vor.u32 %v6260_v61, %v4512_v59 }
 0x196   :  { %v5914_v9 = vld [vmem:[#allocation2 + $0xe28] sm:$0xf0]  ;;  %3509 = vmatmul.bf16.vlgmr.msrb.gmra.mxu0 %v6772_v41  ;;  %v5025_v14 = vor.u32 %v6388_v1, %v5024_v0  ;;  %v4736_v16 = vld [vmem:[#allocation2 + $0x4d0] sm:$0xf]  ;;  %v3329_v33 = vadd.f32 %v3328_v29, %v3316_v22  ;;  %v3330_v1 = vpop.f32.mrf.mxu2 }
 0x197   :  { %v5917_v24 = vor.u32 %v6607_v7, %v5914_v9  ;;  %3534 = vmatpush.bf16.msrb.mxu2 %v5661_v19  ;;  %3553 = vmatpush.bf16.msra.mxu0 %v4353_v25  ;;  %v4769_v7 = vor.u32 %v6324_v63, %v4768_v62  ;;  %v4224_v9 = vld [vmem:[#allocation2 + $0xd0] sm:$0xf] }
 0x198   :  { %3522 = vmatmul.bf16.vlgmr.msrb.gmra.mxu1 %v6776_v44  ;;  %v6316_v17 = vld [vmem:[#allocation2 + $0x4ec] sm:$0xf0]  ;;  %v4225_v23 = vor.u32 %v6188_v10, %v4224_v9  ;;  %v3343_v9 = vpop.f32.mrf.mxu3 }
 0x199   :  { %3547 = vmatpush.bf16.msrb.mxu3 %v5917_v24  ;;  %3566 = vmatpush.bf16.msra.mxu1 %v4609_v26  ;;  %v4992_v18 = vld [vmem:[#allocation2 + $0x6d0] sm:$0xf]  ;;  %v4481_v24 = vor.u32 %v6252_v15, %v4480_v11  ;;  %v4737_v25 = vor.u32 %v6316_v17, %v4736_v16 }
 0x19a   :  { %3535 = vmatmul.bf16.vlgmr.msrb.gmra.mxu2 %v6770_v38  ;;  %v6380_v19 = vld [vmem:[#allocation2 + $0x6ec] sm:$0xf0] }
 0x19b   :  { %3579 = vmatpush.bf16.msra.mxu2 %v4865_v27  ;;  %3554 = vmatpush.bf16.msra.mxu0 %v4321_v36  ;;  %v4192_v26 = vld [vmem:[#allocation2 + $0x90] sm:$0xf]  ;;  %v4993_v40 = vor.u32 %v6380_v19, %v4992_v18 }
 0x19c   :  { %3548 = vmatmul.bf16.vlgmr.msrb.gmra.mxu3 %v6774_v42  ;;  %v6180_v27 = vld [vmem:[#allocation2 + $0xac] sm:$0xf0] }
 0x19d   :  { %3592 = vmatpush.bf16.msra.mxu3 %v5121_v31  ;;  %3567 = vmatpush.bf16.msra.mxu1 %v4577_v37  ;;  %v4448_v28 = vld [vmem:[#allocation2 + $0x290] sm:$0xf]  ;;  %v4193_v36 = vor.u32 %v6180_v27, %v4192_v26  ;;  %v6814_v37 = vadd.f32 %v3341_v34, %v3329_v33 }
 0x19e   :  { %v6244_v30 = vld [vmem:[#allocation2 + $0x2ac] sm:$0xf0] }
 0x19f   :  { %3580 = vmatpush.bf16.msra.mxu2 %v4833_v39  ;;  %3555 = vmatpush.bf16.msra.mxu0 %v4289_v54  ;;  %v4704_v31 = vld [vmem:[#allocation2 + $0x490] sm:$0xf]  ;;  %v3304_v39 = vpop.f32.mrf.mxu0  ;;  %v4449_v43 = vor.u32 %v6244_v30, %v4448_v28 }
 0x1a0   :  { %v6308_v32 = vld [vmem:[#allocation2 + $0x4ac] sm:$0xf0] }
 0x1a1   :  { %3593 = vmatpush.bf16.msra.mxu3 %v5089_v48  ;;  %3568 = vmatpush.bf16.msra.mxu1 %v4545_v55  ;;  %v4960_v8 = vld [vmem:[#allocation2 + $0x690] sm:$0xf]  ;;  %v4705_v45 = vor.u32 %v6308_v32, %v4704_v31 }
 0x1a2   :  { %v6372_v35 = vld [vmem:[#allocation2 + $0x6ac] sm:$0xf0] }
 0x1a3   :  { %3581 = vmatpush.bf16.msra.mxu2 %v4801_v56  ;;  %3556 = vmatpush.bf16.msra.mxu0 %v4257_v2  ;;  %v4160_v46 = vld [vmem:[#allocation2 + $0x50] sm:$0xf]  ;;  %v4961_v51 = vor.u32 %v6372_v35, %v4960_v8 }
 0x1a4   :  { %v6172_v48 = vld [vmem:[#allocation2 + $0x6c] sm:$0xf0] }
 0x1a5   :  { %3594 = vmatpush.bf16.msra.mxu3 %v5057_v60  ;;  %3569 = vmatpush.bf16.msra.mxu1 %v4513_v5  ;;  %v4416_v49 = vld [vmem:[#allocation2 + $0x250] sm:$0xf]  ;;  %v4161_v57 = vor.u32 %v6172_v48, %v4160_v46 }
 0x1a6   :  { %v6236_v52 = vld [vmem:[#allocation2 + $0x26c] sm:$0xf0] }
 0x1a7   :  { %3582 = vmatpush.bf16.msra.mxu2 %v4769_v7  ;;  %3557 = vmatpush.bf16.msra.mxu0 %v4225_v23  ;;  %v4672_v53 = vld [vmem:[#allocation2 + $0x450] sm:$0xf]  ;;  %v4417_v60 = vor.u32 %v6236_v52, %v4416_v49 }
 0x1a8   :  { %v6300_v54 = vld [vmem:[#allocation2 + $0x46c] sm:$0xf0] }
 0x1a9   :  { %3595 = vmatpush.bf16.msra.mxu3 %v5025_v14  ;;  %3570 = vmatpush.bf16.msra.mxu1 %v4481_v24  ;;  %v4928_v55 = vld [vmem:[#allocation2 + $0x650] sm:$0xf]  ;;  %v4673_v61 = vor.u32 %v6300_v54, %v4672_v53 }
 0x1aa   :  { %v6364_v56 = vld [vmem:[#allocation2 + $0x66c] sm:$0xf0] }
 0x1ab   :  { %3583 = vmatpush.bf16.msra.mxu2 %v4737_v25  ;;  %3558 = vmatpush.bf16.msra.mxu0 %v4193_v36  ;;  %v4128_v58 = vld [vmem:[#allocation2 + $0x10] sm:$0xf]  ;;  %v4929_v2 = vor.u32 %v6364_v56, %v4928_v55 }
 0x1ac   :  { %v6164_v59 = vld [vmem:[#allocation2 + $0x2c] sm:$0xf0] }
 0x1ad   :  { %3596 = vmatpush.bf16.msra.mxu3 %v4993_v40  ;;  %3571 = vmatpush.bf16.msra.mxu1 %v4449_v43  ;;  %v4384_v62 = vld [vmem:[#allocation2 + $0x210] sm:$0xf]  ;;  %v4129_v13 = vor.u32 %v6164_v59, %v4128_v58 }
 0x1ae   :  { %v6228_v63 = vld [vmem:[#allocation2 + $0x22c] sm:$0xf0] }
 0x1af   :  { %3584 = vmatpush.bf16.msra.mxu2 %v4705_v45  ;;  %v4640_v0 = vld [vmem:[#allocation2 + $0x410] sm:$0xf]  ;;  %3559 = vmatpush.bf16.msra.mxu0 %v4161_v57  ;;  %v4385_v17 = vor.u32 %v6228_v63, %v4384_v62 }
 0x1b0   :  { %v6292_v3 = vld [vmem:[#allocation2 + $0x42c] sm:$0xf0] }
 0x1b1   :  { %3597 = vmatpush.bf16.msra.mxu3 %v4961_v51  ;;  %v4896_v5 = vld [vmem:[#allocation2 + $0x610] sm:$0xf]  ;;  %3572 = vmatpush.bf16.msra.mxu1 %v4417_v60  ;;  %v4641_v18 = vor.u32 %v6292_v3, %v4640_v0 }
 0x1b2   :  { %v6356_v7 = vld [vmem:[#allocation2 + $0x62c] sm:$0xf0] }
 0x1b3   :  { %v5376_v10 = vld [vmem:[#allocation2 + $0x9d0] sm:$0xf]  ;;  %3585 = vmatpush.bf16.msra.mxu2 %v4673_v61  ;;  %v4897_v23 = vor.u32 %v6356_v7, %v4896_v5  ;;  %3560 = vmatpush.bf16.msra.mxu0 %v4129_v13 }
 0x1b4   :  { %v6476_v11 = vld [vmem:[#allocation2 + $0x9ec] sm:$0xf0] }
 0x1b5   :  { %v5632_v12 = vld [vmem:[#allocation2 + $0xbd0] sm:$0xf]  ;;  %3598 = vmatpush.bf16.msra.mxu3 %v4929_v2  ;;  %v5377_v24 = vor.u32 %v6476_v11, %v5376_v10  ;;  %3573 = vmatpush.bf16.msra.mxu1 %v4385_v17  ;;  %v3354_v2 = vpop.f32.mrf.mxu0  ;;  %v3367_v11 = vpop.f32.mrf.mxu1 }
 0x1b6   :  { %v6540_v14 = vld [vmem:[#allocation2 + $0xbec] sm:$0xf0]  ;;  %3561 = vmatmul.bf16.vlgmr.msra.gmra.mxu0 %v6757_v20 }
 0x1b7   :  { %v5888_v15 = vld [vmem:[#allocation2 + $0xdd0] sm:$0xf]  ;;  %v5633_v25 = vor.u32 %v6540_v14, %v5632_v12  ;;  %3586 = vmatpush.bf16.msra.mxu2 %v4641_v18  ;;  %3605 = vmatpush.bf16.msrb.mxu0 %v5377_v24 }
 0x1b8   :  { %v6604_v16 = vld [vmem:[#allocation2 + $0xdec] sm:$0xf0]  ;;  %3574 = vmatmul.bf16.vlgmr.msra.gmra.mxu1 %v6760_v21 }
 0x1b9   :  { %v6144_v19 = vld [vmem:[#allocation2 + $0xfd0] sm:$0xf]  ;;  %v5889_v26 = vor.u32 %v6604_v16, %v5888_v15  ;;  %3599 = vmatpush.bf16.msra.mxu3 %v4897_v23  ;;  %3618 = vmatpush.bf16.msrb.mxu1 %v5633_v25  ;;  %v3368_v16 = vadd.f32 %v3367_v11, %v3354_v2  ;;  %v6280_v11 = vld [vmem:[#allocation2 + $0x3d4] sm:$0xf] }
 0x1ba   :  { %v6668_v22 = vld [vmem:[#allocation2 + $0xfec] sm:$0xf0]  ;;  %3587 = vmatmul.bf16.vlgmr.msra.gmra.mxu2 %v6749_v4 }
 0x1bb   :  { %v5344_v27 = vld [vmem:[#allocation2 + $0x990] sm:$0xf]  ;;  %v6145_v40 = vor.u32 %v6668_v22, %v6144_v19  ;;  %3631 = vmatpush.bf16.msrb.mxu2 %v5889_v26 }
 0x1bc   :  { %v6468_v28 = vld [vmem:[#allocation2 + $0x9ac] sm:$0xf0]  ;;  %3600 = vmatmul.bf16.vlgmr.msra.gmra.mxu3 %v6754_v6 }
 0x1bd   :  { %v5600_v29 = vld [vmem:[#allocation2 + $0xb90] sm:$0xf]  ;;  %v5345_v8 = vor.u32 %v6468_v28, %v5344_v27  ;;  %3644 = vmatpush.bf16.msrb.mxu3 %v6145_v40  ;;  %v3380_v27 = vpop.f32.mrf.mxu2 }
 0x1be   :  { %v6532_v30 = vld [vmem:[#allocation2 + $0xbac] sm:$0xf0] }
 0x1bf   :  { %v5856_v31 = vld [vmem:[#allocation2 + $0xd90] sm:$0xf]  ;;  %v5601_v35 = vor.u32 %v6532_v30, %v5600_v29  ;;  %3606 = vmatpush.bf16.msrb.mxu0 %v5345_v8 }
 0x1c0   :  { %v6596_v32 = vld [vmem:[#allocation2 + $0xdac] sm:$0xf0] }
 0x1c1   :  { %v6112_v33 = vld [vmem:[#allocation2 + $0xf90] sm:$0xf]  ;;  %v5857_v36 = vor.u32 %v6596_v32, %v5856_v31  ;;  %3619 = vmatpush.bf16.msrb.mxu1 %v5601_v35  ;;  %v3381_v31 = vadd.f32 %v3380_v27, %v3368_v16  ;;  %v3393_v32 = vpop.f32.mrf.mxu3  ;;  %v4322_v27 = vld [vmem:[#allocation2 + $0x1b0] sm:$0xf0] }
 0x1c2   :  { %v6660_v34 = vld [vmem:[#allocation2 + $0xfac] sm:$0xf0] }
 0x1c3   :  { %v5312_v39 = vld [vmem:[#allocation2 + $0x950] sm:$0xf]  ;;  %v6113_v46 = vor.u32 %v6660_v34, %v6112_v33  ;;  %3632 = vmatpush.bf16.msrb.mxu2 %v5857_v36  ;;  %v6820_v35 = vadd.f32 %v3393_v32, %v3381_v31  ;;  %v3356_v36 = vpop.f32.mrf.mxu0  ;;  %v4834_v31 = vld [vmem:[#allocation2 + $0x5b0] sm:$0xf0] }
 0x1c4   :  { %v6460_v43 = vld [vmem:[#allocation2 + $0x96c] sm:$0xf0]  ;;  %v6400_v32 = vld [vmem:[#allocation2 + $0x794] sm:$0xf] }
 0x1c5   :  { %v5568_v45 = vld [vmem:[#allocation2 + $0xb50] sm:$0xf]  ;;  %v5313_v53 = vor.u32 %v6460_v43, %v5312_v39  ;;  %3645 = vmatpush.bf16.msrb.mxu3 %v6113_v46 }
 0x1c6   :  { %v6524_v48 = vld [vmem:[#allocation2 + $0xb6c] sm:$0xf0] }
 0x1c7   :  { %v5824_v49 = vld [vmem:[#allocation2 + $0xd50] sm:$0xf]  ;;  %v5569_v54 = vor.u32 %v6524_v48, %v5568_v45  ;;  %3607 = vmatpush.bf16.msrb.mxu0 %v5313_v53 }
 0x1c8   :  { %v6588_v50 = vld [vmem:[#allocation2 + $0xd6c] sm:$0xf0] }
 0x1c9   :  { %v6080_v51 = vld [vmem:[#allocation2 + $0xf50] sm:$0xf]  ;;  %v5825_v55 = vor.u32 %v6588_v50, %v5824_v49  ;;  %3620 = vmatpush.bf16.msrb.mxu1 %v5569_v54  ;;  %v3369_v49 = vpop.f32.mrf.mxu1 }
 0x1ca   :  { %v6652_v52 = vld [vmem:[#allocation2 + $0xf6c] sm:$0xf0]  ;;  %v6328_v49 = vld [vmem:[#allocation2 + $0x554] sm:$0xf] }
 0x1cb   :  { %v5280_v56 = vld [vmem:[#allocation2 + $0x910] sm:$0xf]  ;;  %v6081_v59 = vor.u32 %v6652_v52, %v6080_v51  ;;  %3633 = vmatpush.bf16.msrb.mxu2 %v5825_v55 }
 0x1cc   :  { %v6452_v57 = vld [vmem:[#allocation2 + $0x92c] sm:$0xf0] }
 0x1cd   :  { %v5536_v58 = vld [vmem:[#allocation2 + $0xb10] sm:$0xf]  ;;  %v5281_v1 = vor.u32 %v6452_v57, %v5280_v56  ;;  %3646 = vmatpush.bf16.msrb.mxu3 %v6081_v59 }
 0x1ce   :  { %v6516_v60 = vld [vmem:[#allocation2 + $0xb2c] sm:$0xf0] }
 0x1cf   :  { %v5792_v61 = vld [vmem:[#allocation2 + $0xd10] sm:$0xf]  ;;  %v5537_v3 = vor.u32 %v6516_v60, %v5536_v58  ;;  %3608 = vmatpush.bf16.msrb.mxu0 %v5281_v1 }
 0x1d0   :  { %v6580_v62 = vld [vmem:[#allocation2 + $0xd2c] sm:$0xf0] }
 0x1d1   :  { %v6048_v63 = vld [vmem:[#allocation2 + $0xf10] sm:$0xf]  ;;  %v5793_v5 = vor.u32 %v6580_v62, %v5792_v61  ;;  %3621 = vmatpush.bf16.msrb.mxu1 %v5537_v3 }
 0x1d2   :  { %v6644_v0 = vld [vmem:[#allocation2 + $0xf2c] sm:$0xf0] }
 0x1d3   :  { %v5248_v7 = vld [vmem:[#allocation2 + $0x8d0] sm:$0xf]  ;;  %v6049_v12 = vor.u32 %v6644_v0, %v6048_v63  ;;  %3634 = vmatpush.bf16.msrb.mxu2 %v5793_v5  ;;  %v3382_v0 = vpop.f32.mrf.mxu2 }
 0x1d4   :  { %v6444_v9 = vld [vmem:[#allocation2 + $0x8ec] sm:$0xf0]  ;;  %v5026_v0 = vld [vmem:[#allocation2 + $0x730] sm:$0xf0] }
 0x1d5   :  { %v5504_v10 = vld [vmem:[#allocation2 + $0xad0] sm:$0xf]  ;;  %v5249_v19 = vor.u32 %v6444_v9, %v5248_v7  ;;  %3647 = vmatpush.bf16.msrb.mxu3 %v6049_v12  ;;  %v3395_v7 = vpop.f32.mrf.mxu3  ;;  %v6216_v9 = vld [vmem:[#allocation2 + $0x1d4] sm:$0xf] }
 0x1d6   :  { %v6508_v13 = vld [vmem:[#allocation2 + $0xaec] sm:$0xf0]  ;;  %v6184_v7 = vld [vmem:[#allocation2 + $0xd4] sm:$0xf] }
 0x1d7   :  { %v5760_v14 = vld [vmem:[#allocation2 + $0xcd0] sm:$0xf]  ;;  %v5505_v22 = vor.u32 %v6508_v13, %v5504_v10  ;;  %3609 = vmatpush.bf16.msrb.mxu0 %v5249_v19  ;;  %v4354_v10 = vld [vmem:[#allocation2 + $0x1f0] sm:$0xf0] }
 0x1d8   :  { %v6572_v15 = vld [vmem:[#allocation2 + $0xcec] sm:$0xf0]  ;;  %v4610_v13 = vld [vmem:[#allocation2 + $0x3f0] sm:$0xf0] }
 0x1d9   :  { %v6016_v17 = vld [vmem:[#allocation2 + $0xed0] sm:$0xf]  ;;  %v5761_v23 = vor.u32 %v6572_v15, %v5760_v14  ;;  %3622 = vmatpush.bf16.msrb.mxu1 %v5505_v22  ;;  %v6344_v14 = vld [vmem:[#allocation2 + $0x5d4] sm:$0xf] }
 0x1da   :  { %v6636_v18 = vld [vmem:[#allocation2 + $0xeec] sm:$0xf0]  ;;  %v4866_v15 = vld [vmem:[#allocation2 + $0x5f0] sm:$0xf0] }
 0x1db   :  { %v5216_v24 = vld [vmem:[#allocation2 + $0x890] sm:$0xf]  ;;  %v6017_v28 = vor.u32 %v6636_v18, %v6016_v17  ;;  %3635 = vmatpush.bf16.msrb.mxu2 %v5761_v23  ;;  %v6408_v18 = vld [vmem:[#allocation2 + $0x7d4] sm:$0xf]  ;;  %v4357_v23 = vor.u32 %v6216_v9, %v4354_v10 }
 0x1dc   :  { %v6436_v25 = vld [vmem:[#allocation2 + $0x8ac] sm:$0xf0]  ;;  %v5122_v19 = vld [vmem:[#allocation2 + $0x7f0] sm:$0xf0] }
 0x1dd   :  { %v5472_v26 = vld [vmem:[#allocation2 + $0xa90] sm:$0xf]  ;;  %v5217_v8 = vor.u32 %v6436_v25, %v5216_v24  ;;  %3648 = vmatpush.bf16.msrb.mxu3 %v6017_v28  ;;  %v4613_v24 = vor.u32 %v6280_v11, %v4610_v13  ;;  %v4869_v25 = vor.u32 %v6344_v14, %v4866_v15  ;;  %v6272_v28 = vld [vmem:[#allocation2 + $0x394] sm:$0xf] }
 0x1de   :  { %v6500_v29 = vld [vmem:[#allocation2 + $0xaac] sm:$0xf0]  ;;  %v4226_v9 = vld [vmem:[#allocation2 + $0xf0] sm:$0xf0] }
 0x1df   :  { %v5728_v40 = vld [vmem:[#allocation2 + $0xc90] sm:$0xf]  ;;  %v5473_v39 = vor.u32 %v6500_v29, %v5472_v26  ;;  %3610 = vmatpush.bf16.msrb.mxu0 %v5217_v8  ;;  %v6208_v26 = vld [vmem:[#allocation2 + $0x194] sm:$0xf]  ;;  %v5125_v29 = vor.u32 %v6408_v18, %v5122_v19 }
 0x1e0   :  { %v6564_v30 = vld [vmem:[#allocation2 + $0xcac] sm:$0xf0]  ;;  %v6248_v10 = vld [vmem:[#allocation2 + $0x2d4] sm:$0xf] }
 0x1e1   :  { %v5984_v33 = vld [vmem:[#allocation2 + $0xe90] sm:$0xf]  ;;  %v5729_v43 = vor.u32 %v6564_v30, %v5728_v40  ;;  %3623 = vmatpush.bf16.msrb.mxu1 %v5473_v39  ;;  %v4578_v40 = vld [vmem:[#allocation2 + $0x3b0] sm:$0xf0] }
 0x1e2   :  { %v6628_v34 = vld [vmem:[#allocation2 + $0xeac] sm:$0xf0]  ;;  %v6336_v30 = vld [vmem:[#allocation2 + $0x594] sm:$0xf]  ;;  %v4581_v8 = vor.u32 %v6272_v28, %v4578_v40  ;;  %v3432_v28 = vpop.f32.mrf.mxu2 }
 0x1e3   :  { %v5184_v45 = vld [vmem:[#allocation2 + $0x850] sm:$0xf]  ;;  %v5985_v50 = vor.u32 %v6628_v34, %v5984_v33  ;;  %3636 = vmatpush.bf16.msrb.mxu2 %v5729_v43  ;;  %v5090_v33 = vld [vmem:[#allocation2 + $0x7b0] sm:$0xf0]  ;;  %v4325_v34 = vor.u32 %v6208_v26, %v4322_v27  ;;  %v4837_v36 = vor.u32 %v6336_v30, %v4834_v31 }
 0x1e4   :  { %v6428_v46 = vld [vmem:[#allocation2 + $0x86c] sm:$0xf0]  ;;  %v6200_v39 = vld [vmem:[#allocation2 + $0x154] sm:$0xf] }
 0x1e5   :  { %v5440_v48 = vld [vmem:[#allocation2 + $0xa50] sm:$0xf]  ;;  %v5185_v56 = vor.u32 %v6428_v46, %v5184_v45  ;;  %3649 = vmatpush.bf16.msrb.mxu3 %v5985_v50  ;;  %v4290_v43 = vld [vmem:[#allocation2 + $0x170] sm:$0xf0]  ;;  %v5093_v46 = vor.u32 %v6400_v32, %v5090_v33  ;;  %v3445_v32 = vpop.f32.mrf.mxu3 }
 0x1e6   :  { %v6492_v51 = vld [vmem:[#allocation2 + $0xa6c] sm:$0xf0]  ;;  %v6264_v45 = vld [vmem:[#allocation2 + $0x354] sm:$0xf] }
 0x1e7   :  { %v5696_v52 = vld [vmem:[#allocation2 + $0xc50] sm:$0xf]  ;;  %v5441_v59 = vor.u32 %v6492_v51, %v5440_v48  ;;  %3611 = vmatpush.bf16.msrb.mxu0 %v5185_v56  ;;  %v4546_v48 = vld [vmem:[#allocation2 + $0x370] sm:$0xf0] }
 0x1e8   :  { %v6556_v53 = vld [vmem:[#allocation2 + $0xc6c] sm:$0xf0]  ;;  %v4802_v50 = vld [vmem:[#allocation2 + $0x570] sm:$0xf0] }
 0x1e9   :  { %v5952_v54 = vld [vmem:[#allocation2 + $0xe50] sm:$0xf]  ;;  %v5697_v60 = vor.u32 %v6556_v53, %v5696_v52  ;;  %3624 = vmatpush.bf16.msrb.mxu1 %v5441_v59  ;;  %v6392_v51 = vld [vmem:[#allocation2 + $0x754] sm:$0xf]  ;;  %v4293_v53 = vor.u32 %v6200_v39, %v4290_v43 }
 0x1ea   :  { %v6620_v55 = vld [vmem:[#allocation2 + $0xe6c] sm:$0xf0]  ;;  %v5058_v52 = vld [vmem:[#allocation2 + $0x770] sm:$0xf0] }
 0x1eb   :  { %v5152_v57 = vld [vmem:[#allocation2 + $0x810] sm:$0xf]  ;;  %v5953_v1 = vor.u32 %v6620_v55, %v5952_v54  ;;  %3637 = vmatpush.bf16.msrb.mxu2 %v5697_v60  ;;  %v4549_v54 = vor.u32 %v6264_v45, %v4546_v48  ;;  %v4805_v55 = vor.u32 %v6328_v49, %v4802_v50  ;;  %v6192_v56 = vld [vmem:[#allocation2 + $0x114] sm:$0xf]  ;;  %v5061_v59 = vor.u32 %v6392_v51, %v5058_v52 }
 0x1ec   :  { %v6420_v58 = vld [vmem:[#allocation2 + $0x82c] sm:$0xf0]  ;;  %v4514_v60 = vld [vmem:[#allocation2 + $0x330] sm:$0xf0] }
 0x1ed   :  { %v5408_v61 = vld [vmem:[#allocation2 + $0xa10] sm:$0xf]  ;;  %v5153_v12 = vor.u32 %v6420_v58, %v5152_v57  ;;  %3650 = vmatpush.bf16.msrb.mxu3 %v5953_v1  ;;  %v4258_v57 = vld [vmem:[#allocation2 + $0x130] sm:$0xf0] }
 0x1ee   :  { %v6484_v62 = vld [vmem:[#allocation2 + $0xa2c] sm:$0xf0]  ;;  %v6256_v58 = vld [vmem:[#allocation2 + $0x314] sm:$0xf]  ;;  %v4261_v1 = vor.u32 %v6192_v56, %v4258_v57 }
 0x1ef   :  { %v5664_v63 = vld [vmem:[#allocation2 + $0xc10] sm:$0xf]  ;;  %v5409_v16 = vor.u32 %v6484_v62, %v5408_v61  ;;  %3612 = vmatpush.bf16.msrb.mxu0 %v5153_v12  ;;  %v6320_v61 = vld [vmem:[#allocation2 + $0x514] sm:$0xf]  ;;  %v3419_v12 = vpop.f32.mrf.mxu1 }
 0x1f0   :  { %v6548_v2 = vld [vmem:[#allocation2 + $0xc2c] sm:$0xf0]  ;;  %v4770_v62 = vld [vmem:[#allocation2 + $0x530] sm:$0xf0] }
 0x1f1   :  { %v5920_v3 = vld [vmem:[#allocation2 + $0xe10] sm:$0xf]  ;;  %v5665_v17 = vor.u32 %v6548_v2, %v5664_v63  ;;  %3625 = vmatpush.bf16.msrb.mxu1 %v5409_v16  ;;  %v6384_v63 = vld [vmem:[#allocation2 + $0x714] sm:$0xf]  ;;  %v3406_v2 = vpop.f32.mrf.mxu0 }
 0x1f2   :  { %v6612_v5 = vld [vmem:[#allocation2 + $0xe2c] sm:$0xf0]  ;;  %3613 = vmatmul.bf16.vlgmr.msrb.gmra.mxu0 %v6772_v41  ;;  %v3407_v11 = vadd.f32 %v3406_v2, %v6820_v35  ;;  %v5029_v13 = vor.u32 %v6384_v63, %v5026_v0  ;;  %v4482_v14 = vld [vmem:[#allocation2 + $0x2f0] sm:$0xf0] }
 0x1f3   :  { %v5921_v22 = vor.u32 %v6612_v5, %v5920_v3  ;;  %3638 = vmatpush.bf16.msrb.mxu2 %v5665_v17  ;;  %3657 = vmatpush.bf16.msra.mxu0 %v4357_v23  ;;  %v4517_v3 = vor.u32 %v6256_v58, %v4514_v60  ;;  %v4773_v5 = vor.u32 %v6320_v61, %v4770_v62  ;;  %v6312_v15 = vld [vmem:[#allocation2 + $0x4d4] sm:$0xf] }
 0x1f4   :  { %3626 = vmatmul.bf16.vlgmr.msrb.gmra.mxu1 %v6776_v44  ;;  %v4738_v16 = vld [vmem:[#allocation2 + $0x4f0] sm:$0xf0]  ;;  %v3420_v19 = vadd.f32 %v3419_v12, %v3407_v11  ;;  %v4485_v23 = vor.u32 %v6248_v10, %v4482_v14 }
 0x1f5   :  { %3651 = vmatpush.bf16.msrb.mxu3 %v5921_v22  ;;  %3670 = vmatpush.bf16.msra.mxu1 %v4613_v24  ;;  %v6376_v17 = vld [vmem:[#allocation2 + $0x6d4] sm:$0xf]  ;;  %v4229_v22 = vor.u32 %v6184_v7, %v4226_v9  ;;  %v4741_v24 = vor.u32 %v6312_v15, %v4738_v16  ;;  %v3447_v9 = vpop.f32.mrf.mxu3 }
 0x1f6   :  { %3639 = vmatmul.bf16.vlgmr.msrb.gmra.mxu2 %v6770_v38  ;;  %v4994_v18 = vld [vmem:[#allocation2 + $0x6f0] sm:$0xf0]  ;;  %v3433_v31 = vadd.f32 %v3432_v28, %v3420_v19 }
 0x1f7   :  { %3683 = vmatpush.bf16.msra.mxu2 %v4869_v25  ;;  %3658 = vmatpush.bf16.msra.mxu0 %v4325_v34  ;;  %v6176_v25 = vld [vmem:[#allocation2 + $0x94] sm:$0xf]  ;;  %v4997_v35 = vor.u32 %v6376_v17, %v4994_v18  ;;  %v3421_v50 = vpop.f32.mrf.mxu1 }
 0x1f8   :  { %3652 = vmatmul.bf16.vlgmr.msrb.gmra.mxu3 %v6774_v42  ;;  %v4194_v26 = vld [vmem:[#allocation2 + $0xb0] sm:$0xf0] }
 0x1f9   :  { %3696 = vmatpush.bf16.msra.mxu3 %v5125_v29  ;;  %3671 = vmatpush.bf16.msra.mxu1 %v4581_v8  ;;  %v6240_v27 = vld [vmem:[#allocation2 + $0x294] sm:$0xf]  ;;  %v4197_v8 = vor.u32 %v6176_v25, %v4194_v26  ;;  %v3408_v39 = vpop.f32.mrf.mxu0 }
 0x1fa   :  { %v4450_v29 = vld [vmem:[#allocation2 + $0x2b0] sm:$0xf0] }
 0x1fb   :  { %3684 = vmatpush.bf16.msra.mxu2 %v4837_v36  ;;  %3659 = vmatpush.bf16.msra.mxu0 %v4293_v53  ;;  %v6304_v40 = vld [vmem:[#allocation2 + $0x494] sm:$0xf]  ;;  %v6827_v36 = vadd.f32 %v3445_v32, %v3433_v31  ;;  %v4453_v43 = vor.u32 %v6240_v27, %v4450_v29 }
 0x1fc   :  { %v4706_v30 = vld [vmem:[#allocation2 + $0x4b0] sm:$0xf0] }
 0x1fd   :  { %3697 = vmatpush.bf16.msra.mxu3 %v5093_v46  ;;  %3672 = vmatpush.bf16.msra.mxu1 %v4549_v54  ;;  %v6368_v33 = vld [vmem:[#allocation2 + $0x694] sm:$0xf]  ;;  %v4709_v45 = vor.u32 %v6304_v40, %v4706_v30 }
 0x1fe   :  { %v4962_v34 = vld [vmem:[#allocation2 + $0x6b0] sm:$0xf0] }
 0x1ff   :  { %3685 = vmatpush.bf16.msra.mxu2 %v4805_v55  ;;  %3660 = vmatpush.bf16.msra.mxu0 %v4261_v1  ;;  %v6168_v46 = vld [vmem:[#allocation2 + $0x54] sm:$0xf]  ;;  %v4965_v51 = vor.u32 %v6368_v33, %v4962_v34  ;;  %v3434_v1 = vpop.f32.mrf.mxu2 }
 0x200   :  { %v4162_v48 = vld [vmem:[#allocation2 + $0x70] sm:$0xf0] }
 0x201   :  { %3698 = vmatpush.bf16.msra.mxu3 %v5061_v59  ;;  %3673 = vmatpush.bf16.msra.mxu1 %v4517_v3  ;;  %v6232_v49 = vld [vmem:[#allocation2 + $0x254] sm:$0xf]  ;;  %v4165_v57 = vor.u32 %v6168_v46, %v4162_v48 }
 0x202   :  { %v4418_v52 = vld [vmem:[#allocation2 + $0x270] sm:$0xf0] }
 0x203   :  { %3686 = vmatpush.bf16.msra.mxu2 %v4773_v5  ;;  %3661 = vmatpush.bf16.msra.mxu0 %v4229_v22  ;;  %v6296_v53 = vld [vmem:[#allocation2 + $0x454] sm:$0xf]  ;;  %v4421_v60 = vor.u32 %v6232_v49, %v4418_v52 }
 0x204   :  { %v4674_v54 = vld [vmem:[#allocation2 + $0x470] sm:$0xf0] }
 0x205   :  { %3699 = vmatpush.bf16.msra.mxu3 %v5029_v13  ;;  %3674 = vmatpush.bf16.msra.mxu1 %v4485_v23  ;;  %v6360_v55 = vld [vmem:[#allocation2 + $0x654] sm:$0xf]  ;;  %v4677_v61 = vor.u32 %v6296_v53, %v4674_v54 }
 0x206   :  { %v4930_v56 = vld [vmem:[#allocation2 + $0x670] sm:$0xf0] }
 0x207   :  { %3687 = vmatpush.bf16.msra.mxu2 %v4741_v24  ;;  %3662 = vmatpush.bf16.msra.mxu0 %v4197_v8  ;;  %v6160_v58 = vld [vmem:[#allocation2 + $0x14] sm:$0xf]  ;;  %v4933_v2 = vor.u32 %v6360_v55, %v4930_v56 }
 0x208   :  { %v4130_v59 = vld [vmem:[#allocation2 + $0x30] sm:$0xf0] }
 0x209   :  { %3700 = vmatpush.bf16.msra.mxu3 %v4997_v35  ;;  %3675 = vmatpush.bf16.msra.mxu1 %v4453_v43  ;;  %v6224_v62 = vld [vmem:[#allocation2 + $0x214] sm:$0xf]  ;;  %v4133_v13 = vor.u32 %v6160_v58, %v4130_v59 }
 0x20a   :  { %v4386_v63 = vld [vmem:[#allocation2 + $0x230] sm:$0xf0] }
 0x20b   :  { %3688 = vmatpush.bf16.msra.mxu2 %v4709_v45  ;;  %v6288_v0 = vld [vmem:[#allocation2 + $0x414] sm:$0xf]  ;;  %3663 = vmatpush.bf16.msra.mxu0 %v4165_v57  ;;  %v4389_v17 = vor.u32 %v6224_v62, %v4386_v63 }
 0x20c   :  { %v4642_v3 = vld [vmem:[#allocation2 + $0x430] sm:$0xf0] }
 0x20d   :  { %3701 = vmatpush.bf16.msra.mxu3 %v4965_v51  ;;  %v6352_v5 = vld [vmem:[#allocation2 + $0x614] sm:$0xf]  ;;  %3676 = vmatpush.bf16.msra.mxu1 %v4421_v60  ;;  %v4645_v18 = vor.u32 %v6288_v0, %v4642_v3  ;;  %v3458_v3 = vpop.f32.mrf.mxu0 }
 0x20e   :  { %v4898_v7 = vld [vmem:[#allocation2 + $0x630] sm:$0xf0] }
 0x20f   :  { %v6472_v10 = vld [vmem:[#allocation2 + $0x9d4] sm:$0xf]  ;;  %3689 = vmatpush.bf16.msra.mxu2 %v4677_v61  ;;  %v4901_v23 = vor.u32 %v6352_v5, %v4898_v7  ;;  %3664 = vmatpush.bf16.msra.mxu0 %v4133_v13 }
 0x210   :  { %v5378_v11 = vld [vmem:[#allocation2 + $0x9f0] sm:$0xf0] }
 0x211   :  { %v6536_v12 = vld [vmem:[#allocation2 + $0xbd4] sm:$0xf]  ;;  %3702 = vmatpush.bf16.msra.mxu3 %v4933_v2  ;;  %v5381_v24 = vor.u32 %v6472_v10, %v5378_v11  ;;  %3677 = vmatpush.bf16.msra.mxu1 %v4389_v17 }
 0x212   :  { %v5634_v14 = vld [vmem:[#allocation2 + $0xbf0] sm:$0xf0]  ;;  %3665 = vmatmul.bf16.vlgmr.msra.gmra.mxu0 %v6757_v20 }
 0x213   :  { %v6600_v15 = vld [vmem:[#allocation2 + $0xdd4] sm:$0xf]  ;;  %v5637_v25 = vor.u32 %v6536_v12, %v5634_v14  ;;  %3690 = vmatpush.bf16.msra.mxu2 %v4645_v18  ;;  %3709 = vmatpush.bf16.msrb.mxu0 %v5381_v24  ;;  %v3471_v12 = vpop.f32.mrf.mxu1 }
 0x214   :  { %v5890_v16 = vld [vmem:[#allocation2 + $0xdf0] sm:$0xf0]  ;;  %3678 = vmatmul.bf16.vlgmr.msra.gmra.mxu1 %v6760_v21  ;;  %v3472_v17 = vadd.f32 %v3471_v12, %v3458_v3  ;;  %v6221_v12 = vld [vmem:[#allocation2 + $0x1f4] sm:$0xf0] }
 0x215   :  { %v6664_v19 = vld [vmem:[#allocation2 + $0xfd4] sm:$0xf]  ;;  %v5893_v26 = vor.u32 %v6600_v15, %v5890_v16  ;;  %3703 = vmatpush.bf16.msra.mxu3 %v4901_v23  ;;  %3722 = vmatpush.bf16.msrb.mxu1 %v5637_v25 }
 0x216   :  { %v6146_v22 = vld [vmem:[#allocation2 + $0xff0] sm:$0xf0]  ;;  %3691 = vmatmul.bf16.vlgmr.msra.gmra.mxu2 %v6749_v4 }
 0x217   :  { %v6464_v27 = vld [vmem:[#allocation2 + $0x994] sm:$0xf]  ;;  %v6149_v29 = vor.u32 %v6664_v19, %v6146_v22  ;;  %3735 = vmatpush.bf16.msrb.mxu2 %v5893_v26 }
 0x218   :  { %v5346_v28 = vld [vmem:[#allocation2 + $0x9b0] sm:$0xf0]  ;;  %3704 = vmatmul.bf16.vlgmr.msra.gmra.mxu3 %v6754_v6 }
 0x219   :  { %v6528_v35 = vld [vmem:[#allocation2 + $0xb94] sm:$0xf]  ;;  %v5349_v34 = vor.u32 %v6464_v27, %v5346_v28  ;;  %3748 = vmatpush.bf16.msrb.mxu3 %v6149_v29  ;;  %v3484_v28 = vpop.f32.mrf.mxu2 }
 0x21a   :  { %v5602_v40 = vld [vmem:[#allocation2 + $0xbb0] sm:$0xf0] }
 0x21b   :  { %v6592_v30 = vld [vmem:[#allocation2 + $0xd94] sm:$0xf]  ;;  %v5605_v8 = vor.u32 %v6528_v35, %v5602_v40  ;;  %3710 = vmatpush.bf16.msrb.mxu0 %v5349_v34 }
 0x21c   :  { %v5858_v31 = vld [vmem:[#allocation2 + $0xdb0] sm:$0xf0] }
 0x21d   :  { %v6656_v32 = vld [vmem:[#allocation2 + $0xf94] sm:$0xf]  ;;  %v5861_v39 = vor.u32 %v6592_v30, %v5858_v31  ;;  %3723 = vmatpush.bf16.msrb.mxu1 %v5605_v8  ;;  %v3485_v31 = vadd.f32 %v3484_v28, %v3472_v17  ;;  %v6349_v17 = vld [vmem:[#allocation2 + $0x5f4] sm:$0xf0] }
 0x21e   :  { %v6114_v33 = vld [vmem:[#allocation2 + $0xfb0] sm:$0xf0]  ;;  %v4328_v28 = vld [vmem:[#allocation2 + $0x198] sm:$0xf] }
 0x21f   :  { %v6456_v43 = vld [vmem:[#allocation2 + $0x954] sm:$0xf]  ;;  %v6117_v48 = vor.u32 %v6656_v32, %v6114_v33  ;;  %3736 = vmatpush.bf16.msrb.mxu2 %v5861_v39  ;;  %v3497_v32 = vpop.f32.mrf.mxu3 }
 0x220   :  { %v5314_v45 = vld [vmem:[#allocation2 + $0x970] sm:$0xf0]  ;;  %v6833_v39 = vadd.f32 %v3497_v32, %v3485_v31  ;;  %v4840_v31 = vld [vmem:[#allocation2 + $0x598] sm:$0xf] }
 0x221   :  { %v6520_v46 = vld [vmem:[#allocation2 + $0xb54] sm:$0xf]  ;;  %v5317_v54 = vor.u32 %v6456_v43, %v5314_v45  ;;  %3749 = vmatpush.bf16.msrb.mxu3 %v6117_v48  ;;  %v3460_v43 = vpop.f32.mrf.mxu0  ;;  %v6341_v32 = vld [vmem:[#allocation2 + $0x5b4] sm:$0xf0] }
 0x222   :  { %v5570_v49 = vld [vmem:[#allocation2 + $0xb70] sm:$0xf0] }
 0x223   :  { %v6584_v50 = vld [vmem:[#allocation2 + $0xd54] sm:$0xf]  ;;  %v5573_v55 = vor.u32 %v6520_v46, %v5570_v49  ;;  %3711 = vmatpush.bf16.msrb.mxu0 %v5317_v54 }
 0x224   :  { %v5826_v51 = vld [vmem:[#allocation2 + $0xd70] sm:$0xf0] }
 0x225   :  { %v6648_v52 = vld [vmem:[#allocation2 + $0xf54] sm:$0xf]  ;;  %v5829_v56 = vor.u32 %v6584_v50, %v5826_v51  ;;  %3724 = vmatpush.bf16.msrb.mxu1 %v5573_v55  ;;  %v3473_v51 = vpop.f32.mrf.mxu1 }
 0x226   :  { %v6082_v53 = vld [vmem:[#allocation2 + $0xf70] sm:$0xf0]  ;;  %v6269_v51 = vld [vmem:[#allocation2 + $0x374] sm:$0xf0] }
 0x227   :  { %v6448_v57 = vld [vmem:[#allocation2 + $0x914] sm:$0xf]  ;;  %v6085_v60 = vor.u32 %v6648_v52, %v6082_v53  ;;  %3737 = vmatpush.bf16.msrb.mxu2 %v5829_v56 }
 0x228   :  { %v5282_v58 = vld [vmem:[#allocation2 + $0x930] sm:$0xf0] }
 0x229   :  { %v6512_v59 = vld [vmem:[#allocation2 + $0xb14] sm:$0xf]  ;;  %v5285_v2 = vor.u32 %v6448_v57, %v5282_v58  ;;  %3750 = vmatpush.bf16.msrb.mxu3 %v6085_v60 }
 0x22a   :  { %v5538_v61 = vld [vmem:[#allocation2 + $0xb30] sm:$0xf0] }
 0x22b   :  { %v6576_v62 = vld [vmem:[#allocation2 + $0xd14] sm:$0xf]  ;;  %v5541_v5 = vor.u32 %v6512_v59, %v5538_v61  ;;  %3712 = vmatpush.bf16.msrb.mxu0 %v5285_v2  ;;  %v3486_v2 = vpop.f32.mrf.mxu2 }
 0x22c   :  { %v5794_v63 = vld [vmem:[#allocation2 + $0xd30] sm:$0xf0]  ;;  %v5032_v2 = vld [vmem:[#allocation2 + $0x718] sm:$0xf] }
 0x22d   :  { %v6640_v0 = vld [vmem:[#allocation2 + $0xf14] sm:$0xf]  ;;  %v5797_v7 = vor.u32 %v6576_v62, %v5794_v63  ;;  %3725 = vmatpush.bf16.msrb.mxu1 %v5541_v5 }
 0x22e   :  { %v6050_v1 = vld [vmem:[#allocation2 + $0xf30] sm:$0xf0] }
 0x22f   :  { %v6440_v9 = vld [vmem:[#allocation2 + $0x8d4] sm:$0xf]  ;;  %v6053_v13 = vor.u32 %v6640_v0, %v6050_v1  ;;  %3738 = vmatpush.bf16.msrb.mxu2 %v5797_v7 }
 0x230   :  { %v5250_v10 = vld [vmem:[#allocation2 + $0x8f0] sm:$0xf0] }
 0x231   :  { %v6504_v11 = vld [vmem:[#allocation2 + $0xad4] sm:$0xf]  ;;  %v5253_v22 = vor.u32 %v6440_v9, %v5250_v10  ;;  %3751 = vmatpush.bf16.msrb.mxu3 %v6053_v13  ;;  %v3499_v10 = vpop.f32.mrf.mxu3  ;;  %v4616_v13 = vld [vmem:[#allocation2 + $0x3d8] sm:$0xf] }
 0x232   :  { %v5506_v14 = vld [vmem:[#allocation2 + $0xaf0] sm:$0xf0] }
 0x233   :  { %v6568_v15 = vld [vmem:[#allocation2 + $0xcd4] sm:$0xf]  ;;  %v5509_v23 = vor.u32 %v6504_v11, %v5506_v14  ;;  %3713 = vmatpush.bf16.msrb.mxu0 %v5253_v22  ;;  %v4360_v11 = vld [vmem:[#allocation2 + $0x1d8] sm:$0xf] }
 0x234   :  { %v5762_v16 = vld [vmem:[#allocation2 + $0xcf0] sm:$0xf0]  ;;  %v5128_v22 = vld [vmem:[#allocation2 + $0x7d8] sm:$0xf] }
 0x235   :  { %v6632_v18 = vld [vmem:[#allocation2 + $0xed4] sm:$0xf]  ;;  %v5765_v24 = vor.u32 %v6568_v15, %v5762_v16  ;;  %3726 = vmatpush.bf16.msrb.mxu1 %v5509_v23  ;;  %v6285_v15 = vld [vmem:[#allocation2 + $0x3f4] sm:$0xf0] }
 0x236   :  { %v6018_v19 = vld [vmem:[#allocation2 + $0xef0] sm:$0xf0]  ;;  %v4872_v16 = vld [vmem:[#allocation2 + $0x5d8] sm:$0xf] }
 0x237   :  { %v6432_v25 = vld [vmem:[#allocation2 + $0x894] sm:$0xf]  ;;  %v6021_v35 = vor.u32 %v6632_v18, %v6018_v19  ;;  %3739 = vmatpush.bf16.msrb.mxu2 %v5765_v24  ;;  %v6413_v23 = vld [vmem:[#allocation2 + $0x7f4] sm:$0xf0] }
 0x238   :  { %v5218_v26 = vld [vmem:[#allocation2 + $0x8b0] sm:$0xf0] }
 0x239   :  { %v6496_v27 = vld [vmem:[#allocation2 + $0xa94] sm:$0xf]  ;;  %v5221_v8 = vor.u32 %v6432_v25, %v5218_v26  ;;  %3752 = vmatpush.bf16.msrb.mxu3 %v6021_v35  ;;  %v4361_v25 = vor.u32 %v6221_v12, %v4360_v11  ;;  %v4617_v26 = vor.u32 %v6285_v15, %v4616_v13  ;;  %v6213_v35 = vld [vmem:[#allocation2 + $0x1b4] sm:$0xf0]  ;;  %v3523_v15 = vpop.f32.mrf.mxu1 }
 0x23a   :  { %v5474_v29 = vld [vmem:[#allocation2 + $0xab0] sm:$0xf0]  ;;  %v4232_v11 = vld [vmem:[#allocation2 + $0xd8] sm:$0xf] }
 0x23b   :  { %v6560_v40 = vld [vmem:[#allocation2 + $0xc94] sm:$0xf]  ;;  %v5477_v45 = vor.u32 %v6496_v27, %v5474_v29  ;;  %3714 = vmatpush.bf16.msrb.mxu0 %v5221_v8  ;;  %v4873_v27 = vor.u32 %v6349_v17, %v4872_v16  ;;  %v4584_v29 = vld [vmem:[#allocation2 + $0x398] sm:$0xf]  ;;  %v4329_v8 = vor.u32 %v6213_v35, %v4328_v28 }
 0x23c   :  { %v5730_v30 = vld [vmem:[#allocation2 + $0xcb0] sm:$0xf0]  ;;  %v6189_v12 = vld [vmem:[#allocation2 + $0xf4] sm:$0xf0] }
 0x23d   :  { %v6624_v33 = vld [vmem:[#allocation2 + $0xe94] sm:$0xf]  ;;  %v5733_v46 = vor.u32 %v6560_v40, %v5730_v30  ;;  %3727 = vmatpush.bf16.msrb.mxu1 %v5477_v45  ;;  %v5129_v40 = vor.u32 %v6413_v23, %v5128_v22  ;;  %v6277_v30 = vld [vmem:[#allocation2 + $0x3b4] sm:$0xf0]  ;;  %v4841_v45 = vor.u32 %v6341_v32, %v4840_v31 }
 0x23e   :  { %v5986_v34 = vld [vmem:[#allocation2 + $0xeb0] sm:$0xf0]  ;;  %v4585_v43 = vor.u32 %v6277_v30, %v4584_v29  ;;  %v4488_v13 = vld [vmem:[#allocation2 + $0x2d8] sm:$0xf] }
 0x23f   :  { %v6424_v48 = vld [vmem:[#allocation2 + $0x854] sm:$0xf]  ;;  %v5989_v52 = vor.u32 %v6624_v33, %v5986_v34  ;;  %3740 = vmatpush.bf16.msrb.mxu2 %v5733_v46  ;;  %v5096_v33 = vld [vmem:[#allocation2 + $0x798] sm:$0xf] }
 0x240   :  { %v5186_v49 = vld [vmem:[#allocation2 + $0x870] sm:$0xf0]  ;;  %v6405_v34 = vld [vmem:[#allocation2 + $0x7b4] sm:$0xf0] }
 0x241   :  { %v6488_v50 = vld [vmem:[#allocation2 + $0xa54] sm:$0xf]  ;;  %v5189_v58 = vor.u32 %v6424_v48, %v5186_v49  ;;  %3753 = vmatpush.bf16.msrb.mxu3 %v5989_v52  ;;  %v4296_v46 = vld [vmem:[#allocation2 + $0x158] sm:$0xf] }
 0x242   :  { %v5442_v53 = vld [vmem:[#allocation2 + $0xa70] sm:$0xf0]  ;;  %v6205_v48 = vld [vmem:[#allocation2 + $0x174] sm:$0xf0] }
 0x243   :  { %v6552_v54 = vld [vmem:[#allocation2 + $0xc54] sm:$0xf]  ;;  %v5445_v61 = vor.u32 %v6488_v50, %v5442_v53  ;;  %3715 = vmatpush.bf16.msrb.mxu0 %v5189_v58  ;;  %v4552_v49 = vld [vmem:[#allocation2 + $0x358] sm:$0xf]  ;;  %v5097_v50 = vor.u32 %v6405_v34, %v5096_v33  ;;  %v3549_v34 = vpop.f32.mrf.mxu3 }
 0x244   :  { %v5698_v55 = vld [vmem:[#allocation2 + $0xc70] sm:$0xf0]  ;;  %v4808_v52 = vld [vmem:[#allocation2 + $0x558] sm:$0xf] }
 0x245   :  { %v6616_v56 = vld [vmem:[#allocation2 + $0xe54] sm:$0xf]  ;;  %v5701_v62 = vor.u32 %v6552_v54, %v5698_v55  ;;  %3728 = vmatpush.bf16.msrb.mxu1 %v5445_v61  ;;  %v6333_v53 = vld [vmem:[#allocation2 + $0x574] sm:$0xf0] }
 0x246   :  { %v5954_v57 = vld [vmem:[#allocation2 + $0xe70] sm:$0xf0]  ;;  %v5064_v54 = vld [vmem:[#allocation2 + $0x758] sm:$0xf]  ;;  %v4809_v58 = vor.u32 %v6333_v53, %v4808_v52 }
 0x247   :  { %v6416_v59 = vld [vmem:[#allocation2 + $0x814] sm:$0xf]  ;;  %v5957_v3 = vor.u32 %v6616_v56, %v5954_v57  ;;  %3741 = vmatpush.bf16.msrb.mxu2 %v5701_v62  ;;  %v6397_v55 = vld [vmem:[#allocation2 + $0x774] sm:$0xf0]  ;;  %v4297_v56 = vor.u32 %v6205_v48, %v4296_v46  ;;  %v4553_v57 = vor.u32 %v6269_v51, %v4552_v49 }
 0x248   :  { %v5154_v60 = vld [vmem:[#allocation2 + $0x830] sm:$0xf0]  ;;  %v4520_v61 = vld [vmem:[#allocation2 + $0x318] sm:$0xf]  ;;  %v5065_v62 = vor.u32 %v6397_v55, %v5064_v54  ;;  %v3525_v54 = vpop.f32.mrf.mxu1 }
 0x249   :  { %v6480_v63 = vld [vmem:[#allocation2 + $0xa14] sm:$0xf]  ;;  %v5157_v14 = vor.u32 %v6416_v59, %v5154_v60  ;;  %3754 = vmatpush.bf16.msrb.mxu3 %v5957_v3  ;;  %v4264_v59 = vld [vmem:[#allocation2 + $0x118] sm:$0xf] }
 0x24a   :  { %v5410_v0 = vld [vmem:[#allocation2 + $0xa30] sm:$0xf0]  ;;  %v6197_v60 = vld [vmem:[#allocation2 + $0x134] sm:$0xf0] }
 0x24b   :  { %v6544_v1 = vld [vmem:[#allocation2 + $0xc14] sm:$0xf]  ;;  %v5413_v18 = vor.u32 %v6480_v63, %v5410_v0  ;;  %3716 = vmatpush.bf16.msrb.mxu0 %v5157_v14  ;;  %v6261_v63 = vld [vmem:[#allocation2 + $0x334] sm:$0xf0] }
 0x24c   :  { %v5666_v5 = vld [vmem:[#allocation2 + $0xc30] sm:$0xf0]  ;;  %v4776_v0 = vld [vmem:[#allocation2 + $0x518] sm:$0xf] }
 0x24d   :  { %v6608_v7 = vld [vmem:[#allocation2 + $0xe14] sm:$0xf]  ;;  %v5669_v19 = vor.u32 %v6544_v1, %v5666_v5  ;;  %3729 = vmatpush.bf16.msrb.mxu1 %v5413_v18  ;;  %v6325_v1 = vld [vmem:[#allocation2 + $0x534] sm:$0xf0]  ;;  %v4265_v5 = vor.u32 %v6197_v60, %v4264_v59 }
 0x24e   :  { %v5922_v9 = vld [vmem:[#allocation2 + $0xe30] sm:$0xf0]  ;;  %3717 = vmatmul.bf16.vlgmr.msrb.gmra.mxu0 %v6772_v41  ;;  %v6389_v3 = vld [vmem:[#allocation2 + $0x734] sm:$0xf0]  ;;  %v4777_v10 = vor.u32 %v6325_v1, %v4776_v0 }
 0x24f   :  { %v5925_v24 = vor.u32 %v6608_v7, %v5922_v9  ;;  %3742 = vmatpush.bf16.msrb.mxu2 %v5669_v19  ;;  %3761 = vmatpush.bf16.msra.mxu0 %v4361_v25  ;;  %v3510_v7 = vpop.f32.mrf.mxu0  ;;  %v4521_v9 = vor.u32 %v6261_v63, %v4520_v61  ;;  %v5033_v16 = vor.u32 %v6389_v3, %v5032_v2  ;;  %v6253_v17 = vld [vmem:[#allocation2 + $0x2f4] sm:$0xf0] }
 0x250   :  { %3730 = vmatmul.bf16.vlgmr.msrb.gmra.mxu1 %v6776_v44  ;;  %v3511_v14 = vadd.f32 %v3510_v7, %v6833_v39  ;;  %v4744_v18 = vld [vmem:[#allocation2 + $0x4d8] sm:$0xf]  ;;  %v4233_v25 = vor.u32 %v6189_v12, %v4232_v11 }
 0x251   :  { %3755 = vmatpush.bf16.msrb.mxu3 %v5925_v24  ;;  %3774 = vmatpush.bf16.msra.mxu1 %v4617_v26  ;;  %v6317_v19 = vld [vmem:[#allocation2 + $0x4f4] sm:$0xf0]  ;;  %v4489_v26 = vor.u32 %v6253_v17, %v4488_v13  ;;  %v3551_v13 = vpop.f32.mrf.mxu3 }
 0x252   :  { %3743 = vmatmul.bf16.vlgmr.msrb.gmra.mxu2 %v6770_v38  ;;  %v5000_v22 = vld [vmem:[#allocation2 + $0x6d8] sm:$0xf]  ;;  %v3524_v24 = vadd.f32 %v3523_v15, %v3511_v14 }
 0x253   :  { %3787 = vmatpush.bf16.msra.mxu2 %v4873_v27  ;;  %3762 = vmatpush.bf16.msra.mxu0 %v4329_v8  ;;  %v6381_v23 = vld [vmem:[#allocation2 + $0x6f4] sm:$0xf0]  ;;  %v4745_v27 = vor.u32 %v6317_v19, %v4744_v18 }
 0x254   :  { %3756 = vmatmul.bf16.vlgmr.msrb.gmra.mxu3 %v6774_v42  ;;  %v4200_v28 = vld [vmem:[#allocation2 + $0x98] sm:$0xf]  ;;  %v5001_v39 = vor.u32 %v6381_v23, %v5000_v22 }
 0x255   :  { %3800 = vmatpush.bf16.msra.mxu3 %v5129_v40  ;;  %3775 = vmatpush.bf16.msra.mxu1 %v4585_v43  ;;  %v6181_v35 = vld [vmem:[#allocation2 + $0xb4] sm:$0xf0]  ;;  %v3536_v40 = vpop.f32.mrf.mxu2 }
 0x256   :  { %v4456_v29 = vld [vmem:[#allocation2 + $0x298] sm:$0xf]  ;;  %v3537_v33 = vadd.f32 %v3536_v40, %v3524_v24 }
 0x257   :  { %3788 = vmatpush.bf16.msra.mxu2 %v4841_v45  ;;  %3763 = vmatpush.bf16.msra.mxu0 %v4297_v56  ;;  %v6245_v30 = vld [vmem:[#allocation2 + $0x2b4] sm:$0xf0]  ;;  %v4201_v45 = vor.u32 %v6181_v35, %v4200_v28  ;;  %v3512_v48 = vpop.f32.mrf.mxu0 }
 0x258   :  { %v4712_v31 = vld [vmem:[#allocation2 + $0x498] sm:$0xf]  ;;  %v6840_v46 = vadd.f32 %v3549_v34, %v3537_v33  ;;  %v4457_v49 = vor.u32 %v6245_v30, %v4456_v29 }
 0x259   :  { %3801 = vmatpush.bf16.msra.mxu3 %v5097_v50  ;;  %3776 = vmatpush.bf16.msra.mxu1 %v4553_v57  ;;  %v6309_v32 = vld [vmem:[#allocation2 + $0x4b4] sm:$0xf0] }
 0x25a   :  { %v4968_v8 = vld [vmem:[#allocation2 + $0x698] sm:$0xf]  ;;  %v4713_v50 = vor.u32 %v6309_v32, %v4712_v31 }
 0x25b   :  { %3789 = vmatpush.bf16.msra.mxu2 %v4809_v58  ;;  %3764 = vmatpush.bf16.msra.mxu0 %v4265_v5  ;;  %v6373_v43 = vld [vmem:[#allocation2 + $0x6b4] sm:$0xf0] }
 0x25c   :  { %v4168_v51 = vld [vmem:[#allocation2 + $0x58] sm:$0xf]  ;;  %v4969_v55 = vor.u32 %v6373_v43, %v4968_v8 }
 0x25d   :  { %3802 = vmatpush.bf16.msra.mxu3 %v5065_v62  ;;  %3777 = vmatpush.bf16.msra.mxu1 %v4521_v9  ;;  %v6173_v52 = vld [vmem:[#allocation2 + $0x74] sm:$0xf0]  ;;  %v3538_v7 = vpop.f32.mrf.mxu2 }
 0x25e   :  { %v4424_v53 = vld [vmem:[#allocation2 + $0x258] sm:$0xf]  ;;  %v4169_v61 = vor.u32 %v6173_v52, %v4168_v51 }
 0x25f   :  { %3790 = vmatpush.bf16.msra.mxu2 %v4777_v10  ;;  %3765 = vmatpush.bf16.msra.mxu0 %v4233_v25  ;;  %v6237_v56 = vld [vmem:[#allocation2 + $0x274] sm:$0xf0] }
 0x260   :  { %v4680_v57 = vld [vmem:[#allocation2 + $0x458] sm:$0xf]  ;;  %v4425_v0 = vor.u32 %v6237_v56, %v4424_v53 }
 0x261   :  { %3803 = vmatpush.bf16.msra.mxu3 %v5033_v16  ;;  %3778 = vmatpush.bf16.msra.mxu1 %v4489_v26  ;;  %v6301_v58 = vld [vmem:[#allocation2 + $0x474] sm:$0xf0] }
 0x262   :  { %v4936_v59 = vld [vmem:[#allocation2 + $0x658] sm:$0xf]  ;;  %v4681_v1 = vor.u32 %v6301_v58, %v4680_v57 }
 0x263   :  { %3791 = vmatpush.bf16.msra.mxu2 %v4745_v27  ;;  %v6365_v60 = vld [vmem:[#allocation2 + $0x674] sm:$0xf0]  ;;  %3766 = vmatpush.bf16.msra.mxu0 %v4201_v45 }
 0x264   :  { %v4136_v62 = vld [vmem:[#allocation2 + $0x18] sm:$0xf]  ;;  %v4937_v9 = vor.u32 %v6365_v60, %v4936_v59 }
 0x265   :  { %3804 = vmatpush.bf16.msra.mxu3 %v5001_v39  ;;  %v6165_v63 = vld [vmem:[#allocation2 + $0x34] sm:$0xf0]  ;;  %3779 = vmatpush.bf16.msra.mxu1 %v4457_v49 }
 0x266   :  { %v4392_v2 = vld [vmem:[#allocation2 + $0x218] sm:$0xf]  ;;  %v4137_v17 = vor.u32 %v6165_v63, %v4136_v62 }
 0x267   :  { %3792 = vmatpush.bf16.msra.mxu2 %v4713_v50  ;;  %v6229_v3 = vld [vmem:[#allocation2 + $0x234] sm:$0xf0]  ;;  %3767 = vmatpush.bf16.msra.mxu0 %v4169_v61 }
 0x268   :  { %v4648_v5 = vld [vmem:[#allocation2 + $0x418] sm:$0xf]  ;;  %v4393_v23 = vor.u32 %v6229_v3, %v4392_v2 }
 0x269   :  { %3805 = vmatpush.bf16.msra.mxu3 %v4969_v55  ;;  %v6293_v10 = vld [vmem:[#allocation2 + $0x434] sm:$0xf0]  ;;  %3780 = vmatpush.bf16.msra.mxu1 %v4425_v0 }
 0x26a   :  { %v4904_v11 = vld [vmem:[#allocation2 + $0x618] sm:$0xf]  ;;  %v4649_v24 = vor.u32 %v6293_v10, %v4648_v5 }
 0x26b   :  { %v6357_v12 = vld [vmem:[#allocation2 + $0x634] sm:$0xf0]  ;;  %3793 = vmatpush.bf16.msra.mxu2 %v4681_v1  ;;  %3768 = vmatpush.bf16.msra.mxu0 %v4137_v17  ;;  %v6848_v17 = vpop.f32.mrf.mxu1 }
 0x26c   :  { %v5384_v14 = vld [vmem:[#allocation2 + $0x9d8] sm:$0xf]  ;;  %v4905_v27 = vor.u32 %v6357_v12, %v4904_v11  ;;  %v6846_v11 = vpop.f32.mrf.mxu0 }
 0x26d   :  { %v6477_v15 = vld [vmem:[#allocation2 + $0x9f4] sm:$0xf0]  ;;  %3806 = vmatpush.bf16.msra.mxu3 %v4937_v9  ;;  %3781 = vmatpush.bf16.msra.mxu1 %v4393_v23 }
 0x26e   :  { %v5640_v16 = vld [vmem:[#allocation2 + $0xbd8] sm:$0xf]  ;;  %v5385_v28 = vor.u32 %v6477_v15, %v5384_v14  ;;  %3769 = vmatmul.bf16.vlgmr.msra.gmra.mxu0 %v6757_v20 }
 0x26f   :  { %v6541_v18 = vld [vmem:[#allocation2 + $0xbf4] sm:$0xf0]  ;;  %3794 = vmatpush.bf16.msra.mxu2 %v4649_v24 }
 0x270   :  { %v5896_v19 = vld [vmem:[#allocation2 + $0xdd8] sm:$0xf]  ;;  %v5641_v35 = vor.u32 %v6541_v18, %v5640_v16  ;;  %3813 = vmatpush.bf16.msrb.mxu0 %v5385_v28  ;;  %3782 = vmatmul.bf16.vlgmr.msra.gmra.mxu1 %v6760_v21 }
 0x271   :  { %v6605_v22 = vld [vmem:[#allocation2 + $0xdf4] sm:$0xf0]  ;;  %3807 = vmatpush.bf16.msra.mxu3 %v4905_v27 }
 0x272   :  { %v6152_v25 = vld [vmem:[#allocation2 + $0xfd8] sm:$0xf]  ;;  %v5897_v29 = vor.u32 %v6605_v22, %v5896_v19  ;;  %3826 = vmatpush.bf16.msrb.mxu1 %v5641_v35  ;;  %3795 = vmatmul.bf16.vlgmr.msra.gmra.mxu2 %v6749_v4 }
 0x273   :  { %v6669_v26 = vld [vmem:[#allocation2 + $0xff4] sm:$0xf0] }
 0x274   :  { %v5352_v40 = vld [vmem:[#allocation2 + $0x998] sm:$0xf]  ;;  %v6153_v31 = vor.u32 %v6669_v26, %v6152_v25  ;;  %3839 = vmatpush.bf16.msrb.mxu2 %v5897_v29  ;;  %3808 = vmatmul.bf16.vlgmr.msra.gmra.mxu3 %v6754_v6 }
 0x275   :  { %v6469_v39 = vld [vmem:[#allocation2 + $0x9b4] sm:$0xf0] }
 0x276   :  { %v5608_v30 = vld [vmem:[#allocation2 + $0xb98] sm:$0xf]  ;;  %v5353_v45 = vor.u32 %v6469_v39, %v5352_v40  ;;  %3852 = vmatpush.bf16.msrb.mxu3 %v6153_v31  ;;  %v6850_v39 = vpop.f32.mrf.mxu2 }
 0x277   :  { %v6533_v32 = vld [vmem:[#allocation2 + $0xbb4] sm:$0xf0] }
 0x278   :  { %v5864_v33 = vld [vmem:[#allocation2 + $0xd98] sm:$0xf]  ;;  %v5609_v48 = vor.u32 %v6533_v32, %v5608_v30  ;;  %3814 = vmatpush.bf16.msrb.mxu0 %v5353_v45 }
 0x279   :  { %v6597_v34 = vld [vmem:[#allocation2 + $0xdb4] sm:$0xf0] }
 0x27a   :  { %v6120_v8 = vld [vmem:[#allocation2 + $0xf98] sm:$0xf]  ;;  %v5865_v49 = vor.u32 %v6597_v34, %v5864_v33  ;;  %3827 = vmatpush.bf16.msrb.mxu1 %v5609_v48  ;;  %v6852_v34 = vpop.f32.mrf.mxu3  ;;  %v3564_v48 = vpop.f32.mrf.mxu0 }
 0x27b   :  { %v6661_v43 = vld [vmem:[#allocation2 + $0xfb4] sm:$0xf0]  ;;  %v6337_v48 = vld [vmem:[#allocation2 + $0x59c] sm:$0xf] }
 0x27c   :  { %v5320_v50 = vld [vmem:[#allocation2 + $0x958] sm:$0xf]  ;;  %v6121_v53 = vor.u32 %v6661_v43, %v6120_v8  ;;  %3840 = vmatpush.bf16.msrb.mxu2 %v5865_v49 }
 0x27d   :  { %v6461_v51 = vld [vmem:[#allocation2 + $0x974] sm:$0xf0] }
 0x27e   :  { %v5576_v52 = vld [vmem:[#allocation2 + $0xb58] sm:$0xf]  ;;  %v5321_v59 = vor.u32 %v6461_v51, %v5320_v50  ;;  %3853 = vmatpush.bf16.msrb.mxu3 %v6121_v53 }
 0x27f   :  { %v6525_v54 = vld [vmem:[#allocation2 + $0xb74] sm:$0xf0] }
 0x280   :  { %v5832_v55 = vld [vmem:[#allocation2 + $0xd58] sm:$0xf]  ;;  %v5577_v60 = vor.u32 %v6525_v54, %v5576_v52  ;;  %3815 = vmatpush.bf16.msrb.mxu0 %v5321_v59  ;;  %v3577_v54 = vpop.f32.mrf.mxu1 }
 0x281   :  { %v6589_v56 = vld [vmem:[#allocation2 + $0xd74] sm:$0xf0]  ;;  %v6201_v54 = vld [vmem:[#allocation2 + $0x15c] sm:$0xf] }
 0x282   :  { %v6088_v57 = vld [vmem:[#allocation2 + $0xf58] sm:$0xf]  ;;  %v5833_v61 = vor.u32 %v6589_v56, %v5832_v55  ;;  %3828 = vmatpush.bf16.msrb.mxu1 %v5577_v60 }
 0x283   :  { %v6653_v58 = vld [vmem:[#allocation2 + $0xf74] sm:$0xf0] }
 0x284   :  { %v5288_v62 = vld [vmem:[#allocation2 + $0x918] sm:$0xf]  ;;  %v6089_v1 = vor.u32 %v6653_v58, %v6088_v57  ;;  %3841 = vmatpush.bf16.msrb.mxu2 %v5833_v61 }
 0x285   :  { %v6453_v63 = vld [vmem:[#allocation2 + $0x934] sm:$0xf0] }
 0x286   :  { %v5544_v0 = vld [vmem:[#allocation2 + $0xb18] sm:$0xf]  ;;  %v5289_v10 = vor.u32 %v6453_v63, %v5288_v62  ;;  %3854 = vmatpush.bf16.msrb.mxu3 %v6089_v1 }
 0x287   :  { %v6517_v2 = vld [vmem:[#allocation2 + $0xb34] sm:$0xf0] }
 0x288   :  { %v5800_v3 = vld [vmem:[#allocation2 + $0xd18] sm:$0xf]  ;;  %v5545_v12 = vor.u32 %v6517_v2, %v5544_v0  ;;  %3816 = vmatpush.bf16.msrb.mxu0 %v5289_v10 }
 0x289   :  { %v6581_v5 = vld [vmem:[#allocation2 + $0xd34] sm:$0xf0] }
 0x28a   :  { %v6056_v7 = vld [vmem:[#allocation2 + $0xf18] sm:$0xf]  ;;  %v5801_v13 = vor.u32 %v6581_v5, %v5800_v3  ;;  %3829 = vmatpush.bf16.msrb.mxu1 %v5545_v12 }
 0x28b   :  { %v6645_v9 = vld [vmem:[#allocation2 + $0xf34] sm:$0xf0] }
 0x28c   :  { %v5256_v14 = vld [vmem:[#allocation2 + $0x8d8] sm:$0xf]  ;;  %v6057_v18 = vor.u32 %v6645_v9, %v6056_v7  ;;  %3842 = vmatpush.bf16.msrb.mxu2 %v5801_v13  ;;  %v3590_v7 = vpop.f32.mrf.mxu2 }
 0x28d   :  { %v6445_v15 = vld [vmem:[#allocation2 + $0x8f4] sm:$0xf0] }
 0x28e   :  { %v5512_v16 = vld [vmem:[#allocation2 + $0xad8] sm:$0xf]  ;;  %v5257_v26 = vor.u32 %v6445_v15, %v5256_v14  ;;  %3855 = vmatpush.bf16.msrb.mxu3 %v6057_v18  ;;  %v3603_v14 = vpop.f32.mrf.mxu3  ;;  %v6217_v15 = vld [vmem:[#allocation2 + $0x1dc] sm:$0xf] }
 0x28f   :  { %v6509_v19 = vld [vmem:[#allocation2 + $0xaf4] sm:$0xf0]  ;;  %v6281_v18 = vld [vmem:[#allocation2 + $0x3dc] sm:$0xf] }
 0x290   :  { %v5768_v22 = vld [vmem:[#allocation2 + $0xcd8] sm:$0xf]  ;;  %v5513_v27 = vor.u32 %v6509_v19, %v5512_v16  ;;  %3817 = vmatpush.bf16.msrb.mxu0 %v5257_v26  ;;  %v4362_v16 = vld [vmem:[#allocation2 + $0x1f8] sm:$0xf0] }
 0x291   :  { %v6573_v23 = vld [vmem:[#allocation2 + $0xcf4] sm:$0xf0]  ;;  %v5034_v14 = vld [vmem:[#allocation2 + $0x738] sm:$0xf0] }
 0x292   :  { %v6024_v24 = vld [vmem:[#allocation2 + $0xed8] sm:$0xf]  ;;  %v5769_v28 = vor.u32 %v6573_v23, %v5768_v22  ;;  %3830 = vmatpush.bf16.msrb.mxu1 %v5513_v27  ;;  %v4618_v22 = vld [vmem:[#allocation2 + $0x3f8] sm:$0xf0] }
 0x293   :  { %v6637_v25 = vld [vmem:[#allocation2 + $0xef4] sm:$0xf0]  ;;  %v6345_v23 = vld [vmem:[#allocation2 + $0x5dc] sm:$0xf] }
 0x294   :  { %v5224_v35 = vld [vmem:[#allocation2 + $0x898] sm:$0xf]  ;;  %v6025_v30 = vor.u32 %v6637_v25, %v6024_v24  ;;  %3843 = vmatpush.bf16.msrb.mxu2 %v5769_v28  ;;  %v4874_v24 = vld [vmem:[#allocation2 + $0x5f8] sm:$0xf0] }
 0x295   :  { %v6437_v29 = vld [vmem:[#allocation2 + $0x8b4] sm:$0xf0]  ;;  %v6409_v27 = vld [vmem:[#allocation2 + $0x7dc] sm:$0xf] }
 0x296   :  { %v5480_v40 = vld [vmem:[#allocation2 + $0xa98] sm:$0xf]  ;;  %v5225_v45 = vor.u32 %v6437_v29, %v5224_v35  ;;  %3856 = vmatpush.bf16.msrb.mxu3 %v6025_v30  ;;  %v5130_v28 = vld [vmem:[#allocation2 + $0x7f8] sm:$0xf0]  ;;  %v4365_v29 = vor.u32 %v6217_v15, %v4362_v16  ;;  %v4621_v30 = vor.u32 %v6281_v18, %v4618_v22  ;;  %v3614_v16 = vpop.f32.mrf.mxu0  ;;  %v3627_v22 = vpop.f32.mrf.mxu1 }
 0x297   :  { %v6501_v31 = vld [vmem:[#allocation2 + $0xab4] sm:$0xf0] }
 0x298   :  { %v5736_v32 = vld [vmem:[#allocation2 + $0xc98] sm:$0xf]  ;;  %v5481_v49 = vor.u32 %v6501_v31, %v5480_v40  ;;  %3818 = vmatpush.bf16.msrb.mxu0 %v5225_v45  ;;  %v3576_v40 = vadd.f32 %v6848_v17, %v6846_v11  ;;  %v4877_v31 = vor.u32 %v6345_v23, %v4874_v24  ;;  %v4586_v45 = vld [vmem:[#allocation2 + $0x3b8] sm:$0xf0] }
 0x299   :  { %v6565_v33 = vld [vmem:[#allocation2 + $0xcb4] sm:$0xf0]  ;;  %v6185_v23 = vld [vmem:[#allocation2 + $0xdc] sm:$0xf] }
 0x29a   :  { %v5992_v8 = vld [vmem:[#allocation2 + $0xe98] sm:$0xf]  ;;  %v5737_v50 = vor.u32 %v6565_v33, %v5736_v32  ;;  %3831 = vmatpush.bf16.msrb.mxu1 %v5481_v49  ;;  %v6209_v32 = vld [vmem:[#allocation2 + $0x19c] sm:$0xf]  ;;  %v3589_v11 = vadd.f32 %v6850_v39, %v3576_v40 }
 0x29b   :  { %v6629_v43 = vld [vmem:[#allocation2 + $0xeb4] sm:$0xf0]  ;;  %v4330_v33 = vld [vmem:[#allocation2 + $0x1b8] sm:$0xf0] }
 0x29c   :  { %v5192_v51 = vld [vmem:[#allocation2 + $0x858] sm:$0xf]  ;;  %v5993_v55 = vor.u32 %v6629_v43, %v5992_v8  ;;  %3844 = vmatpush.bf16.msrb.mxu2 %v5737_v50  ;;  %v6273_v8 = vld [vmem:[#allocation2 + $0x39c] sm:$0xf]  ;;  %v5133_v43 = vor.u32 %v6409_v27, %v5130_v28 }
 0x29d   :  { %v6429_v52 = vld [vmem:[#allocation2 + $0x874] sm:$0xf0]  ;;  %v4842_v49 = vld [vmem:[#allocation2 + $0x5b8] sm:$0xf0]  ;;  %v4589_v17 = vor.u32 %v6273_v8, %v4586_v45  ;;  %v3640_v45 = vpop.f32.mrf.mxu2 }
 0x29e   :  { %v5448_v53 = vld [vmem:[#allocation2 + $0xa58] sm:$0xf]  ;;  %v5193_v61 = vor.u32 %v6429_v52, %v5192_v51  ;;  %3857 = vmatpush.bf16.msrb.mxu3 %v5993_v55  ;;  %v6401_v50 = vld [vmem:[#allocation2 + $0x79c] sm:$0xf]  ;;  %v4333_v52 = vor.u32 %v6209_v32, %v4330_v33 }
 0x29f   :  { %v6493_v56 = vld [vmem:[#allocation2 + $0xa74] sm:$0xf0]  ;;  %v5098_v51 = vld [vmem:[#allocation2 + $0x7b8] sm:$0xf0] }
 0x2a0   :  { %v5704_v57 = vld [vmem:[#allocation2 + $0xc58] sm:$0xf]  ;;  %v5449_v0 = vor.u32 %v6493_v56, %v5448_v53  ;;  %3819 = vmatpush.bf16.msrb.mxu0 %v5193_v61  ;;  %v4845_v53 = vor.u32 %v6337_v48, %v4842_v49  ;;  %v4298_v55 = vld [vmem:[#allocation2 + $0x178] sm:$0xf0] }
 0x2a1   :  { %v6557_v58 = vld [vmem:[#allocation2 + $0xc74] sm:$0xf0]  ;;  %v6265_v56 = vld [vmem:[#allocation2 + $0x35c] sm:$0xf]  ;;  %v4301_v39 = vor.u32 %v6201_v54, %v4298_v55  ;;  %v6871_v55 = vld [vmem:[%s6935_s3] sm:$0xff] }
 0x2a2   :  { %v5960_v59 = vld [vmem:[#allocation2 + $0xe58] sm:$0xf]  ;;  %v5705_v1 = vor.u32 %v6557_v58, %v5704_v57  ;;  %3832 = vmatpush.bf16.msrb.mxu1 %v5449_v0  ;;  %v5101_v57 = vor.u32 %v6401_v50, %v5098_v51  ;;  %v4554_v58 = vld [vmem:[#allocation2 + $0x378] sm:$0xf0] }
 0x2a3   :  { %v6621_v60 = vld [vmem:[#allocation2 + $0xe74] sm:$0xf0]  ;;  %v6393_v61 = vld [vmem:[#allocation2 + $0x75c] sm:$0xf]  ;;  %v4557_v0 = vor.u32 %v6265_v56, %v4554_v58 }
 0x2a4   :  { %v5160_v62 = vld [vmem:[#allocation2 + $0x818] sm:$0xf]  ;;  %v5961_v9 = vor.u32 %v6621_v60, %v5960_v59  ;;  %3845 = vmatpush.bf16.msrb.mxu2 %v5705_v1  ;;  %v6329_v59 = vld [vmem:[#allocation2 + $0x55c] sm:$0xf] }
 0x2a5   :  { %v6421_v63 = vld [vmem:[#allocation2 + $0x834] sm:$0xf0]  ;;  %v4810_v60 = vld [vmem:[#allocation2 + $0x578] sm:$0xf0] }
 0x2a6   :  { %v5416_v2 = vld [vmem:[#allocation2 + $0xa18] sm:$0xf]  ;;  %v5161_v19 = vor.u32 %v6421_v63, %v5160_v62  ;;  %3858 = vmatpush.bf16.msrb.mxu3 %v5961_v9  ;;  %v5066_v62 = vld [vmem:[#allocation2 + $0x778] sm:$0xf0]  ;;  %v3602_v63 = vadd.f32 %v6852_v34, %v3589_v11  ;;  %v4813_v1 = vor.u32 %v6329_v59, %v4810_v60  ;;  %v3653_v11 = vpop.f32.mrf.mxu3  ;;  %v4001_v59 = vperm.slane %v6871_v55, 4 }
 0x2a7   :  { %v6485_v3 = vld [vmem:[#allocation2 + $0xa34] sm:$0xf0]  ;;  %v5069_v7 = vor.u32 %v6393_v61, %v5066_v62  ;;  %v4522_v9 = vld [vmem:[#allocation2 + $0x338] sm:$0xf0]  ;;  %v3616_v61 = vpop.f32.mrf.mxu0 }
 0x2a8   :  { %v5672_v5 = vld [vmem:[#allocation2 + $0xc18] sm:$0xf]  ;;  %v5417_v25 = vor.u32 %v6485_v3, %v5416_v2  ;;  %3820 = vmatpush.bf16.msrb.mxu0 %v5161_v19  ;;  %v6193_v2 = vld [vmem:[#allocation2 + $0x11c] sm:$0xf]  ;;  %v3615_v19 = vadd.f32 %v3614_v16, %v3602_v63 }
 0x2a9   :  { %v6549_v10 = vld [vmem:[#allocation2 + $0xc34] sm:$0xf0]  ;;  %v4266_v3 = vld [vmem:[#allocation2 + $0x138] sm:$0xf0] }
 0x2aa   :  { %v5928_v12 = vld [vmem:[#allocation2 + $0xe18] sm:$0xf]  ;;  %v5673_v26 = vor.u32 %v6549_v10, %v5672_v5  ;;  %3833 = vmatpush.bf16.msrb.mxu1 %v5417_v25  ;;  %v6257_v5 = vld [vmem:[#allocation2 + $0x31c] sm:$0xf]  ;;  %v4269_v15 = vor.u32 %v6193_v2, %v4266_v3  ;;  %v3628_v40 = vadd.f32 %v3627_v22, %v3615_v19  ;;  %v3629_v2 = vpop.f32.mrf.mxu1 }
 0x2ab   :  { %v6613_v13 = vld [vmem:[#allocation2 + $0xe34] sm:$0xf0]  ;;  %3821 = vmatmul.bf16.vlgmr.msrb.gmra.mxu0 %v6772_v41  ;;  %v6321_v10 = vld [vmem:[#allocation2 + $0x51c] sm:$0xf]  ;;  %v4525_v34 = vor.u32 %v6257_v5, %v4522_v9 }
 0x2ac   :  { %v5929_v35 = vor.u32 %v6613_v13, %v5928_v12  ;;  %3846 = vmatpush.bf16.msrb.mxu2 %v5673_v26  ;;  %3865 = vmatpush.bf16.msra.mxu0 %v4365_v29  ;;  %v4778_v12 = vld [vmem:[#allocation2 + $0x538] sm:$0xf0]  ;;  %v6865_v29 = vld [vmem:[%s6934_s2] sm:$0xff] }
 0x2ad   :  { %3834 = vmatmul.bf16.vlgmr.msrb.gmra.mxu1 %v6776_v44  ;;  %v6385_v13 = vld [vmem:[#allocation2 + $0x71c] sm:$0xf]  ;;  %v4781_v18 = vor.u32 %v6321_v10, %v4778_v12  ;;  %v3975_v33 = vperm.slane %v6865_v29, 4 }
 0x2ae   :  { %3859 = vmatpush.bf16.msrb.mxu3 %v5929_v35  ;;  %3878 = vmatpush.bf16.msra.mxu1 %v4621_v30  ;;  %v4234_v24 = vld [vmem:[#allocation2 + $0xf8] sm:$0xf0]  ;;  %v5037_v26 = vor.u32 %v6385_v13, %v5034_v14 }
 0x2af   :  { %3847 = vmatmul.bf16.vlgmr.msrb.gmra.mxu2 %v6770_v38  ;;  %v6249_v25 = vld [vmem:[#allocation2 + $0x2dc] sm:$0xf]  ;;  %v4237_v32 = vor.u32 %v6185_v23, %v4234_v24 }
 0x2b0   :  { %3891 = vmatpush.bf16.msra.mxu2 %v4877_v31  ;;  %3866 = vmatpush.bf16.msra.mxu0 %v4333_v52  ;;  %v4490_v27 = vld [vmem:[#allocation2 + $0x2f8] sm:$0xf0]  ;;  %v3641_v52 = vadd.f32 %v3640_v45, %v3628_v40 }
 0x2b1   :  { %3860 = vmatmul.bf16.vlgmr.msrb.gmra.mxu3 %v6774_v42  ;;  %v6313_v28 = vld [vmem:[#allocation2 + $0x4dc] sm:$0xf]  ;;  %v4493_v8 = vor.u32 %v6249_v25, %v4490_v27  ;;  %v3642_v27 = vpop.f32.mrf.mxu2 }
 0x2b2   :  { %3904 = vmatpush.bf16.msra.mxu3 %v5133_v43  ;;  %3879 = vmatpush.bf16.msra.mxu1 %v4589_v17  ;;  %v4746_v35 = vld [vmem:[#allocation2 + $0x4f8] sm:$0xf0]  ;;  %v3654_v58 = vadd.f32 %v3653_v11, %v3641_v52 }
 0x2b3   :  { %v6377_v30 = vld [vmem:[#allocation2 + $0x6dc] sm:$0xf]  ;;  %v4749_v43 = vor.u32 %v6313_v28, %v4746_v35 }
 0x2b4   :  { %3892 = vmatpush.bf16.msra.mxu2 %v4845_v53  ;;  %3867 = vmatpush.bf16.msra.mxu0 %v4301_v39  ;;  %v5002_v31 = vld [vmem:[#allocation2 + $0x6f8] sm:$0xf0]  ;;  %v3991_v3 = vmul.f32 %v3975_v33, %v3654_v58 }
 0x2b5   :  { %v6177_v48 = vld [vmem:[#allocation2 + $0x9c] sm:$0xf]  ;;  %v5005_v51 = vor.u32 %v6377_v30, %v5002_v31  ;;  %v3655_v31 = vpop.f32.mrf.mxu3 }
 0x2b6   :  { %3905 = vmatpush.bf16.msra.mxu3 %v5101_v57  ;;  %3880 = vmatpush.bf16.msra.mxu1 %v4557_v0  ;;  %v4202_v49 = vld [vmem:[#allocation2 + $0xb8] sm:$0xf0] }
 0x2b7   :  { %v6241_v50 = vld [vmem:[#allocation2 + $0x29c] sm:$0xf]  ;;  %v4205_v60 = vor.u32 %v6177_v48, %v4202_v49 }
 0x2b8   :  { %3893 = vmatpush.bf16.msra.mxu2 %v4813_v1  ;;  %3868 = vmatpush.bf16.msra.mxu0 %v4269_v15  ;;  %v4458_v17 = vld [vmem:[#allocation2 + $0x2b8] sm:$0xf0]  ;;  %v4017_v15 = vadd.f32 %v4001_v59, %v3991_v3 }
 0x2b9   :  { %v6305_v53 = vld [vmem:[#allocation2 + $0x49c] sm:$0xf]  ;;  %v4461_v62 = vor.u32 %v6241_v50, %v4458_v17 }
 0x2ba   :  { %3906 = vmatpush.bf16.msra.mxu3 %v5069_v7  ;;  %3881 = vmatpush.bf16.msra.mxu1 %v4525_v34  ;;  %v4714_v54 = vld [vmem:[#allocation2 + $0x4b8] sm:$0xf0]  ;;  %v4021_v28 = vsub.f32 0.0, %v4017_v15 }
 0x2bb   :  { %v6369_v56 = vld [vmem:[#allocation2 + $0x69c] sm:$0xf]  ;;  %v4717_v39 = vor.u32 %v6305_v53, %v4714_v54 }
 0x2bc   :  { %3894 = vmatpush.bf16.msra.mxu2 %v4781_v18  ;;  %v4970_v57 = vld [vmem:[#allocation2 + $0x6b8] sm:$0xf0]  ;;  %3869 = vmatpush.bf16.msra.mxu0 %v4237_v32 }
 0x2bd   :  { %v6169_v63 = vld [vmem:[#allocation2 + $0x5c] sm:$0xf]  ;;  %v4973_v5 = vor.u32 %v6369_v56, %v4970_v57 }
 0x2be   :  { %3907 = vmatpush.bf16.msra.mxu3 %v5037_v26  ;;  %3882 = vmatpush.bf16.msra.mxu1 %v4493_v8  ;;  %v4170_v0 = vld [vmem:[#allocation2 + $0x78] sm:$0xf0] }
 0x2bf   :  { %v6233_v1 = vld [vmem:[#allocation2 + $0x25c] sm:$0xf]  ;;  %v4173_v16 = vor.u32 %v6169_v63, %v4170_v0 }
 0x2c0   :  { %3895 = vmatpush.bf16.msra.mxu2 %v4749_v43  ;;  %v4426_v7 = vld [vmem:[#allocation2 + $0x278] sm:$0xf0]  ;;  %3870 = vmatpush.bf16.msra.mxu0 %v4205_v60  ;;  %v4025_v43 = vmul.f32 1.442695, %v4021_v28 }
 0x2c1   :  { %v6297_v9 = vld [vmem:[#allocation2 + $0x45c] sm:$0xf]  ;;  %v4429_v22 = vor.u32 %v6233_v1, %v4426_v7 }
 0x2c2   :  { %3908 = vmatpush.bf16.msra.mxu3 %v5005_v51  ;;  %v4682_v10 = vld [vmem:[#allocation2 + $0x478] sm:$0xf0]  ;;  %3883 = vmatpush.bf16.msra.mxu1 %v4461_v62  ;;  %6673 = vpow2.f32 %v4025_v43  ;;  %v6883_v43 = vpop.f32.mrf.mxu1 }
 0x2c3   :  { %v6361_v12 = vld [vmem:[#allocation2 + $0x65c] sm:$0xf]  ;;  %v4685_v23 = vor.u32 %v6297_v9, %v4682_v10 }
 0x2c4   :  { %v4938_v13 = vld [vmem:[#allocation2 + $0x678] sm:$0xf0]  ;;  %3896 = vmatpush.bf16.msra.mxu2 %v4717_v39  ;;  %3871 = vmatpush.bf16.msra.mxu0 %v4173_v16 }
 0x2c5   :  { %v6161_v14 = vld [vmem:[#allocation2 + $0x1c] sm:$0xf]  ;;  %v4941_v35 = vor.u32 %v6361_v12, %v4938_v13 }
 0x2c6   :  { %v4138_v34 = vld [vmem:[#allocation2 + $0x38] sm:$0xf0]  ;;  %3909 = vmatpush.bf16.msra.mxu3 %v4973_v5  ;;  %3884 = vmatpush.bf16.msra.mxu1 %v4429_v22 }
 0x2c7   :  { %v6225_v18 = vld [vmem:[#allocation2 + $0x21c] sm:$0xf]  ;;  %v4141_v45 = vor.u32 %v6161_v14, %v4138_v34 }
 0x2c8   :  { %v4394_v19 = vld [vmem:[#allocation2 + $0x238] sm:$0xf0]  ;;  %3897 = vmatpush.bf16.msra.mxu2 %v4685_v23  ;;  %v6674_v10 = vpop.eup %6673 }
 0x2c9   :  { %v6289_v24 = vld [vmem:[#allocation2 + $0x41c] sm:$0xf]  ;;  %v4397_v50 = vor.u32 %v6225_v18, %v4394_v19  ;;  %3872 = vmatpush.bf16.msra.mxu0 %v4141_v45  ;;  %v6875_v16 = vadd.f32 1.0, %v6674_v10 }
 0x2ca   :  { %v4650_v25 = vld [vmem:[#allocation2 + $0x438] sm:$0xf0]  ;;  %3910 = vmatpush.bf16.msra.mxu3 %v4941_v35 }
 0x2cb   :  { %v6353_v26 = vld [vmem:[#allocation2 + $0x61c] sm:$0xf]  ;;  %v4653_v51 = vor.u32 %v6289_v24, %v4650_v25  ;;  %3885 = vmatpush.bf16.msra.mxu1 %v4397_v50  ;;  %6675 = vrcp.f32 %v6875_v16  ;;  %vm4042_vm1 = vweird.f32 %v6875_v16 }
 0x2cc   :  { %v4906_v40 = vld [vmem:[#allocation2 + $0x638] sm:$0xf0]  ;;  %3873 = vmatmul.bf16.vlgmr.msra.gmra.mxu0 %v6757_v20 }
 0x2cd   :  { %v6473_v30 = vld [vmem:[#allocation2 + $0x9dc] sm:$0xf]  ;;  %v4909_v17 = vor.u32 %v6353_v26, %v4906_v40  ;;  %3898 = vmatpush.bf16.msra.mxu2 %v4653_v51 }
 0x2ce   :  { %v5386_v32 = vld [vmem:[#allocation2 + $0x9f8] sm:$0xf0]  ;;  %3886 = vmatmul.bf16.vlgmr.msra.gmra.mxu1 %v6760_v21 }
 0x2cf   :  { %v6537_v33 = vld [vmem:[#allocation2 + $0xbdc] sm:$0xf]  ;;  %v5389_v53 = vor.u32 %v6473_v30, %v5386_v32  ;;  %3911 = vmatpush.bf16.msra.mxu3 %v4909_v17  ;;  %v6881_v30 = vpop.f32.mrf.mxu0 }
 0x2d0   :  { %v5642_v8 = vld [vmem:[#allocation2 + $0xbf8] sm:$0xf0]  ;;  %3899 = vmatmul.bf16.vlgmr.msra.gmra.mxu2 %v6749_v4 }
 0x2d1   :  { %v6601_v48 = vld [vmem:[#allocation2 + $0xddc] sm:$0xf]  ;;  %v5645_v54 = vor.u32 %v6537_v33, %v5642_v8  ;;  %3917 = vmatpush.bf16.msrb.mxu0 %v5389_v53  ;;  %v6676_v51 = vpop.eup %6675 }
 0x2d2   :  { %v5898_v49 = vld [vmem:[#allocation2 + $0xdf8] sm:$0xf0]  ;;  %3912 = vmatmul.bf16.vlgmr.msra.gmra.mxu3 %v6754_v6  ;;  %v4038_v53 = vmul.f32 %v6676_v51, %v6875_v16  ;;  %vm4043_vm0 = vweird.f32 %v6676_v51 }
 0x2d3   :  { %v6665_v52 = vld [vmem:[#allocation2 + $0xfdc] sm:$0xf]  ;;  %v5901_v56 = vor.u32 %v6601_v48, %v5898_v49  ;;  %3930 = vmatpush.bf16.msrb.mxu1 %v5645_v54  ;;  %vm4044_vm2 = vmor %vm4042_vm1, %vm4043_vm0 }
 0x2d4   :  { %v6154_v11 = vld [vmem:[#allocation2 + $0xff8] sm:$0xf0] }
 0x2d5   :  { %v6465_v57 = vld [vmem:[#allocation2 + $0x99c] sm:$0xf]  ;;  %v6157_v60 = vor.u32 %v6665_v52, %v6154_v11  ;;  %3943 = vmatpush.bf16.msrb.mxu2 %v5901_v56  ;;  %v3971_v52 = vperm.slane %v6865_v29, 0 }
 0x2d6   :  { %v5354_v58 = vld [vmem:[#allocation2 + $0x9b8] sm:$0xf0] }
 0x2d7   :  { %v6529_v59 = vld [vmem:[#allocation2 + $0xb9c] sm:$0xf]  ;;  %v5357_v1 = vor.u32 %v6465_v57, %v5354_v58  ;;  %3956 = vmatpush.bf16.msrb.mxu3 %v6157_v60 }
 0x2d8   :  { %v5610_v61 = vld [vmem:[#allocation2 + $0xbb8] sm:$0xf0] }
 0x2d9   :  { %v6593_v62 = vld [vmem:[#allocation2 + $0xd9c] sm:$0xf]  ;;  %v5613_v2 = vor.u32 %v6529_v59, %v5610_v61  ;;  %3918 = vmatpush.bf16.msrb.mxu0 %v5357_v1 }
 0x2da   :  { %v5866_v39 = vld [vmem:[#allocation2 + $0xdb8] sm:$0xf0] }
 0x2db   :  { %v6657_v63 = vld [vmem:[#allocation2 + $0xf9c] sm:$0xf]  ;;  %v5869_v3 = vor.u32 %v6593_v62, %v5866_v39  ;;  %3931 = vmatpush.bf16.msrb.mxu1 %v5613_v2  ;;  %v6887_v62 = vpop.f32.mrf.mxu2  ;;  %v4039_v39 = vsub.f32 1.0, %v4038_v53  ;;  %v6889_v2 = vpop.f32.mrf.mxu3 }
 0x2dc   :  { %v6122_v0 = vld [vmem:[#allocation2 + $0xfb8] sm:$0xf0] }
 0x2dd   :  { %v6457_v5 = vld [vmem:[#allocation2 + $0x95c] sm:$0xf]  ;;  %v6125_v12 = vor.u32 %v6657_v63, %v6122_v0  ;;  %3944 = vmatpush.bf16.msrb.mxu2 %v5869_v3  ;;  %v3987_v3 = vmul.f32 %v3971_v52, %v6801_v47 }
 0x2de   :  { %v5322_v7 = vld [vmem:[#allocation2 + $0x978] sm:$0xf0] }
 0x2df   :  { %v6521_v9 = vld [vmem:[#allocation2 + $0xb5c] sm:$0xf]  ;;  %v5325_v19 = vor.u32 %v6457_v5, %v5322_v7  ;;  %3957 = vmatpush.bf16.msrb.mxu3 %v6125_v12  ;;  %v3997_v5 = vperm.slane %v6871_v55, 0  ;;  %v4048_v7 = vand.u32 2147483648, %v6875_v16  ;;  %v4040_v12 = vmul.f32 %v6676_v51, %v4039_v39 }
 0x2e0   :  { %v5578_v13 = vld [vmem:[#allocation2 + $0xb78] sm:$0xf0] }
 0x2e1   :  { %v6585_v14 = vld [vmem:[#allocation2 + $0xd5c] sm:$0xf]  ;;  %v5581_v4 = vor.u32 %v6521_v9, %v5578_v13  ;;  %3919 = vmatpush.bf16.msrb.mxu0 %v5325_v19  ;;  %v4046_v13 = vand.u32 2147483647, %v6875_v16 }
 0x2e2   :  { %v5834_v15 = vld [vmem:[#allocation2 + $0xd78] sm:$0xf0] }
 0x2e3   :  { %v6649_v34 = vld [vmem:[#allocation2 + $0xf5c] sm:$0xf]  ;;  %v5837_v22 = vor.u32 %v6585_v14, %v5834_v15  ;;  %3932 = vmatpush.bf16.msrb.mxu1 %v5581_v4  ;;  %v3668_v15 = vpop.f32.mrf.mxu0  ;;  %vm4047_vm3 = vcmp.eq.f32.partialorder %v4046_v13, 8.507059e+37  ;;  %v3707_v53 = vpop.f32.mrf.mxu3 }
 0x2e4   :  { %v6090_v18 = vld [vmem:[#allocation2 + $0xf78] sm:$0xf0] }
 0x2e5   :  { %v6449_v23 = vld [vmem:[#allocation2 + $0x91c] sm:$0xf]  ;;  %v6093_v26 = vor.u32 %v6649_v34, %v6090_v18  ;;  %3945 = vmatpush.bf16.msrb.mxu2 %v5837_v22  ;;  %v3681_v22 = vpop.f32.mrf.mxu1 }
 0x2e6   :  { %v5290_v24 = vld [vmem:[#allocation2 + $0x938] sm:$0xf0] }
 0x2e7   :  { %v6513_v25 = vld [vmem:[#allocation2 + $0xb1c] sm:$0xf]  ;;  %v5293_v40 = vor.u32 %v6449_v23, %v5290_v24  ;;  %3958 = vmatpush.bf16.msrb.mxu3 %v6093_v26  ;;  %v4041_v23 = vadd.f32 %v6676_v51, %v4040_v12 }
 0x2e8   :  { %v5546_v27 = vld [vmem:[#allocation2 + $0xb38] sm:$0xf0] }
 0x2e9   :  { %v6577_v28 = vld [vmem:[#allocation2 + $0xd1c] sm:$0xf]  ;;  %v5549_v21 = vor.u32 %v6513_v25, %v5546_v27  ;;  %3920 = vmatpush.bf16.msrb.mxu0 %v5293_v40  ;;  %v4045_v40 = vsel %vm4044_vm2, %v6676_v51, %v4041_v23 }
 0x2ea   :  { %v5802_v20 = vld [vmem:[#allocation2 + $0xd38] sm:$0xf0] }
 0x2eb   :  { %v6641_v35 = vld [vmem:[#allocation2 + $0xf1c] sm:$0xf]  ;;  %v5805_v31 = vor.u32 %v6577_v28, %v5802_v20  ;;  %3933 = vmatpush.bf16.msrb.mxu1 %v5549_v21  ;;  %v4049_v28 = vor.u32 1.1754944e-38, %v4048_v7  ;;  %v3976_v7 = vperm.slane %v6865_v29, 5 }
 0x2ec   :  { %v6058_v6 = vld [vmem:[#allocation2 + $0xf38] sm:$0xf0] }
 0x2ed   :  { %v6441_v32 = vld [vmem:[#allocation2 + $0x8dc] sm:$0xf]  ;;  %v6061_v45 = vor.u32 %v6641_v35, %v6058_v6  ;;  %3946 = vmatpush.bf16.msrb.mxu2 %v5805_v31  ;;  %v4013_v6 = vadd.f32 %v3997_v5, %v3987_v3  ;;  %v4050_v31 = vsel %vm4047_vm3, %v4049_v28, %v4045_v40  ;;  %v3757_v5 = vpop.f32.mrf.mxu3 }
 0x2ee   :  { %v5258_v33 = vld [vmem:[#allocation2 + $0x8f8] sm:$0xf0] }
 0x2ef   :  { %v6505_v8 = vld [vmem:[#allocation2 + $0xadc] sm:$0xf]  ;;  %v5261_v54 = vor.u32 %v6441_v32, %v5258_v33  ;;  %3959 = vmatpush.bf16.msrb.mxu3 %v6061_v45 }
 0x2f0   :  { %v5514_v48 = vld [vmem:[#allocation2 + $0xaf8] sm:$0xf0] }
 0x2f1   :  { %v6569_v49 = vld [vmem:[#allocation2 + $0xcdc] sm:$0xf]  ;;  %v5517_v57 = vor.u32 %v6505_v8, %v5514_v48  ;;  %3921 = vmatpush.bf16.msrb.mxu0 %v5261_v54  ;;  %v3694_v48 = vpop.f32.mrf.mxu2 }
 0x2f2   :  { %v5770_v50 = vld [vmem:[#allocation2 + $0xcf8] sm:$0xf0] }
 0x2f3   :  { %v6633_v11 = vld [vmem:[#allocation2 + $0xedc] sm:$0xf]  ;;  %v5773_v58 = vor.u32 %v6569_v49, %v5770_v50  ;;  %3934 = vmatpush.bf16.msrb.mxu1 %v5517_v57  ;;  %v4097_v49 = vmul.f32 %v4050_v31, %v4013_v6 }
 0x2f4   :  { %v6026_v17 = vld [vmem:[#allocation2 + $0xef8] sm:$0xf0] }
 0x2f5   :  { %v6433_v56 = vld [vmem:[#allocation2 + $0x89c] sm:$0xf]  ;;  %v6029_v63 = vor.u32 %v6633_v11, %v6026_v17  ;;  %3947 = vmatpush.bf16.msrb.mxu2 %v5773_v58  ;;  %4101 = vst [vmem:[%s6936_s4] sm:$0xff] %v4097_v49  ;;  %v3759_v13 = vpop.f32.mrf.mxu3 }
 0x2f6   :  { %v5226_v59 = vld [vmem:[#allocation2 + $0x8b8] sm:$0xf0] }
 0x2f7   :  { %v6497_v60 = vld [vmem:[#allocation2 + $0xa9c] sm:$0xf]  ;;  %v5229_v14 = vor.u32 %v6433_v56, %v5226_v59  ;;  %3960 = vmatpush.bf16.msrb.mxu3 %v6029_v63  ;;  %v3718_v63 = vpop.f32.mrf.mxu0 }
 0x2f8   :  { %v5482_v61 = vld [vmem:[#allocation2 + $0xab8] sm:$0xf0] }
 0x2f9   :  { %v6561_v0 = vld [vmem:[#allocation2 + $0xc9c] sm:$0xf]  ;;  %v5485_v34 = vor.u32 %v6497_v60, %v5482_v61  ;;  %3922 = vmatpush.bf16.msrb.mxu0 %v5229_v14  ;;  %v3680_v60 = vadd.f32 %v6883_v43, %v6881_v30  ;;  %v3744_v43 = vpop.f32.mrf.mxu2 }
 0x2fa   :  { %v5738_v1 = vld [vmem:[#allocation2 + $0xcb8] sm:$0xf0] }
 0x2fb   :  { %v6625_v9 = vld [vmem:[#allocation2 + $0xe9c] sm:$0xf]  ;;  %v5741_v18 = vor.u32 %v6561_v0, %v5738_v1  ;;  %3935 = vmatpush.bf16.msrb.mxu1 %v5485_v34  ;;  %v3693_v61 = vadd.f32 %v6887_v62, %v3680_v60  ;;  %v3731_v1 = vpop.f32.mrf.mxu1 }
 0x2fc   :  { %v5994_v10 = vld [vmem:[#allocation2 + $0xeb8] sm:$0xf0] }
 0x2fd   :  { %v6425_v19 = vld [vmem:[#allocation2 + $0x85c] sm:$0xf]  ;;  %v5997_v24 = vor.u32 %v6625_v9, %v5994_v10  ;;  %3948 = vmatpush.bf16.msrb.mxu2 %v5741_v18  ;;  %v3706_v39 = vadd.f32 %v6889_v2, %v3693_v61 }
 0x2fe   :  { %v5194_v4 = vld [vmem:[#allocation2 + $0x878] sm:$0xf0] }
 0x2ff   :  { %v6489_v47 = vld [vmem:[#allocation2 + $0xa5c] sm:$0xf]  ;;  %v5197_v21 = vor.u32 %v6425_v19, %v5194_v4  ;;  %3961 = vmatpush.bf16.msrb.mxu3 %v5997_v24  ;;  %v3719_v0 = vadd.f32 %v3718_v63, %v3706_v39  ;;  %v3720_v9 = vpop.f32.mrf.mxu0  ;;  %v3972_v4 = vperm.slane %v6865_v29, 1  ;;  %v3809_v24 = vpop.f32.mrf.mxu3 }
 0x300   :  { %v5450_v25 = vld [vmem:[#allocation2 + $0xa78] sm:$0xf0] }
 0x301   :  { %v6553_v26 = vld [vmem:[#allocation2 + $0xc5c] sm:$0xf]  ;;  %v5453_v32 = vor.u32 %v6489_v47, %v5450_v25  ;;  %3923 = vmatpush.bf16.msrb.mxu0 %v5197_v21  ;;  %v3732_v30 = vadd.f32 %v3731_v1, %v3719_v0  ;;  %v3746_v12 = vpop.f32.mrf.mxu2  ;;  %v3998_v25 = vperm.slane %v6871_v55, 1 }
 0x302   :  { %v5706_v27 = vld [vmem:[#allocation2 + $0xc78] sm:$0xf0]  ;;  %v3999_v12 = vperm.slane %v6871_v55, 2 }
 0x303   :  { %v6617_v20 = vld [vmem:[#allocation2 + $0xe5c] sm:$0xf]  ;;  %v5709_v16 = vor.u32 %v6553_v26, %v5706_v27  ;;  %3936 = vmatpush.bf16.msrb.mxu1 %v5453_v32  ;;  %v3745_v3 = vadd.f32 %v3744_v43, %v3732_v30  ;;  %v3988_v27 = vmul.f32 %v3972_v4, %v6814_v37 }
 0x304   :  { %v5962_v35 = vld [vmem:[#allocation2 + $0xe78] sm:$0xf0] }
 0x305   :  { %v6417_v33 = vld [vmem:[#allocation2 + $0x81c] sm:$0xf]  ;;  %v5965_v50 = vor.u32 %v6617_v20, %v5962_v35  ;;  %3949 = vmatpush.bf16.msrb.mxu2 %v5709_v16  ;;  %v3758_v62 = vadd.f32 %v3757_v5, %v3745_v3  ;;  %v4014_v31 = vadd.f32 %v3998_v25, %v3988_v27 }
 0x306   :  { %v5162_v8 = vld [vmem:[#allocation2 + $0x838] sm:$0xf0] }
 0x307   :  { %v6481_v45 = vld [vmem:[#allocation2 + $0xa1c] sm:$0xf]  ;;  %v5165_v56 = vor.u32 %v6417_v33, %v5162_v8  ;;  %3962 = vmatpush.bf16.msrb.mxu3 %v5965_v50  ;;  %v3992_v10 = vmul.f32 %v3976_v7, %v3758_v62  ;;  %v3770_v34 = vpop.f32.mrf.mxu0 }
 0x308   :  { %v5418_v52 = vld [vmem:[#allocation2 + $0xa38] sm:$0xf0] }
 0x309   :  { %v6545_v11 = vld [vmem:[#allocation2 + $0xc1c] sm:$0xf]  ;;  %v5421_v57 = vor.u32 %v6481_v45, %v5418_v52  ;;  %3924 = vmatpush.bf16.msrb.mxu0 %v5165_v56  ;;  %v3796_v22 = vpop.f32.mrf.mxu2  ;;  %v3811_v45 = vpop.f32.mrf.mxu3  ;;  %v3977_v56 = vperm.slane %v6865_v29, 6 }
 0x30a   :  { %v5674_v17 = vld [vmem:[#allocation2 + $0xc38] sm:$0xf0]  ;;  %v4004_v45 = vperm.slane %v6871_v55, 7 }
 0x30b   :  { %v6609_v51 = vld [vmem:[#allocation2 + $0xe1c] sm:$0xf]  ;;  %v5677_v58 = vor.u32 %v6545_v11, %v5674_v17  ;;  %3937 = vmatpush.bf16.msrb.mxu1 %v5421_v57 }
 0x30c   :  { %v5930_v54 = vld [vmem:[#allocation2 + $0xe38] sm:$0xf0]  ;;  %3925 = vmatmul.bf16.vlgmr.msrb.gmra.mxu0 %v6772_v41  ;;  %v4002_v41 = vperm.slane %v6871_v55, 5 }
 0x30d   :  { %v5933_v59 = vor.u32 %v6609_v51, %v5930_v54  ;;  %3950 = vmatpush.bf16.msrb.mxu2 %v5677_v58  ;;  %v4003_v58 = vperm.slane %v6871_v55, 6 }
 0x30e   :  { %3938 = vmatmul.bf16.vlgmr.msrb.gmra.mxu1 %v6776_v44  ;;  %v3733_v44 = vpop.f32.mrf.mxu1 }
 0x30f   :  { %3963 = vmatpush.bf16.msrb.mxu3 %v5933_v59  ;;  %v3772_v35 = vpop.f32.mrf.mxu0 }
 0x310   :  { %3951 = vmatmul.bf16.vlgmr.msrb.gmra.mxu2 %v6770_v38  ;;  %v4018_v38 = vadd.f32 %v4002_v41, %v3992_v10  ;;  %v3973_v41 = vperm.slane %v6865_v29, 2 }
 0x311   :  { %v3798_v33 = vpop.f32.mrf.mxu2 }
 0x312   :  { %3964 = vmatmul.bf16.vlgmr.msrb.gmra.mxu3 %v6774_v42  ;;  %v4022_v42 = vsub.f32 0.0, %v4018_v38  ;;  %v3989_v13 = vmul.f32 %v3973_v41, %v6827_v36 }
 0x314   :  { %v4027_v2 = vmul.f32 1.442695, %v4022_v42  ;;  %v4015_v4 = vadd.f32 %v3999_v12, %v3989_v13 }
 0x316   :  { %6677 = vpow2.f32 %v4027_v2  ;;  %v3783_v18 = vpop.f32.mrf.mxu1 }
 0x317   :  { %v3784_v37 = vadd.f32 %v3783_v18, %v3770_v34 }
 0x319   :  { %v3797_v48 = vadd.f32 %v3796_v22, %v3784_v37 }
 0x31b   :  { %v3810_v49 = vadd.f32 %v3809_v24, %v3797_v48 }
 0x31c   :  { %v6678_v14 = vpop.eup %6677 }
 0x31d   :  { %v4034_v15 = vadd.f32 1.0, %v6678_v14 }
 0x31e   :  { %v3785_v6 = vpop.f32.mrf.mxu1 }
 0x31f   :  { %6679 = vrcp.f32 %v4034_v15  ;;  %v4063_v26 = vand.u32 2147483648, %v4034_v15  ;;  %v4061_v20 = vand.u32 2147483647, %v4034_v15  ;;  %vm4057_vm5 = vweird.f32 %v4034_v15 }
 0x321   :  { %v4064_v21 = vor.u32 1.1754944e-38, %v4063_v26  ;;  %vm4062_vm7 = vcmp.eq.f32.partialorder %v4061_v20, 8.507059e+37 }
 0x325   :  { %v6680_v19 = vpop.eup %6679 }
 0x326   :  { %v4053_v47 = vmul.f32 %v6680_v19, %v4034_v15  ;;  %vm4058_vm4 = vweird.f32 %v6680_v19 }
 0x327   :  { %vm4059_vm6 = vmor %vm4057_vm5, %vm4058_vm4 }
 0x328   :  { %v4054_v23 = vsub.f32 1.0, %v4053_v47  ;;  %v3822_v50 = vpop.f32.mrf.mxu0 }
 0x329   :  { %v3823_v52 = vadd.f32 %v3822_v50, %v3810_v49 }
 0x32a   :  { %v4055_v28 = vmul.f32 %v6680_v19, %v4054_v23  ;;  %v3835_v11 = vpop.f32.mrf.mxu1 }
 0x32b   :  { %v3836_v17 = vadd.f32 %v3835_v11, %v3823_v52 }
 0x32c   :  { %v4056_v40 = vadd.f32 %v6680_v19, %v4055_v28 }
 0x32e   :  { %v4060_v32 = vsel %vm4059_vm6, %v6680_v19, %v4056_v40 }
 0x32f   :  { %v4065_v16 = vsel %vm4062_vm7, %v4064_v21, %v4060_v32  ;;  %v3978_v32 = vperm.slane %v6865_v29, 7 }
 0x330   :  { %v4098_v8 = vmul.f32 %v4065_v16, %v4014_v31  ;;  %v3824_v59 = vpop.f32.mrf.mxu0 }
 0x332   :  { %4102 = vst [vmem:[%s6936_s4 + $0x8] sm:$0xff] %v4098_v8  ;;  %v3848_v53 = vpop.f32.mrf.mxu2  ;;  %v3837_v60 = vpop.f32.mrf.mxu1 }
 0x333   :  { %v3849_v51 = vadd.f32 %v3848_v53, %v3836_v17 }
 0x334   :  { %v3861_v54 = vpop.f32.mrf.mxu3 }
 0x335   :  { %v3862_v57 = vadd.f32 %v3861_v54, %v3849_v51  ;;  %v3974_v54 = vperm.slane %v6865_v29, 3 }
 0x337   :  { %v3993_v61 = vmul.f32 %v3977_v56, %v3862_v57  ;;  %v3990_v60 = vmul.f32 %v3974_v54, %v6840_v46 }
 0x339   :  { %v4019_v39 = vadd.f32 %v4003_v58, %v3993_v61  ;;  %v4000_v58 = vperm.slane %v6871_v55, 3 }
 0x33a   :  { %v3850_v63 = vpop.f32.mrf.mxu2 }
 0x33b   :  { %v4023_v0 = vsub.f32 0.0, %v4019_v39 }
 0x33c   :  { %v3863_v1 = vpop.f32.mrf.mxu3 }
 0x33d   :  { %v4029_v30 = vmul.f32 1.442695, %v4023_v0  ;;  %v4016_v1 = vadd.f32 %v4000_v58, %v3990_v60 }
 0x33f   :  { %6681 = vpow2.f32 %v4029_v30 }
 0x345   :  { %v6682_v43 = vpop.eup %6681 }
 0x346   :  { %v4035_v3 = vadd.f32 1.0, %v6682_v43 }
 0x348   :  { %6683 = vrcp.f32 %v4035_v3  ;;  %v4078_v42 = vand.u32 2147483648, %v4035_v3  ;;  %v4076_v14 = vand.u32 2147483647, %v4035_v3  ;;  %vm4072_vm9 = vweird.f32 %v4035_v3 }
 0x349   :  { %v3874_v5 = vpop.f32.mrf.mxu0 }
 0x34a   :  { %v4079_v19 = vor.u32 1.1754944e-38, %v4078_v42  ;;  %vm4077_vm11 = vcmp.eq.f32.partialorder %v4076_v14, 8.507059e+37 }
 0x34b   :  { %v3887_v7 = vpop.f32.mrf.mxu1 }
 0x34c   :  { %v3888_v36 = vadd.f32 %v3887_v7, %v3874_v5 }
 0x34e   :  { %v6684_v62 = vpop.eup %6683 }
 0x34f   :  { %v4068_v9 = vmul.f32 %v6684_v62, %v4035_v3  ;;  %vm4073_vm8 = vweird.f32 %v6684_v62 }
 0x350   :  { %vm4074_vm10 = vmor %vm4072_vm9, %vm4073_vm8 }
 0x351   :  { %v4069_v10 = vsub.f32 1.0, %v4068_v9  ;;  %v3876_v15 = vpop.f32.mrf.mxu0 }
 0x353   :  { %v3900_v44 = vpop.f32.mrf.mxu2  ;;  %v4070_v2 = vmul.f32 %v6684_v62, %v4069_v10  ;;  %v3889_v34 = vpop.f32.mrf.mxu1 }
 0x354   :  { %v3901_v26 = vadd.f32 %v3900_v44, %v3888_v36 }
 0x355   :  { %v3913_v38 = vpop.f32.mrf.mxu3  ;;  %v4071_v18 = vadd.f32 %v6684_v62, %v4070_v2 }
 0x356   :  { %v3914_v27 = vadd.f32 %v3913_v38, %v3901_v26 }
 0x357   :  { %v4075_v47 = vsel %vm4074_vm10, %v6684_v62, %v4071_v18 }
 0x358   :  { %v4080_v22 = vsel %vm4077_vm11, %v4079_v19, %v4075_v47 }
 0x359   :  { %v4099_v24 = vmul.f32 %v4080_v22, %v4015_v4 }
 0x35b   :  { %v3902_v23 = vpop.f32.mrf.mxu2  ;;  %4103 = vst [vmem:[%s6936_s4 + $0x10] sm:$0xff] %v4099_v24 }
 0x35d   :  { %v3915_v25 = vpop.f32.mrf.mxu3 }
 0x389   :  { %v3926_v28 = vpop.f32.mrf.mxu0 }
 0x38a   :  { %v3927_v35 = vadd.f32 %v3926_v28, %v3914_v27 }
 0x38b   :  { %v3939_v20 = vpop.f32.mrf.mxu1 }
 0x38c   :  { %v3940_v6 = vadd.f32 %v3939_v20, %v3927_v35 }
 0x391   :  { %v3928_v16 = vpop.f32.mrf.mxu0 }
 0x393   :  { %v3952_v40 = vpop.f32.mrf.mxu2  ;;  %v3941_v33 = vpop.f32.mrf.mxu1 }
 0x394   :  { %v3953_v21 = vadd.f32 %v3952_v40, %v3940_v6 }
 0x395   :  { %v3965_v31 = vpop.f32.mrf.mxu3 }
 0x396   :  { %v3966_v8 = vadd.f32 %v3965_v31, %v3953_v21 }
 0x398   :  { %v3994_v37 = vmul.f32 %v3978_v32, %v3966_v8 }
 0x39a   :  { %v4020_v48 = vadd.f32 %v4004_v45, %v3994_v37 }
 0x39b   :  { %v3954_v49 = vpop.f32.mrf.mxu2 }
 0x39c   :  { %v4024_v50 = vsub.f32 0.0, %v4020_v48 }
 0x39d   :  { %v3967_v52 = vpop.f32.mrf.mxu3 }
 0x39e   :  { %v4031_v11 = vmul.f32 1.442695, %v4024_v50 }
 0x3a0   :  { %6685 = vpow2.f32 %v4031_v11 }
 0x3a6   :  { %v6686_v17 = vpop.eup %6685 }
 0x3a7   :  { %v4036_v53 = vadd.f32 1.0, %v6686_v17 }
 0x3a9   :  { %6687 = vrcp.f32 %v4036_v53  ;;  %v4093_v59 = vand.u32 2147483648, %v4036_v53  ;;  %v4091_v39 = vand.u32 2147483647, %v4036_v53  ;;  %vm4087_vm13 = vweird.f32 %v4036_v53 }
 0x3ab   :  { %v4094_v0 = vor.u32 1.1754944e-38, %v4093_v59  ;;  %vm4092_vm15 = vcmp.eq.f32.partialorder %v4091_v39, 8.507059e+37 }
 0x3af   :  { %v6688_v51 = vpop.eup %6687 }
 0x3b0   :  { %v4083_v56 = vmul.f32 %v6688_v51, %v4036_v53  ;;  %vm4088_vm12 = vweird.f32 %v6688_v51 }
 0x3b1   :  { %vm4089_vm14 = vmor %vm4087_vm13, %vm4088_vm12 }
 0x3b2   :  { %v4084_v57 = vsub.f32 1.0, %v4083_v56 }
 0x3b4   :  { %v4085_v61 = vmul.f32 %v6688_v51, %v4084_v57 }
 0x3b6   :  { %v4086_v63 = vadd.f32 %v6688_v51, %v4085_v61 }
 0x3b8   :  { %v4090_v30 = vsel %vm4089_vm14, %v6688_v51, %v4086_v63 }
 0x3b9   :  { %v4095_v43 = vsel %vm4092_vm15, %v4094_v0, %v4090_v30 }
 0x3ba   :  { %v4100_v3 = vmul.f32 %v4095_v43, %v4016_v1 }
 0x3bc   :  { %4104 = vst [vmem:[%s6936_s4 + $0x18] sm:$0xff] %v4100_v3 }
 0x3bd   :  { %4109 = vsyncpa [#allocation3], 1 }

// kernel: _lambda_.6
= control target key start
LH: loop header
LB: loop body
LE: loop exit
PB: predicated region body
PF: predicated region fallthrough
CT: control target
= control target key end

     0   :  { %s2314_s15 = smov 0   ;;  %s3121_s0 = inlined_call_operand.vmem [shape: bf16[512,256], index: 0, kind: input, shape index: {}]   ;;  %s3122_s1 = inlined_call_operand.vmem [shape: bf16[256,256], index: 1, kind: input, shape index: {}]   ;;  %s3123_s2 = inlined_call_operand.vmem [shape: f32[1,256], index: 2, kind: input, shape index: {}]   ;;  %s3124_s3 = inlined_call_operand.vmem [shape: f32[1,256], index: 3, kind: input, shape index: {}]   ;;  %s3125_s4 = inlined_call_operand.vmem [shape: f32[512,128], index: 4, kind: output, shape index: {}]  }
   0x1 LB: > { %s1812_s16 = sadd.s32 4294967295, %s2287_s15   ;;  %p1816_p0 = scmp.ge.s32.totalorder %s2287_s15, 1  ;;  %s2287_s15 = sphi %s2314_s15, %s14_s15  }
   0x2   : > { %p164_p1 = scmp.lt.s32.totalorder %s2287_s15, 3 }
   0x4   : > { %p165_p2 = pnand %p1816_p0, %p164_p1 }
   0x5   : > { %s1817_s17 = sshll.u32 (!%p165_p2), %s1812_s16, 5 }
   0x6   : > { %168 = sbr.rel (%p165_p2) target bundleno = 467 (0x1d3), region = 36  ;;  %p192_p3 = scmp.lt.s32.totalorder (!%p165_p2), %s1817_s17, 63 }
   0xb   : > { %v2127_v0 = vld [vmem:[%s3122_s1 + $0x74] sm:$0xf]  ;;  %v2010_v1 = vld [vmem:[%s3122_s1 + $0x78] sm:$0xf0]  ;;  %v2125_v5 = vld [vmem:[%s3122_s1 + $0x64] sm:$0xf] }
   0xc   : > { %v2143_v2 = vld [vmem:[%s3122_s1 + $0xf4] sm:$0xf]  ;;  %v2013_v3 = vor.u32 %v2127_v0, %v2010_v1  ;;  %v2074_v4 = vld [vmem:[%s3122_s1 + $0xf8] sm:$0xf0]  ;;  %v2002_v6 = vld [vmem:[%s3122_s1 + $0x68] sm:$0xf0] }
   0xd   : > { %v2077_v7 = vor.u32 %v2143_v2, %v2074_v4  ;;  %v2141_v8 = vld [vmem:[%s3122_s1 + $0xe4] sm:$0xf]  ;;  %v2066_v9 = vld [vmem:[%s3122_s1 + $0xe8] sm:$0xf0]  ;;  %v2005_v10 = vor.u32 %v2125_v5, %v2002_v6  ;;  %v2123_v12 = vld [vmem:[%s3122_s1 + $0x54] sm:$0xf] }
   0xe   : > { %766 = vmatpush.bf16.msra.mxu2 %v2013_v3  ;;  %v2069_v11 = vor.u32 %v2141_v8, %v2066_v9  ;;  %v1994_v13 = vld [vmem:[%s3122_s1 + $0x58] sm:$0xf0]  ;;  %v2139_v14 = vld [vmem:[%s3122_s1 + $0xd4] sm:$0xf]  ;;  %v2121_v18 = vld [vmem:[%s3122_s1 + $0x44] sm:$0xf] }
   0xf   : > { %855 = vmatpush.bf16.msra.mxu3 %v2077_v7  ;;  %v2058_v15 = vld [vmem:[%s3122_s1 + $0xd8] sm:$0xf0]  ;;  %v1997_v16 = vor.u32 %v2123_v12, %v1994_v13  ;;  %v1986_v19 = vld [vmem:[%s3122_s1 + $0x48] sm:$0xf0]  ;;  %v2137_v20 = vld [vmem:[%s3122_s1 + $0xc4] sm:$0xf] }
  0x10   : > { %v2061_v17 = vor.u32 %v2139_v14, %v2058_v15  ;;  %v2050_v21 = vld [vmem:[%s3122_s1 + $0xc8] sm:$0xf0]  ;;  %v2008_v22 = vld [vmem:[%s3122_s1 + $0x70] sm:$0xf]  ;;  %v2128_v23 = vld [vmem:[%s3122_s1 + $0x74] sm:$0xf0]  ;;  %v1989_v28 = vor.u32 %v2121_v18, %v1986_v19 }
  0x11   : > { %v2119_v24 = vld [vmem:[%s3122_s1 + $0x34] sm:$0xf]  ;;  %v2009_v25 = vor.u32 %v2128_v23, %v2008_v22  ;;  %v2072_v26 = vld [vmem:[%s3122_s1 + $0xf0] sm:$0xf]  ;;  %v2144_v27 = vld [vmem:[%s3122_s1 + $0xf4] sm:$0xf0]  ;;  %v2053_v33 = vor.u32 %v2137_v20, %v2050_v21 }
  0x12   : > { %767 = vmatpush.bf16.msra.mxu2 %v2005_v10  ;;  %v1978_v29 = vld [vmem:[%s3122_s1 + $0x38] sm:$0xf0]  ;;  %v2135_v30 = vld [vmem:[%s3122_s1 + $0xb4] sm:$0xf]  ;;  %v2073_v32 = vor.u32 %v2144_v27, %v2072_v26  ;;  %v2000_v34 = vld [vmem:[%s3122_s1 + $0x60] sm:$0xf] }
  0x13   : > { %856 = vmatpush.bf16.msra.mxu3 %v2069_v11  ;;  %v2042_v31 = vld [vmem:[%s3122_s1 + $0xb8] sm:$0xf0]  ;;  %588 = vmatpush.bf16.msra.mxu0 %v2009_v25  ;;  %v2126_v35 = vld [vmem:[%s3122_s1 + $0x64] sm:$0xf0]  ;;  %v2064_v37 = vld [vmem:[%s3122_s1 + $0xe0] sm:$0xf]  ;;  %v1981_v43 = vor.u32 %v2119_v24, %v1978_v29 }
  0x14   : > { %677 = vmatpush.bf16.msra.mxu1 %v2073_v32  ;;  %v2001_v36 = vor.u32 %v2126_v35, %v2000_v34  ;;  %v2142_v38 = vld [vmem:[%s3122_s1 + $0xe4] sm:$0xf0]  ;;  %v1992_v40 = vld [vmem:[%s3122_s1 + $0x50] sm:$0xf]  ;;  %v2124_v41 = vld [vmem:[%s3122_s1 + $0x54] sm:$0xf0]  ;;  %v2045_v46 = vor.u32 %v2135_v30, %v2042_v31 }
  0x15   : > { %v2065_v39 = vor.u32 %v2142_v38, %v2064_v37  ;;  %v2056_v42 = vld [vmem:[%s3122_s1 + $0xd0] sm:$0xf]  ;;  %v2117_v44 = vld [vmem:[%s3122_s1 + $0x24] sm:$0xf]  ;;  %v2140_v45 = vld [vmem:[%s3122_s1 + $0xd4] sm:$0xf0]  ;;  %v1993_v50 = vor.u32 %v2124_v41, %v1992_v40 }
  0x16   : > { %768 = vmatpush.bf16.msra.mxu2 %v1997_v16  ;;  %v1970_v47 = vld [vmem:[%s3122_s1 + $0x28] sm:$0xf0]  ;;  %v2133_v48 = vld [vmem:[%s3122_s1 + $0xa4] sm:$0xf]  ;;  %s3127_s17 = smov (!%p192_p3, %s1817_s17), 63  ;;  %v2057_v51 = vor.u32 %v2140_v45, %v2056_v42 }
  0x17   : > { %857 = vmatpush.bf16.msra.mxu3 %v2061_v17  ;;  %v2034_v49 = vld [vmem:[%s3122_s1 + $0xa8] sm:$0xf0]  ;;  %589 = vmatpush.bf16.msra.mxu0 %v2001_v36  ;;  %v1984_v52 = vld [vmem:[%s3122_s1 + $0x40] sm:$0xf]  ;;  %v2122_v53 = vld [vmem:[%s3122_s1 + $0x44] sm:$0xf0]  ;;  %v1973_v56 = vor.u32 %v2117_v44, %v1970_v47 }
  0x18   : > { %678 = vmatpush.bf16.msra.mxu1 %v2065_v39  ;;  %v2048_v54 = vld [vmem:[%s3122_s1 + $0xc0] sm:$0xf]  ;;  %v2138_v55 = vld [vmem:[%s3122_s1 + $0xc4] sm:$0xf0]  ;;  %v2115_v57 = vld [vmem:[%s3122_s1 + $0x14] sm:$0xf]  ;;  %v2037_v58 = vor.u32 %v2133_v48, %v2034_v49  ;;  %v1985_v62 = vor.u32 %v2122_v53, %v1984_v52 }
  0x19   : > { %v1962_v59 = vld [vmem:[%s3122_s1 + $0x18] sm:$0xf0]  ;;  %v2131_v60 = vld [vmem:[%s3122_s1 + $0x94] sm:$0xf]  ;;  %s2080_s7 = sshll.u32 %s3127_s17, 3  ;;  %v2049_v63 = vor.u32 %v2138_v55, %v2048_v54 }
  0x1a   : > { %769 = vmatpush.bf16.msra.mxu2 %v1989_v28  ;;  %v2026_v61 = vld [vmem:[%s3122_s1 + $0x98] sm:$0xf0]  ;;  %v1976_v0 = vld [vmem:[%s3122_s1 + $0x30] sm:$0xf]  ;;  %v2120_v1 = vld [vmem:[%s3122_s1 + $0x34] sm:$0xf0]  ;;  %v1965_v4 = vor.u32 %v2115_v57, %v1962_v59  ;;  %s2486_s26 = scalar_lea.vmem %s3121_s0, %s2080_s7  ;;  %s2629_s12 = scalar_lea.vmem %s3125_s4, %s2080_s7 }
  0x1b   : > { %858 = vmatpush.bf16.msra.mxu3 %v2053_v33  ;;  %590 = vmatpush.bf16.msra.mxu0 %v1993_v50  ;;  %v2040_v2 = vld [vmem:[%s3122_s1 + $0xb0] sm:$0xf]  ;;  %v2136_v3 = vld [vmem:[%s3122_s1 + $0xb4] sm:$0xf0]  ;;  %v2029_v5 = vor.u32 %v2131_v60, %v2026_v61  ;;  %v2113_v6 = vld [vmem:[%s3122_s1 + $0x4] sm:$0xf]  ;;  %v1977_v9 = vor.u32 %v2120_v1, %v1976_v0 }
  0x1c   : > { %679 = vmatpush.bf16.msra.mxu1 %v2057_v51  ;;  %v1954_v7 = vld [vmem:[%s3122_s1 + $0x8] sm:$0xf0]  ;;  %v2129_v8 = vld [vmem:[%s3122_s1 + $0x84] sm:$0xf]  ;;  %v2041_v11 = vor.u32 %v2136_v3, %v2040_v2  ;;  %v1968_v12 = vld [vmem:[%s3122_s1 + $0x20] sm:$0xf] }
  0x1d   : > { %v2018_v10 = vld [vmem:[%s3122_s1 + $0x88] sm:$0xf0]  ;;  %v2118_v13 = vld [vmem:[%s3122_s1 + $0x24] sm:$0xf0]  ;;  %v2032_v14 = vld [vmem:[%s3122_s1 + $0xa0] sm:$0xf]  ;;  %v1957_v16 = vor.u32 %v2113_v6, %v1954_v7 }
  0x1e   : > { %770 = vmatpush.bf16.msra.mxu2 %v1981_v43  ;;  %v2134_v15 = vld [vmem:[%s3122_s1 + $0xa4] sm:$0xf0]  ;;  %v1824_v17 = vld [vmem:[%s2486_s26] sm:$0xf]  ;;  %v2021_v19 = vor.u32 %v2129_v8, %v2018_v10  ;;  %v2081_v20 = vld [vmem:[%s2486_s26 + $0x4] sm:$0xf]  ;;  %v1969_v22 = vor.u32 %v2118_v13, %v1968_v12 }
  0x1f   : > { %859 = vmatpush.bf16.msra.mxu3 %v2045_v46  ;;  %591 = vmatpush.bf16.msra.mxu0 %v1985_v62  ;;  %v2082_v18 = vld [vmem:[%s2486_s26 + $0x4] sm:$0xf0]  ;;  %v1826_v21 = vld [vmem:[%s2486_s26 + $0x8] sm:$0xf0]  ;;  %v2033_v23 = vor.u32 %v2134_v15, %v2032_v14  ;;  %v1960_v24 = vld [vmem:[%s3122_s1 + $0x10] sm:$0xf] }
  0x20   : > { %680 = vmatpush.bf16.msra.mxu1 %v2049_v63  ;;  %v2116_v25 = vld [vmem:[%s3122_s1 + $0x14] sm:$0xf0]  ;;  %v1825_v26 = vor.u32 %v2082_v18, %v1824_v17  ;;  %v2024_v27 = vld [vmem:[%s3122_s1 + $0x90] sm:$0xf]  ;;  %v1829_v29 = vor.u32 %v2081_v20, %v1826_v21  ;;  %v1952_v32 = vld [vmem:[%s3122_s1] sm:$0xf] }
  0x21   : > { %v2132_v28 = vld [vmem:[%s3122_s1 + $0x94] sm:$0xf0]  ;;  %v1961_v30 = vor.u32 %v2116_v25, %v1960_v24  ;;  %v2114_v33 = vld [vmem:[%s3122_s1 + $0x4] sm:$0xf0]  ;;  %v2016_v34 = vld [vmem:[%s3122_s1 + $0x80] sm:$0xf] }
  0x22   : > { %771 = vmatpush.bf16.msra.mxu2 %v1973_v56  ;;  %v2025_v31 = vor.u32 %v2132_v28, %v2024_v27  ;;  %v2130_v35 = vld [vmem:[%s3122_s1 + $0x84] sm:$0xf0]  ;;  %v1953_v36 = vor.u32 %v2114_v33, %v1952_v32  ;;  %v1832_v38 = vld [vmem:[%s2486_s26 + $0x10] sm:$0xf]  ;;  %v2084_v39 = vld [vmem:[%s2486_s26 + $0x14] sm:$0xf0] }
  0x23   : > { %860 = vmatpush.bf16.msra.mxu3 %v2037_v58  ;;  %592 = vmatpush.bf16.msra.mxu0 %v1977_v9  ;;  %v2017_v37 = vor.u32 %v2130_v35, %v2016_v34  ;;  %v2083_v40 = vld [vmem:[%s2486_s26 + $0x14] sm:$0xf]  ;;  %v1834_v41 = vld [vmem:[%s2486_s26 + $0x18] sm:$0xf0]  ;;  %v1833_v42 = vor.u32 %v2084_v39, %v1832_v38  ;;  %v1840_v44 = vld [vmem:[%s2486_s26 + $0x20] sm:$0xf] }
  0x24   : > { %681 = vmatpush.bf16.msra.mxu1 %v2041_v11  ;;  %v1837_v43 = vor.u32 %v2083_v40, %v1834_v41  ;;  %v2086_v45 = vld [vmem:[%s2486_s26 + $0x24] sm:$0xf0]  ;;  %v2085_v46 = vld [vmem:[%s2486_s26 + $0x24] sm:$0xf]  ;;  %v1842_v47 = vld [vmem:[%s2486_s26 + $0x28] sm:$0xf0] }
  0x25   : > { %v1841_v48 = vor.u32 %v2086_v45, %v1840_v44  ;;  %v1845_v49 = vor.u32 %v2085_v46, %v1842_v47  ;;  %v1848_v50 = vld [vmem:[%s2486_s26 + $0x30] sm:$0xf]  ;;  %v2088_v51 = vld [vmem:[%s2486_s26 + $0x34] sm:$0xf0]  ;;  %v2087_v52 = vld [vmem:[%s2486_s26 + $0x34] sm:$0xf] }
  0x26   : > { %772 = vmatpush.bf16.msra.mxu2 %v1965_v4  ;;  %v1850_v53 = vld [vmem:[%s2486_s26 + $0x38] sm:$0xf0]  ;;  %v1849_v54 = vor.u32 %v2088_v51, %v1848_v50  ;;  %v1856_v56 = vld [vmem:[%s2486_s26 + $0x40] sm:$0xf]  ;;  %v2090_v57 = vld [vmem:[%s2486_s26 + $0x44] sm:$0xf0] }
  0x27   : > { %861 = vmatpush.bf16.msra.mxu3 %v2029_v5  ;;  %593 = vmatpush.bf16.msra.mxu0 %v1969_v22  ;;  %v1853_v55 = vor.u32 %v2087_v52, %v1850_v53  ;;  %v2089_v58 = vld [vmem:[%s2486_s26 + $0x44] sm:$0xf]  ;;  %v1858_v59 = vld [vmem:[%s2486_s26 + $0x48] sm:$0xf0]  ;;  %v1857_v60 = vor.u32 %v2090_v57, %v1856_v56  ;;  %v1864_v62 = vld [vmem:[%s2486_s26 + $0x50] sm:$0xf] }
  0x28   : > { %682 = vmatpush.bf16.msra.mxu1 %v2033_v23  ;;  %v1861_v61 = vor.u32 %v2089_v58, %v1858_v59  ;;  %v2092_v63 = vld [vmem:[%s2486_s26 + $0x54] sm:$0xf0]  ;;  %v2091_v0 = vld [vmem:[%s2486_s26 + $0x54] sm:$0xf]  ;;  %v1866_v1 = vld [vmem:[%s2486_s26 + $0x58] sm:$0xf0] }
  0x29   : > { %v1865_v2 = vor.u32 %v2092_v63, %v1864_v62  ;;  %v1869_v3 = vor.u32 %v2091_v0, %v1866_v1  ;;  %v1872_v4 = vld [vmem:[%s2486_s26 + $0x60] sm:$0xf]  ;;  %v2094_v5 = vld [vmem:[%s2486_s26 + $0x64] sm:$0xf0]  ;;  %v2093_v6 = vld [vmem:[%s2486_s26 + $0x64] sm:$0xf] }
  0x2a   : > { %773 = vmatpush.bf16.msra.mxu2 %v1957_v16  ;;  %v1874_v7 = vld [vmem:[%s2486_s26 + $0x68] sm:$0xf0]  ;;  %v1873_v8 = vor.u32 %v2094_v5, %v1872_v4  ;;  %v1880_v10 = vld [vmem:[%s2486_s26 + $0x70] sm:$0xf]  ;;  %v2096_v11 = vld [vmem:[%s2486_s26 + $0x74] sm:$0xf0] }
  0x2b   : > { %862 = vmatpush.bf16.msra.mxu3 %v2021_v19  ;;  %594 = vmatpush.bf16.msra.mxu0 %v1961_v30  ;;  %v1877_v9 = vor.u32 %v2093_v6, %v1874_v7  ;;  %v2095_v12 = vld [vmem:[%s2486_s26 + $0x74] sm:$0xf]  ;;  %v1882_v13 = vld [vmem:[%s2486_s26 + $0x78] sm:$0xf0]  ;;  %v1881_v14 = vor.u32 %v2096_v11, %v1880_v10  ;;  %v1888_v16 = vld [vmem:[%s2486_s26 + $0x80] sm:$0xf] }
  0x2c   : > { %683 = vmatpush.bf16.msra.mxu1 %v2025_v31  ;;  %v1885_v15 = vor.u32 %v2095_v12, %v1882_v13  ;;  %v2098_v17 = vld [vmem:[%s2486_s26 + $0x84] sm:$0xf0]  ;;  %v2097_v18 = vld [vmem:[%s2486_s26 + $0x84] sm:$0xf]  ;;  %v1890_v19 = vld [vmem:[%s2486_s26 + $0x88] sm:$0xf0] }
  0x2d   : > { %774 = vmatmul.bf16.vlgmr.msra.gmra.mxu2 %v1825_v26  ;;  %v1889_v20 = vor.u32 %v2098_v17, %v1888_v16  ;;  %v1893_v21 = vor.u32 %v2097_v18, %v1890_v19  ;;  %v944_v22 = vld [vmem:[%s3123_s2] sm:$0x3]  ;;  %v1896_v33 = vld [vmem:[%s2486_s26 + $0x90] sm:$0xf]  ;;  %v2100_v34 = vld [vmem:[%s2486_s26 + $0x94] sm:$0xf0] }
  0x2e   : > { %863 = vmatmul.bf16.vlgmr.msra.gmra.mxu3 %v1829_v29  ;;  %v2569_v23 = vld [vmem:[%s3124_s3] sm:$0x3]  ;;  %v2571_v25 = vperm.slane %v944_v22, 1  ;;  %v2099_v35 = vld [vmem:[%s2486_s26 + $0x94] sm:$0xf]  ;;  %v1897_v40 = vor.u32 %v2100_v34, %v1896_v33 }
  0x2f   : > { %595 = vmatpush.bf16.msra.mxu0 %v1953_v36  ;;  %v2574_v28 = vperm.slane %v2569_v23, 1  ;;  %v1898_v36 = vld [vmem:[%s2486_s26 + $0x98] sm:$0xf0]  ;;  %v1904_v59 = vld [vmem:[%s2486_s26 + $0xa0] sm:$0xf]  ;;  %v2610_v16 = vperm.slane %v2569_v23, 0 }
  0x30   : > { %684 = vmatpush.bf16.msra.mxu1 %v2017_v37  ;;  %v1906_v62 = vld [vmem:[%s2486_s26 + $0xa8] sm:$0xf0] }
  0x32   : > { %596 = vmatmul.bf16.vlgmr.msra.gmra.mxu0 %v1825_v26 }
  0x33   : > { %685 = vmatmul.bf16.vlgmr.msra.gmra.mxu1 %v1829_v29 }
  0x3d   : > { %779 = vmatmul.bf16.gmra.mxu2 %v1833_v42 }
  0x3e   : > { %868 = vmatmul.bf16.gmra.mxu3 %v1837_v43 }
  0x42   : > { %601 = vmatmul.bf16.gmra.mxu0 %v1833_v42 }
  0x43   : > { %690 = vmatmul.bf16.gmra.mxu1 %v1837_v43  ;;  %v1901_v43 = vor.u32 %v2099_v35, %v1898_v36 }
  0x4d   : > { %784 = vmatmul.bf16.gmra.mxu2 %v1841_v48 }
  0x4e   : > { %873 = vmatmul.bf16.gmra.mxu3 %v1845_v49 }
  0x52   : > { %606 = vmatmul.bf16.gmra.mxu0 %v1841_v48 }
  0x53   : > { %695 = vmatmul.bf16.gmra.mxu1 %v1845_v49 }
  0x5d   : > { %789 = vmatmul.bf16.gmra.mxu2 %v1849_v54 }
  0x5e   : > { %878 = vmatmul.bf16.gmra.mxu3 %v1853_v55 }
  0x62   : > { %611 = vmatmul.bf16.gmra.mxu0 %v1849_v54 }
  0x63   : > { %700 = vmatmul.bf16.gmra.mxu1 %v1853_v55 }
  0x6d   : > { %794 = vmatmul.bf16.gmra.mxu2 %v1857_v60 }
  0x6e   : > { %883 = vmatmul.bf16.gmra.mxu3 %v1861_v61 }
  0x72   : > { %616 = vmatmul.bf16.gmra.mxu0 %v1857_v60  ;;  %v2102_v60 = vld [vmem:[%s2486_s26 + $0xa4] sm:$0xf0] }
  0x73   : > { %705 = vmatmul.bf16.gmra.mxu1 %v1861_v61  ;;  %v2101_v61 = vld [vmem:[%s2486_s26 + $0xa4] sm:$0xf]  ;;  %v1905_v4 = vor.u32 %v2102_v60, %v1904_v59 }
  0x7d   : > { %799 = vmatmul.bf16.gmra.mxu2 %v1865_v2 }
  0x7e   : > { %888 = vmatmul.bf16.gmra.mxu3 %v1869_v3 }
  0x82   : > { %621 = vmatmul.bf16.gmra.mxu0 %v1865_v2  ;;  %v2598_v2 = vperm.slane %v944_v22, 0 }
  0x83   : > { %710 = vmatmul.bf16.gmra.mxu1 %v1869_v3 }
  0x8d   : > { %804 = vmatmul.bf16.gmra.mxu2 %v1873_v8 }
  0x8e   : > { %893 = vmatmul.bf16.gmra.mxu3 %v1877_v9 }
  0x92   : > { %626 = vmatmul.bf16.gmra.mxu0 %v1873_v8  ;;  %v1909_v8 = vor.u32 %v2101_v61, %v1906_v62 }
  0x93   : > { %715 = vmatmul.bf16.gmra.mxu1 %v1877_v9 }
  0x9d   : > { %809 = vmatmul.bf16.gmra.mxu2 %v1881_v14 }
  0x9e   : > { %898 = vmatmul.bf16.gmra.mxu3 %v1885_v15 }
  0xa2   : > { %631 = vmatmul.bf16.gmra.mxu0 %v1881_v14 }
  0xa3   : > { %720 = vmatmul.bf16.gmra.mxu1 %v1885_v15 }
  0xad   : > { %814 = vmatmul.bf16.gmra.mxu2 %v1889_v20 }
  0xae   : > { %903 = vmatmul.bf16.gmra.mxu3 %v1893_v21 }
  0xaf   : > { %v597_v29 = vpop.f32.mrf.mxu0 }
  0xb0   : > { %v775_v24 = vpop.f32.mrf.mxu2  ;;  %v686_v31 = vpop.f32.mrf.mxu1 }
  0xb1   : > { %v864_v26 = vpop.f32.mrf.mxu3  ;;  %v687_v1 = vadd.f32 %v686_v31, %v597_v29 }
  0xb2   : > { %v865_v27 = vadd.f32 %v864_v26, %v775_v24  ;;  %636 = vmatmul.bf16.gmra.mxu0 %v1889_v20 }
  0xb3   : > { %725 = vmatmul.bf16.gmra.mxu1 %v1893_v21  ;;  %v950_v15 = vmul.f32 %v2598_v2, %v687_v1 }
  0xb4   : > { %v951_v30 = vmul.f32 %v2571_v25, %v865_v27 }
  0xb5   : > { %v1020_v26 = vadd.f32 %v2610_v16, %v950_v15 }
  0xb6   : > { %v1021_v32 = vadd.f32 %v2574_v28, %v951_v30 }
  0xb7   : > { %v2582_v44 = vpop.f32.mrf.mxu0 }
  0xb8   : > { %v1084_v37 = vsub.f32 0.0, %v1021_v32  ;;  %v777_v38 = vpop.f32.mrf.mxu2  ;;  %v2585_v46 = vpop.f32.mrf.mxu1 }
  0xb9   : > { %v866_v39 = vpop.f32.mrf.mxu3  ;;  %v689_v35 = vadd.f32 %v2585_v46, %v2582_v44  ;;  %v1912_v44 = vld [vmem:[%s2486_s26 + $0xb0] sm:$0xf] }
  0xba   : > { %v1116_v41 = vmul.f32 1.442695, %v1084_v37  ;;  %v867_v42 = vadd.f32 %v866_v39, %v777_v38 }
  0xbb   : > { %v952_v46 = vmul.f32 %v2598_v2, %v689_v35 }
  0xbc   : > { %2153 = vpow2.f32 %v1116_v41  ;;  %v953_v45 = vmul.f32 %v2571_v25, %v867_v42 }
  0xbd   : > { %819 = vmatmul.bf16.gmra.mxu2 %v1897_v40 }
  0xbe   : > { %v1023_v47 = vadd.f32 %v2574_v28, %v953_v45  ;;  %908 = vmatmul.bf16.gmra.mxu3 %v1901_v43  ;;  %v2104_v45 = vld [vmem:[%s2486_s26 + $0xb4] sm:$0xf0] }
  0xbf   : > { %v2588_v55 = vpop.f32.mrf.mxu0  ;;  %v1913_v59 = vor.u32 %v2104_v45, %v1912_v44 }
  0xc0   : > { %v1085_v48 = vsub.f32 0.0, %v1023_v47  ;;  %v780_v49 = vpop.f32.mrf.mxu2  ;;  %v2591_v57 = vpop.f32.mrf.mxu1 }
  0xc1   : > { %v869_v50 = vpop.f32.mrf.mxu3 }
  0xc2   : > { %v2154_v51 = vpop.eup %2153  ;;  %v1118_v52 = vmul.f32 1.442695, %v1085_v48  ;;  %v870_v53 = vadd.f32 %v869_v50, %v780_v49  ;;  %641 = vmatmul.bf16.gmra.mxu0 %v1897_v40  ;;  %v2103_v49 = vld [vmem:[%s2486_s26 + $0xb4] sm:$0xf]  ;;  %v1914_v50 = vld [vmem:[%s2486_s26 + $0xb8] sm:$0xf0] }
  0xc3   : > { %v1180_v54 = vadd.f32 1.0, %v2154_v51  ;;  %730 = vmatmul.bf16.gmra.mxu1 %v1901_v43 }
  0xc4   : > { %2155 = vpow2.f32 %v1118_v52  ;;  %v955_v56 = vmul.f32 %v2571_v25, %v870_v53 }
  0xc5   : > { %2157 = vrcp.f32 %v1180_v54  ;;  %v1223_v19 = vand.u32 2147483648, %v1180_v54  ;;  %v1221_v21 = vand.u32 2147483647, %v1180_v54  ;;  %vm1217_vm1 = vweird.f32 %v1180_v54 }
  0xc6   : > { %v1025_v58 = vadd.f32 %v2574_v28, %v955_v56  ;;  %v692_v56 = vadd.f32 %v2591_v57, %v2588_v55 }
  0xc7   : > { %v2602_v11 = vpop.f32.mrf.mxu0  ;;  %v1224_v34 = vor.u32 1.1754944e-38, %v1223_v19  ;;  %vm1222_vm3 = vcmp.eq.f32.partialorder %v1221_v21, 8.507059e+37 }
  0xc8   : > { %v1086_v63 = vsub.f32 0.0, %v1025_v58  ;;  %v782_v0 = vpop.f32.mrf.mxu2  ;;  %v2605_v14 = vpop.f32.mrf.mxu1 }
  0xc9   : > { %v871_v3 = vpop.f32.mrf.mxu3 }
  0xca   : > { %v2156_v5 = vpop.eup %2155  ;;  %v1120_v6 = vmul.f32 1.442695, %v1086_v63  ;;  %v872_v7 = vadd.f32 %v871_v3, %v782_v0  ;;  %v1917_v63 = vor.u32 %v2103_v49, %v1914_v50  ;;  %v1022_v3 = vadd.f32 %v2610_v16, %v952_v46  ;;  %v2105_v46 = vld [vmem:[%s2486_s26 + $0xc4] sm:$0xf] }
  0xcb   : > { %v2158_v9 = vpop.eup %2157  ;;  %v2600_v10 = vadd.f32 1.0, %v2156_v5 }
  0xcc   : > { %2159 = vpow2.f32 %v1120_v6  ;;  %v1213_v12 = vmul.f32 %v2158_v9, %v1180_v54  ;;  %v957_v13 = vmul.f32 %v2571_v25, %v872_v7  ;;  %vm1218_vm0 = vweird.f32 %v2158_v9 }
  0xcd   : > { %2161 = vrcp.f32 %v2600_v10  ;;  %824 = vmatmul.bf16.gmra.mxu2 %v1905_v4  ;;  %vm1219_vm2 = vmor %vm1217_vm1, %vm1218_vm0  ;;  %v1238_v47 = vand.u32 2147483648, %v2600_v10  ;;  %v1236_v52 = vand.u32 2147483647, %v2600_v10  ;;  %vm1232_vm5 = vweird.f32 %v2600_v10 }
  0xce   : > { %v1214_v17 = vsub.f32 1.0, %v1213_v12  ;;  %v1027_v18 = vadd.f32 %v2574_v28, %v957_v13  ;;  %913 = vmatmul.bf16.gmra.mxu3 %v1909_v8 }
  0xcf   : > { %v2618_v36 = vpop.f32.mrf.mxu0  ;;  %vm1237_vm7 = vcmp.eq.f32.partialorder %v1236_v52, 8.507059e+37 }
  0xd0   : > { %v1215_v20 = vmul.f32 %v2158_v9, %v1214_v17  ;;  %v1087_v22 = vsub.f32 0.0, %v1027_v18  ;;  %v785_v24 = vpop.f32.mrf.mxu2  ;;  %v2621_v39 = vpop.f32.mrf.mxu1 }
  0xd1   : > { %v874_v27 = vpop.f32.mrf.mxu3 }
  0xd2   : > { %v2160_v29 = vpop.eup %2159  ;;  %v1216_v30 = vadd.f32 %v2158_v9, %v1215_v20  ;;  %v1122_v23 = vmul.f32 1.442695, %v1087_v22  ;;  %v875_v31 = vadd.f32 %v874_v27, %v785_v24  ;;  %646 = vmatmul.bf16.gmra.mxu0 %v1905_v4  ;;  %v1239_v4 = vor.u32 1.1754944e-38, %v1238_v47  ;;  %v1922_v47 = vld [vmem:[%s2486_s26 + $0xc8] sm:$0xf0] }
  0xd3   : > { %v2162_v32 = vpop.eup %2161  ;;  %v2614_v33 = vadd.f32 1.0, %v2160_v29  ;;  %735 = vmatmul.bf16.gmra.mxu1 %v1909_v8 }
  0xd4   : > { %v1220_v37 = vsel %vm1219_vm2, %v2158_v9, %v1216_v30  ;;  %2163 = vpow2.f32 %v1122_v23  ;;  %v1228_v38 = vmul.f32 %v2162_v32, %v2600_v10  ;;  %v959_v41 = vmul.f32 %v2571_v25, %v875_v31 }
  0xd5   : > { %2165 = vrcp.f32 %v2614_v33  ;;  %v1225_v40 = vsel %vm1222_vm3, %v1224_v34, %v1220_v37  ;;  %vm1233_vm4 = vweird.f32 %v2162_v32  ;;  %v954_v10 = vmul.f32 %v2598_v2, %v692_v56 }
  0xd6   : > { %v1692_v42 = vmul.f32 %v1225_v40, %v1020_v26  ;;  %v1229_v43 = vsub.f32 1.0, %v1228_v38  ;;  %v1029_v48 = vadd.f32 %v2574_v28, %v959_v41  ;;  %vm1234_vm6 = vmor %vm1232_vm5, %vm1233_vm4  ;;  %v1253_v17 = vand.u32 2147483648, %v2614_v33 }
  0xd7   : > { %v2648_v6 = vpop.f32.mrf.mxu0  ;;  %v1251_v19 = vand.u32 2147483647, %v2614_v33  ;;  %v1024_v22 = vadd.f32 %v2610_v16, %v954_v10  ;;  %vm1247_vm9 = vweird.f32 %v2614_v33  ;;  %v694_v31 = vadd.f32 %v2605_v14, %v2602_v11  ;;  %v1920_v14 = vld [vmem:[%s2486_s26 + $0xc0] sm:$0xf] }
  0xd8   : > { %1724 = vst [vmem:[%s2629_s12] sm:$0xff] %v1692_v42  ;;  %v1230_v51 = vmul.f32 %v2162_v32, %v1229_v43  ;;  %v787_v53 = vpop.f32.mrf.mxu2  ;;  %v1088_v54 = vsub.f32 0.0, %v1029_v48  ;;  %v2652_v8 = vpop.f32.mrf.mxu1  ;;  %v1254_v23 = vor.u32 1.1754944e-38, %v1253_v17  ;;  %v2106_v43 = vld [vmem:[%s2486_s26 + $0xc4] sm:$0xf0] }
  0xd9   : > { %v876_v58 = vpop.f32.mrf.mxu3  ;;  %vm1252_vm11 = vcmp.eq.f32.partialorder %v1251_v19, 8.507059e+37  ;;  %v956_v48 = vmul.f32 %v2598_v2, %v694_v31 }
  0xda   : > { %v2164_v60 = vpop.eup %2163  ;;  %v1231_v61 = vadd.f32 %v2162_v32, %v1230_v51  ;;  %v877_v62 = vadd.f32 %v876_v58, %v787_v53  ;;  %v1124_v5 = vmul.f32 1.442695, %v1088_v54  ;;  %v1921_v54 = vor.u32 %v2106_v43, %v1920_v14  ;;  %v2107_v14 = vld [vmem:[%s2486_s26 + $0xd4] sm:$0xf]  ;;  %v1930_v43 = vld [vmem:[%s2486_s26 + $0xd8] sm:$0xf0] }
  0xdb   : > { %v2166_v0 = vpop.eup %2165  ;;  %v2644_v1 = vadd.f32 1.0, %v2164_v60  ;;  %v1925_v60 = vor.u32 %v2105_v46, %v1922_v47 }
  0xdc   : > { %v1235_v55 = vsel %vm1234_vm6, %v2162_v32, %v1231_v61  ;;  %v1243_v57 = vmul.f32 %v2166_v0, %v2614_v33  ;;  %v961_v7 = vmul.f32 %v2571_v25, %v877_v62  ;;  %vm1248_vm8 = vweird.f32 %v2166_v0 }
  0xdd   : > { %2167 = vrcp.f32 %v2644_v1  ;;  %v1240_v9 = vsel %vm1237_vm7, %v1239_v4, %v1235_v55  ;;  %829 = vmatmul.bf16.gmra.mxu2 %v1913_v59  ;;  %vm1249_vm10 = vmor %vm1247_vm9, %vm1248_vm8  ;;  %v1268_v44 = vand.u32 2147483648, %v2644_v1  ;;  %v1266_v50 = vand.u32 2147483647, %v2644_v1 }
  0xde   : > { %v1693_v12 = vmul.f32 %v1240_v9, %v1022_v3  ;;  %2169 = vpow2.f32 %v1124_v5  ;;  %v1244_v13 = vsub.f32 1.0, %v1243_v57  ;;  %v1031_v15 = vadd.f32 %v2574_v28, %v961_v7  ;;  %918 = vmatmul.bf16.gmra.mxu3 %v1917_v63 }
  0xdf   : > { %v2664_v32 = vpop.f32.mrf.mxu0  ;;  %vm1262_vm13 = vweird.f32 %v2644_v1  ;;  %v1269_v62 = vor.u32 1.1754944e-38, %v1268_v44  ;;  %v1026_v4 = vadd.f32 %v2610_v16, %v956_v48  ;;  %vm1267_vm15 = vcmp.eq.f32.partialorder %v1266_v50, 8.507059e+37 }
  0xe0   : > { %1725 = vst [vmem:[%s2629_s12 + $0x8] sm:$0xff] %v1693_v12  ;;  %v1245_v18 = vmul.f32 %v2166_v0, %v1244_v13  ;;  %v1089_v20 = vsub.f32 0.0, %v1031_v15  ;;  %v790_v21 = vpop.f32.mrf.mxu2  ;;  %v2667_v37 = vpop.f32.mrf.mxu1 }
  0xe1   : > { %v879_v24 = vpop.f32.mrf.mxu3 }
  0xe2   : > { %v1246_v26 = vadd.f32 %v2166_v0, %v1245_v18  ;;  %v1126_v27 = vmul.f32 1.442695, %v1089_v20  ;;  %v880_v29 = vadd.f32 %v879_v24, %v790_v21  ;;  %651 = vmatmul.bf16.gmra.mxu0 %v1913_v59  ;;  %v699_v18 = vadd.f32 %v2652_v8, %v2648_v6 }
  0xe3   : > { %v2168_v30 = vpop.eup %2167  ;;  %740 = vmatmul.bf16.gmra.mxu1 %v1917_v63 }
  0xe4   : > { %v2170_v34 = vpop.eup %2169  ;;  %v1250_v35 = vsel %vm1249_vm10, %v2166_v0, %v1246_v26  ;;  %2171 = vpow2.f32 %v1126_v27  ;;  %v1258_v33 = vmul.f32 %v2168_v30, %v2644_v1  ;;  %v963_v41 = vmul.f32 %v2571_v25, %v880_v29 }
  0xe5   : > { %v2669_v38 = vadd.f32 1.0, %v2170_v34  ;;  %v1255_v40 = vsel %vm1252_vm11, %v1254_v23, %v1250_v35  ;;  %vm1263_vm12 = vweird.f32 %v2168_v30  ;;  %v697_v0 = vadd.f32 %v2621_v39, %v2618_v36 }
  0xe6   : > { %v1694_v42 = vmul.f32 %v1255_v40, %v1024_v22  ;;  %v1259_v11 = vsub.f32 1.0, %v1258_v33  ;;  %v1033_v45 = vadd.f32 %v2574_v28, %v963_v41  ;;  %vm1264_vm14 = vmor %vm1262_vm13, %vm1263_vm12  ;;  %v960_v33 = vmul.f32 %v2598_v2, %v699_v18  ;;  %v1928_v40 = vld [vmem:[%s2486_s26 + $0xd0] sm:$0xf]  ;;  %v2108_v41 = vld [vmem:[%s2486_s26 + $0xd4] sm:$0xf0] }
  0xe7   : > { %2173 = vrcp.f32 %v2669_v38  ;;  %v2687_v3 = vpop.f32.mrf.mxu0  ;;  %v958_v39 = vmul.f32 %v2598_v2, %v697_v0  ;;  %v1283_v15 = vand.u32 2147483648, %v2669_v38  ;;  %v1281_v21 = vand.u32 2147483647, %v2669_v38 }
  0xe8   : > { %1726 = vst [vmem:[%s2629_s12 + $0x10] sm:$0xff] %v1694_v42  ;;  %v1260_v49 = vmul.f32 %v2168_v30, %v1259_v11  ;;  %v792_v51 = vpop.f32.mrf.mxu2  ;;  %v1090_v52 = vsub.f32 0.0, %v1033_v45  ;;  %v2691_v1 = vpop.f32.mrf.mxu1  ;;  %vm1277_vm1 = vweird.f32 %v2669_v38 }
  0xe9   : > { %v881_v53 = vpop.f32.mrf.mxu3  ;;  %v1028_v26 = vadd.f32 %v2610_v16, %v958_v39  ;;  %v1284_v35 = vor.u32 1.1754944e-38, %v1283_v15  ;;  %vm1282_vm3 = vcmp.eq.f32.partialorder %v1281_v21, 8.507059e+37 }
  0xea   : > { %v2172_v56 = vpop.eup %2171  ;;  %v1261_v58 = vadd.f32 %v2168_v30, %v1260_v49  ;;  %v882_v59 = vadd.f32 %v881_v53, %v792_v51  ;;  %v1128_v63 = vmul.f32 1.442695, %v1090_v52  ;;  %v1929_v52 = vor.u32 %v2108_v41, %v1928_v40 }
  0xeb   : > { %v2683_v61 = vadd.f32 1.0, %v2172_v56  ;;  %v2721_v53 = vor.u32 %v2107_v14, %v1930_v43  ;;  %v1938_v14 = vld [vmem:[%s2486_s26 + $0xe8] sm:$0xf0] }
  0xec   : > { %v1265_v5 = vsel %vm1264_vm14, %v2168_v30, %v1261_v58  ;;  %v965_v55 = vmul.f32 %v2571_v25, %v882_v59 }
  0xed   : > { %v2174_v57 = vpop.eup %2173  ;;  %2175 = vrcp.f32 %v2683_v61  ;;  %v1270_v7 = vsel %vm1267_vm15, %v1269_v62, %v1265_v5  ;;  %834 = vmatmul.bf16.gmra.mxu2 %v1921_v54  ;;  %v1296_v45 = vand.u32 2147483647, %v2683_v61  ;;  %v1298_v46 = vand.u32 2147483648, %v2683_v61 }
  0xee   : > { %v1695_v9 = vmul.f32 %v1270_v7, %v1026_v4  ;;  %2177 = vpow2.f32 %v1128_v63  ;;  %v1273_v36 = vmul.f32 %v2174_v57, %v2669_v38  ;;  %923 = vmatmul.bf16.gmra.mxu3 %v1925_v60  ;;  %v1035_v10 = vadd.f32 %v2574_v28, %v965_v55 }
  0xef   : > { %vm1278_vm0 = vweird.f32 %v2174_v57  ;;  %v2703_v29 = vpop.f32.mrf.mxu0  ;;  %vm1292_vm5 = vweird.f32 %v2683_v61  ;;  %v1030_v62 = vadd.f32 %v2610_v16, %v960_v33  ;;  %vm1297_vm7 = vcmp.eq.f32.partialorder %v1296_v45, 8.507059e+37  ;;  %v2110_v33 = vld [vmem:[%s2486_s26 + $0xe4] sm:$0xf0] }
  0xf0   : > { %1727 = vst [vmem:[%s2629_s12 + $0x18] sm:$0xff] %v1695_v9  ;;  %v1274_v12 = vsub.f32 1.0, %v1273_v36  ;;  %v795_v13 = vpop.f32.mrf.mxu2  ;;  %v1091_v17 = vsub.f32 0.0, %v1035_v10  ;;  %v2708_v31 = vpop.f32.mrf.mxu1  ;;  %vm1279_vm2 = vmor %vm1277_vm1, %vm1278_vm0  ;;  %v702_v63 = vadd.f32 %v2667_v37, %v2664_v32 }
  0xf1   : > { %v884_v19 = vpop.f32.mrf.mxu3 }
  0xf2   : > { %v1275_v20 = vmul.f32 %v2174_v57, %v1274_v12  ;;  %v885_v22 = vadd.f32 %v884_v19, %v795_v13  ;;  %v1130_v27 = vmul.f32 1.442695, %v1091_v17  ;;  %656 = vmatmul.bf16.gmra.mxu0 %v1921_v54  ;;  %v962_v37 = vmul.f32 %v2598_v2, %v702_v63 }
  0xf3   : > { %v2176_v24 = vpop.eup %2175  ;;  %745 = vmatmul.bf16.gmra.mxu1 %v1925_v60  ;;  %v1299_v60 = vor.u32 1.1754944e-38, %v1298_v46 }
  0xf4   : > { %v2178_v30 = vpop.eup %2177  ;;  %v1276_v23 = vadd.f32 %v2174_v57, %v1275_v20  ;;  %v1288_v6 = vmul.f32 %v2176_v24, %v2683_v61  ;;  %v967_v8 = vmul.f32 %v2571_v25, %v885_v22  ;;  %2179 = vpow2.f32 %v1130_v27 }
  0xf5   : > { %v2710_v34 = vadd.f32 1.0, %v2178_v30  ;;  %vm1293_vm4 = vweird.f32 %v2176_v24  ;;  %v1032_v30 = vadd.f32 %v2610_v16, %v962_v37 }
  0xf6   : > { %v1280_v42 = vsel %vm1279_vm2, %v2174_v57, %v1276_v23  ;;  %v1289_v11 = vsub.f32 1.0, %v1288_v6  ;;  %v1037_v38 = vadd.f32 %v2574_v28, %v967_v8  ;;  %vm1294_vm6 = vmor %vm1292_vm5, %vm1293_vm4 }
  0xf7   : > { %2181 = vrcp.f32 %v2710_v34  ;;  %v1285_v44 = vsel %vm1282_vm3, %v1284_v35, %v1280_v42  ;;  %v2728_v0 = vpop.f32.mrf.mxu0  ;;  %v1313_v12 = vand.u32 2147483648, %v2710_v34  ;;  %v1311_v19 = vand.u32 2147483647, %v2710_v34 }
  0xf8   : > { %v1696_v47 = vmul.f32 %v1285_v44, %v1028_v26  ;;  %v1290_v48 = vmul.f32 %v2176_v24, %v1289_v11  ;;  %v1092_v49 = vsub.f32 0.0, %v1037_v38  ;;  %v797_v50 = vpop.f32.mrf.mxu2  ;;  %v2733_v55 = vpop.f32.mrf.mxu1  ;;  %vm1307_vm9 = vweird.f32 %v2710_v34  ;;  %v2109_v38 = vld [vmem:[%s2486_s26 + $0xe4] sm:$0xf] }
  0xf9   : > { %v886_v51 = vpop.f32.mrf.mxu3  ;;  %v1314_v35 = vor.u32 1.1754944e-38, %v1313_v12  ;;  %vm1312_vm11 = vcmp.eq.f32.partialorder %v1311_v19, 8.507059e+37 }
  0xfa   : > { %1728 = vst [vmem:[%s2629_s12 + $0x20] sm:$0xff] %v1696_v47  ;;  %v1291_v56 = vadd.f32 %v2176_v24, %v1290_v48  ;;  %v1132_v54 = vmul.f32 1.442695, %v1092_v49  ;;  %v887_v58 = vadd.f32 %v886_v51, %v797_v50  ;;  %v2180_v59 = vpop.eup %2179  ;;  %v707_v50 = vadd.f32 %v2708_v31, %v2703_v29 }
  0xfb   : > { %v2730_v4 = vadd.f32 1.0, %v2180_v59 }
  0xfc   : > { %v1295_v5 = vsel %vm1294_vm6, %v2176_v24, %v1291_v56  ;;  %2183 = vpow2.f32 %v1132_v54  ;;  %v969_v61 = vmul.f32 %v2571_v25, %v887_v58  ;;  %v704_v24 = vadd.f32 %v2691_v1, %v2687_v3  ;;  %v1936_v1 = vld [vmem:[%s2486_s26 + $0xe0] sm:$0xf] }
  0xfd   : > { %v2182_v57 = vpop.eup %2181  ;;  %v1300_v7 = vsel %vm1297_vm7, %v1299_v60, %v1295_v5  ;;  %839 = vmatmul.bf16.gmra.mxu2 %v1929_v52  ;;  %2185 = vrcp.f32 %v2730_v4  ;;  %v1328_v44 = vand.u32 2147483648, %v2730_v4  ;;  %v2764_v47 = vor.u32 %v2110_v33, %v1936_v1  ;;  %v1944_v33 = vld [vmem:[%s2486_s26 + $0xf0] sm:$0xf] }
  0xfe   : > { %v1697_v9 = vmul.f32 %v1300_v7, %v1030_v62  ;;  %v1303_v36 = vmul.f32 %v2182_v57, %v2710_v34  ;;  %928 = vmatmul.bf16.gmra.mxu3 %v2721_v53  ;;  %v1039_v32 = vadd.f32 %v2574_v28, %v969_v61  ;;  %vm1308_vm8 = vweird.f32 %v2182_v57 }
  0xff   : > { %v2747_v26 = vpop.f32.mrf.mxu0  ;;  %vm1309_vm10 = vmor %vm1307_vm9, %vm1308_vm8  ;;  %v964_v42 = vmul.f32 %v2598_v2, %v704_v24  ;;  %v1326_v49 = vand.u32 2147483647, %v2730_v4  ;;  %v1941_v54 = vor.u32 %v2109_v38, %v1938_v14  ;;  %vm1322_vm13 = vweird.f32 %v2730_v4 }
 0x100   : > { %1729 = vst [vmem:[%s2629_s12 + $0x28] sm:$0xff] %v1697_v9  ;;  %v1304_v39 = vsub.f32 1.0, %v1303_v36  ;;  %v800_v10 = vpop.f32.mrf.mxu2  ;;  %v1093_v13 = vsub.f32 0.0, %v1039_v32  ;;  %v2752_v8 = vpop.f32.mrf.mxu1  ;;  %v1329_v63 = vor.u32 1.1754944e-38, %v1328_v44  ;;  %v966_v7 = vmul.f32 %v2598_v2, %v707_v50 }
 0x101   : > { %v889_v15 = vpop.f32.mrf.mxu3  ;;  %v1034_v58 = vadd.f32 %v2610_v16, %v964_v42  ;;  %vm1327_vm15 = vcmp.eq.f32.partialorder %v1326_v49, 8.507059e+37  ;;  %v1946_v42 = vld [vmem:[%s2486_s26 + $0xf8] sm:$0xf0] }
 0x102   : > { %v2184_v17 = vpop.eup %2183  ;;  %v1305_v18 = vmul.f32 %v2182_v57, %v1304_v39  ;;  %v890_v20 = vadd.f32 %v889_v15, %v800_v10  ;;  %v1134_v22 = vmul.f32 1.442695, %v1093_v13  ;;  %661 = vmatmul.bf16.gmra.mxu0 %v1929_v52  ;;  %v1036_v15 = vadd.f32 %v2610_v16, %v966_v7 }
 0x103   : > { %v2743_v21 = vadd.f32 1.0, %v2184_v17  ;;  %v2186_v27 = vpop.eup %2185  ;;  %750 = vmatmul.bf16.gmra.mxu1 %v2721_v53 }
 0x104   : > { %v1306_v23 = vadd.f32 %v2182_v57, %v1305_v18  ;;  %v971_v6 = vmul.f32 %v2571_v25, %v890_v20  ;;  %v1318_v3 = vmul.f32 %v2186_v27, %v2730_v4  ;;  %vm1323_vm12 = vweird.f32 %v2186_v27 }
 0x105   : > { %2187 = vrcp.f32 %v2743_v21  ;;  %vm1324_vm14 = vmor %vm1322_vm13, %vm1323_vm12  ;;  %v1343_v37 = vand.u32 2147483648, %v2743_v21  ;;  %v1341_v10 = vand.u32 2147483647, %v2743_v21  ;;  %vm1337_vm1 = vweird.f32 %v2743_v21 }
 0x106   : > { %v1310_v40 = vsel %vm1309_vm10, %v2182_v57, %v1306_v23  ;;  %2189 = vpow2.f32 %v1134_v22  ;;  %v1041_v41 = vadd.f32 %v2574_v28, %v971_v6  ;;  %v1319_v11 = vsub.f32 1.0, %v1318_v3 }
 0x107   : > { %v1315_v34 = vsel %vm1312_vm11, %v1314_v35, %v1310_v40  ;;  %v2772_v62 = vpop.f32.mrf.mxu0  ;;  %vm1342_vm3 = vcmp.eq.f32.partialorder %v1341_v10, 8.507059e+37  ;;  %v2112_v40 = vld [vmem:[%s2486_s26 + $0xf4] sm:$0xf0] }
 0x108   : > { %v1698_v43 = vmul.f32 %v1315_v34, %v1032_v30  ;;  %v1094_v45 = vsub.f32 0.0, %v1041_v41  ;;  %v802_v46 = vpop.f32.mrf.mxu2  ;;  %v1320_v48 = vmul.f32 %v2186_v27, %v1319_v11  ;;  %v2776_v31 = vpop.f32.mrf.mxu1  ;;  %v709_v30 = vadd.f32 %v2733_v55, %v2728_v0  ;;  %v2111_v34 = vld [vmem:[%s2486_s26 + $0xf4] sm:$0xf] }
 0x109   : > { %v891_v51 = vpop.f32.mrf.mxu3  ;;  %v2808_v44 = vor.u32 %v2112_v40, %v1944_v33  ;;  %v1949_v50 = vor.u32 %v2111_v34, %v1946_v42 }
 0x10a   : > { %1730 = vst [vmem:[%s2629_s12 + $0x30] sm:$0xff] %v1698_v43  ;;  %v1136_v52 = vmul.f32 1.442695, %v1094_v45  ;;  %v892_v56 = vadd.f32 %v891_v51, %v802_v46  ;;  %v1321_v59 = vadd.f32 %v2186_v27, %v1320_v48  ;;  %v968_v11 = vmul.f32 %v2598_v2, %v709_v30 }
 0x10b   : > { %v2188_v53 = vpop.eup %2187  ;;  %v712_v48 = vadd.f32 %v2752_v8, %v2747_v26  ;;  %v714_v30 = vadd.f32 %v2776_v31, %v2772_v62 }
 0x10c   : > { %v2190_v60 = vpop.eup %2189  ;;  %2191 = vpow2.f32 %v1136_v52  ;;  %v1333_v5 = vmul.f32 %v2188_v53, %v2743_v21  ;;  %v973_v29 = vmul.f32 %v2571_v25, %v892_v56  ;;  %v1325_v57 = vsel %vm1324_vm14, %v2186_v27, %v1321_v59 }
 0x10d   : > { %v2778_v61 = vadd.f32 1.0, %v2190_v60  ;;  %844 = vmatmul.bf16.gmra.mxu2 %v2764_v47  ;;  %v1330_v4 = vsel %vm1327_vm15, %v1329_v63, %v1325_v57  ;;  %vm1338_vm0 = vweird.f32 %v2188_v53  ;;  %v1344_v27 = vor.u32 1.1754944e-38, %v1343_v37 }
 0x10e   : > { %v1334_v9 = vsub.f32 1.0, %v1333_v5  ;;  %v1043_v36 = vadd.f32 %v2574_v28, %v973_v29  ;;  %933 = vmatmul.bf16.gmra.mxu3 %v1941_v54  ;;  %v1699_v32 = vmul.f32 %v1330_v4, %v1034_v58  ;;  %vm1339_vm2 = vmor %vm1337_vm1, %vm1338_vm0  ;;  %v1038_v26 = vadd.f32 %v2610_v16, %v968_v11 }
 0x10f   : > { %2193 = vrcp.f32 %v2778_v61  ;;  %v2793_v23 = vpop.f32.mrf.mxu0  ;;  %v1356_v45 = vand.u32 2147483647, %v2778_v61  ;;  %v1358_v46 = vand.u32 2147483648, %v2778_v61  ;;  %vm1352_vm5 = vweird.f32 %v2778_v61 }
 0x110   : > { %v1335_v39 = vmul.f32 %v2188_v53, %v1334_v9  ;;  %v1095_v12 = vsub.f32 0.0, %v1043_v36  ;;  %v805_v13 = vpop.f32.mrf.mxu2  ;;  %1731 = vst [vmem:[%s2629_s12 + $0x38] sm:$0xff] %v1699_v32  ;;  %v2796_v35 = vpop.f32.mrf.mxu1  ;;  %v972_v62 = vmul.f32 %v2598_v2, %v714_v30 }
 0x111   : > { %v894_v17 = vpop.f32.mrf.mxu3  ;;  %v1359_v8 = vor.u32 1.1754944e-38, %v1358_v46  ;;  %vm1357_vm7 = vcmp.eq.f32.partialorder %v1356_v45, 8.507059e+37 }
 0x112   : > { %v2192_v18 = vpop.eup %2191  ;;  %v1336_v19 = vadd.f32 %v2188_v53, %v1335_v39  ;;  %v1138_v20 = vmul.f32 1.442695, %v1095_v12  ;;  %v895_v22 = vadd.f32 %v894_v17, %v805_v13  ;;  %666 = vmatmul.bf16.gmra.mxu0 %v2764_v47 }
 0x113   : > { %v2789_v24 = vadd.f32 1.0, %v2192_v18  ;;  %755 = vmatmul.bf16.gmra.mxu1 %v1941_v54 }
 0x114   : > { %v1340_v6 = vsel %vm1339_vm2, %v2188_v53, %v1336_v19  ;;  %2195 = vpow2.f32 %v1138_v20  ;;  %v975_v21 = vmul.f32 %v2571_v25, %v895_v22 }
 0x115   : > { %v2194_v3 = vpop.eup %2193  ;;  %2197 = vrcp.f32 %v2789_v24  ;;  %v1345_v1 = vsel %vm1342_vm3, %v1344_v27, %v1340_v6  ;;  %v1373_v4 = vand.u32 2147483648, %v2789_v24  ;;  %v1371_v37 = vand.u32 2147483647, %v2789_v24 }
 0x116   : > { %v1700_v41 = vmul.f32 %v1345_v1, %v1036_v15  ;;  %v1348_v0 = vmul.f32 %v2194_v3, %v2778_v61  ;;  %v1045_v55 = vadd.f32 %v2574_v28, %v975_v21  ;;  %vm1353_vm4 = vweird.f32 %v2194_v3 }
 0x117   : > { %v2816_v58 = vpop.f32.mrf.mxu0  ;;  %vm1354_vm6 = vmor %vm1352_vm5, %vm1353_vm4  ;;  %v970_v61 = vmul.f32 %v2598_v2, %v712_v48  ;;  %vm1367_vm9 = vweird.f32 %v2789_v24  ;;  %v1374_v22 = vor.u32 1.1754944e-38, %v1373_v4  ;;  %vm1372_vm11 = vcmp.eq.f32.partialorder %v1371_v37, 8.507059e+37 }
 0x118   : > { %1732 = vst [vmem:[%s2629_s12 + $0x40] sm:$0xff] %v1700_v41  ;;  %v1349_v38 = vsub.f32 1.0, %v1348_v0  ;;  %v1096_v14 = vsub.f32 0.0, %v1045_v55  ;;  %v807_v43 = vpop.f32.mrf.mxu2  ;;  %v2820_v63 = vpop.f32.mrf.mxu1  ;;  %v1042_v48 = vadd.f32 %v2610_v16, %v972_v62 }
 0x119   : > { %v896_v49 = vpop.f32.mrf.mxu3  ;;  %v1040_v15 = vadd.f32 %v2610_v16, %v970_v61 }
 0x11a   : > { %v2196_v51 = vpop.eup %2195  ;;  %v1350_v47 = vmul.f32 %v2194_v3, %v1349_v38  ;;  %v1140_v52 = vmul.f32 1.442695, %v1096_v14  ;;  %v897_v56 = vadd.f32 %v896_v49, %v807_v43  ;;  %v717_v38 = vadd.f32 %v2796_v35, %v2793_v23 }
 0x11b   : > { %v2198_v54 = vpop.eup %2197  ;;  %v2814_v53 = vadd.f32 1.0, %v2196_v51 }
 0x11c   : > { %v1351_v59 = vadd.f32 %v2194_v3, %v1350_v47  ;;  %2199 = vpow2.f32 %v1140_v52  ;;  %v1363_v60 = vmul.f32 %v2198_v54, %v2789_v24  ;;  %v977_v5 = vmul.f32 %v2571_v25, %v897_v56 }
 0x11d   : > { %2201 = vrcp.f32 %v2814_v53  ;;  %849 = vmatmul.bf16.gmra.mxu2 %v2808_v44  ;;  %vm1368_vm8 = vweird.f32 %v2198_v54  ;;  %v1388_v31 = vand.u32 2147483648, %v2814_v53  ;;  %v1386_v34 = vand.u32 2147483647, %v2814_v53 }
 0x11e   : > { %v1355_v29 = vsel %vm1354_vm6, %v2194_v3, %v1351_v59  ;;  %v1364_v57 = vsub.f32 1.0, %v1363_v60  ;;  %938 = vmatmul.bf16.gmra.mxu3 %v1949_v50  ;;  %v1047_v9 = vadd.f32 %v2574_v28, %v977_v5  ;;  %vm1369_vm10 = vmor %vm1367_vm9, %vm1368_vm8  ;;  %vm1382_vm13 = vweird.f32 %v2814_v53 }
 0x11f   : > { %v1360_v7 = vsel %vm1357_vm7, %v1359_v8, %v1355_v29  ;;  %v2837_v6 = vpop.f32.mrf.mxu0  ;;  %v1389_v49 = vor.u32 1.1754944e-38, %v1388_v31  ;;  %vm1387_vm15 = vcmp.eq.f32.partialorder %v1386_v34, 8.507059e+37  ;;  %v974_v59 = vmul.f32 %v2598_v2, %v717_v38 }
 0x120   : > { %v1701_v36 = vmul.f32 %v1360_v7, %v1038_v26  ;;  %v1365_v32 = vmul.f32 %v2198_v54, %v1364_v57  ;;  %v810_v39 = vpop.f32.mrf.mxu2  ;;  %v1097_v10 = vsub.f32 0.0, %v1047_v9  ;;  %v2841_v24 = vpop.f32.mrf.mxu1 }
 0x121   : > { %v899_v12 = vpop.f32.mrf.mxu3  ;;  %v1044_v9 = vadd.f32 %v2610_v16, %v974_v59 }
 0x122   : > { %v2200_v13 = vpop.eup %2199  ;;  %1733 = vst [vmem:[%s2629_s12 + $0x48] sm:$0xff] %v1701_v36  ;;  %v1366_v17 = vadd.f32 %v2198_v54, %v1365_v32  ;;  %v900_v18 = vadd.f32 %v899_v12, %v810_v39  ;;  %v1142_v27 = vmul.f32 1.442695, %v1097_v10  ;;  %671 = vmatmul.bf16.gmra.mxu0 %v2808_v44  ;;  %v719_v12 = vadd.f32 %v2820_v63, %v2816_v58 }
 0x123   : > { %v2202_v19 = vpop.eup %2201  ;;  %v2833_v20 = vadd.f32 1.0, %v2200_v13  ;;  %760 = vmatmul.bf16.gmra.mxu1 %v1949_v50 }
 0x124   : > { %v1370_v21 = vsel %vm1369_vm10, %v2198_v54, %v1366_v17  ;;  %v1378_v3 = vmul.f32 %v2202_v19, %v2814_v53  ;;  %v979_v1 = vmul.f32 %v2571_v25, %v900_v18  ;;  %vm1383_vm12 = vweird.f32 %v2202_v19 }
 0x125   : > { %2203 = vrcp.f32 %v2833_v20  ;;  %v1375_v33 = vsel %vm1372_vm11, %v1374_v22, %v1370_v21  ;;  %vm1384_vm14 = vmor %vm1382_vm13, %vm1383_vm12  ;;  %v1403_v26 = vand.u32 2147483648, %v2833_v20  ;;  %v1401_v29 = vand.u32 2147483647, %v2833_v20 }
 0x126   : > { %v1702_v40 = vmul.f32 %v1375_v33, %v1040_v15  ;;  %2205 = vpow2.f32 %v1142_v27  ;;  %v1379_v41 = vsub.f32 1.0, %v1378_v3  ;;  %v1049_v0 = vadd.f32 %v2574_v28, %v979_v1 }
 0x127   : > { %v2854_v50 = vpop.f32.mrf.mxu0  ;;  %vm1397_vm1 = vweird.f32 %v2833_v20  ;;  %v1404_v39 = vor.u32 1.1754944e-38, %v1403_v26  ;;  %vm1402_vm3 = vcmp.eq.f32.partialorder %v1401_v29, 8.507059e+37  ;;  %v976_v30 = vmul.f32 %v2598_v2, %v719_v12 }
 0x128   : > { %1734 = vst [vmem:[%s2629_s12 + $0x50] sm:$0xff] %v1702_v40  ;;  %v1380_v55 = vmul.f32 %v2202_v19, %v1379_v41  ;;  %v1098_v42 = vsub.f32 0.0, %v1049_v0  ;;  %v812_v11 = vpop.f32.mrf.mxu2  ;;  %v2857_v35 = vpop.f32.mrf.mxu1  ;;  %v722_v33 = vadd.f32 %v2841_v24, %v2837_v6 }
 0x129   : > { %v901_v14 = vpop.f32.mrf.mxu3 }
 0x12a   : > { %v1381_v43 = vadd.f32 %v2202_v19, %v1380_v55  ;;  %v1144_v44 = vmul.f32 1.442695, %v1098_v42  ;;  %v902_v45 = vadd.f32 %v901_v14, %v812_v11  ;;  %v1046_v55 = vadd.f32 %v2610_v16, %v976_v30 }
 0x12b   : > { %v2204_v46 = vpop.eup %2203 }
 0x12c   : > { %v2206_v51 = vpop.eup %2205  ;;  %v1385_v47 = vsel %vm1384_vm14, %v2202_v19, %v1381_v43  ;;  %2207 = vpow2.f32 %v1144_v44  ;;  %v1393_v23 = vmul.f32 %v2204_v46, %v2833_v20  ;;  %v981_v54 = vmul.f32 %v2571_v25, %v902_v45 }
 0x12d   : > { %v2859_v52 = vadd.f32 1.0, %v2206_v51  ;;  %v1390_v56 = vsel %vm1387_vm15, %v1389_v49, %v1385_v47  ;;  %vm1398_vm0 = vweird.f32 %v2204_v46  ;;  %v978_v45 = vmul.f32 %v2598_v2, %v722_v33 }
 0x12e   : > { %v1703_v53 = vmul.f32 %v1390_v56, %v1042_v48  ;;  %v1394_v60 = vsub.f32 1.0, %v1393_v23  ;;  %v1051_v8 = vadd.f32 %v2574_v28, %v981_v54  ;;  %vm1399_vm2 = vmor %vm1397_vm1, %vm1398_vm0 }
 0x12f   : > { %2209 = vrcp.f32 %v2859_v52  ;;  %v2874_v13 = vpop.f32.mrf.mxu0  ;;  %v1418_v3 = vand.u32 2147483648, %v2859_v52  ;;  %v1416_v0 = vand.u32 2147483647, %v2859_v52  ;;  %vm1412_vm5 = vweird.f32 %v2859_v52 }
 0x130   : > { %1735 = vst [vmem:[%s2629_s12 + $0x58] sm:$0xff] %v1703_v53  ;;  %v1395_v5 = vmul.f32 %v2204_v46, %v1394_v60  ;;  %v815_v61 = vpop.f32.mrf.mxu2  ;;  %v1099_v57 = vsub.f32 0.0, %v1051_v8  ;;  %v2877_v18 = vpop.f32.mrf.mxu1  ;;  %v1048_v59 = vadd.f32 %v2610_v16, %v978_v45 }
 0x131   : > { %v904_v7 = vpop.f32.mrf.mxu3  ;;  %v1419_v44 = vor.u32 1.1754944e-38, %v1418_v3  ;;  %vm1417_vm7 = vcmp.eq.f32.partialorder %v1416_v0, 8.507059e+37 }
 0x132   : > { %v2208_v4 = vpop.eup %2207  ;;  %v1396_v36 = vadd.f32 %v2204_v46, %v1395_v5  ;;  %v905_v32 = vadd.f32 %v904_v7, %v815_v61  ;;  %v1146_v10 = vmul.f32 1.442695, %v1099_v57 }
 0x133   : > { %v2870_v37 = vadd.f32 1.0, %v2208_v4 }
 0x134   : > { %v1400_v15 = vsel %vm1399_vm2, %v2204_v46, %v1396_v36  ;;  %v983_v17 = vmul.f32 %v2571_v25, %v905_v32 }
 0x135   : > { %v2210_v19 = vpop.eup %2209  ;;  %2211 = vrcp.f32 %v2870_v37  ;;  %v1405_v20 = vsel %vm1402_vm3, %v1404_v39, %v1400_v15  ;;  %v1431_v47 = vand.u32 2147483647, %v2870_v37  ;;  %v1433_v23 = vand.u32 2147483648, %v2870_v37 }
 0x136   : > { %v1704_v22 = vmul.f32 %v1405_v20, %v1044_v9  ;;  %2213 = vpow2.f32 %v1146_v10  ;;  %v1408_v27 = vmul.f32 %v2210_v19, %v2859_v52  ;;  %v1053_v58 = vadd.f32 %v2574_v28, %v983_v17 }
 0x137   : > { %vm1413_vm4 = vweird.f32 %v2210_v19  ;;  %v2889_v42 = vpop.f32.mrf.mxu0  ;;  %vm1427_vm9 = vweird.f32 %v2870_v37  ;;  %vm1432_vm11 = vcmp.eq.f32.partialorder %v1431_v47, 8.507059e+37  ;;  %v1434_v61 = vor.u32 1.1754944e-38, %v1433_v23 }
 0x138   : > { %1736 = vst [vmem:[%s2629_s12 + $0x60] sm:$0xff] %v1704_v22  ;;  %v1409_v63 = vsub.f32 1.0, %v1408_v27  ;;  %v817_v21 = vpop.f32.mrf.mxu2  ;;  %v1100_v1 = vsub.f32 0.0, %v1053_v58  ;;  %v2894_v24 = vpop.f32.mrf.mxu1  ;;  %vm1414_vm6 = vmor %vm1412_vm5, %vm1413_vm4 }
 0x139   : > { %v906_v40 = vpop.f32.mrf.mxu3 }
 0x13a   : > { %v1410_v41 = vmul.f32 %v2210_v19, %v1409_v63  ;;  %v907_v62 = vadd.f32 %v906_v40, %v817_v21  ;;  %v1148_v34 = vmul.f32 1.442695, %v1100_v1  ;;  %v727_v1 = vadd.f32 %v2877_v18, %v2874_v13 }
 0x13b   : > { %v2212_v31 = vpop.eup %2211 }
 0x13c   : > { %v2214_v11 = vpop.eup %2213  ;;  %v1411_v38 = vadd.f32 %v2210_v19, %v1410_v41  ;;  %v1423_v14 = vmul.f32 %v2212_v31, %v2870_v37  ;;  %v985_v6 = vmul.f32 %v2571_v25, %v907_v62  ;;  %2215 = vpow2.f32 %v1148_v34 }
 0x13d   : > { %v2896_v43 = vadd.f32 1.0, %v2214_v11  ;;  %vm1428_vm8 = vweird.f32 %v2212_v31  ;;  %v724_v37 = vadd.f32 %v2857_v35, %v2854_v50 }
 0x13e   : > { %v1415_v46 = vsel %vm1414_vm6, %v2210_v19, %v1411_v38  ;;  %v1424_v48 = vsub.f32 1.0, %v1423_v14  ;;  %v1055_v49 = vadd.f32 %v2574_v28, %v985_v6  ;;  %vm1429_vm10 = vmor %vm1427_vm9, %vm1428_vm8  ;;  %v982_v38 = vmul.f32 %v2598_v2, %v727_v1 }
 0x13f   : > { %2217 = vrcp.f32 %v2896_v43  ;;  %v1420_v51 = vsel %vm1417_vm7, %v1419_v44, %v1415_v46  ;;  %v2906_v57 = vpop.f32.mrf.mxu0  ;;  %v980_v20 = vmul.f32 %v2598_v2, %v724_v37  ;;  %v1448_v22 = vand.u32 2147483648, %v2896_v43 }
 0x140   : > { %v1705_v52 = vmul.f32 %v1420_v51, %v1046_v55  ;;  %v1425_v56 = vmul.f32 %v2212_v31, %v1424_v48  ;;  %v1101_v54 = vsub.f32 0.0, %v1055_v49  ;;  %v820_v53 = vpop.f32.mrf.mxu2  ;;  %v2911_v36 = vpop.f32.mrf.mxu1  ;;  %v1446_v50 = vand.u32 2147483647, %v2896_v43 }
 0x141   : > { %v909_v60 = vpop.f32.mrf.mxu3  ;;  %vm1442_vm13 = vweird.f32 %v2896_v43  ;;  %v1449_v55 = vor.u32 1.1754944e-38, %v1448_v22 }
 0x142   : > { %1737 = vst [vmem:[%s2629_s12 + $0x68] sm:$0xff] %v1705_v52  ;;  %v1426_v26 = vadd.f32 %v2212_v31, %v1425_v56  ;;  %v1150_v8 = vmul.f32 1.442695, %v1101_v54  ;;  %v910_v5 = vadd.f32 %v909_v60, %v820_v53  ;;  %v2216_v29 = vpop.eup %2215  ;;  %vm1447_vm15 = vcmp.eq.f32.partialorder %v1446_v50, 8.507059e+37 }
 0x143   : > { %v2908_v7 = vadd.f32 1.0, %v2216_v29  ;;  %v1052_v52 = vadd.f32 %v2610_v16, %v982_v38  ;;  %v729_v54 = vadd.f32 %v2894_v24, %v2889_v42 }
 0x144   : > { %v1430_v4 = vsel %vm1429_vm10, %v2212_v31, %v1426_v26  ;;  %2219 = vpow2.f32 %v1150_v8  ;;  %v987_v9 = vmul.f32 %v2571_v25, %v910_v5  ;;  %v1050_v31 = vadd.f32 %v2610_v16, %v980_v20 }
 0x145   : > { %v2218_v32 = vpop.eup %2217  ;;  %v1435_v39 = vsel %vm1432_vm11, %v1434_v61, %v1430_v4  ;;  %2221 = vrcp.f32 %v2908_v7  ;;  %v1461_v48 = vand.u32 2147483647, %v2908_v7  ;;  %vm1457_vm1 = vweird.f32 %v2908_v7 }
 0x146   : > { %v1706_v10 = vmul.f32 %v1435_v39, %v1048_v59  ;;  %v1438_v12 = vmul.f32 %v2218_v32, %v2896_v43  ;;  %v1057_v15 = vadd.f32 %v2574_v28, %v987_v9  ;;  %vm1443_vm12 = vweird.f32 %v2218_v32 }
 0x147   : > { %v2926_v33 = vpop.f32.mrf.mxu0  ;;  %vm1444_vm14 = vmor %vm1442_vm13, %vm1443_vm12  ;;  %v1463_v43 = vand.u32 2147483648, %v2908_v7  ;;  %vm1462_vm3 = vcmp.eq.f32.partialorder %v1461_v48, 8.507059e+37  ;;  %v984_v9 = vmul.f32 %v2598_v2, %v729_v54 }
 0x148   : > { %1738 = vst [vmem:[%s2629_s12 + $0x70] sm:$0xff] %v1706_v10  ;;  %v1439_v17 = vsub.f32 1.0, %v1438_v12  ;;  %v822_v19 = vpop.f32.mrf.mxu2  ;;  %v1102_v27 = vsub.f32 0.0, %v1057_v15  ;;  %v2930_v62 = vpop.f32.mrf.mxu1 }
 0x149   : > { %v911_v30 = vpop.f32.mrf.mxu3  ;;  %v1464_v59 = vor.u32 1.1754944e-38, %v1463_v43  ;;  %v734_v48 = vadd.f32 %v2930_v62, %v2926_v33 }
 0x14a   : > { %v2220_v58 = vpop.eup %2219  ;;  %v1440_v63 = vmul.f32 %v2218_v32, %v1439_v17  ;;  %v912_v35 = vadd.f32 %v911_v30, %v822_v19  ;;  %v1152_v3 = vmul.f32 1.442695, %v1102_v27  ;;  %v1054_v30 = vadd.f32 %v2610_v16, %v984_v9 }
 0x14b   : > { %v2922_v21 = vadd.f32 1.0, %v2220_v58  ;;  %v2222_v40 = vpop.eup %2221 }
 0x14c   : > { %v1441_v41 = vadd.f32 %v2218_v32, %v1440_v63  ;;  %v989_v0 = vmul.f32 %v2571_v25, %v912_v35  ;;  %v1453_v34 = vmul.f32 %v2222_v40, %v2908_v7  ;;  %vm1458_vm0 = vweird.f32 %v2222_v40 }
 0x14d   : > { %2223 = vrcp.f32 %v2922_v21  ;;  %vm1459_vm2 = vmor %vm1457_vm1, %vm1458_vm0  ;;  %v1476_v37 = vand.u32 2147483647, %v2922_v21  ;;  %vm1472_vm5 = vweird.f32 %v2922_v21  ;;  %v732_v63 = vadd.f32 %v2911_v36, %v2906_v57 }
 0x14e   : > { %v1445_v13 = vsel %vm1444_vm14, %v2218_v32, %v1441_v41  ;;  %2225 = vpow2.f32 %v1152_v3  ;;  %v1059_v18 = vadd.f32 %v2574_v28, %v989_v0  ;;  %v1454_v14 = vsub.f32 1.0, %v1453_v34 }
 0x14f   : > { %v1450_v11 = vsel %vm1447_vm15, %v1449_v55, %v1445_v13  ;;  %v2946_v8 = vpop.f32.mrf.mxu0  ;;  %v1478_v32 = vand.u32 2147483648, %v2922_v21  ;;  %vm1477_vm7 = vcmp.eq.f32.partialorder %v1476_v37, 8.507059e+37 }
 0x150   : > { %v1707_v6 = vmul.f32 %v1450_v11, %v1050_v31  ;;  %v1103_v44 = vsub.f32 0.0, %v1059_v18  ;;  %v825_v45 = vpop.f32.mrf.mxu2  ;;  %v1455_v46 = vmul.f32 %v2222_v40, %v1454_v14  ;;  %v2950_v61 = vpop.f32.mrf.mxu1  ;;  %v986_v31 = vmul.f32 %v2598_v2, %v732_v63 }
 0x151   : > { %v914_v49 = vpop.f32.mrf.mxu3  ;;  %v1479_v58 = vor.u32 1.1754944e-38, %v1478_v32 }
 0x152   : > { %1739 = vst [vmem:[%s2629_s12 + $0x78] sm:$0xff] %v1707_v6  ;;  %v1154_v51 = vmul.f32 1.442695, %v1103_v44  ;;  %v915_v47 = vadd.f32 %v914_v49, %v825_v45  ;;  %v1456_v56 = vadd.f32 %v2222_v40, %v1455_v46  ;;  %v1056_v46 = vadd.f32 %v2610_v16, %v986_v31 }
 0x153   : > { %v2224_v23 = vpop.eup %2223 }
 0x154   : > { %v2226_v53 = vpop.eup %2225  ;;  %2227 = vpow2.f32 %v1154_v51  ;;  %v1468_v60 = vmul.f32 %v2224_v23, %v2922_v21  ;;  %v991_v26 = vmul.f32 %v2571_v25, %v915_v47  ;;  %v1460_v29 = vsel %vm1459_vm2, %v2222_v40, %v1456_v56 }
 0x155   : > { %v2948_v5 = vadd.f32 1.0, %v2226_v53  ;;  %v1465_v7 = vsel %vm1462_vm3, %v1464_v59, %v1460_v29  ;;  %vm1473_vm4 = vweird.f32 %v2224_v23  ;;  %v988_v53 = vmul.f32 %v2598_v2, %v734_v48 }
 0x156   : > { %v1469_v4 = vsub.f32 1.0, %v1468_v60  ;;  %v1061_v42 = vadd.f32 %v2574_v28, %v991_v26  ;;  %v1708_v24 = vmul.f32 %v1465_v7, %v1052_v52  ;;  %vm1474_vm6 = vmor %vm1472_vm5, %vm1473_vm4 }
 0x157   : > { %2229 = vrcp.f32 %v2948_v5  ;;  %v2968_v0 = vpop.f32.mrf.mxu0  ;;  %v1491_v13 = vand.u32 2147483647, %v2948_v5  ;;  %v1493_v18 = vand.u32 2147483648, %v2948_v5  ;;  %vm1487_vm9 = vweird.f32 %v2948_v5 }
 0x158   : > { %v1470_v39 = vmul.f32 %v2224_v23, %v1469_v4  ;;  %v1104_v10 = vsub.f32 0.0, %v1061_v42  ;;  %v827_v12 = vpop.f32.mrf.mxu2  ;;  %1740 = vst [vmem:[%s2629_s12 + $0x80] sm:$0xff] %v1708_v24  ;;  %v2971_v55 = vpop.f32.mrf.mxu1  ;;  %v737_v4 = vadd.f32 %v2950_v61, %v2946_v8 }
 0x159   : > { %v916_v15 = vpop.f32.mrf.mxu3  ;;  %v1494_v47 = vor.u32 1.1754944e-38, %v1493_v18  ;;  %vm1492_vm11 = vcmp.eq.f32.partialorder %v1491_v13, 8.507059e+37  ;;  %v739_v18 = vadd.f32 %v2971_v55, %v2968_v0 }
 0x15a   : > { %v2228_v17 = vpop.eup %2227  ;;  %v1471_v19 = vadd.f32 %v2224_v23, %v1470_v39  ;;  %v1156_v20 = vmul.f32 1.442695, %v1104_v10  ;;  %v917_v22 = vadd.f32 %v916_v15, %v827_v12  ;;  %v1058_v12 = vadd.f32 %v2610_v16, %v988_v53 }
 0x15b   : > { %v2959_v27 = vadd.f32 1.0, %v2228_v17  ;;  %v992_v55 = vmul.f32 %v2598_v2, %v739_v18 }
 0x15c   : > { %v1475_v50 = vsel %vm1474_vm6, %v2224_v23, %v1471_v19  ;;  %2231 = vpow2.f32 %v1156_v20  ;;  %v993_v35 = vmul.f32 %v2571_v25, %v917_v22  ;;  %v990_v22 = vmul.f32 %v2598_v2, %v737_v4 }
 0x15d   : > { %v2230_v3 = vpop.eup %2229  ;;  %2233 = vrcp.f32 %v2959_v27  ;;  %v1480_v21 = vsel %vm1477_vm7, %v1479_v58, %v1475_v50  ;;  %v1508_v33 = vand.u32 2147483648, %v2959_v27  ;;  %v1506_v26 = vand.u32 2147483647, %v2959_v27 }
 0x15e   : > { %v1709_v1 = vmul.f32 %v1480_v21, %v1054_v30  ;;  %v1483_v40 = vmul.f32 %v2230_v3, %v2948_v5  ;;  %v1063_v41 = vadd.f32 %v2574_v28, %v993_v35  ;;  %vm1488_vm8 = vweird.f32 %v2230_v3 }
 0x15f   : > { %vm1489_vm10 = vmor %vm1487_vm9, %vm1488_vm8  ;;  %v2989_v29 = vpop.f32.mrf.mxu0  ;;  %vm1502_vm13 = vweird.f32 %v2959_v27  ;;  %v1509_v15 = vor.u32 1.1754944e-38, %v1508_v33  ;;  %vm1507_vm15 = vcmp.eq.f32.partialorder %v1506_v26, 8.507059e+37 }
 0x160   : > { %1741 = vst [vmem:[%s2629_s12 + $0x88] sm:$0xff] %v1709_v1  ;;  %v1484_v57 = vsub.f32 1.0, %v1483_v40  ;;  %v1105_v36 = vsub.f32 0.0, %v1063_v41  ;;  %v830_v34 = vpop.f32.mrf.mxu2  ;;  %v2993_v24 = vpop.f32.mrf.mxu1  ;;  %v1060_v1 = vadd.f32 %v2610_v16, %v990_v22 }
 0x161   : > { %v919_v11 = vpop.f32.mrf.mxu3  ;;  %v742_v26 = vadd.f32 %v2993_v24, %v2989_v29 }
 0x162   : > { %v2232_v38 = vpop.eup %2231  ;;  %v1485_v14 = vmul.f32 %v2230_v3, %v1484_v57  ;;  %v1158_v6 = vmul.f32 1.442695, %v1105_v36  ;;  %v920_v43 = vadd.f32 %v919_v11, %v830_v34 }
 0x163   : > { %v2234_v44 = vpop.eup %2233  ;;  %v2976_v45 = vadd.f32 1.0, %v2232_v38 }
 0x164   : > { %v1486_v49 = vadd.f32 %v2230_v3, %v1485_v14  ;;  %2235 = vpow2.f32 %v1158_v6  ;;  %v1498_v51 = vmul.f32 %v2234_v44, %v2959_v27  ;;  %v995_v23 = vmul.f32 %v2571_v25, %v920_v43 }
 0x165   : > { %2237 = vrcp.f32 %v2976_v45  ;;  %vm1503_vm12 = vweird.f32 %v2234_v44  ;;  %v1523_v63 = vand.u32 2147483648, %v2976_v45  ;;  %v1521_v35 = vand.u32 2147483647, %v2976_v45 }
 0x166   : > { %v1490_v52 = vsel %vm1489_vm10, %v2230_v3, %v1486_v49  ;;  %v1499_v56 = vsub.f32 1.0, %v1498_v51  ;;  %v1065_v62 = vadd.f32 %v2574_v28, %v995_v23  ;;  %vm1504_vm14 = vmor %vm1502_vm13, %vm1503_vm12  ;;  %vm1517_vm1 = vweird.f32 %v2976_v45 }
 0x167   : > { %v1495_v54 = vsel %vm1492_vm11, %v1494_v47, %v1490_v52  ;;  %v654_v36 = vpop.f32.mrf.mxu0  ;;  %v1524_v13 = vor.u32 1.1754944e-38, %v1523_v63  ;;  %vm1522_vm3 = vcmp.eq.f32.partialorder %v1521_v35, 8.507059e+37 }
 0x168   : > { %v1710_v59 = vmul.f32 %v1495_v54, %v1056_v46  ;;  %v1500_v60 = vmul.f32 %v2234_v44, %v1499_v56  ;;  %v832_v5 = vpop.f32.mrf.mxu2  ;;  %v1106_v7 = vsub.f32 0.0, %v1065_v62  ;;  %v743_v11 = vpop.f32.mrf.mxu1 }
 0x169   : > { %v921_v42 = vpop.f32.mrf.mxu3 }
 0x16a   : > { %v2236_v9 = vpop.eup %2235  ;;  %1742 = vst [vmem:[%s2629_s12 + $0x90] sm:$0xff] %v1710_v59  ;;  %v1501_v32 = vadd.f32 %v2234_v44, %v1500_v60  ;;  %v922_v39 = vadd.f32 %v921_v42, %v832_v5  ;;  %v1160_v17 = vmul.f32 1.442695, %v1106_v7  ;;  %v1062_v5 = vadd.f32 %v2610_v16, %v992_v55 }
 0x16b   : > { %v2238_v37 = vpop.eup %2237  ;;  %v2997_v10 = vadd.f32 1.0, %v2236_v9 }
 0x16c   : > { %v1505_v8 = vsel %vm1504_vm14, %v2234_v44, %v1501_v32  ;;  %v1513_v61 = vmul.f32 %v2238_v37, %v2976_v45  ;;  %v997_v19 = vmul.f32 %v2571_v25, %v922_v39  ;;  %vm1518_vm0 = vweird.f32 %v2238_v37 }
 0x16d   : > { %2239 = vrcp.f32 %v2997_v10  ;;  %v1510_v20 = vsel %vm1507_vm15, %v1509_v15, %v1505_v8  ;;  %vm1519_vm2 = vmor %vm1517_vm1, %vm1518_vm0  ;;  %v1538_v49 = vand.u32 2147483648, %v2997_v10  ;;  %v1536_v47 = vand.u32 2147483647, %v2997_v10 }
 0x16e   : > { %v1711_v27 = vmul.f32 %v1510_v20, %v1058_v12  ;;  %2241 = vpow2.f32 %v1160_v17  ;;  %v1514_v30 = vsub.f32 1.0, %v1513_v61  ;;  %v1067_v58 = vadd.f32 %v2574_v28, %v997_v19 }
 0x16f   : > { %vm1532_vm5 = vweird.f32 %v2997_v10  ;;  %v1539_v59 = vor.u32 1.1754944e-38, %v1538_v49  ;;  %vm1537_vm7 = vcmp.eq.f32.partialorder %v1536_v47, 8.507059e+37  ;;  %v657_v42 = vpop.f32.mrf.mxu0  ;;  %v994_v12 = vmul.f32 %v2598_v2, %v742_v26 }
 0x170   : > { %1743 = vst [vmem:[%s2629_s12 + $0x98] sm:$0xff] %v1711_v27  ;;  %v1515_v50 = vmul.f32 %v2238_v37, %v1514_v30  ;;  %v1107_v3 = vsub.f32 0.0, %v1067_v58  ;;  %v835_v21 = vpop.f32.mrf.mxu2  ;;  %v746_v39 = vpop.f32.mrf.mxu1  ;;  %v744_v61 = vadd.f32 %v743_v11, %v654_v36 }
 0x171   : > { %v924_v40 = vpop.f32.mrf.mxu3  ;;  %v1064_v58 = vadd.f32 %v2610_v16, %v994_v12  ;;  %v747_v47 = vadd.f32 %v746_v39, %v657_v42 }
 0x172   : > { %v1516_v41 = vadd.f32 %v2238_v37, %v1515_v50  ;;  %v1162_v31 = vmul.f32 1.442695, %v1107_v3  ;;  %v925_v57 = vadd.f32 %v924_v40, %v835_v21 }
 0x173   : > { %v2240_v34 = vpop.eup %2239 }
 0x174   : > { %v2242_v38 = vpop.eup %2241  ;;  %v1520_v14 = vsel %vm1519_vm2, %v2238_v37, %v1516_v41  ;;  %2243 = vpow2.f32 %v1162_v31  ;;  %v1528_v6 = vmul.f32 %v2240_v34, %v2997_v10  ;;  %v999_v45 = vmul.f32 %v2571_v25, %v925_v57 }
 0x175   : > { %v3014_v43 = vadd.f32 1.0, %v2242_v38  ;;  %v1525_v44 = vsel %vm1522_vm3, %v1524_v13, %v1520_v14  ;;  %vm1533_vm4 = vweird.f32 %v2240_v34  ;;  %v996_v41 = vmul.f32 %v2598_v2, %v744_v61 }
 0x176   : > { %v1712_v46 = vmul.f32 %v1525_v44, %v1060_v1  ;;  %v1529_v48 = vsub.f32 1.0, %v1528_v6  ;;  %v1069_v0 = vadd.f32 %v2574_v28, %v999_v45  ;;  %vm1534_vm6 = vmor %vm1532_vm5, %vm1533_vm4 }
 0x177   : > { %2245 = vrcp.f32 %v3014_v43  ;;  %v1553_v17 = vand.u32 2147483648, %v3014_v43  ;;  %v1551_v22 = vand.u32 2147483647, %v3014_v43  ;;  %vm1547_vm9 = vweird.f32 %v3014_v43 }
 0x178   : > { %1744 = vst [vmem:[%s2629_s12 + $0xa0] sm:$0xff] %v1712_v46  ;;  %v1530_v51 = vmul.f32 %v2240_v34, %v1529_v48  ;;  %v837_v23 = vpop.f32.mrf.mxu2  ;;  %v1108_v52 = vsub.f32 0.0, %v1069_v0  ;;  %v748_v38 = vpop.f32.mrf.mxu1  ;;  %v1066_v55 = vadd.f32 %v2610_v16, %v996_v41 }
 0x179   : > { %v926_v56 = vpop.f32.mrf.mxu3  ;;  %v1554_v40 = vor.u32 1.1754944e-38, %v1553_v17  ;;  %vm1552_vm11 = vcmp.eq.f32.partialorder %v1551_v22, 8.507059e+37 }
 0x17a   : > { %v2244_v54 = vpop.eup %2243  ;;  %v1531_v53 = vadd.f32 %v2240_v34, %v1530_v51  ;;  %v927_v33 = vadd.f32 %v926_v56, %v837_v23  ;;  %v1164_v60 = vmul.f32 1.442695, %v1108_v52 }
 0x17b   : > { %v3024_v62 = vadd.f32 1.0, %v2244_v54 }
 0x17c   : > { %v1535_v7 = vsel %vm1534_vm6, %v2240_v34, %v1531_v53  ;;  %v1001_v4 = vmul.f32 %v2571_v25, %v927_v33  ;;  %v659_v34 = vpop.f32.mrf.mxu0 }
 0x17d   : > { %v2246_v9 = vpop.eup %2245  ;;  %2247 = vrcp.f32 %v3024_v62  ;;  %v1540_v32 = vsel %vm1537_vm7, %v1539_v59, %v1535_v7  ;;  %v1566_v18 = vand.u32 2147483647, %v3024_v62  ;;  %v1568_v11 = vand.u32 2147483648, %v3024_v62 }
 0x17e   : > { %v1713_v37 = vmul.f32 %v1540_v32, %v1062_v5  ;;  %2249 = vpow2.f32 %v1164_v60  ;;  %v1543_v10 = vmul.f32 %v2246_v9, %v3014_v43  ;;  %v1071_v29 = vadd.f32 %v2574_v28, %v1001_v4 }
 0x17f   : > { %vm1548_vm8 = vweird.f32 %v2246_v9  ;;  %vm1562_vm13 = vweird.f32 %v3024_v62  ;;  %vm1567_vm15 = vcmp.eq.f32.partialorder %v1566_v18, 8.507059e+37  ;;  %v1569_v51 = vor.u32 1.1754944e-38, %v1568_v11 }
 0x180   : > { %1745 = vst [vmem:[%s2629_s12 + $0xa8] sm:$0xff] %v1713_v37  ;;  %v1544_v24 = vsub.f32 1.0, %v1543_v10  ;;  %v840_v15 = vpop.f32.mrf.mxu2  ;;  %v1109_v8 = vsub.f32 0.0, %v1071_v29  ;;  %vm1549_vm10 = vmor %vm1547_vm9, %vm1548_vm8  ;;  %v998_v60 = vmul.f32 %v2598_v2, %v747_v47  ;;  %v751_v32 = vpop.f32.mrf.mxu1 }
 0x181   : > { %v929_v19 = vpop.f32.mrf.mxu3 }
 0x182   : > { %v1545_v20 = vmul.f32 %v2246_v9, %v1544_v24  ;;  %v930_v27 = vadd.f32 %v929_v19, %v840_v15  ;;  %v1166_v63 = vmul.f32 1.442695, %v1109_v8  ;;  %v749_v15 = vadd.f32 %v748_v38, %v659_v34 }
 0x183   : > { %v2248_v30 = vpop.eup %2247  ;;  %v1068_v8 = vadd.f32 %v2610_v16, %v998_v60 }
 0x184   : > { %v2250_v50 = vpop.eup %2249  ;;  %v1546_v35 = vadd.f32 %v2246_v9, %v1545_v20  ;;  %v1558_v3 = vmul.f32 %v2248_v30, %v3024_v62  ;;  %v1003_v21 = vmul.f32 %v2571_v25, %v930_v27  ;;  %2251 = vpow2.f32 %v1166_v63  ;;  %v662_v7 = vpop.f32.mrf.mxu0 }
 0x185   : > { %v3041_v1 = vadd.f32 1.0, %v2250_v50  ;;  %vm1563_vm12 = vweird.f32 %v2248_v30  ;;  %v1000_v63 = vmul.f32 %v2598_v2, %v749_v15 }
 0x186   : > { %v1550_v31 = vsel %vm1549_vm10, %v2246_v9, %v1546_v35  ;;  %v1559_v57 = vsub.f32 1.0, %v1558_v3  ;;  %v1073_v36 = vadd.f32 %v2574_v28, %v1003_v21  ;;  %vm1564_vm14 = vmor %vm1562_vm13, %vm1563_vm12 }
 0x187   : > { %2253 = vrcp.f32 %v3041_v1  ;;  %v1555_v13 = vsel %vm1552_vm11, %v1554_v40, %v1550_v31  ;;  %v1583_v4 = vand.u32 2147483648, %v3041_v1  ;;  %v1581_v10 = vand.u32 2147483647, %v3041_v1 }
 0x188   : > { %v1714_v14 = vmul.f32 %v1555_v13, %v1064_v58  ;;  %v1560_v6 = vmul.f32 %v2248_v30, %v1559_v57  ;;  %v1110_v43 = vsub.f32 0.0, %v1073_v36  ;;  %v842_v44 = vpop.f32.mrf.mxu2  ;;  %vm1577_vm1 = vweird.f32 %v3041_v1 }
 0x189   : > { %v931_v45 = vpop.f32.mrf.mxu3  ;;  %v1584_v20 = vor.u32 1.1754944e-38, %v1583_v4  ;;  %vm1582_vm3 = vcmp.eq.f32.partialorder %v1581_v10, 8.507059e+37  ;;  %v752_v31 = vadd.f32 %v751_v32, %v662_v7  ;;  %v1070_v18 = vadd.f32 %v2610_v16, %v1000_v63 }
 0x18a   : > { %1746 = vst [vmem:[%s2629_s12 + $0xb0] sm:$0xff] %v1714_v14  ;;  %v1561_v46 = vadd.f32 %v2248_v30, %v1560_v6  ;;  %v1168_v48 = vmul.f32 1.442695, %v1110_v43  ;;  %v932_v49 = vadd.f32 %v931_v45, %v842_v44  ;;  %v2252_v0 = vpop.eup %2251  ;;  %v753_v14 = vpop.f32.mrf.mxu1 }
 0x18b   : > { %v3051_v23 = vadd.f32 1.0, %v2252_v0 }
 0x18c   : > { %v1565_v52 = vsel %vm1564_vm14, %v2248_v30, %v1561_v46  ;;  %2255 = vpow2.f32 %v1168_v48  ;;  %v1005_v56 = vmul.f32 %v2571_v25, %v932_v49  ;;  %v664_v38 = vpop.f32.mrf.mxu0  ;;  %v1002_v49 = vmul.f32 %v2598_v2, %v752_v31 }
 0x18d   : > { %v2254_v54 = vpop.eup %2253  ;;  %v1570_v53 = vsel %vm1567_vm15, %v1569_v51, %v1565_v52  ;;  %2257 = vrcp.f32 %v3051_v23  ;;  %v1598_v3 = vand.u32 2147483648, %v3051_v23  ;;  %v1596_v41 = vand.u32 2147483647, %v3051_v23 }
 0x18e   : > { %v1715_v33 = vmul.f32 %v1570_v53, %v1066_v55  ;;  %v1573_v62 = vmul.f32 %v2254_v54, %v3041_v1  ;;  %v1075_v59 = vadd.f32 %v2574_v28, %v1005_v56  ;;  %vm1578_vm0 = vweird.f32 %v2254_v54 }
 0x18f   : > { %vm1579_vm2 = vmor %vm1577_vm1, %vm1578_vm0  ;;  %vm1592_vm5 = vweird.f32 %v3051_v23  ;;  %v1599_v43 = vor.u32 1.1754944e-38, %v1598_v3  ;;  %vm1597_vm7 = vcmp.eq.f32.partialorder %v1596_v41, 8.507059e+37 }
 0x190   : > { %1747 = vst [vmem:[%s2629_s12 + $0xb8] sm:$0xff] %v1715_v33  ;;  %v1574_v26 = vsub.f32 1.0, %v1573_v62  ;;  %v845_v5 = vpop.f32.mrf.mxu2  ;;  %v1111_v42 = vsub.f32 0.0, %v1075_v59  ;;  %v1072_v33 = vadd.f32 %v2610_v16, %v1002_v49 }
 0x191   : > { %v934_v9 = vpop.f32.mrf.mxu3 }
 0x192   : > { %v2256_v39 = vpop.eup %2255  ;;  %v1575_v37 = vmul.f32 %v2254_v54, %v1574_v26  ;;  %v935_v12 = vadd.f32 %v934_v9, %v845_v5  ;;  %v1170_v24 = vmul.f32 1.442695, %v1111_v42 }
 0x193   : > { %v3061_v29 = vadd.f32 1.0, %v2256_v39  ;;  %v2258_v17 = vpop.eup %2257 }
 0x194   : > { %v1576_v61 = vadd.f32 %v2254_v54, %v1575_v37  ;;  %v1007_v19 = vmul.f32 %v2571_v25, %v935_v12  ;;  %v1588_v22 = vmul.f32 %v2258_v17, %v3051_v23  ;;  %vm1593_vm4 = vweird.f32 %v2258_v17  ;;  %v667_v10 = vpop.f32.mrf.mxu0  ;;  %v756_v12 = vpop.f32.mrf.mxu1 }
 0x195   : > { %2259 = vrcp.f32 %v3061_v29  ;;  %vm1594_vm6 = vmor %vm1592_vm5, %vm1593_vm4  ;;  %v1613_v23 = vand.u32 2147483648, %v3061_v29  ;;  %v1611_v56 = vand.u32 2147483647, %v3061_v29  ;;  %vm1607_vm9 = vweird.f32 %v3061_v29 }
 0x196   : > { %v1580_v27 = vsel %vm1579_vm2, %v2254_v54, %v1576_v61  ;;  %2261 = vpow2.f32 %v1170_v24  ;;  %v1077_v30 = vadd.f32 %v2574_v28, %v1007_v19  ;;  %v1589_v50 = vsub.f32 1.0, %v1588_v22 }
 0x197   : > { %v1585_v58 = vsel %vm1582_vm3, %v1584_v20, %v1580_v27  ;;  %v1614_v4 = vor.u32 1.1754944e-38, %v1613_v23  ;;  %vm1612_vm11 = vcmp.eq.f32.partialorder %v1611_v56, 8.507059e+37  ;;  %v754_v37 = vadd.f32 %v753_v14, %v664_v38 }
 0x198   : > { %v1716_v35 = vmul.f32 %v1585_v58, %v1068_v8  ;;  %v1112_v21 = vsub.f32 0.0, %v1077_v30  ;;  %v847_v1 = vpop.f32.mrf.mxu2  ;;  %v1590_v40 = vmul.f32 %v2258_v17, %v1589_v50  ;;  %v757_v27 = vadd.f32 %v756_v12, %v667_v10 }
 0x199   : > { %v936_v57 = vpop.f32.mrf.mxu3  ;;  %v1004_v19 = vmul.f32 %v2598_v2, %v754_v37 }
 0x19a   : > { %1748 = vst [vmem:[%s2629_s12 + $0xc0] sm:$0xff] %v1716_v35  ;;  %v1172_v36 = vmul.f32 1.442695, %v1112_v21  ;;  %v937_v34 = vadd.f32 %v936_v57, %v847_v1  ;;  %v1591_v11 = vadd.f32 %v2258_v17, %v1590_v40 }
 0x19b   : > { %v2260_v13 = vpop.eup %2259  ;;  %v1074_v41 = vadd.f32 %v2610_v16, %v1004_v19 }
 0x19c   : > { %v2262_v6 = vpop.eup %2261  ;;  %2263 = vpow2.f32 %v1172_v36  ;;  %v1603_v44 = vmul.f32 %v2260_v13, %v3061_v29  ;;  %v1009_v45 = vmul.f32 %v2571_v25, %v937_v34  ;;  %v1595_v48 = vsel %vm1594_vm6, %v2258_v17, %v1591_v11  ;;  %v669_v14 = vpop.f32.mrf.mxu0 }
 0x19d   : > { %v3077_v46 = vadd.f32 1.0, %v2262_v6  ;;  %v1600_v0 = vsel %vm1597_vm7, %v1599_v43, %v1595_v48  ;;  %vm1608_vm8 = vweird.f32 %v2260_v13  ;;  %v1006_v34 = vmul.f32 %v2598_v2, %v757_v27  ;;  %v758_v6 = vpop.f32.mrf.mxu1 }
 0x19e   : > { %v1604_v55 = vsub.f32 1.0, %v1603_v44  ;;  %v1079_v51 = vadd.f32 %v2574_v28, %v1009_v45  ;;  %v1717_v47 = vmul.f32 %v1600_v0, %v1070_v18  ;;  %vm1609_vm10 = vmor %vm1607_vm9, %vm1608_vm8  ;;  %v759_v23 = vadd.f32 %v758_v6, %v669_v14 }
 0x19f   : > { %2265 = vrcp.f32 %v3077_v46  ;;  %v1626_v20 = vand.u32 2147483647, %v3077_v46  ;;  %v1628_v22 = vand.u32 2147483648, %v3077_v46  ;;  %vm1622_vm13 = vweird.f32 %v3077_v46 }
 0x1a0   : > { %v1605_v52 = vmul.f32 %v2260_v13, %v1604_v55  ;;  %v1113_v54 = vsub.f32 0.0, %v1079_v51  ;;  %v850_v53 = vpop.f32.mrf.mxu2  ;;  %1749 = vst [vmem:[%s2629_s12 + $0xc8] sm:$0xff] %v1717_v47  ;;  %v1076_v48 = vadd.f32 %v2610_v16, %v1006_v34 }
 0x1a1   : > { %v939_v62 = vpop.f32.mrf.mxu3  ;;  %v1629_v31 = vor.u32 1.1754944e-38, %v1628_v22  ;;  %vm1627_vm15 = vcmp.eq.f32.partialorder %v1626_v20, 8.507059e+37 }
 0x1a2   : > { %v2264_v59 = vpop.eup %2263  ;;  %v1606_v60 = vadd.f32 %v2260_v13, %v1605_v52  ;;  %v1174_v26 = vmul.f32 1.442695, %v1113_v54  ;;  %v940_v5 = vadd.f32 %v939_v62, %v850_v53  ;;  %v1008_v62 = vmul.f32 %v2598_v2, %v759_v23 }
 0x1a3   : > { %v3087_v7 = vadd.f32 1.0, %v2264_v59 }
 0x1a4   : > { %v1610_v42 = vsel %vm1609_vm10, %v2260_v13, %v1606_v60  ;;  %2267 = vpow2.f32 %v1174_v26  ;;  %v1011_v9 = vmul.f32 %v2571_v25, %v940_v5  ;;  %v672_v26 = vpop.f32.mrf.mxu0 }
 0x1a5   : > { %v2266_v32 = vpop.eup %2265  ;;  %2269 = vrcp.f32 %v3087_v7  ;;  %v1615_v39 = vsel %vm1612_vm11, %v1614_v4, %v1610_v42  ;;  %v1643_v11 = vand.u32 2147483648, %v3087_v7  ;;  %v1641_v45 = vand.u32 2147483647, %v3087_v7  ;;  %v761_v5 = vpop.f32.mrf.mxu1 }
 0x1a6   : > { %v1718_v29 = vmul.f32 %v1615_v39, %v1072_v33  ;;  %v1618_v24 = vmul.f32 %v2266_v32, %v3077_v46  ;;  %v1081_v15 = vadd.f32 %v2574_v28, %v1011_v9  ;;  %vm1623_vm12 = vweird.f32 %v2266_v32 }
 0x1a7   : > { %vm1624_vm14 = vmor %vm1622_vm13, %vm1623_vm12  ;;  %vm1637_vm1 = vweird.f32 %v3087_v7  ;;  %vm1642_vm3 = vcmp.eq.f32.partialorder %v1641_v45, 8.507059e+37  ;;  %v762_v4 = vadd.f32 %v761_v5, %v672_v26  ;;  %v1078_v39 = vadd.f32 %v2610_v16, %v1008_v62 }
 0x1a8   : > { %1750 = vst [vmem:[%s2629_s12 + $0xd0] sm:$0xff] %v1718_v29  ;;  %v1619_v17 = vsub.f32 1.0, %v1618_v24  ;;  %v1114_v8 = vsub.f32 0.0, %v1081_v15  ;;  %v852_v61 = vpop.f32.mrf.mxu2 }
 0x1a9   : > { %v941_v30 = vpop.f32.mrf.mxu3  ;;  %v1010_v15 = vmul.f32 %v2598_v2, %v762_v4 }
 0x1aa   : > { %v2268_v58 = vpop.eup %2267  ;;  %v1620_v63 = vmul.f32 %v2266_v32, %v1619_v17  ;;  %v1176_v50 = vmul.f32 1.442695, %v1114_v8  ;;  %v942_v35 = vadd.f32 %v941_v30, %v852_v61 }
 0x1ab   : > { %v2270_v3 = vpop.eup %2269  ;;  %v1209_v21 = vadd.f32 1.0, %v2268_v58  ;;  %v1080_v20 = vadd.f32 %v2610_v16, %v1010_v15 }
 0x1ac   : > { %v1621_v1 = vadd.f32 %v2266_v32, %v1620_v63  ;;  %2271 = vpow2.f32 %v1176_v50  ;;  %v1633_v40 = vmul.f32 %v2270_v3, %v3087_v7  ;;  %v1013_v57 = vmul.f32 %v2571_v25, %v942_v35  ;;  %v674_v30 = vpop.f32.mrf.mxu0 }
 0x1ad   : > { %2273 = vrcp.f32 %v1209_v21  ;;  %vm1638_vm0 = vweird.f32 %v2270_v3  ;;  %v1658_v33 = vand.u32 2147483648, %v1209_v21  ;;  %v1656_v60 = vand.u32 2147483647, %v1209_v21  ;;  %v763_v58 = vpop.f32.mrf.mxu1 }
 0x1ae   : > { %v1625_v36 = vsel %vm1624_vm14, %v2266_v32, %v1621_v1  ;;  %v1634_v13 = vsub.f32 1.0, %v1633_v40  ;;  %v1083_v38 = vadd.f32 %v2574_v28, %v1013_v57  ;;  %vm1639_vm2 = vmor %vm1637_vm1, %vm1638_vm0  ;;  %v1644_v28 = vor.u32 1.1754944e-38, %v1643_v11 }
 0x1af   : > { %v1630_v18 = vsel %vm1627_vm15, %v1629_v31, %v1625_v36  ;;  %vm1652_vm5 = vweird.f32 %v1209_v21  ;;  %v1659_v9 = vor.u32 1.1754944e-38, %v1658_v33  ;;  %vm1657_vm7 = vcmp.eq.f32.partialorder %v1656_v60, 8.507059e+37 }
 0x1b0   : > { %v1719_v43 = vmul.f32 %v1630_v18, %v1074_v41  ;;  %v1635_v44 = vmul.f32 %v2270_v3, %v1634_v13  ;;  %v1115_v46 = vsub.f32 0.0, %v1083_v38 }
 0x1b2   : > { %v2272_v25 = vpop.eup %2271  ;;  %1751 = vst [vmem:[%s2629_s12 + $0xd8] sm:$0xff] %v1719_v43  ;;  %v1636_v49 = vadd.f32 %v2270_v3, %v1635_v44  ;;  %v1178_v51 = vmul.f32 1.442695, %v1115_v46 }
 0x1b3   : > { %v2274_v0 = vpop.eup %2273  ;;  %v1210_v55 = vadd.f32 1.0, %v2272_v25 }
 0x1b4   : > { %v1640_v47 = vsel %vm1639_vm2, %v2270_v3, %v1636_v49  ;;  %v1648_v52 = vmul.f32 %v2274_v0, %v1209_v21  ;;  %vm1653_vm4 = vweird.f32 %v2274_v0  ;;  %v764_v21 = vadd.f32 %v763_v58, %v674_v30 }
 0x1b5   : > { %2275 = vrcp.f32 %v1210_v55  ;;  %v1645_v56 = vsel %vm1642_vm3, %v1644_v28, %v1640_v47  ;;  %vm1654_vm6 = vmor %vm1652_vm5, %vm1653_vm4  ;;  %v1673_v8 = vand.u32 2147483648, %v1210_v55  ;;  %v1671_v19 = vand.u32 2147483647, %v1210_v55 }
 0x1b6   : > { %v1720_v54 = vmul.f32 %v1645_v56, %v1076_v48  ;;  %2277 = vpow2.f32 %v1178_v51  ;;  %v1649_v53 = vsub.f32 1.0, %v1648_v52  ;;  %vm1667_vm9 = vweird.f32 %v1210_v55 }
 0x1b7   : > { %v1674_v27 = vor.u32 1.1754944e-38, %v1673_v8  ;;  %vm1672_vm11 = vcmp.eq.f32.partialorder %v1671_v19, 8.507059e+37  ;;  %v1012_v31 = vmul.f32 %v2598_v2, %v764_v21 }
 0x1b8   : > { %1752 = vst [vmem:[%s2629_s12 + $0xe0] sm:$0xff] %v1720_v54  ;;  %v1650_v59 = vmul.f32 %v2274_v0, %v1649_v53 }
 0x1b9   : > { %v1082_v18 = vadd.f32 %v2610_v16, %v1012_v31 }
 0x1ba   : > { %v1651_v7 = vadd.f32 %v2274_v0, %v1650_v59 }
 0x1bb   : > { %v2276_v42 = vpop.eup %2275 }
 0x1bc   : > { %v2278_v32 = vpop.eup %2277  ;;  %v1655_v37 = vsel %vm1654_vm6, %v2274_v0, %v1651_v7  ;;  %v1663_v10 = vmul.f32 %v2276_v42, %v1210_v55  ;;  %vm1668_vm8 = vweird.f32 %v2276_v42 }
 0x1bd   : > { %v1211_v12 = vadd.f32 1.0, %v2278_v32  ;;  %v1660_v29 = vsel %vm1657_vm7, %v1659_v9, %v1655_v37  ;;  %vm1669_vm10 = vmor %vm1667_vm9, %vm1668_vm8 }
 0x1be   : > { %v1721_v24 = vmul.f32 %v1660_v29, %v1078_v39  ;;  %v1664_v17 = vsub.f32 1.0, %v1663_v10 }
 0x1bf   : > { %2279 = vrcp.f32 %v1211_v12  ;;  %v1688_v41 = vand.u32 2147483648, %v1211_v12  ;;  %v1686_v36 = vand.u32 2147483647, %v1211_v12  ;;  %vm1682_vm13 = vweird.f32 %v1211_v12 }
 0x1c0   : > { %1753 = vst [vmem:[%s2629_s12 + $0xe8] sm:$0xff] %v1721_v24  ;;  %v1665_v61 = vmul.f32 %v2276_v42, %v1664_v17 }
 0x1c1   : > { %v1689_v13 = vor.u32 1.1754944e-38, %v1688_v41  ;;  %vm1687_vm15 = vcmp.eq.f32.partialorder %v1686_v36, 8.507059e+37 }
 0x1c2   : > { %v1666_v22 = vadd.f32 %v2276_v42, %v1665_v61 }
 0x1c4   : > { %v1670_v63 = vsel %vm1669_vm10, %v2276_v42, %v1666_v22 }
 0x1c5   : > { %v2280_v50 = vpop.eup %2279  ;;  %v1675_v35 = vsel %vm1672_vm11, %v1674_v27, %v1670_v63 }
 0x1c6   : > { %v1722_v3 = vmul.f32 %v1675_v35, %v1080_v20  ;;  %v1678_v1 = vmul.f32 %v2280_v50, %v1211_v12  ;;  %vm1683_vm12 = vweird.f32 %v2280_v50 }
 0x1c7   : > { %vm1684_vm14 = vmor %vm1682_vm13, %vm1683_vm12 }
 0x1c8   : > { %1754 = vst [vmem:[%s2629_s12 + $0xf0] sm:$0xff] %v1722_v3  ;;  %v1679_v40 = vsub.f32 1.0, %v1678_v1 }
 0x1ca   : > { %v1680_v57 = vmul.f32 %v2280_v50, %v1679_v40 }
 0x1cc   : > { %v1681_v34 = vadd.f32 %v2280_v50, %v1680_v57 }
 0x1ce   : > { %v1685_v11 = vsel %vm1684_vm14, %v2280_v50, %v1681_v34 }
 0x1cf   : > { %v1690_v38 = vsel %vm1687_vm15, %v1689_v13, %v1685_v11 }
 0x1d0   : > { %v1723_v14 = vmul.f32 %v1690_v38, %v1082_v18 }
 0x1d2   : > { %1755 = vst [vmem:[%s2629_s12 + $0xf8] sm:$0xff] %v1723_v14 }
 0x1d3 PF: > { %s14_s15 = sadd.s32 1, %s2287_s15  }
 0x1d4   : > { %p11_p4 = scmp.ge.s32.totalorder %s14_s15, 4  }
 0x1d6   :  { %13 = sbr.rel (!%p11_p4) target bundleno = 1 (0x1), region = 66 }

// kernel: _lambda_.7
= control target key start
LH: loop header
LB: loop body
LE: loop exit
PB: predicated region body
PF: predicated region fallthrough
CT: control target
= control target key end

     0   :  { %s3123_s15 = smov 0   ;;  %s4997_s0 = inlined_call_operand.vmem [shape: bf16[2048,128], index: 0, kind: input, shape index: {}]   ;;  %s4998_s1 = inlined_call_operand.vmem [shape: bf16[128,256], index: 1, kind: input, shape index: {}]   ;;  %s4999_s2 = inlined_call_operand.vmem [shape: f32[1,256], index: 2, kind: input, shape index: {}]   ;;  %s5000_s3 = inlined_call_operand.vmem [shape: f32[1,256], index: 3, kind: input, shape index: {}]   ;;  %s5001_s4 = inlined_call_operand.vmem [shape: f32[2048,128], index: 4, kind: output, shape index: {}]  }
   0x1 LB: > { %s2559_s16 = sadd.s32 4294967295, %s3096_s15   ;;  %p2563_p0 = scmp.ge.s32.totalorder %s3096_s15, 1  ;;  %s3096_s15 = sphi %s3123_s15, %s14_s15  }
   0x2   : > { %p163_p1 = scmp.lt.s32.totalorder %s3096_s15, 5 }
   0x4   : > { %p164_p2 = pnand %p2563_p0, %p163_p1 }
   0x5   : > { %s2564_s25 = sshll.u32 (!%p164_p2), %s2559_s16, 6 }
   0x6   : > { %167 = sbr.rel (%p164_p2) target bundleno = 546 (0x222), region = 36  ;;  %p190_p3 = scmp.lt.s32.totalorder (!%p164_p2), %s2564_s25, 255 }
   0xb   : > { %v2808_v0 = vld [vmem:[%s4998_s1 + $0x74] sm:$0xf]  ;;  %v2756_v1 = vld [vmem:[%s4998_s1 + $0x78] sm:$0xf0]  ;;  %v2806_v2 = vld [vmem:[%s4998_s1 + $0x64] sm:$0xf] }
   0xc   : > { %v2759_v3 = vor.u32 %v2808_v0, %v2756_v1  ;;  %v2748_v4 = vld [vmem:[%s4998_s1 + $0x68] sm:$0xf0]  ;;  %v2804_v6 = vld [vmem:[%s4998_s1 + $0x54] sm:$0xf]  ;;  %v2740_v7 = vld [vmem:[%s4998_s1 + $0x58] sm:$0xf0] }
   0xd   : > { %v2751_v5 = vor.u32 %v2806_v2, %v2748_v4  ;;  %v2754_v8 = vld [vmem:[%s4998_s1 + $0x70] sm:$0xf]  ;;  %v2809_v9 = vld [vmem:[%s4998_s1 + $0x74] sm:$0xf0]  ;;  %v2746_v11 = vld [vmem:[%s4998_s1 + $0x60] sm:$0xf]  ;;  %v2743_v13 = vor.u32 %v2804_v6, %v2740_v7 }
   0xe   : > { %722 = vmatpush.bf16.msra.mxu1 %v2759_v3  ;;  %2818 = vmatpush.bf16.msra.mxu3 %v2759_v3  ;;  %v2755_v10 = vor.u32 %v2809_v9, %v2754_v8  ;;  %v2807_v12 = vld [vmem:[%s4998_s1 + $0x64] sm:$0xf0]  ;;  %v2802_v14 = vld [vmem:[%s4998_s1 + $0x44] sm:$0xf]  ;;  %v2732_v15 = vld [vmem:[%s4998_s1 + $0x48] sm:$0xf0] }
   0xf   : > { %v2747_v16 = vor.u32 %v2807_v12, %v2746_v11  ;;  %v2738_v17 = vld [vmem:[%s4998_s1 + $0x50] sm:$0xf]  ;;  %v2805_v18 = vld [vmem:[%s4998_s1 + $0x54] sm:$0xf0]  ;;  %v2735_v19 = vor.u32 %v2802_v14, %v2732_v15  ;;  %v2800_v20 = vld [vmem:[%s4998_s1 + $0x34] sm:$0xf] }
  0x10   : > { %2810 = vmatpush.bf16.msra.mxu2 %v2755_v10  ;;  %553 = vmatpush.bf16.msra.mxu0 %v2755_v10  ;;  %v2724_v21 = vld [vmem:[%s4998_s1 + $0x38] sm:$0xf0]  ;;  %v2739_v22 = vor.u32 %v2805_v18, %v2738_v17  ;;  %v2730_v23 = vld [vmem:[%s4998_s1 + $0x40] sm:$0xf]  ;;  %v2803_v24 = vld [vmem:[%s4998_s1 + $0x44] sm:$0xf0] }
  0x11   : > { %v2727_v25 = vor.u32 %v2800_v20, %v2724_v21  ;;  %v2798_v26 = vld [vmem:[%s4998_s1 + $0x24] sm:$0xf]  ;;  %v2716_v27 = vld [vmem:[%s4998_s1 + $0x28] sm:$0xf0]  ;;  %v2731_v28 = vor.u32 %v2803_v24, %v2730_v23  ;;  %v2722_v29 = vld [vmem:[%s4998_s1 + $0x30] sm:$0xf] }
  0x12   : > { %723 = vmatpush.bf16.msra.mxu1 %v2751_v5  ;;  %2819 = vmatpush.bf16.msra.mxu3 %v2751_v5  ;;  %v2801_v30 = vld [vmem:[%s4998_s1 + $0x34] sm:$0xf0]  ;;  %v2719_v31 = vor.u32 %v2798_v26, %v2716_v27  ;;  %v2796_v32 = vld [vmem:[%s4998_s1 + $0x14] sm:$0xf]  ;;  %v2708_v33 = vld [vmem:[%s4998_s1 + $0x18] sm:$0xf0] }
  0x13   : > { %s5119_s25 = smov (!%p190_p3, %s2564_s25), 255  ;;  %v2723_v34 = vor.u32 %v2801_v30, %v2722_v29  ;;  %v2714_v35 = vld [vmem:[%s4998_s1 + $0x20] sm:$0xf]  ;;  %v2799_v36 = vld [vmem:[%s4998_s1 + $0x24] sm:$0xf0]  ;;  %v2711_v37 = vor.u32 %v2796_v32, %v2708_v33 }
  0x14   : > { %2811 = vmatpush.bf16.msra.mxu2 %v2747_v16  ;;  %554 = vmatpush.bf16.msra.mxu0 %v2747_v16  ;;  %v2794_v38 = vld [vmem:[%s4998_s1 + $0x4] sm:$0xf]  ;;  %v2700_v39 = vld [vmem:[%s4998_s1 + $0x8] sm:$0xf0]  ;;  %s2565_s26 = sshll.u32 %s5119_s25, 2  ;;  %v2715_v40 = vor.u32 %v2799_v36, %v2714_v35  ;;  %s2567_s17 = sshll.u32 %s5119_s25, 3 }
  0x15   : > { %v2706_v41 = vld [vmem:[%s4998_s1 + $0x10] sm:$0xf]  ;;  %v2797_v42 = vld [vmem:[%s4998_s1 + $0x14] sm:$0xf0]  ;;  %v2703_v43 = vor.u32 %v2794_v38, %v2700_v39  ;;  %s3229_s7 = scalar_lea.vmem %s4997_s0, %s2565_s26  ;;  %v2698_v45 = vld [vmem:[%s4998_s1] sm:$0xf]  ;;  %s3368_s19 = scalar_lea.vmem %s5001_s4, %s2567_s17 }
  0x16   : > { %724 = vmatpush.bf16.msra.mxu1 %v2743_v13  ;;  %2820 = vmatpush.bf16.msra.mxu3 %v2743_v13  ;;  %v2707_v44 = vor.u32 %v2797_v42, %v2706_v41  ;;  %v2795_v46 = vld [vmem:[%s4998_s1 + $0x4] sm:$0xf0]  ;;  %v2762_v47 = vld [vmem:[%s3229_s7] sm:$0xff]  ;;  %v2764_v52 = vld [vmem:[%s3229_s7 + $0x10] sm:$0xff] }
  0x17   : > { %v2778_v48 = vld [vmem:[%s3229_s7 + $0x80] sm:$0xff]  ;;  %v2699_v49 = vor.u32 %v2795_v46, %v2698_v45  ;;  %v2763_v50 = vld [vmem:[%s3229_s7 + $0x8] sm:$0xff]  ;;  %v2780_v53 = vld [vmem:[%s3229_s7 + $0x90] sm:$0xff] }
  0x18   : > { %2812 = vmatpush.bf16.msra.mxu2 %v2739_v22  ;;  %555 = vmatpush.bf16.msra.mxu0 %v2739_v22  ;;  %v2779_v51 = vld [vmem:[%s3229_s7 + $0x88] sm:$0xff]  ;;  %v2765_v54 = vld [vmem:[%s3229_s7 + $0x18] sm:$0xff]  ;;  %v2766_v56 = vld [vmem:[%s3229_s7 + $0x20] sm:$0xff] }
  0x19   : > { %v2781_v55 = vld [vmem:[%s3229_s7 + $0x98] sm:$0xff]  ;;  %v2782_v57 = vld [vmem:[%s3229_s7 + $0xa0] sm:$0xff]  ;;  %v2767_v58 = vld [vmem:[%s3229_s7 + $0x28] sm:$0xff] }
  0x1a   : > { %725 = vmatpush.bf16.msra.mxu1 %v2735_v19  ;;  %2821 = vmatpush.bf16.msra.mxu3 %v2735_v19  ;;  %v2783_v59 = vld [vmem:[%s3229_s7 + $0xa8] sm:$0xff]  ;;  %v2768_v60 = vld [vmem:[%s3229_s7 + $0x30] sm:$0xff]  ;;  %v2769_v62 = vld [vmem:[%s3229_s7 + $0x38] sm:$0xff] }
  0x1b   : > { %v2784_v61 = vld [vmem:[%s3229_s7 + $0xb0] sm:$0xff]  ;;  %v2785_v63 = vld [vmem:[%s3229_s7 + $0xb8] sm:$0xff]  ;;  %v891_v0 = vld [vmem:[%s4999_s2] sm:$0x3] }
  0x1c   : > { %2813 = vmatpush.bf16.msra.mxu2 %v2731_v28  ;;  %556 = vmatpush.bf16.msra.mxu0 %v2731_v28  ;;  %v1025_v1 = vld [vmem:[%s5000_s3] sm:$0x3]  ;;  %v3259_v2 = vperm.slane %v891_v0, 1  ;;  %v3271_v23 = vperm.slane %v891_v0, 0  ;;  %v2771_v27 = vld [vmem:[%s3229_s7 + $0x48] sm:$0xff] }
  0x1d   : > { %v3261_v3 = vperm.slane %v1025_v1, 1  ;;  %v2770_v4 = vld [vmem:[%s3229_s7 + $0x40] sm:$0xff]  ;;  %v2787_v28 = vld [vmem:[%s3229_s7 + $0xc8] sm:$0xff] }
  0x1e   : > { %726 = vmatpush.bf16.msra.mxu1 %v2727_v25  ;;  %2822 = vmatpush.bf16.msra.mxu3 %v2727_v25  ;;  %v2786_v5 = vld [vmem:[%s3229_s7 + $0xc0] sm:$0xff] }
  0x20   : > { %2814 = vmatpush.bf16.msra.mxu2 %v2723_v34  ;;  %557 = vmatpush.bf16.msra.mxu0 %v2723_v34  ;;  %v3280_v34 = vperm.slane %v1025_v1, 0 }
  0x22   : > { %727 = vmatpush.bf16.msra.mxu1 %v2719_v31  ;;  %2823 = vmatpush.bf16.msra.mxu3 %v2719_v31 }
  0x24   : > { %2815 = vmatpush.bf16.msra.mxu2 %v2715_v40  ;;  %558 = vmatpush.bf16.msra.mxu0 %v2715_v40 }
  0x26   : > { %728 = vmatpush.bf16.msra.mxu1 %v2711_v37  ;;  %2824 = vmatpush.bf16.msra.mxu3 %v2711_v37 }
  0x28   : > { %2816 = vmatpush.bf16.msra.mxu2 %v2707_v44  ;;  %559 = vmatpush.bf16.msra.mxu0 %v2707_v44 }
  0x2a   : > { %729 = vmatpush.bf16.msra.mxu1 %v2703_v43  ;;  %2825 = vmatpush.bf16.msra.mxu3 %v2703_v43 }
  0x2c   : > { %2817 = vmatpush.bf16.msra.mxu2 %v2699_v49  ;;  %560 = vmatpush.bf16.msra.mxu0 %v2699_v49 }
  0x2d   : > { %730 = vmatmul.bf16.vlgmr.msra.gmra.mxu1 %v2762_v47  ;;  %810 = vmatmul.bf16.vlgmr.msra.gmra.mxu3 %v2778_v48 }
  0x2f   : > { %641 = vmatmul.bf16.vlgmr.msra.gmra.mxu2 %v2778_v48  ;;  %561 = vmatmul.bf16.vlgmr.msra.gmra.mxu0 %v2762_v47 }
  0x3d   : > { %735 = vmatmul.bf16.gmra.mxu1 %v2763_v50  ;;  %815 = vmatmul.bf16.gmra.mxu3 %v2779_v51 }
  0x3f   : > { %646 = vmatmul.bf16.gmra.mxu2 %v2779_v51  ;;  %566 = vmatmul.bf16.gmra.mxu0 %v2763_v50 }
  0x4d   : > { %740 = vmatmul.bf16.gmra.mxu1 %v2764_v52  ;;  %820 = vmatmul.bf16.gmra.mxu3 %v2780_v53 }
  0x4f   : > { %651 = vmatmul.bf16.gmra.mxu2 %v2780_v53  ;;  %571 = vmatmul.bf16.gmra.mxu0 %v2764_v52 }
  0x5d   : > { %745 = vmatmul.bf16.gmra.mxu1 %v2765_v54  ;;  %825 = vmatmul.bf16.gmra.mxu3 %v2781_v55 }
  0x5f   : > { %656 = vmatmul.bf16.gmra.mxu2 %v2781_v55  ;;  %576 = vmatmul.bf16.gmra.mxu0 %v2765_v54 }
  0x6d   : > { %750 = vmatmul.bf16.gmra.mxu1 %v2766_v56  ;;  %830 = vmatmul.bf16.gmra.mxu3 %v2782_v57 }
  0x6f   : > { %661 = vmatmul.bf16.gmra.mxu2 %v2782_v57  ;;  %581 = vmatmul.bf16.gmra.mxu0 %v2766_v56 }
  0x7d   : > { %755 = vmatmul.bf16.gmra.mxu1 %v2767_v58  ;;  %835 = vmatmul.bf16.gmra.mxu3 %v2783_v59 }
  0x7f   : > { %666 = vmatmul.bf16.gmra.mxu2 %v2783_v59  ;;  %586 = vmatmul.bf16.gmra.mxu0 %v2767_v58 }
  0x8d   : > { %760 = vmatmul.bf16.gmra.mxu1 %v2768_v60  ;;  %840 = vmatmul.bf16.gmra.mxu3 %v2784_v61 }
  0x8f   : > { %671 = vmatmul.bf16.gmra.mxu2 %v2784_v61  ;;  %591 = vmatmul.bf16.gmra.mxu0 %v2768_v60 }
  0x9d   : > { %765 = vmatmul.bf16.gmra.mxu1 %v2769_v62  ;;  %845 = vmatmul.bf16.gmra.mxu3 %v2785_v63 }
  0x9f   : > { %676 = vmatmul.bf16.gmra.mxu2 %v2785_v63  ;;  %596 = vmatmul.bf16.gmra.mxu0 %v2769_v62 }
  0xaa   : > { %v731_v6 = vpop.f32.mrf.mxu1 }
  0xab   : > { %v898_v7 = vmul.f32 %v3259_v2, %v731_v6 }
  0xac   : > { %v562_v10 = vpop.f32.mrf.mxu0 }
  0xad   : > { %v1032_v8 = vadd.f32 %v3261_v3, %v898_v7  ;;  %770 = vmatmul.bf16.gmra.mxu1 %v2770_v4  ;;  %850 = vmatmul.bf16.gmra.mxu3 %v2786_v5  ;;  %v897_v35 = vmul.f32 %v3271_v23, %v562_v10 }
  0xaf   : > { %v1159_v9 = vsub.f32 0.0, %v1032_v8  ;;  %681 = vmatmul.bf16.gmra.mxu2 %v2786_v5  ;;  %601 = vmatmul.bf16.gmra.mxu0 %v2770_v4  ;;  %v3290_v46 = vadd.f32 %v3280_v34, %v897_v35 }
  0xb0   : > { %v811_v11 = vpop.f32.mrf.mxu3 }
  0xb1   : > { %v1223_v12 = vmul.f32 1.442695, %v1159_v9  ;;  %v962_v13 = vmul.f32 %v3259_v2, %v811_v11 }
  0xb2   : > { %v733_v14 = vpop.f32.mrf.mxu1  ;;  %v642_v19 = vpop.f32.mrf.mxu2 }
  0xb3   : > { %2834 = vpow2.f32 %v1223_v12  ;;  %v1096_v15 = vadd.f32 %v3261_v3, %v962_v13  ;;  %v900_v16 = vmul.f32 %v3259_v2, %v733_v14  ;;  %v961_v36 = vmul.f32 %v3271_v23, %v642_v19 }
  0xb4   : > { %v564_v29 = vpop.f32.mrf.mxu0 }
  0xb5   : > { %v1191_v17 = vsub.f32 0.0, %v1096_v15  ;;  %v1034_v18 = vadd.f32 %v3261_v3, %v900_v16  ;;  %v899_v37 = vmul.f32 %v3271_v23, %v564_v29  ;;  %v3293_v47 = vadd.f32 %v3280_v34, %v961_v36 }
  0xb7   : > { %v1287_v20 = vmul.f32 1.442695, %v1191_v17  ;;  %v1160_v21 = vsub.f32 0.0, %v1034_v18  ;;  %v3296_v48 = vadd.f32 %v3280_v34, %v899_v37 }
  0xb8   : > { %v813_v22 = vpop.f32.mrf.mxu3 }
  0xb9   : > { %v2835_v24 = vpop.eup %2834  ;;  %2836 = vpow2.f32 %v1287_v20  ;;  %v1225_v25 = vmul.f32 1.442695, %v1160_v21  ;;  %v964_v26 = vmul.f32 %v3259_v2, %v813_v22 }
  0xba   : > { %v3276_v30 = vadd.f32 1.0, %v2835_v24  ;;  %v736_v31 = vpop.f32.mrf.mxu1  ;;  %v644_v43 = vpop.f32.mrf.mxu2 }
  0xbb   : > { %2838 = vpow2.f32 %v1225_v25  ;;  %v1098_v32 = vadd.f32 %v3261_v3, %v964_v26  ;;  %v902_v33 = vmul.f32 %v3259_v2, %v736_v31  ;;  %v963_v57 = vmul.f32 %v3271_v23, %v644_v43  ;;  %v2772_v26 = vld [vmem:[%s3229_s7 + $0x50] sm:$0xff] }
  0xbc   : > { %2840 = vrcp.f32 %v3276_v30  ;;  %v1424_v52 = vand.u32 2147483647, %v3276_v30  ;;  %v1426_v56 = vand.u32 2147483648, %v3276_v30  ;;  %v567_v61 = vpop.f32.mrf.mxu0  ;;  %vm1420_vm0 = vweird.f32 %v3276_v30 }
  0xbd   : > { %v1192_v38 = vsub.f32 0.0, %v1098_v32  ;;  %v1036_v39 = vadd.f32 %v3261_v3, %v902_v33  ;;  %775 = vmatmul.bf16.gmra.mxu1 %v2771_v27  ;;  %855 = vmatmul.bf16.gmra.mxu3 %v2787_v28  ;;  %v901_v63 = vmul.f32 %v3271_v23, %v567_v61  ;;  %v3323_v8 = vadd.f32 %v3280_v34, %v963_v57 }
  0xbe   : > { %vm3318_vm2 = vcmp.eq.f32.partialorder %v1424_v52, 8.507059e+37  ;;  %v1427_v7 = vor.u32 1.1754944e-38, %v1426_v56 }
  0xbf   : > { %v2837_v40 = vpop.eup %2836  ;;  %v1289_v41 = vmul.f32 1.442695, %v1192_v38  ;;  %v1161_v42 = vsub.f32 0.0, %v1036_v39  ;;  %686 = vmatmul.bf16.gmra.mxu2 %v2787_v28  ;;  %606 = vmatmul.bf16.gmra.mxu0 %v2771_v27  ;;  %v3336_v19 = vadd.f32 %v3280_v34, %v901_v63  ;;  %v2788_v27 = vld [vmem:[%s3229_s7 + $0xd0] sm:$0xff] }
  0xc0   : > { %v3287_v44 = vadd.f32 1.0, %v2837_v40  ;;  %v816_v45 = vpop.f32.mrf.mxu3 }
  0xc1   : > { %v2839_v49 = vpop.eup %2838  ;;  %2842 = vpow2.f32 %v1289_v41  ;;  %v1227_v50 = vmul.f32 1.442695, %v1161_v42  ;;  %v966_v51 = vmul.f32 %v3259_v2, %v816_v45 }
  0xc2   : > { %v3300_v53 = vpop.eup %2840  ;;  %2844 = vrcp.f32 %v3287_v44  ;;  %v3303_v54 = vadd.f32 1.0, %v2839_v49  ;;  %v738_v55 = vpop.f32.mrf.mxu1  ;;  %v1906_v62 = vand.u32 2147483648, %v3287_v44  ;;  %v1904_v5 = vand.u32 2147483647, %v3287_v44 }
  0xc3   : > { %2846 = vpow2.f32 %v1227_v50  ;;  %v1100_v58 = vadd.f32 %v3261_v3, %v966_v51  ;;  %v904_v59 = vmul.f32 %v3259_v2, %v738_v55  ;;  %v1416_v60 = vmul.f32 %v3300_v53, %v3276_v30  ;;  %v647_v28 = vpop.f32.mrf.mxu2 }
  0xc4   : > { %2848 = vrcp.f32 %v3303_v54  ;;  %vm1421_vm1 = vweird.f32 %v3300_v53  ;;  %vm1900_vm3 = vweird.f32 %v3287_v44  ;;  %v3327_v13 = vor.u32 1.1754944e-38, %v1906_v62 }
  0xc5   : > { %v1193_v0 = vsub.f32 0.0, %v1100_v58  ;;  %v1038_v1 = vadd.f32 %v3261_v3, %v904_v59  ;;  %v1417_v4 = vsub.f32 1.0, %v1416_v60  ;;  %v1439_v17 = vand.u32 2147483647, %v3303_v54  ;;  %vm1422_vm5 = vmor %vm1420_vm0, %vm1421_vm1 }
  0xc6   : > { %v1441_v18 = vand.u32 2147483648, %v3303_v54  ;;  %vm3342_vm4 = vcmp.eq.f32.partialorder %v1904_v5, 8.507059e+37  ;;  %vm1435_vm6 = vweird.f32 %v3303_v54  ;;  %v3360_v35 = vmul.f32 %v3271_v23, %v647_v28 }
  0xc7   : > { %v2843_v9 = vpop.eup %2842  ;;  %v1291_v10 = vmul.f32 1.442695, %v1193_v0  ;;  %v1162_v11 = vsub.f32 0.0, %v1038_v1  ;;  %v1418_v12 = vmul.f32 %v3300_v53, %v1417_v4  ;;  %vm3375_vm7 = vcmp.eq.f32.partialorder %v1439_v17, 8.507059e+37 }
  0xc8   : > { %v3329_v14 = vpop.eup %2844  ;;  %v3331_v15 = vadd.f32 1.0, %v2843_v9  ;;  %v818_v16 = vpop.f32.mrf.mxu3  ;;  %v1442_v51 = vor.u32 1.1754944e-38, %v1441_v18 }
  0xc9   : > { %v2847_v20 = vpop.eup %2846  ;;  %2850 = vpow2.f32 %v1291_v10  ;;  %v1229_v21 = vmul.f32 1.442695, %v1162_v11  ;;  %v1419_v22 = vadd.f32 %v3300_v53, %v1418_v12  ;;  %v1896_v24 = vmul.f32 %v3329_v14, %v3287_v44 }
  0xca   : > { %v3348_v29 = vpop.eup %2848  ;;  %2852 = vrcp.f32 %v3331_v15  ;;  %v3351_v31 = vadd.f32 1.0, %v2847_v20  ;;  %v968_v32 = vmul.f32 %v3259_v2, %v818_v16  ;;  %v741_v33 = vpop.f32.mrf.mxu1  ;;  %vm1901_vm8 = vweird.f32 %v3329_v14 }
  0xcb   : > { %2854 = vpow2.f32 %v1229_v21  ;;  %v1423_v36 = vsel %vm1422_vm5, %v3300_v53, %v1419_v22  ;;  %v1897_v37 = vsub.f32 1.0, %v1896_v24  ;;  %v906_v38 = vmul.f32 %v3259_v2, %v741_v33  ;;  %vm1902_vm11 = vmor %vm1900_vm3, %vm1901_vm8 }
  0xcc   : > { %2856 = vrcp.f32 %v3351_v31  ;;  %v1428_v30 = vsel %vm3318_vm2, %v1427_v7, %v1423_v36  ;;  %v1102_v39 = vadd.f32 %v3261_v3, %v968_v32  ;;  %v1431_v40 = vmul.f32 %v3348_v29, %v3303_v54 }
  0xcd   : > { %v2375_v42 = vmul.f32 %v1428_v30, %v3290_v46  ;;  %v1898_v43 = vmul.f32 %v3329_v14, %v1897_v37  ;;  %v1040_v45 = vadd.f32 %v3261_v3, %v906_v38  ;;  %780 = vmatmul.bf16.gmra.mxu1 %v2772_v26  ;;  %860 = vmatmul.bf16.gmra.mxu3 %v2788_v27  ;;  %vm1436_vm9 = vweird.f32 %v3348_v29  ;;  %v2773_v38 = vld [vmem:[%s3229_s7 + $0x58] sm:$0xff] }
  0xce   : > { %v1194_v49 = vsub.f32 0.0, %v1102_v39  ;;  %v1432_v50 = vsub.f32 1.0, %v1431_v40  ;;  %vm1915_vm10 = vweird.f32 %v3331_v15  ;;  %v1919_v46 = vand.u32 2147483647, %v3331_v15  ;;  %vm1437_vm13 = vmor %vm1435_vm6, %vm1436_vm9 }
  0xcf   : > { %v2851_v52 = vpop.eup %2850  ;;  %2439 = vst [vmem:[%s3368_s19] sm:$0xff] %v2375_v42  ;;  %v1899_v53 = vadd.f32 %v3329_v14, %v1898_v43  ;;  %v1163_v55 = vsub.f32 0.0, %v1040_v45  ;;  %v1921_v60 = vand.u32 2147483648, %v3331_v15  ;;  %vm1450_vm12 = vweird.f32 %v3351_v31  ;;  %691 = vmatmul.bf16.gmra.mxu2 %v2788_v27  ;;  %611 = vmatmul.bf16.gmra.mxu0 %v2772_v26 }
  0xd0   : > { %v2853_v56 = vpop.eup %2852  ;;  %v3388_v57 = vadd.f32 1.0, %v2851_v52  ;;  %v1293_v58 = vmul.f32 1.442695, %v1194_v49  ;;  %v1433_v59 = vmul.f32 %v3348_v29, %v1432_v50  ;;  %v821_v61 = vpop.f32.mrf.mxu3  ;;  %vm3413_vm14 = vcmp.eq.f32.partialorder %v1919_v46, 8.507059e+37 }
  0xd1   : > { %v2855_v62 = vpop.eup %2854  ;;  %v1903_v63 = vsel %vm1902_vm11, %v3329_v14, %v1899_v53  ;;  %v1231_v0 = vmul.f32 1.442695, %v1163_v55  ;;  %v1911_v1 = vmul.f32 %v2853_v56, %v3331_v15  ;;  %vm1916_vm15 = vweird.f32 %v2853_v56  ;;  %v2789_v15 = vld [vmem:[%s3229_s7 + $0xd8] sm:$0xff]  ;;  %v569_v55 = vpop.f32.mrf.mxu0 }
  0xd2   : > { %v3399_v4 = vpop.eup %2856  ;;  %2858 = vrcp.f32 %v3388_v57  ;;  %v3402_v44 = vadd.f32 1.0, %v2855_v62  ;;  %v1908_v5 = vsel %vm3342_vm4, %v3327_v13, %v1903_v63  ;;  %v1434_v6 = vadd.f32 %v3348_v29, %v1433_v59  ;;  %v743_v7 = vpop.f32.mrf.mxu1  ;;  %vm1917_vm0 = vmor %vm1915_vm10, %vm1916_vm15 }
  0xd3   : > { %v2407_v9 = vmul.f32 %v1908_v5, %v3293_v47  ;;  %2860 = vpow2.f32 %v1293_v58  ;;  %v1912_v10 = vsub.f32 1.0, %v1911_v1  ;;  %v970_v13 = vmul.f32 %v3259_v2, %v821_v61  ;;  %v649_v5 = vpop.f32.mrf.mxu2 }
  0xd4   : > { %v1438_v12 = vsel %vm1437_vm13, %v3348_v29, %v1434_v6  ;;  %v908_v14 = vmul.f32 %v3259_v2, %v743_v7  ;;  %2862 = vpow2.f32 %v1231_v0  ;;  %v1446_v16 = vmul.f32 %v3399_v4, %v3351_v31 }
  0xd5   : > { %2471 = vst [vmem:[%s3368_s19 + $0x100] sm:$0xff] %v2407_v9  ;;  %v1443_v47 = vsel %vm3375_vm7, %v1442_v51, %v1438_v12  ;;  %v1913_v54 = vmul.f32 %v2853_v56, %v1912_v10  ;;  %2864 = vrcp.f32 %v3402_v44  ;;  %v1104_v18 = vadd.f32 %v3261_v3, %v970_v13 }
  0xd6   : > { %v2376_v17 = vmul.f32 %v1443_v47, %v3296_v48  ;;  %v1042_v20 = vadd.f32 %v3261_v3, %v908_v14  ;;  %v1447_v22 = vsub.f32 1.0, %v1446_v16  ;;  %v1454_v24 = vand.u32 2147483647, %v3351_v31 }
  0xd7   : > { %v1914_v21 = vadd.f32 %v2853_v56, %v1913_v54  ;;  %v1456_v25 = vand.u32 2147483648, %v3351_v31  ;;  %v1922_v48 = vor.u32 1.1754944e-38, %v1921_v60  ;;  %v1195_v27 = vsub.f32 0.0, %v1104_v18 }
  0xd8   : > { %v3431_v26 = vpop.eup %2858  ;;  %2440 = vst [vmem:[%s3368_s19 + $0x8] sm:$0xff] %v2376_v17  ;;  %v1164_v28 = vsub.f32 0.0, %v1042_v20  ;;  %vm1451_vm1 = vweird.f32 %v3399_v4  ;;  %v1448_v33 = vmul.f32 %v3399_v4, %v1447_v22  ;;  %vm3439_vm2 = vcmp.eq.f32.partialorder %v1454_v24, 8.507059e+37  ;;  %v823_v42 = vpop.f32.mrf.mxu3 }
  0xd9   : > { %v2861_v29 = vpop.eup %2860  ;;  %v1918_v32 = vsel %vm1917_vm0, %v2853_v56, %v1914_v21  ;;  %v3445_v37 = vadd.f32 %v3280_v34, %v3360_v35  ;;  %v1295_v40 = vmul.f32 1.442695, %v1195_v27  ;;  %v1457_v41 = vor.u32 1.1754944e-38, %v1456_v25  ;;  %vm1452_vm3 = vmor %vm1450_vm12, %vm1451_vm1 }
  0xda   : > { %v3449_v30 = vadd.f32 1.0, %v2861_v29  ;;  %v1923_v39 = vsel %vm3413_vm14, %v1922_v48, %v1918_v32  ;;  %v2863_v43 = vpop.eup %2862  ;;  %v1233_v49 = vmul.f32 1.442695, %v1164_v28  ;;  %v1449_v50 = vadd.f32 %v3399_v4, %v1448_v33  ;;  %v746_v59 = vpop.f32.mrf.mxu1 }
  0xdb   : > { %v2408_v45 = vmul.f32 %v1923_v39, %v3323_v8  ;;  %v1926_v35 = vmul.f32 %v3431_v26, %v3388_v57  ;;  %v3457_v51 = vpop.eup %2864  ;;  %v3460_v52 = vadd.f32 1.0, %v2863_v43  ;;  %v1934_v53 = vand.u32 2147483647, %v3388_v57  ;;  %v572_v33 = vpop.f32.mrf.mxu0  ;;  %v2774_v43 = vld [vmem:[%s3229_s7 + $0x60] sm:$0xff] }
  0xdc   : > { %2866 = vrcp.f32 %v3449_v30  ;;  %v1936_v8 = vand.u32 2147483648, %v3388_v57  ;;  %v1453_v46 = vsel %vm1452_vm3, %v3399_v4, %v1449_v50  ;;  %v972_v58 = vmul.f32 %v3259_v2, %v823_v42 }
  0xdd   : > { %2472 = vst [vmem:[%s3368_s19 + $0x108] sm:$0xff] %v2408_v45  ;;  %2868 = vpow2.f32 %v1295_v40  ;;  %v1927_v56 = vsub.f32 1.0, %v1926_v35  ;;  %785 = vmatmul.bf16.gmra.mxu1 %v2773_v38  ;;  %865 = vmatmul.bf16.gmra.mxu3 %v2789_v15  ;;  %v1458_v31 = vsel %vm3439_vm2, %v1457_v41, %v1453_v46  ;;  %vm1930_vm4 = vweird.f32 %v3388_v57  ;;  %v2790_v45 = vld [vmem:[%s3229_s7 + $0xe0] sm:$0xff] }
  0xde   : > { %2870 = vrcp.f32 %v3460_v52  ;;  %vm1931_vm5 = vweird.f32 %v3431_v26  ;;  %v2377_v60 = vmul.f32 %v1458_v31, %v3336_v19  ;;  %v1106_v62 = vadd.f32 %v3261_v3, %v972_v58  ;;  %v652_v31 = vpop.f32.mrf.mxu2 }
  0xdf   : > { %2872 = vpow2.f32 %v1233_v49  ;;  %v1928_v61 = vmul.f32 %v3431_v26, %v1927_v56  ;;  %vm3479_vm6 = vcmp.eq.f32.partialorder %v1934_v53, 8.507059e+37  ;;  %v1937_v0 = vor.u32 1.1754944e-38, %v1936_v8  ;;  %vm1932_vm7 = vmor %vm1930_vm4, %vm1931_vm5  ;;  %696 = vmatmul.bf16.gmra.mxu2 %v2789_v15  ;;  %616 = vmatmul.bf16.gmra.mxu0 %v2773_v38 }
  0xe0   : > { %v910_v1 = vmul.f32 %v3259_v2, %v746_v59  ;;  %v1461_v4 = vmul.f32 %v3457_v51, %v3402_v44  ;;  %2441 = vst [vmem:[%s3368_s19 + $0x10] sm:$0xff] %v2377_v60  ;;  %v1196_v7 = vsub.f32 0.0, %v1106_v62  ;;  %v903_v19 = vmul.f32 %v3271_v23, %v569_v55  ;;  %v826_v48 = vpop.f32.mrf.mxu3 }
  0xe1   : > { %v1929_v6 = vadd.f32 %v3431_v26, %v1928_v61  ;;  %v1469_v9 = vand.u32 2147483647, %v3402_v44  ;;  %vm1465_vm8 = vweird.f32 %v3402_v44  ;;  %v1471_v13 = vand.u32 2147483648, %v3402_v44 }
  0xe2   : > { %v3490_v10 = vpop.eup %2866  ;;  %v1044_v11 = vadd.f32 %v3261_v3, %v910_v1  ;;  %v1462_v12 = vsub.f32 1.0, %v1461_v4  ;;  %v1297_v54 = vmul.f32 1.442695, %v1196_v7  ;;  %vm1466_vm9 = vweird.f32 %v3457_v51  ;;  %v748_v15 = vpop.f32.mrf.mxu1 }
  0xe3   : > { %v2869_v14 = vpop.eup %2868  ;;  %v1933_v47 = vsel %vm1932_vm7, %v3431_v26, %v1929_v6  ;;  %v967_v16 = vmul.f32 %v3271_v23, %v649_v5  ;;  %v1037_v25 = vadd.f32 %v3280_v34, %v903_v19  ;;  %vm3511_vm10 = vcmp.eq.f32.partialorder %v1469_v9, 8.507059e+37  ;;  %vm1467_vm11 = vmor %vm1465_vm8, %vm1466_vm9 }
  0xe4   : > { %v3502_v17 = vpop.eup %2870  ;;  %v3504_v57 = vadd.f32 1.0, %v2869_v14  ;;  %v1938_v18 = vsel %vm3479_vm6, %v1937_v0, %v1933_v47  ;;  %v1165_v20 = vsub.f32 0.0, %v1044_v11  ;;  %v1463_v21 = vmul.f32 %v3457_v51, %v1462_v12  ;;  %v574_v47 = vpop.f32.mrf.mxu0 }
  0xe5   : > { %v2873_v22 = vpop.eup %2872  ;;  %v2409_v24 = vmul.f32 %v1938_v18, %v3445_v37  ;;  %2874 = vpow2.f32 %v1297_v54  ;;  %v1472_v32 = vor.u32 1.1754944e-38, %v1471_v13  ;;  %v1101_v36 = vadd.f32 %v3280_v34, %v967_v16 }
  0xe6   : > { %v3515_v27 = vadd.f32 1.0, %v2873_v22  ;;  %v1235_v28 = vmul.f32 1.442695, %v1165_v20  ;;  %v1464_v29 = vadd.f32 %v3457_v51, %v1463_v21  ;;  %2876 = vrcp.f32 %v3504_v57 }
  0xe7   : > { %2473 = vst [vmem:[%s3368_s19 + $0x110] sm:$0xff] %v2409_v24  ;;  %v1941_v37 = vmul.f32 %v3490_v10, %v3449_v30  ;;  %v1949_v38 = vand.u32 2147483647, %v3449_v30  ;;  %vm1945_vm12 = vweird.f32 %v3449_v30  ;;  %v1951_v40 = vand.u32 2147483648, %v3449_v30 }
  0xe8   : > { %v1468_v39 = vsel %vm1467_vm11, %v3457_v51, %v1464_v29  ;;  %v974_v41 = vmul.f32 %v3259_v2, %v826_v48  ;;  %2878 = vpow2.f32 %v1235_v28  ;;  %vm1946_vm13 = vweird.f32 %v3490_v10  ;;  %v828_v16 = vpop.f32.mrf.mxu3 }
  0xe9   : > { %v1473_v44 = vsel %vm3511_vm10, %v1472_v32, %v1468_v39  ;;  %v1942_v42 = vsub.f32 1.0, %v1941_v37  ;;  %2880 = vrcp.f32 %v3515_v27  ;;  %v912_v35 = vmul.f32 %v3259_v2, %v748_v15  ;;  %vm1947_vm0 = vmor %vm1945_vm12, %vm1946_vm13  ;;  %v654_v39 = vpop.f32.mrf.mxu2 }
  0xea   : > { %v2378_v49 = vmul.f32 %v1473_v44, %v1037_v25  ;;  %v1108_v50 = vadd.f32 %v3261_v3, %v974_v41  ;;  %vm3541_vm14 = vcmp.eq.f32.partialorder %v1949_v38, 8.507059e+37  ;;  %v905_v55 = vmul.f32 %v3271_v23, %v572_v33  ;;  %v751_v18 = vpop.f32.mrf.mxu1 }
  0xeb   : > { %v2875_v51 = vpop.eup %2874  ;;  %v1943_v53 = vmul.f32 %v3490_v10, %v1942_v42  ;;  %v1476_v46 = vmul.f32 %v3502_v17, %v3460_v52  ;;  %v1952_v56 = vor.u32 1.1754944e-38, %v1951_v40  ;;  %v1046_v59 = vadd.f32 %v3261_v3, %v912_v35 }
  0xec   : > { %2442 = vst [vmem:[%s3368_s19 + $0x18] sm:$0xff] %v2378_v49  ;;  %v1197_v58 = vsub.f32 0.0, %v1108_v50  ;;  %vm1480_vm15 = vweird.f32 %v3460_v52  ;;  %v3551_v60 = vpop.eup %2876  ;;  %v3553_v61 = vadd.f32 1.0, %v2875_v51  ;;  %v1484_v0 = vand.u32 2147483647, %v3460_v52 }
  0xed   : > { %v1944_v62 = vadd.f32 %v3490_v10, %v1943_v53  ;;  %v1477_v63 = vsub.f32 1.0, %v1476_v46  ;;  %790 = vmatmul.bf16.gmra.mxu1 %v2774_v43  ;;  %870 = vmatmul.bf16.gmra.mxu3 %v2790_v45  ;;  %v1166_v4 = vsub.f32 0.0, %v1046_v59  ;;  %vm1481_vm1 = vweird.f32 %v3502_v17 }
  0xee   : > { %v1299_v1 = vmul.f32 1.442695, %v1197_v58  ;;  %v1486_v5 = vand.u32 2147483648, %v3460_v52  ;;  %v2879_v6 = vpop.eup %2878  ;;  %v1039_v19 = vadd.f32 %v3280_v34, %v905_v55  ;;  %v969_v11 = vmul.f32 %v3271_v23, %v652_v31  ;;  %vm1482_vm3 = vmor %vm1480_vm15, %vm1481_vm1  ;;  %v2791_v58 = vld [vmem:[%s3229_s7 + $0xe8] sm:$0xff] }
  0xef   : > { %v1948_v7 = vsel %vm1947_vm0, %v3490_v10, %v1944_v62  ;;  %v1478_v9 = vmul.f32 %v3502_v17, %v1477_v63  ;;  %v3567_v12 = vpop.eup %2880  ;;  %v3569_v13 = vadd.f32 1.0, %v2879_v6  ;;  %v1237_v14 = vmul.f32 1.442695, %v1166_v4  ;;  %701 = vmatmul.bf16.gmra.mxu2 %v2790_v45  ;;  %621 = vmatmul.bf16.gmra.mxu0 %v2774_v43 }
  0xf0   : > { %v1953_v30 = vsel %vm3541_vm14, %v1952_v56, %v1948_v7  ;;  %2882 = vpow2.f32 %v1299_v1  ;;  %vm1485_vm2 = vcmp.eq.f32.partialorder %v1484_v0, 8.507059e+37  ;;  %v1487_v20 = vor.u32 1.1754944e-38, %v1486_v5  ;;  %v2775_v56 = vld [vmem:[%s3229_s7 + $0x68] sm:$0xff]  ;;  %v577_v1 = vpop.f32.mrf.mxu0  ;;  %v831_v6 = vpop.f32.mrf.mxu3 }
  0xf1   : > { %2884 = vrcp.f32 %v3553_v61  ;;  %v2410_v10 = vmul.f32 %v1953_v30, %v1101_v36  ;;  %v1479_v54 = vadd.f32 %v3502_v17, %v1478_v9  ;;  %v1103_v21 = vadd.f32 %v3280_v34, %v969_v11 }
  0xf2   : > { %2886 = vrcp.f32 %v3569_v13  ;;  %v1956_v22 = vmul.f32 %v3551_v60, %v3504_v57  ;;  %v1964_v25 = vand.u32 2147483647, %v3504_v57  ;;  %v1966_v26 = vand.u32 2147483648, %v3504_v57  ;;  %v753_v7 = vpop.f32.mrf.mxu1 }
  0xf3   : > { %2474 = vst [vmem:[%s3368_s19 + $0x118] sm:$0xff] %v2410_v10  ;;  %2888 = vpow2.f32 %v1237_v14  ;;  %v1483_v24 = vsel %vm1482_vm3, %v3502_v17, %v1479_v54  ;;  %v976_v28 = vmul.f32 %v3259_v2, %v828_v16  ;;  %v914_v29 = vmul.f32 %v3259_v2, %v751_v18 }
  0xf4   : > { %v1488_v48 = vsel %vm1485_vm2, %v1487_v20, %v1483_v24  ;;  %v1957_v52 = vsub.f32 1.0, %v1956_v22  ;;  %vm1960_vm4 = vweird.f32 %v3504_v57  ;;  %vm1961_vm5 = vweird.f32 %v3551_v60 }
  0xf5   : > { %v2379_v32 = vmul.f32 %v1488_v48, %v1039_v19  ;;  %v907_v33 = vmul.f32 %v3271_v23, %v574_v47  ;;  %v1110_v37 = vadd.f32 %v3261_v3, %v976_v28  ;;  %v1048_v38 = vadd.f32 %v3261_v3, %v914_v29  ;;  %vm1962_vm7 = vmor %vm1960_vm4, %vm1961_vm5  ;;  %v657_v29 = vpop.f32.mrf.mxu2 }
  0xf6   : > { %v2883_v36 = vpop.eup %2882  ;;  %v1958_v17 = vmul.f32 %v3551_v60, %v1957_v52  ;;  %v1491_v15 = vmul.f32 %v3567_v12, %v3515_v27  ;;  %vm3602_vm6 = vcmp.eq.f32.partialorder %v1964_v25, 8.507059e+37  ;;  %v1967_v42 = vor.u32 1.1754944e-38, %v1966_v26 }
  0xf7   : > { %v3597_v40 = vpop.eup %2884  ;;  %v3599_v41 = vadd.f32 1.0, %v2883_v36  ;;  %2443 = vst [vmem:[%s3368_s19 + $0x20] sm:$0xff] %v2379_v32  ;;  %v1041_v43 = vadd.f32 %v3280_v34, %v907_v33  ;;  %v1198_v50 = vsub.f32 0.0, %v1110_v37  ;;  %v1167_v35 = vsub.f32 0.0, %v1048_v38 }
  0xf8   : > { %v3607_v45 = vpop.eup %2886  ;;  %v1959_v49 = vadd.f32 %v3551_v60, %v1958_v17  ;;  %v1492_v51 = vsub.f32 1.0, %v1491_v15  ;;  %vm1495_vm8 = vweird.f32 %v3515_v27  ;;  %v1499_v8 = vand.u32 2147483647, %v3515_v27 }
  0xf9   : > { %v2889_v53 = vpop.eup %2888  ;;  %v1501_v55 = vand.u32 2147483648, %v3515_v27  ;;  %v971_v46 = vmul.f32 %v3271_v23, %v654_v39  ;;  %v1301_v62 = vmul.f32 1.442695, %v1198_v50  ;;  %v1239_v63 = vmul.f32 1.442695, %v1167_v35 }
  0xfa   : > { %v3620_v59 = vadd.f32 1.0, %v2889_v53  ;;  %v1963_v31 = vsel %vm1962_vm7, %v3551_v60, %v1959_v49  ;;  %2890 = vrcp.f32 %v3599_v41  ;;  %v1493_v0 = vmul.f32 %v3567_v12, %v1492_v51  ;;  %v579_v53 = vpop.f32.mrf.mxu0 }
  0xfb   : > { %v1968_v57 = vsel %vm3602_vm6, %v1967_v42, %v1963_v31  ;;  %vm1496_vm9 = vweird.f32 %v3567_v12  ;;  %vm3629_vm10 = vcmp.eq.f32.partialorder %v1499_v8, 8.507059e+37  ;;  %v1971_v60 = vmul.f32 %v3597_v40, %v3553_v61 }
  0xfc   : > { %2892 = vrcp.f32 %v3620_v59  ;;  %v2411_v4 = vmul.f32 %v1968_v57, %v1103_v21  ;;  %v1494_v19 = vadd.f32 %v3567_v12, %v1493_v0  ;;  %v1502_v9 = vor.u32 1.1754944e-38, %v1501_v55  ;;  %vm1497_vm11 = vmor %vm1495_vm8, %vm1496_vm9 }
  0xfd   : > { %2894 = vpow2.f32 %v1301_v62  ;;  %v1105_v11 = vadd.f32 %v3280_v34, %v971_v46  ;;  %795 = vmatmul.bf16.gmra.mxu1 %v2775_v56  ;;  %875 = vmatmul.bf16.gmra.mxu3 %v2791_v58  ;;  %v1972_v30 = vsub.f32 1.0, %v1971_v60  ;;  %v1979_v14 = vand.u32 2147483647, %v3553_v61  ;;  %v833_v46 = vpop.f32.mrf.mxu3 }
  0xfe   : > { %2475 = vst [vmem:[%s3368_s19 + $0x120] sm:$0xff] %v2411_v4  ;;  %2896 = vpow2.f32 %v1239_v63  ;;  %v1981_v47 = vand.u32 2147483648, %v3553_v61  ;;  %v1498_v10 = vsel %vm1497_vm11, %v3567_v12, %v1494_v19  ;;  %vm1975_vm12 = vweird.f32 %v3553_v61  ;;  %v2792_v4 = vld [vmem:[%s3229_s7 + $0xf0] sm:$0xff] }
  0xff   : > { %v978_v54 = vmul.f32 %v3259_v2, %v831_v6  ;;  %v916_v16 = vmul.f32 %v3259_v2, %v753_v7  ;;  %v1503_v18 = vsel %vm3629_vm10, %v1502_v9, %v1498_v10  ;;  %v1973_v20 = vmul.f32 %v3597_v40, %v1972_v30  ;;  %706 = vmatmul.bf16.gmra.mxu2 %v2791_v58 }
 0x100   : > { %vm1976_vm13 = vweird.f32 %v3597_v40  ;;  %v909_v27 = vmul.f32 %v3271_v23, %v577_v1  ;;  %v3653_v21 = vpop.eup %2890  ;;  %v2380_v22 = vmul.f32 %v1503_v18, %v1041_v43  ;;  %vm3655_vm14 = vcmp.eq.f32.partialorder %v1979_v14, 8.507059e+37  ;;  %626 = vmatmul.bf16.gmra.mxu0 %v2775_v56  ;;  %v756_v56 = vpop.f32.mrf.mxu1  ;;  %v2776_v1 = vld [vmem:[%s3229_s7 + $0x70] sm:$0xff] }
 0x101   : > { %v1112_v24 = vadd.f32 %v3261_v3, %v978_v54  ;;  %v1050_v25 = vadd.f32 %v3261_v3, %v916_v16  ;;  %v1974_v48 = vadd.f32 %v3597_v40, %v1973_v20  ;;  %v1982_v52 = vor.u32 1.1754944e-38, %v1981_v47  ;;  %vm1977_vm0 = vmor %vm1975_vm12, %vm1976_vm13  ;;  %v659_v47 = vpop.f32.mrf.mxu2 }
 0x102   : > { %v3661_v26 = vpop.eup %2892  ;;  %v1506_v28 = vmul.f32 %v3607_v45, %v3569_v13  ;;  %vm1510_vm15 = vweird.f32 %v3569_v13  ;;  %2444 = vst [vmem:[%s3368_s19 + $0x28] sm:$0xff] %v2380_v22  ;;  %v1514_v17 = vand.u32 2147483647, %v3569_v13  ;;  %v1516_v37 = vand.u32 2147483648, %v3569_v13 }
 0x103   : > { %v2895_v32 = vpop.eup %2894  ;;  %v1199_v33 = vsub.f32 0.0, %v1112_v24  ;;  %v1168_v36 = vsub.f32 0.0, %v1050_v25  ;;  %v1978_v39 = vsel %vm1977_vm0, %v3597_v40, %v1974_v48  ;;  %v973_v42 = vmul.f32 %v3271_v23, %v657_v29 }
 0x104   : > { %v2897_v38 = vpop.eup %2896  ;;  %v3674_v15 = vadd.f32 1.0, %v2895_v32  ;;  %v1507_v44 = vsub.f32 1.0, %v1506_v28  ;;  %v1983_v61 = vsel %vm3655_vm14, %v1982_v52, %v1978_v39  ;;  %vm1511_vm1 = vweird.f32 %v3607_v45 }
 0x105   : > { %v3678_v43 = vadd.f32 1.0, %v2897_v38  ;;  %v1303_v49 = vmul.f32 1.442695, %v1199_v33  ;;  %v1241_v50 = vmul.f32 1.442695, %v1168_v36  ;;  %v2412_v35 = vmul.f32 %v1983_v61, %v1105_v11  ;;  %vm1512_vm3 = vmor %vm1510_vm15, %vm1511_vm1 }
 0x106   : > { %2898 = vrcp.f32 %v3674_v15  ;;  %v1508_v51 = vmul.f32 %v3607_v45, %v1507_v44  ;;  %v1043_v40 = vadd.f32 %v3280_v34, %v909_v27  ;;  %vm3687_vm2 = vcmp.eq.f32.partialorder %v1514_v17, 8.507059e+37  ;;  %v836_v44 = vpop.f32.mrf.mxu3 }
 0x107   : > { %2900 = vrcp.f32 %v3678_v43  ;;  %v1986_v55 = vmul.f32 %v3653_v21, %v3599_v41  ;;  %2476 = vst [vmem:[%s3368_s19 + $0x128] sm:$0xff] %v2412_v35  ;;  %v1517_v31 = vor.u32 1.1754944e-38, %v1516_v37  ;;  %v1107_v62 = vadd.f32 %v3280_v34, %v973_v42  ;;  %v582_v35 = vpop.f32.mrf.mxu0 }
 0x108   : > { %2902 = vpow2.f32 %v1303_v49  ;;  %v1509_v58 = vadd.f32 %v3607_v45, %v1508_v51  ;;  %v1994_v57 = vand.u32 2147483647, %v3599_v41  ;;  %v1996_v0 = vand.u32 2147483648, %v3599_v41  ;;  %v758_v42 = vpop.f32.mrf.mxu1 }
 0x109   : > { %2904 = vpow2.f32 %v1241_v50  ;;  %v1987_v63 = vsub.f32 1.0, %v1986_v55  ;;  %v980_v60 = vmul.f32 %v3259_v2, %v833_v46  ;;  %v918_v6 = vmul.f32 %v3259_v2, %v756_v56 }
 0x10a   : > { %v1513_v5 = vsel %vm1512_vm3, %v3607_v45, %v1509_v58  ;;  %v911_v7 = vmul.f32 %v3271_v23, %v579_v53  ;;  %vm1990_vm4 = vweird.f32 %v3599_v41  ;;  %vm1991_vm5 = vweird.f32 %v3653_v21 }
 0x10b   : > { %v1518_v19 = vsel %vm3687_vm2, %v1517_v31, %v1513_v5  ;;  %v1988_v13 = vmul.f32 %v3653_v21, %v1987_v63  ;;  %vm3713_vm6 = vcmp.eq.f32.partialorder %v1994_v57, 8.507059e+37  ;;  %v1114_v30 = vadd.f32 %v3261_v3, %v980_v60  ;;  %vm1992_vm7 = vmor %vm1990_vm4, %vm1991_vm5  ;;  %v662_v60 = vpop.f32.mrf.mxu2 }
 0x10c   : > { %v3711_v9 = vpop.eup %2898  ;;  %v2381_v11 = vmul.f32 %v1518_v19, %v1043_v40  ;;  %v1052_v14 = vadd.f32 %v3261_v3, %v918_v6  ;;  %v1997_v16 = vor.u32 1.1754944e-38, %v1996_v0  ;;  %v1045_v18 = vadd.f32 %v3280_v34, %v911_v7 }
 0x10d   : > { %v3719_v10 = vpop.eup %2900  ;;  %v1989_v54 = vadd.f32 %v3653_v21, %v1988_v13  ;;  %v1521_v20 = vmul.f32 %v3661_v26, %v3620_v59  ;;  %800 = vmatmul.bf16.gmra.mxu1 %v2776_v1  ;;  %880 = vmatmul.bf16.gmra.mxu3 %v2792_v4  ;;  %v1200_v22 = vsub.f32 0.0, %v1114_v30  ;;  %v1529_v24 = vand.u32 2147483647, %v3620_v59 }
 0x10e   : > { %v2903_v27 = vpop.eup %2902  ;;  %2445 = vst [vmem:[%s3368_s19 + $0x30] sm:$0xff] %v2381_v11  ;;  %v1169_v12 = vsub.f32 0.0, %v1052_v14  ;;  %v1531_v25 = vand.u32 2147483648, %v3620_v59  ;;  %v975_v32 = vmul.f32 %v3271_v23, %v659_v47  ;;  %vm1526_vm8 = vweird.f32 %v3661_v26 }
 0x10f   : > { %v2905_v48 = vpop.eup %2904  ;;  %v3732_v52 = vadd.f32 1.0, %v2903_v27  ;;  %v1993_v28 = vsel %vm1992_vm7, %v3653_v21, %v1989_v54  ;;  %v1522_v29 = vsub.f32 1.0, %v1521_v20  ;;  %v1305_v36 = vmul.f32 1.442695, %v1200_v22  ;;  %711 = vmatmul.bf16.gmra.mxu2 %v2792_v4 }
 0x110   : > { %v3736_v33 = vadd.f32 1.0, %v2905_v48  ;;  %v1998_v41 = vsel %vm3713_vm6, %v1997_v16, %v1993_v28  ;;  %v1243_v17 = vmul.f32 1.442695, %v1169_v12  ;;  %vm1525_vm9 = vweird.f32 %v3620_v59  ;;  %631 = vmatmul.bf16.gmra.mxu0 %v2776_v1  ;;  %v761_v48 = vpop.f32.mrf.mxu1  ;;  %v584_v28 = vpop.f32.mrf.mxu0 }
 0x111   : > { %2906 = vrcp.f32 %v3732_v52  ;;  %v2413_v37 = vmul.f32 %v1998_v41, %v1107_v62  ;;  %v1523_v38 = vmul.f32 %v3661_v26, %v1522_v29  ;;  %vm3745_vm10 = vcmp.eq.f32.partialorder %v1529_v24, 8.507059e+37  ;;  %vm1527_vm11 = vmor %vm1525_vm9, %vm1526_vm8 }
 0x112   : > { %2908 = vrcp.f32 %v3736_v33  ;;  %v2001_v39 = vmul.f32 %v3711_v9, %v3674_v15  ;;  %v1532_v49 = vor.u32 1.1754944e-38, %v1531_v25  ;;  %v1109_v50 = vadd.f32 %v3280_v34, %v975_v32 }
 0x113   : > { %2477 = vst [vmem:[%s3368_s19 + $0x130] sm:$0xff] %v2413_v37  ;;  %2910 = vpow2.f32 %v1305_v36  ;;  %v1524_v61 = vadd.f32 %v3661_v26, %v1523_v38  ;;  %v2009_v51 = vand.u32 2147483647, %v3674_v15  ;;  %v2011_v53 = vand.u32 2147483648, %v3674_v15  ;;  %v2777_v36 = vld [vmem:[%s3229_s7 + $0x78] sm:$0xff] }
 0x114   : > { %2912 = vpow2.f32 %v1243_v17  ;;  %v2002_v59 = vsub.f32 1.0, %v2001_v39  ;;  %vm2005_vm12 = vweird.f32 %v3674_v15  ;;  %v982_v8 = vmul.f32 %v3259_v2, %v836_v44  ;;  %v2793_v17 = vld [vmem:[%s3229_s7 + $0xf8] sm:$0xff] }
 0x115   : > { %v1528_v40 = vsel %vm1527_vm11, %v3661_v26, %v1524_v61  ;;  %v920_v55 = vmul.f32 %v3259_v2, %v758_v42  ;;  %vm2006_vm13 = vweird.f32 %v3711_v9  ;;  %v913_v58 = vmul.f32 %v3271_v23, %v582_v35 }
 0x116   : > { %v1533_v46 = vsel %vm3745_vm10, %v1532_v49, %v1528_v40  ;;  %v2003_v56 = vmul.f32 %v3711_v9, %v2002_v59  ;;  %vm3769_vm14 = vcmp.eq.f32.partialorder %v2009_v51, 8.507059e+37  ;;  %v1116_v63 = vadd.f32 %v3261_v3, %v982_v8  ;;  %vm2007_vm0 = vmor %vm2005_vm12, %vm2006_vm13 }
 0x117   : > { %v3767_v31 = vpop.eup %2906  ;;  %v2382_v62 = vmul.f32 %v1533_v46, %v1045_v18  ;;  %v1054_v57 = vadd.f32 %v3261_v3, %v920_v55  ;;  %v2012_v4 = vor.u32 1.1754944e-38, %v2011_v53  ;;  %v1536_v5 = vmul.f32 %v3719_v10, %v3678_v43  ;;  %v664_v53 = vpop.f32.mrf.mxu2 }
 0x118   : > { %v3775_v0 = vpop.eup %2908  ;;  %v2004_v1 = vadd.f32 %v3711_v9, %v2003_v56  ;;  %vm1540_vm15 = vweird.f32 %v3678_v43  ;;  %v1201_v7 = vsub.f32 0.0, %v1116_v63  ;;  %v1544_v13 = vand.u32 2147483647, %v3678_v43 }
 0x119   : > { %v2911_v6 = vpop.eup %2910  ;;  %2446 = vst [vmem:[%s3368_s19 + $0x38] sm:$0xff] %v2382_v62  ;;  %v1170_v19 = vsub.f32 0.0, %v1054_v57  ;;  %v1546_v11 = vand.u32 2147483648, %v3678_v43  ;;  %v1537_v47 = vsub.f32 1.0, %v1536_v5  ;;  %v977_v54 = vmul.f32 %v3271_v23, %v662_v60 }
 0x11a   : > { %v2913_v45 = vpop.eup %2912  ;;  %v3788_v30 = vadd.f32 1.0, %v2911_v6  ;;  %v2008_v14 = vsel %vm2007_vm0, %v3711_v9, %v2004_v1  ;;  %v1307_v18 = vmul.f32 1.442695, %v1201_v7  ;;  %vm1541_vm1 = vweird.f32 %v3719_v10  ;;  %v838_v9 = vpop.f32.mrf.mxu3 }
 0x11b   : > { %v3792_v16 = vadd.f32 1.0, %v2913_v45  ;;  %v2013_v15 = vsel %vm3769_vm14, %v2012_v4, %v2008_v14  ;;  %v1245_v20 = vmul.f32 1.442695, %v1170_v19  ;;  %v1538_v22 = vmul.f32 %v3719_v10, %v1537_v47  ;;  %vm1542_vm3 = vmor %vm1540_vm15, %vm1541_vm1 }
 0x11c   : > { %2914 = vrcp.f32 %v3788_v30  ;;  %v2414_v27 = vmul.f32 %v2013_v15, %v1109_v50  ;;  %v1047_v12 = vadd.f32 %v3280_v34, %v913_v58  ;;  %vm3801_vm2 = vcmp.eq.f32.partialorder %v1544_v13, 8.507059e+37 }
 0x11d   : > { %2916 = vrcp.f32 %v3792_v16  ;;  %v2016_v25 = vmul.f32 %v3767_v31, %v3732_v52  ;;  %v1539_v29 = vadd.f32 %v3719_v10, %v1538_v22  ;;  %v1547_v32 = vor.u32 1.1754944e-38, %v1546_v11  ;;  %805 = vmatmul.bf16.gmra.mxu1 %v2777_v36  ;;  %885 = vmatmul.bf16.gmra.mxu3 %v2793_v17 }
 0x11e   : > { %2478 = vst [vmem:[%s3368_s19 + $0x138] sm:$0xff] %v2414_v27  ;;  %2918 = vpow2.f32 %v1307_v18  ;;  %v1111_v41 = vadd.f32 %v3280_v34, %v977_v54  ;;  %v2024_v38 = vand.u32 2147483647, %v3732_v52  ;;  %v2026_v21 = vand.u32 2147483648, %v3732_v52  ;;  %v763_v54 = vpop.f32.mrf.mxu1  ;;  %v587_v27 = vpop.f32.mrf.mxu0 }
 0x11f   : > { %2920 = vpow2.f32 %v1245_v20  ;;  %v2017_v37 = vsub.f32 1.0, %v2016_v25  ;;  %v1543_v39 = vsel %vm1542_vm3, %v3719_v10, %v1539_v29  ;;  %v984_v44 = vmul.f32 %v3259_v2, %v838_v9  ;;  %716 = vmatmul.bf16.gmra.mxu2 %v2793_v17 }
 0x120   : > { %v922_v42 = vmul.f32 %v3259_v2, %v761_v48  ;;  %v915_v61 = vmul.f32 %v3271_v23, %v584_v28  ;;  %v1548_v49 = vsel %vm3801_vm2, %v1547_v32, %v1543_v39  ;;  %vm2020_vm4 = vweird.f32 %v3732_v52  ;;  %636 = vmatmul.bf16.gmra.mxu0 %v2777_v36 }
 0x121   : > { %v2018_v43 = vmul.f32 %v3767_v31, %v2017_v37  ;;  %vm2021_vm5 = vweird.f32 %v3767_v31  ;;  %v2383_v10 = vmul.f32 %v1548_v49, %v1047_v12  ;;  %vm3829_vm6 = vcmp.eq.f32.partialorder %v2024_v38, 8.507059e+37 }
 0x122   : > { %v3827_v50 = vpop.eup %2914  ;;  %v1118_v59 = vadd.f32 %v3261_v3, %v984_v44  ;;  %v1056_v51 = vadd.f32 %v3261_v3, %v922_v42  ;;  %v2027_v55 = vor.u32 1.1754944e-38, %v2026_v21  ;;  %v1049_v46 = vadd.f32 %v3280_v34, %v915_v61  ;;  %vm2022_vm7 = vmor %vm2020_vm4, %vm2021_vm5  ;;  %v841_v47 = vpop.f32.mrf.mxu3 }
 0x123   : > { %v3835_v40 = vpop.eup %2916  ;;  %v2019_v8 = vadd.f32 %v3767_v31, %v2018_v43  ;;  %v1551_v56 = vmul.f32 %v3775_v0, %v3736_v33  ;;  %2447 = vst [vmem:[%s3368_s19 + $0x40] sm:$0xff] %v2383_v10  ;;  %v1559_v63 = vand.u32 2147483647, %v3736_v33  ;;  %v1561_v57 = vand.u32 2147483648, %v3736_v33  ;;  %v667_v44 = vpop.f32.mrf.mxu2 }
 0x124   : > { %v2919_v58 = vpop.eup %2918  ;;  %v1202_v62 = vsub.f32 0.0, %v1118_v59  ;;  %v1171_v26 = vsub.f32 0.0, %v1056_v51  ;;  %v979_v6 = vmul.f32 %v3271_v23, %v664_v53  ;;  %vm1556_vm8 = vweird.f32 %v3775_v0 }
 0x125   : > { %v2921_v1 = vpop.eup %2920  ;;  %v3848_v4 = vadd.f32 1.0, %v2919_v58  ;;  %v2023_v5 = vsel %vm2022_vm7, %v3767_v31, %v2019_v8  ;;  %v1552_v60 = vsub.f32 1.0, %v1551_v56  ;;  %vm1555_vm9 = vweird.f32 %v3736_v33 }
 0x126   : > { %v3852_v7 = vadd.f32 1.0, %v2921_v1  ;;  %v2028_v52 = vsel %vm3829_vm6, %v2027_v55, %v2023_v5  ;;  %v1309_v19 = vmul.f32 1.442695, %v1202_v62  ;;  %v1247_v13 = vmul.f32 1.442695, %v1171_v26  ;;  %vm1557_vm11 = vmor %vm1555_vm9, %vm1556_vm8  ;;  %v766_v1 = vpop.f32.mrf.mxu1  ;;  %v589_v5 = vpop.f32.mrf.mxu0 }
 0x127   : > { %2922 = vrcp.f32 %v3848_v4  ;;  %v2415_v11 = vmul.f32 %v2028_v52, %v1111_v41  ;;  %v1553_v45 = vmul.f32 %v3775_v0, %v1552_v60  ;;  %vm3861_vm10 = vcmp.eq.f32.partialorder %v1559_v63, 8.507059e+37 }
 0x128   : > { %2924 = vrcp.f32 %v3852_v7  ;;  %v2031_v14 = vmul.f32 %v3827_v50, %v3788_v30  ;;  %v1562_v18 = vor.u32 1.1754944e-38, %v1561_v57  ;;  %v1113_v20 = vadd.f32 %v3280_v34, %v979_v6 }
 0x129   : > { %2479 = vst [vmem:[%s3368_s19 + $0x140] sm:$0xff] %v2415_v11  ;;  %2926 = vpow2.f32 %v1309_v19  ;;  %v1554_v15 = vadd.f32 %v3775_v0, %v1553_v45  ;;  %v2039_v22 = vand.u32 2147483647, %v3788_v30  ;;  %v2041_v9 = vand.u32 2147483648, %v3788_v30 }
 0x12a   : > { %2928 = vpow2.f32 %v1247_v13  ;;  %v2032_v33 = vsub.f32 1.0, %v2031_v14  ;;  %vm2035_vm12 = vweird.f32 %v3788_v30  ;;  %v986_v24 = vmul.f32 %v3259_v2, %v841_v47  ;;  %v843_v26 = vpop.f32.mrf.mxu3 }
 0x12b   : > { %v1558_v12 = vsel %vm1557_vm11, %v3775_v0, %v1554_v15  ;;  %v924_v25 = vmul.f32 %v3259_v2, %v763_v54  ;;  %vm2036_vm13 = vweird.f32 %v3827_v50  ;;  %v917_v29 = vmul.f32 %v3271_v23, %v587_v27 }
 0x12c   : > { %v1563_v48 = vsel %vm3861_vm10, %v1562_v18, %v1558_v12  ;;  %v2033_v28 = vmul.f32 %v3827_v50, %v2032_v33  ;;  %vm3883_vm14 = vcmp.eq.f32.partialorder %v2039_v22, 8.507059e+37  ;;  %v1120_v36 = vadd.f32 %v3261_v3, %v986_v24  ;;  %vm2037_vm0 = vmor %vm2035_vm12, %vm2036_vm13  ;;  %v669_v33 = vpop.f32.mrf.mxu2 }
 0x12d   : > { %v3881_v32 = vpop.eup %2922  ;;  %v2384_v41 = vmul.f32 %v1563_v48, %v1049_v46  ;;  %v1058_v17 = vadd.f32 %v3261_v3, %v924_v25  ;;  %v2042_v21 = vor.u32 1.1754944e-38, %v2041_v9  ;;  %v1566_v39 = vmul.f32 %v3835_v40, %v3792_v16 }
 0x12e   : > { %v3889_v37 = vpop.eup %2924  ;;  %v2034_v38 = vadd.f32 %v3827_v50, %v2033_v28  ;;  %vm1570_vm15 = vweird.f32 %v3792_v16  ;;  %v1203_v61 = vsub.f32 0.0, %v1120_v36  ;;  %v1574_v43 = vand.u32 2147483647, %v3792_v16 }
 0x12f   : > { %v2927_v42 = vpop.eup %2926  ;;  %2448 = vst [vmem:[%s3368_s19 + $0x48] sm:$0xff] %v2384_v41  ;;  %v1172_v49 = vsub.f32 0.0, %v1058_v17  ;;  %v1576_v10 = vand.u32 2147483648, %v3792_v16  ;;  %v1567_v53 = vsub.f32 1.0, %v1566_v39  ;;  %v981_v8 = vmul.f32 %v3271_v23, %v667_v44 }
 0x130   : > { %v2929_v35 = vpop.eup %2928  ;;  %v3902_v59 = vadd.f32 1.0, %v2927_v42  ;;  %v2038_v51 = vsel %vm2037_vm0, %v3827_v50, %v2034_v38  ;;  %v1311_v46 = vmul.f32 1.442695, %v1203_v61  ;;  %vm1571_vm1 = vweird.f32 %v3835_v40 }
 0x131   : > { %v3906_v55 = vadd.f32 1.0, %v2929_v35  ;;  %v2043_v30 = vsel %vm3883_vm14, %v2042_v21, %v2038_v51  ;;  %v1249_v56 = vmul.f32 1.442695, %v1172_v49  ;;  %v1568_v62 = vmul.f32 %v3835_v40, %v1567_v53  ;;  %vm1572_vm3 = vmor %vm1570_vm15, %vm1571_vm1  ;;  %v768_v51 = vpop.f32.mrf.mxu1 }
 0x132   : > { %2930 = vrcp.f32 %v3902_v59  ;;  %v2416_v58 = vmul.f32 %v2043_v30, %v1113_v20  ;;  %v1051_v50 = vadd.f32 %v3280_v34, %v917_v29  ;;  %vm3915_vm2 = vcmp.eq.f32.partialorder %v1574_v43, 8.507059e+37  ;;  %v846_v35 = vpop.f32.mrf.mxu3 }
 0x133   : > { %2932 = vrcp.f32 %v3906_v55  ;;  %v2046_v57 = vmul.f32 %v3881_v32, %v3848_v4  ;;  %v1569_v60 = vadd.f32 %v3835_v40, %v1568_v62  ;;  %v1577_v6 = vor.u32 1.1754944e-38, %v1576_v10 }
 0x134   : > { %2480 = vst [vmem:[%s3368_s19 + $0x148] sm:$0xff] %v2416_v58  ;;  %2934 = vpow2.f32 %v1311_v46  ;;  %v1115_v52 = vadd.f32 %v3280_v34, %v981_v8  ;;  %v2054_v13 = vand.u32 2147483647, %v3848_v4  ;;  %v2056_v11 = vand.u32 2147483648, %v3848_v4  ;;  %v592_v46 = vpop.f32.mrf.mxu0 }
 0x135   : > { %2936 = vpow2.f32 %v1249_v56  ;;  %v2047_v19 = vsub.f32 1.0, %v2046_v57  ;;  %v1573_v45 = vsel %vm1572_vm3, %v3835_v40, %v1569_v60  ;;  %v988_v31 = vmul.f32 %v3259_v2, %v843_v26 }
 0x136   : > { %v926_v14 = vmul.f32 %v3259_v2, %v766_v1  ;;  %v919_v47 = vmul.f32 %v3271_v23, %v589_v5  ;;  %v1578_v54 = vsel %vm3915_vm2, %v1577_v6, %v1573_v45  ;;  %vm2050_vm4 = vweird.f32 %v3848_v4 }
 0x137   : > { %v2048_v16 = vmul.f32 %v3881_v32, %v2047_v19  ;;  %vm2051_vm5 = vweird.f32 %v3881_v32  ;;  %v2385_v18 = vmul.f32 %v1578_v54, %v1051_v50  ;;  %vm3939_vm6 = vcmp.eq.f32.partialorder %v2054_v13, 8.507059e+37 }
 0x138   : > { %v3937_v15 = vpop.eup %2930  ;;  %v1122_v20 = vadd.f32 %v3261_v3, %v988_v31  ;;  %v1060_v27 = vadd.f32 %v3261_v3, %v926_v14  ;;  %v2057_v12 = vor.u32 1.1754944e-38, %v2056_v11  ;;  %v1053_v24 = vadd.f32 %v3280_v34, %v919_v47  ;;  %vm2052_vm7 = vmor %vm2050_vm4, %vm2051_vm5  ;;  %v672_v31 = vpop.f32.mrf.mxu2 }
 0x139   : > { %v3945_v22 = vpop.eup %2932  ;;  %v2049_v9 = vadd.f32 %v3881_v32, %v2048_v16  ;;  %v1581_v25 = vmul.f32 %v3889_v37, %v3852_v7  ;;  %2449 = vst [vmem:[%s3368_s19 + $0x50] sm:$0xff] %v2385_v18  ;;  %v1589_v41 = vand.u32 2147483647, %v3852_v7  ;;  %v1591_v0 = vand.u32 2147483648, %v3852_v7 }
 0x13a   : > { %v2935_v48 = vpop.eup %2934  ;;  %v1204_v28 = vsub.f32 0.0, %v1122_v20  ;;  %v1173_v29 = vsub.f32 0.0, %v1060_v27  ;;  %v983_v39 = vmul.f32 %v3271_v23, %v669_v33  ;;  %vm1586_vm8 = vweird.f32 %v3889_v37 }
 0x13b   : > { %v2937_v36 = vpop.eup %2936  ;;  %v3956_v17 = vadd.f32 1.0, %v2935_v48  ;;  %v2053_v38 = vsel %vm2052_vm7, %v3881_v32, %v2049_v9  ;;  %v1582_v21 = vsub.f32 1.0, %v1581_v25  ;;  %vm1585_vm9 = vweird.f32 %v3852_v7 }
 0x13c   : > { %v3960_v44 = vadd.f32 1.0, %v2937_v36  ;;  %v2058_v4 = vsel %vm3939_vm6, %v2057_v12, %v2053_v38  ;;  %v1313_v42 = vmul.f32 1.442695, %v1204_v28  ;;  %v1251_v61 = vmul.f32 1.442695, %v1173_v29  ;;  %vm1587_vm11 = vmor %vm1585_vm9, %vm1586_vm8  ;;  %v848_v29 = vpop.f32.mrf.mxu3  ;;  %v771_v36 = vpop.f32.mrf.mxu1 }
 0x13d   : > { %2938 = vrcp.f32 %v3956_v17  ;;  %v2417_v49 = vmul.f32 %v2058_v4, %v1115_v52  ;;  %v1583_v43 = vmul.f32 %v3889_v37, %v1582_v21  ;;  %vm3969_vm10 = vcmp.eq.f32.partialorder %v1589_v41, 8.507059e+37  ;;  %v594_v38 = vpop.f32.mrf.mxu0 }
 0x13e   : > { %2940 = vrcp.f32 %v3960_v44  ;;  %v2061_v10 = vmul.f32 %v3937_v15, %v3902_v59  ;;  %v1592_v8 = vor.u32 1.1754944e-38, %v1591_v0  ;;  %v1117_v30 = vadd.f32 %v3280_v34, %v983_v39 }
 0x13f   : > { %2481 = vst [vmem:[%s3368_s19 + $0x150] sm:$0xff] %v2417_v49  ;;  %2942 = vpow2.f32 %v1313_v42  ;;  %v1584_v53 = vadd.f32 %v3889_v37, %v1583_v43  ;;  %v2069_v56 = vand.u32 2147483647, %v3902_v59  ;;  %v2071_v58 = vand.u32 2147483648, %v3902_v59 }
 0x140   : > { %2944 = vpow2.f32 %v1251_v61  ;;  %v2062_v7 = vsub.f32 1.0, %v2061_v10  ;;  %vm2065_vm12 = vweird.f32 %v3902_v59  ;;  %v990_v26 = vmul.f32 %v3259_v2, %v846_v35 }
 0x141   : > { %v1588_v62 = vsel %vm1587_vm11, %v3889_v37, %v1584_v53  ;;  %v928_v50 = vmul.f32 %v3259_v2, %v768_v51  ;;  %vm2066_vm13 = vweird.f32 %v3937_v15  ;;  %v921_v1 = vmul.f32 %v3271_v23, %v592_v46 }
 0x142   : > { %v1593_v63 = vsel %vm3969_vm10, %v1592_v8, %v1588_v62  ;;  %v2063_v57 = vmul.f32 %v3937_v15, %v2062_v7  ;;  %vm3991_vm14 = vcmp.eq.f32.partialorder %v2069_v56, 8.507059e+37  ;;  %v1124_v6 = vadd.f32 %v3261_v3, %v990_v26  ;;  %vm2067_vm0 = vmor %vm2065_vm12, %vm2066_vm13  ;;  %v674_v7 = vpop.f32.mrf.mxu2 }
 0x143   : > { %v3989_v5 = vpop.eup %2938  ;;  %v2386_v60 = vmul.f32 %v1593_v63, %v1053_v24  ;;  %v1062_v52 = vadd.f32 %v3261_v3, %v928_v50  ;;  %v2072_v11 = vor.u32 1.1754944e-38, %v2071_v58  ;;  %v1596_v45 = vmul.f32 %v3945_v22, %v3906_v55 }
 0x144   : > { %v3997_v19 = vpop.eup %2940  ;;  %v2064_v13 = vadd.f32 %v3937_v15, %v2063_v57  ;;  %vm1600_vm15 = vweird.f32 %v3906_v55  ;;  %v1205_v47 = vsub.f32 0.0, %v1124_v6  ;;  %v1604_v16 = vand.u32 2147483647, %v3906_v55 }
 0x145   : > { %v2943_v14 = vpop.eup %2942  ;;  %2450 = vst [vmem:[%s3368_s19 + $0x58] sm:$0xff] %v2386_v60  ;;  %v1174_v54 = vsub.f32 0.0, %v1062_v52  ;;  %v1606_v18 = vand.u32 2147483648, %v3906_v55  ;;  %v1597_v33 = vsub.f32 1.0, %v1596_v45  ;;  %v985_v9 = vmul.f32 %v3271_v23, %v672_v31 }
 0x146   : > { %v2945_v40 = vpop.eup %2944  ;;  %v4010_v20 = vadd.f32 1.0, %v2943_v14  ;;  %v2068_v27 = vsel %vm2067_vm0, %v3937_v15, %v2064_v13  ;;  %v1315_v24 = vmul.f32 1.442695, %v1205_v47  ;;  %vm1601_vm1 = vweird.f32 %v3945_v22 }
 0x147   : > { %v4014_v12 = vadd.f32 1.0, %v2945_v40  ;;  %v2073_v59 = vsel %vm3991_vm14, %v2072_v11, %v2068_v27  ;;  %v1253_v25 = vmul.f32 1.442695, %v1174_v54  ;;  %v1598_v28 = vmul.f32 %v3945_v22, %v1597_v33  ;;  %vm1602_vm3 = vmor %vm1600_vm15, %vm1601_vm1  ;;  %v851_v40 = vpop.f32.mrf.mxu3  ;;  %v773_v27 = vpop.f32.mrf.mxu1 }
 0x148   : > { %2946 = vrcp.f32 %v4010_v20  ;;  %v2418_v48 = vmul.f32 %v2073_v59, %v1117_v30  ;;  %v1055_v15 = vadd.f32 %v3280_v34, %v921_v1  ;;  %vm4023_vm2 = vcmp.eq.f32.partialorder %v1604_v16, 8.507059e+37 }
 0x149   : > { %2948 = vrcp.f32 %v4014_v12  ;;  %v2076_v0 = vmul.f32 %v3989_v5, %v3956_v17  ;;  %v1599_v21 = vadd.f32 %v3945_v22, %v1598_v28  ;;  %v1607_v39 = vor.u32 1.1754944e-38, %v1606_v18 }
 0x14a   : > { %2482 = vst [vmem:[%s3368_s19 + $0x158] sm:$0xff] %v2418_v48  ;;  %2950 = vpow2.f32 %v1315_v24  ;;  %v1119_v4 = vadd.f32 %v3280_v34, %v985_v9  ;;  %v2084_v61 = vand.u32 2147483647, %v3956_v17  ;;  %v2086_v49 = vand.u32 2147483648, %v3956_v17  ;;  %v597_v24 = vpop.f32.mrf.mxu0 }
 0x14b   : > { %2952 = vpow2.f32 %v1253_v25  ;;  %v2077_v42 = vsub.f32 1.0, %v2076_v0  ;;  %v1603_v43 = vsel %vm1602_vm3, %v3945_v22, %v1599_v21  ;;  %v992_v32 = vmul.f32 %v3259_v2, %v848_v29 }
 0x14c   : > { %v930_v10 = vmul.f32 %v3259_v2, %v771_v36  ;;  %v923_v35 = vmul.f32 %v3271_v23, %v594_v38  ;;  %v1608_v51 = vsel %vm4023_vm2, %v1607_v39, %v1603_v43  ;;  %vm2080_vm4 = vweird.f32 %v3956_v17 }
 0x14d   : > { %v2078_v55 = vmul.f32 %v3989_v5, %v2077_v42  ;;  %vm2081_vm5 = vweird.f32 %v3989_v5  ;;  %v2387_v8 = vmul.f32 %v1608_v51, %v1055_v15  ;;  %vm4047_vm6 = vcmp.eq.f32.partialorder %v2084_v61, 8.507059e+37 }
 0x14e   : > { %v4045_v53 = vpop.eup %2946  ;;  %v1126_v30 = vadd.f32 %v3261_v3, %v992_v32  ;;  %v1064_v46 = vadd.f32 %v3261_v3, %v930_v10  ;;  %v2087_v62 = vor.u32 1.1754944e-38, %v2086_v49  ;;  %v1057_v26 = vadd.f32 %v3280_v34, %v923_v35  ;;  %vm2082_vm7 = vmor %vm2080_vm4, %vm2081_vm5  ;;  %v677_v32 = vpop.f32.mrf.mxu2 }
 0x14f   : > { %v4053_v56 = vpop.eup %2948  ;;  %v2079_v58 = vadd.f32 %v3989_v5, %v2078_v55  ;;  %v1611_v50 = vmul.f32 %v3997_v19, %v3960_v44  ;;  %2451 = vst [vmem:[%s3368_s19 + $0x60] sm:$0xff] %v2387_v8  ;;  %v1619_v60 = vand.u32 2147483647, %v3960_v44  ;;  %v1621_v37 = vand.u32 2147483648, %v3960_v44 }
 0x150   : > { %v2951_v63 = vpop.eup %2950  ;;  %v1206_v57 = vsub.f32 0.0, %v1126_v30  ;;  %v1175_v1 = vsub.f32 0.0, %v1064_v46  ;;  %v987_v45 = vmul.f32 %v3271_v23, %v674_v7  ;;  %vm1616_vm8 = vweird.f32 %v3997_v19 }
 0x151   : > { %v2953_v6 = vpop.eup %2952  ;;  %v4064_v52 = vadd.f32 1.0, %v2951_v63  ;;  %v2083_v13 = vsel %vm2082_vm7, %v3989_v5, %v2079_v58  ;;  %v1612_v11 = vsub.f32 1.0, %v1611_v50  ;;  %vm1615_vm9 = vweird.f32 %v3960_v44 }
 0x152   : > { %v4068_v31 = vadd.f32 1.0, %v2953_v6  ;;  %v2088_v17 = vsel %vm4047_vm6, %v2087_v62, %v2083_v13  ;;  %v1317_v14 = vmul.f32 1.442695, %v1206_v57  ;;  %v1255_v47 = vmul.f32 1.442695, %v1175_v1  ;;  %vm1617_vm11 = vmor %vm1615_vm9, %vm1616_vm8  ;;  %v853_v1 = vpop.f32.mrf.mxu3  ;;  %v776_v6 = vpop.f32.mrf.mxu1 }
 0x153   : > { %2954 = vrcp.f32 %v4064_v52  ;;  %v2419_v54 = vmul.f32 %v2088_v17, %v1119_v4  ;;  %v1613_v16 = vmul.f32 %v3997_v19, %v1612_v11  ;;  %vm4077_vm10 = vcmp.eq.f32.partialorder %v1619_v60, 8.507059e+37  ;;  %v599_v13 = vpop.f32.mrf.mxu0 }
 0x154   : > { %2956 = vrcp.f32 %v4068_v31  ;;  %v2091_v18 = vmul.f32 %v4045_v53, %v4010_v20  ;;  %v1622_v9 = vor.u32 1.1754944e-38, %v1621_v37  ;;  %v1121_v59 = vadd.f32 %v3280_v34, %v987_v45 }
 0x155   : > { %2483 = vst [vmem:[%s3368_s19 + $0x160] sm:$0xff] %v2419_v54  ;;  %2958 = vpow2.f32 %v1317_v14  ;;  %v1614_v33 = vadd.f32 %v3997_v19, %v1613_v16  ;;  %v2099_v25 = vand.u32 2147483647, %v4010_v20  ;;  %v2101_v48 = vand.u32 2147483648, %v4010_v20 }
 0x156   : > { %2960 = vpow2.f32 %v1255_v47  ;;  %v2092_v44 = vsub.f32 1.0, %v2091_v18  ;;  %vm2095_vm12 = vweird.f32 %v4010_v20  ;;  %v994_v29 = vmul.f32 %v3259_v2, %v851_v40 }
 0x157   : > { %v1618_v28 = vsel %vm1617_vm11, %v3997_v19, %v1614_v33  ;;  %v932_v15 = vmul.f32 %v3259_v2, %v773_v27  ;;  %vm2096_vm13 = vweird.f32 %v4045_v53  ;;  %v925_v36 = vmul.f32 %v3271_v23, %v597_v24 }
 0x158   : > { %v1623_v41 = vsel %vm4077_vm10, %v1622_v9, %v1618_v28  ;;  %v2093_v0 = vmul.f32 %v4045_v53, %v2092_v44  ;;  %vm4099_vm14 = vcmp.eq.f32.partialorder %v2099_v25, 8.507059e+37  ;;  %v1128_v39 = vadd.f32 %v3261_v3, %v994_v29  ;;  %vm2097_vm0 = vmor %vm2095_vm12, %vm2096_vm13  ;;  %v679_v44 = vpop.f32.mrf.mxu2 }
 0x159   : > { %v4097_v38 = vpop.eup %2954  ;;  %v2388_v21 = vmul.f32 %v1623_v41, %v1057_v26  ;;  %v1066_v4 = vadd.f32 %v3261_v3, %v932_v15  ;;  %v2102_v49 = vor.u32 1.1754944e-38, %v2101_v48  ;;  %v1626_v43 = vmul.f32 %v4053_v56, %v4014_v12 }
 0x15a   : > { %v4105_v42 = vpop.eup %2956  ;;  %v2094_v61 = vadd.f32 %v4045_v53, %v2093_v0  ;;  %vm1630_vm15 = vweird.f32 %v4014_v12  ;;  %v1207_v35 = vsub.f32 0.0, %v1128_v39  ;;  %v1634_v55 = vand.u32 2147483647, %v4014_v12 }
 0x15b   : > { %v2959_v10 = vpop.eup %2958  ;;  %2452 = vst [vmem:[%s3368_s19 + $0x68] sm:$0xff] %v2388_v21  ;;  %v1176_v51 = vsub.f32 0.0, %v1066_v4  ;;  %v1636_v8 = vand.u32 2147483648, %v4014_v12  ;;  %v1627_v7 = vsub.f32 1.0, %v1626_v43  ;;  %v989_v58 = vmul.f32 %v3271_v23, %v677_v32 }
 0x15c   : > { %v2961_v22 = vpop.eup %2960  ;;  %v4118_v30 = vadd.f32 1.0, %v2959_v10  ;;  %v2098_v46 = vsel %vm2097_vm0, %v4045_v53, %v2094_v61  ;;  %v1319_v26 = vmul.f32 1.442695, %v1207_v35  ;;  %vm1631_vm1 = vweird.f32 %v4053_v56 }
 0x15d   : > { %v4122_v62 = vadd.f32 1.0, %v2961_v22  ;;  %v2103_v20 = vsel %vm4099_vm14, %v2102_v49, %v2098_v46  ;;  %v1257_v50 = vmul.f32 1.442695, %v1176_v51  ;;  %v1628_v57 = vmul.f32 %v4053_v56, %v1627_v7  ;;  %vm1632_vm3 = vmor %vm1630_vm15, %vm1631_vm1  ;;  %v856_v22 = vpop.f32.mrf.mxu3  ;;  %v778_v46 = vpop.f32.mrf.mxu1 }
 0x15e   : > { %2962 = vrcp.f32 %v4118_v30  ;;  %v2420_v63 = vmul.f32 %v2103_v20, %v1121_v59  ;;  %v1059_v53 = vadd.f32 %v3280_v34, %v925_v36  ;;  %vm4131_vm2 = vcmp.eq.f32.partialorder %v1634_v55, 8.507059e+37 }
 0x15f   : > { %2964 = vrcp.f32 %v4122_v62  ;;  %v2106_v37 = vmul.f32 %v4097_v38, %v4064_v52  ;;  %v1629_v11 = vadd.f32 %v4053_v56, %v1628_v57  ;;  %v1637_v45 = vor.u32 1.1754944e-38, %v1636_v8 }
 0x160   : > { %2484 = vst [vmem:[%s3368_s19 + $0x168] sm:$0xff] %v2420_v63  ;;  %2966 = vpow2.f32 %v1319_v26  ;;  %v1123_v17 = vadd.f32 %v3280_v34, %v989_v58  ;;  %v2114_v47 = vand.u32 2147483647, %v4064_v52  ;;  %v2116_v54 = vand.u32 2147483648, %v4064_v52  ;;  %v602_v26 = vpop.f32.mrf.mxu0 }
 0x161   : > { %2968 = vpow2.f32 %v1257_v50  ;;  %v2107_v14 = vsub.f32 1.0, %v2106_v37  ;;  %v1633_v16 = vsel %vm1632_vm3, %v4053_v56, %v1629_v11  ;;  %v996_v5 = vmul.f32 %v3259_v2, %v853_v1 }
 0x162   : > { %v934_v18 = vmul.f32 %v3259_v2, %v776_v6  ;;  %v927_v40 = vmul.f32 %v3271_v23, %v599_v13  ;;  %v1638_v27 = vsel %vm4131_vm2, %v1637_v45, %v1633_v16  ;;  %vm2110_vm4 = vweird.f32 %v4064_v52 }
 0x163   : > { %v2108_v12 = vmul.f32 %v4097_v38, %v2107_v14  ;;  %vm2111_vm5 = vweird.f32 %v4097_v38  ;;  %v2389_v9 = vmul.f32 %v1638_v27, %v1059_v53  ;;  %vm4155_vm6 = vcmp.eq.f32.partialorder %v2114_v47, 8.507059e+37 }
 0x164   : > { %v4153_v33 = vpop.eup %2962  ;;  %v1130_v59 = vadd.f32 %v3261_v3, %v996_v5  ;;  %v1068_v24 = vadd.f32 %v3261_v3, %v934_v18  ;;  %v2117_v28 = vor.u32 1.1754944e-38, %v2116_v54  ;;  %v1061_v29 = vadd.f32 %v3280_v34, %v927_v40  ;;  %vm2112_vm7 = vmor %vm2110_vm4, %vm2111_vm5  ;;  %v682_v5 = vpop.f32.mrf.mxu2 }
 0x165   : > { %v4161_v25 = vpop.eup %2964  ;;  %v2109_v48 = vadd.f32 %v4097_v38, %v2108_v12  ;;  %v1641_v15 = vmul.f32 %v4105_v42, %v4068_v31  ;;  %2453 = vst [vmem:[%s3368_s19 + $0x70] sm:$0xff] %v2389_v9  ;;  %v1649_v21 = vand.u32 2147483647, %v4068_v31  ;;  %v1651_v19 = vand.u32 2147483648, %v4068_v31 }
 0x166   : > { %v2967_v41 = vpop.eup %2966  ;;  %v1208_v0 = vsub.f32 0.0, %v1130_v59  ;;  %v1177_v36 = vsub.f32 0.0, %v1068_v24  ;;  %v991_v43 = vmul.f32 %v3271_v23, %v679_v44  ;;  %vm1646_vm8 = vweird.f32 %v4105_v42 }
 0x167   : > { %v2969_v39 = vpop.eup %2968  ;;  %v4172_v4 = vadd.f32 1.0, %v2967_v41  ;;  %v2113_v61 = vsel %vm2112_vm7, %v4097_v38, %v2109_v48  ;;  %v1642_v49 = vsub.f32 1.0, %v1641_v15  ;;  %vm1645_vm9 = vweird.f32 %v4068_v31 }
 0x168   : > { %v4176_v32 = vadd.f32 1.0, %v2969_v39  ;;  %v2118_v52 = vsel %vm4155_vm6, %v2117_v28, %v2113_v61  ;;  %v1321_v10 = vmul.f32 1.442695, %v1208_v0  ;;  %v1259_v35 = vmul.f32 1.442695, %v1177_v36  ;;  %vm1647_vm11 = vmor %vm1645_vm9, %vm1646_vm8  ;;  %v858_v36 = vpop.f32.mrf.mxu3  ;;  %v781_v39 = vpop.f32.mrf.mxu1 }
 0x169   : > { %2970 = vrcp.f32 %v4172_v4  ;;  %v2421_v51 = vmul.f32 %v2118_v52, %v1123_v17  ;;  %v1643_v55 = vmul.f32 %v4105_v42, %v1642_v49  ;;  %vm4185_vm10 = vcmp.eq.f32.partialorder %v1649_v21, 8.507059e+37  ;;  %v604_v61 = vpop.f32.mrf.mxu0 }
 0x16a   : > { %2972 = vrcp.f32 %v4176_v32  ;;  %v2121_v8 = vmul.f32 %v4153_v33, %v4118_v30  ;;  %v1652_v58 = vor.u32 1.1754944e-38, %v1651_v19  ;;  %v1125_v20 = vadd.f32 %v3280_v34, %v991_v43 }
 0x16b   : > { %2485 = vst [vmem:[%s3368_s19 + $0x170] sm:$0xff] %v2421_v51  ;;  %2974 = vpow2.f32 %v1321_v10  ;;  %v1644_v7 = vadd.f32 %v4105_v42, %v1643_v55  ;;  %v2129_v50 = vand.u32 2147483647, %v4118_v30  ;;  %v2131_v63 = vand.u32 2147483648, %v4118_v30 }
 0x16c   : > { %2976 = vpow2.f32 %v1259_v35  ;;  %v2122_v31 = vsub.f32 1.0, %v2121_v8  ;;  %vm2125_vm12 = vweird.f32 %v4118_v30  ;;  %v998_v1 = vmul.f32 %v3259_v2, %v856_v22 }
 0x16d   : > { %v1648_v57 = vsel %vm1647_vm11, %v4105_v42, %v1644_v7  ;;  %v936_v53 = vmul.f32 %v3259_v2, %v778_v46  ;;  %vm2126_vm13 = vweird.f32 %v4153_v33  ;;  %v929_v6 = vmul.f32 %v3271_v23, %v602_v26 }
 0x16e   : > { %v1653_v60 = vsel %vm4185_vm10, %v1652_v58, %v1648_v57  ;;  %v2123_v37 = vmul.f32 %v4153_v33, %v2122_v31  ;;  %vm4207_vm14 = vcmp.eq.f32.partialorder %v2129_v50, 8.507059e+37  ;;  %v1132_v45 = vadd.f32 %v3261_v3, %v998_v1  ;;  %vm2127_vm0 = vmor %vm2125_vm12, %vm2126_vm13  ;;  %v684_v31 = vpop.f32.mrf.mxu2 }
 0x16f   : > { %v4205_v13 = vpop.eup %2970  ;;  %v2390_v11 = vmul.f32 %v1653_v60, %v1061_v29  ;;  %v1070_v17 = vadd.f32 %v3261_v3, %v936_v53  ;;  %v2132_v54 = vor.u32 1.1754944e-38, %v2131_v63  ;;  %v1656_v16 = vmul.f32 %v4161_v25, %v4122_v62 }
 0x170   : > { %v4213_v14 = vpop.eup %2972  ;;  %v2124_v47 = vadd.f32 %v4153_v33, %v2123_v37  ;;  %vm1660_vm15 = vweird.f32 %v4122_v62  ;;  %v1209_v40 = vsub.f32 0.0, %v1132_v45  ;;  %v1664_v12 = vand.u32 2147483647, %v4122_v62 }
 0x171   : > { %v2975_v18 = vpop.eup %2974  ;;  %2454 = vst [vmem:[%s3368_s19 + $0x78] sm:$0xff] %v2390_v11  ;;  %v1178_v27 = vsub.f32 0.0, %v1070_v17  ;;  %v1666_v9 = vand.u32 2147483648, %v4122_v62  ;;  %v1657_v44 = vsub.f32 1.0, %v1656_v16  ;;  %v993_v48 = vmul.f32 %v3271_v23, %v682_v5 }
 0x172   : > { %v2977_v56 = vpop.eup %2976  ;;  %v4226_v59 = vadd.f32 1.0, %v2975_v18  ;;  %v2128_v24 = vsel %vm2127_vm0, %v4153_v33, %v2124_v47  ;;  %v1323_v29 = vmul.f32 1.442695, %v1209_v40  ;;  %vm1661_vm1 = vweird.f32 %v4161_v25 }
 0x173   : > { %v4230_v28 = vadd.f32 1.0, %v2977_v56  ;;  %v2133_v30 = vsel %vm4207_vm14, %v2132_v54, %v2128_v24  ;;  %v1261_v15 = vmul.f32 1.442695, %v1178_v27  ;;  %v1658_v0 = vmul.f32 %v4161_v25, %v1657_v44  ;;  %vm1662_vm3 = vmor %vm1660_vm15, %vm1661_vm1  ;;  %v861_v56 = vpop.f32.mrf.mxu3  ;;  %v783_v24 = vpop.f32.mrf.mxu1 }
 0x174   : > { %2978 = vrcp.f32 %v4226_v59  ;;  %v2422_v41 = vmul.f32 %v2133_v30, %v1125_v20  ;;  %v1063_v33 = vadd.f32 %v3280_v34, %v929_v6  ;;  %vm4239_vm2 = vcmp.eq.f32.partialorder %v1664_v12, 8.507059e+37 }
 0x175   : > { %2980 = vrcp.f32 %v4230_v28  ;;  %v2136_v19 = vmul.f32 %v4205_v13, %v4172_v4  ;;  %v1659_v49 = vadd.f32 %v4161_v25, %v1658_v0  ;;  %v1667_v43 = vor.u32 1.1754944e-38, %v1666_v9 }
 0x176   : > { %2486 = vst [vmem:[%s3368_s19 + $0x178] sm:$0xff] %v2422_v41  ;;  %2982 = vpow2.f32 %v1323_v29  ;;  %v1127_v52 = vadd.f32 %v3280_v34, %v993_v48  ;;  %v2144_v35 = vand.u32 2147483647, %v4172_v4  ;;  %v2146_v51 = vand.u32 2147483648, %v4172_v4  ;;  %v607_v29 = vpop.f32.mrf.mxu0 }
 0x177   : > { %2984 = vpow2.f32 %v1261_v15  ;;  %v2137_v10 = vsub.f32 1.0, %v2136_v19  ;;  %v1663_v55 = vsel %vm1662_vm3, %v4161_v25, %v1659_v49  ;;  %v1000_v38 = vmul.f32 %v3259_v2, %v858_v36 }
 0x178   : > { %v938_v8 = vmul.f32 %v3259_v2, %v781_v39  ;;  %v931_v22 = vmul.f32 %v3271_v23, %v604_v61  ;;  %v1668_v46 = vsel %vm4239_vm2, %v1667_v43, %v1663_v55  ;;  %vm2140_vm4 = vweird.f32 %v4172_v4 }
 0x179   : > { %v2138_v62 = vmul.f32 %v4205_v13, %v2137_v10  ;;  %vm2141_vm5 = vweird.f32 %v4205_v13  ;;  %v2391_v58 = vmul.f32 %v1668_v46, %v1063_v33  ;;  %vm4263_vm6 = vcmp.eq.f32.partialorder %v2144_v35, 8.507059e+37 }
 0x17a   : > { %v4261_v7 = vpop.eup %2978  ;;  %v1134_v20 = vadd.f32 %v3261_v3, %v1000_v38  ;;  %v1072_v26 = vadd.f32 %v3261_v3, %v938_v8  ;;  %v2147_v57 = vor.u32 1.1754944e-38, %v2146_v51  ;;  %v1065_v1 = vadd.f32 %v3280_v34, %v931_v22  ;;  %vm2142_vm7 = vmor %vm2140_vm4, %vm2141_vm5  ;;  %v687_v38 = vpop.f32.mrf.mxu2 }
 0x17b   : > { %v4269_v50 = vpop.eup %2980  ;;  %v2139_v63 = vadd.f32 %v4205_v13, %v2138_v62  ;;  %v1671_v53 = vmul.f32 %v4213_v14, %v4176_v32  ;;  %2455 = vst [vmem:[%s3368_s19 + $0x80] sm:$0xff] %v2391_v58  ;;  %v1679_v11 = vand.u32 2147483647, %v4176_v32  ;;  %v1681_v42 = vand.u32 2147483648, %v4176_v32 }
 0x17c   : > { %v2983_v60 = vpop.eup %2982  ;;  %v1210_v37 = vsub.f32 0.0, %v1134_v20  ;;  %v1179_v6 = vsub.f32 0.0, %v1072_v26  ;;  %v995_v16 = vmul.f32 %v3271_v23, %v684_v31  ;;  %vm1676_vm8 = vweird.f32 %v4213_v14 }
 0x17d   : > { %v2985_v45 = vpop.eup %2984  ;;  %v4280_v17 = vadd.f32 1.0, %v2983_v60  ;;  %v2143_v47 = vsel %vm2142_vm7, %v4205_v13, %v2139_v63  ;;  %v1672_v54 = vsub.f32 1.0, %v1671_v53  ;;  %vm1675_vm9 = vweird.f32 %v4176_v32 }
 0x17e   : > { %v4284_v5 = vadd.f32 1.0, %v2985_v45  ;;  %v2148_v4 = vsel %vm4263_vm6, %v2147_v57, %v2143_v47  ;;  %v1325_v18 = vmul.f32 1.442695, %v1210_v37  ;;  %v1263_v40 = vmul.f32 1.442695, %v1179_v6  ;;  %vm1677_vm11 = vmor %vm1675_vm9, %vm1676_vm8  ;;  %v863_v6 = vpop.f32.mrf.mxu3  ;;  %v786_v45 = vpop.f32.mrf.mxu1 }
 0x17f   : > { %2986 = vrcp.f32 %v4280_v17  ;;  %v2423_v27 = vmul.f32 %v2148_v4, %v1127_v52  ;;  %v1673_v12 = vmul.f32 %v4213_v14, %v1672_v54  ;;  %vm4293_vm10 = vcmp.eq.f32.partialorder %v1679_v11, 8.507059e+37  ;;  %v609_v47 = vpop.f32.mrf.mxu0 }
 0x180   : > { %2988 = vrcp.f32 %v4284_v5  ;;  %v2151_v9 = vmul.f32 %v4261_v7, %v4226_v59  ;;  %v1682_v48 = vor.u32 1.1754944e-38, %v1681_v42  ;;  %v1129_v30 = vadd.f32 %v3280_v34, %v995_v16 }
 0x181   : > { %2487 = vst [vmem:[%s3368_s19 + $0x180] sm:$0xff] %v2423_v27  ;;  %2990 = vpow2.f32 %v1325_v18  ;;  %v1674_v44 = vadd.f32 %v4213_v14, %v1673_v12  ;;  %v2159_v15 = vand.u32 2147483647, %v4226_v59  ;;  %v2161_v41 = vand.u32 2147483648, %v4226_v59 }
 0x182   : > { %2992 = vpow2.f32 %v1263_v40  ;;  %v2152_v32 = vsub.f32 1.0, %v2151_v9  ;;  %vm2155_vm12 = vweird.f32 %v4226_v59  ;;  %v1002_v36 = vmul.f32 %v3259_v2, %v861_v56 }
 0x183   : > { %v1678_v0 = vsel %vm1677_vm11, %v4213_v14, %v1674_v44  ;;  %v940_v33 = vmul.f32 %v3259_v2, %v783_v24  ;;  %vm2156_vm13 = vweird.f32 %v4261_v7  ;;  %v933_v39 = vmul.f32 %v3271_v23, %v607_v29 }
 0x184   : > { %v1683_v21 = vsel %vm4293_vm10, %v1682_v48, %v1678_v0  ;;  %v2153_v19 = vmul.f32 %v4261_v7, %v2152_v32  ;;  %vm4315_vm14 = vcmp.eq.f32.partialorder %v2159_v15, 8.507059e+37  ;;  %v1136_v43 = vadd.f32 %v3261_v3, %v1002_v36  ;;  %vm2157_vm0 = vmor %vm2155_vm12, %vm2156_vm13  ;;  %v689_v32 = vpop.f32.mrf.mxu2 }
 0x185   : > { %v4313_v61 = vpop.eup %2986  ;;  %v2392_v49 = vmul.f32 %v1683_v21, %v1065_v1  ;;  %v1074_v52 = vadd.f32 %v3261_v3, %v940_v33  ;;  %v2162_v51 = vor.u32 1.1754944e-38, %v2161_v41  ;;  %v1686_v55 = vmul.f32 %v4269_v50, %v4230_v28 }
 0x186   : > { %v4321_v10 = vpop.eup %2988  ;;  %v2154_v35 = vadd.f32 %v4261_v7, %v2153_v19  ;;  %vm1690_vm15 = vweird.f32 %v4230_v28  ;;  %v1211_v22 = vsub.f32 0.0, %v1136_v43  ;;  %v1694_v62 = vand.u32 2147483647, %v4230_v28 }
 0x187   : > { %v2991_v8 = vpop.eup %2990  ;;  %2456 = vst [vmem:[%s3368_s19 + $0x88] sm:$0xff] %v2392_v49  ;;  %v1180_v46 = vsub.f32 0.0, %v1074_v52  ;;  %v1696_v58 = vand.u32 2147483648, %v4230_v28  ;;  %v1687_v31 = vsub.f32 1.0, %v1686_v55  ;;  %v997_v63 = vmul.f32 %v3271_v23, %v687_v38 }
 0x188   : > { %v2993_v25 = vpop.eup %2992  ;;  %v4334_v20 = vadd.f32 1.0, %v2991_v8  ;;  %v2158_v26 = vsel %vm2157_vm0, %v4261_v7, %v2154_v35  ;;  %v1327_v1 = vmul.f32 1.442695, %v1211_v22  ;;  %vm1691_vm1 = vweird.f32 %v4269_v50 }
 0x189   : > { %v4338_v57 = vadd.f32 1.0, %v2993_v25  ;;  %v2163_v59 = vsel %vm4315_vm14, %v2162_v51, %v2158_v26  ;;  %v1265_v53 = vmul.f32 1.442695, %v1180_v46  ;;  %v1688_v37 = vmul.f32 %v4269_v50, %v1687_v31  ;;  %vm1692_vm3 = vmor %vm1690_vm15, %vm1691_vm1  ;;  %v866_v25 = vpop.f32.mrf.mxu3  ;;  %v788_v26 = vpop.f32.mrf.mxu1 }
 0x18a   : > { %2994 = vrcp.f32 %v4334_v20  ;;  %v2424_v60 = vmul.f32 %v2163_v59, %v1129_v30  ;;  %v1067_v7 = vadd.f32 %v3280_v34, %v933_v39  ;;  %vm4347_vm2 = vcmp.eq.f32.partialorder %v1694_v62, 8.507059e+37 }
 0x18b   : > { %2996 = vrcp.f32 %v4338_v57  ;;  %v2166_v42 = vmul.f32 %v4313_v61, %v4280_v17  ;;  %v1689_v54 = vadd.f32 %v4269_v50, %v1688_v37  ;;  %v1697_v16 = vor.u32 1.1754944e-38, %v1696_v58 }
 0x18c   : > { %2488 = vst [vmem:[%s3368_s19 + $0x188] sm:$0xff] %v2424_v60  ;;  %2998 = vpow2.f32 %v1327_v1  ;;  %v1131_v4 = vadd.f32 %v3280_v34, %v997_v63  ;;  %v2174_v40 = vand.u32 2147483647, %v4280_v17  ;;  %v2176_v27 = vand.u32 2147483648, %v4280_v17  ;;  %v612_v1 = vpop.f32.mrf.mxu0 }
 0x18d   : > { %3000 = vpow2.f32 %v1265_v53  ;;  %v2167_v18 = vsub.f32 1.0, %v2166_v42  ;;  %v1693_v12 = vsel %vm1692_vm3, %v4269_v50, %v1689_v54  ;;  %v1004_v13 = vmul.f32 %v3259_v2, %v863_v6 }
 0x18e   : > { %v942_v9 = vmul.f32 %v3259_v2, %v786_v45  ;;  %v935_v56 = vmul.f32 %v3271_v23, %v609_v47  ;;  %v1698_v24 = vsel %vm4347_vm2, %v1697_v16, %v1693_v12  ;;  %vm2170_vm4 = vweird.f32 %v4280_v17 }
 0x18f   : > { %v2168_v28 = vmul.f32 %v4313_v61, %v2167_v18  ;;  %vm2171_vm5 = vweird.f32 %v4313_v61  ;;  %v2393_v48 = vmul.f32 %v1698_v24, %v1067_v7  ;;  %vm4371_vm6 = vcmp.eq.f32.partialorder %v2174_v40, 8.507059e+37 }
 0x190   : > { %v4369_v44 = vpop.eup %2994  ;;  %v1138_v30 = vadd.f32 %v3261_v3, %v1004_v13  ;;  %v1076_v29 = vadd.f32 %v3261_v3, %v942_v9  ;;  %v2177_v0 = vor.u32 1.1754944e-38, %v2176_v27  ;;  %v1069_v36 = vadd.f32 %v3280_v34, %v935_v56  ;;  %vm2172_vm7 = vmor %vm2170_vm4, %vm2171_vm5  ;;  %v692_v13 = vpop.f32.mrf.mxu2 }
 0x191   : > { %v4377_v15 = vpop.eup %2996  ;;  %v2169_v41 = vadd.f32 %v4313_v61, %v2168_v28  ;;  %v1701_v33 = vmul.f32 %v4321_v10, %v4284_v5  ;;  %2457 = vst [vmem:[%s3368_s19 + $0x90] sm:$0xff] %v2393_v48  ;;  %v1709_v49 = vand.u32 2147483647, %v4284_v5  ;;  %v1711_v14 = vand.u32 2147483648, %v4284_v5 }
 0x192   : > { %v2999_v21 = vpop.eup %2998  ;;  %v1212_v19 = vsub.f32 0.0, %v1138_v30  ;;  %v1181_v39 = vsub.f32 0.0, %v1076_v29  ;;  %v999_v55 = vmul.f32 %v3271_v23, %v689_v32  ;;  %vm1706_vm8 = vweird.f32 %v4321_v10 }
 0x193   : > { %v3001_v43 = vpop.eup %3000  ;;  %v4388_v52 = vadd.f32 1.0, %v2999_v21  ;;  %v2173_v35 = vsel %vm2172_vm7, %v4313_v61, %v2169_v41  ;;  %v1702_v51 = vsub.f32 1.0, %v1701_v33  ;;  %vm1705_vm9 = vweird.f32 %v4284_v5 }
 0x194   : > { %v4392_v38 = vadd.f32 1.0, %v3001_v43  ;;  %v2178_v17 = vsel %vm4371_vm6, %v2177_v0, %v2173_v35  ;;  %v1329_v8 = vmul.f32 1.442695, %v1212_v19  ;;  %v1267_v22 = vmul.f32 1.442695, %v1181_v39  ;;  %vm1707_vm11 = vmor %vm1705_vm9, %vm1706_vm8  ;;  %v868_v39 = vpop.f32.mrf.mxu3  ;;  %v791_v43 = vpop.f32.mrf.mxu1 }
 0x195   : > { %3002 = vrcp.f32 %v4388_v52  ;;  %v2425_v46 = vmul.f32 %v2178_v17, %v1131_v4  ;;  %v1703_v62 = vmul.f32 %v4321_v10, %v1702_v51  ;;  %vm4401_vm10 = vcmp.eq.f32.partialorder %v1709_v49, 8.507059e+37  ;;  %v614_v35 = vpop.f32.mrf.mxu0 }
 0x196   : > { %3004 = vrcp.f32 %v4392_v38  ;;  %v2181_v58 = vmul.f32 %v4369_v44, %v4334_v20  ;;  %v1712_v63 = vor.u32 1.1754944e-38, %v1711_v14  ;;  %v1133_v59 = vadd.f32 %v3280_v34, %v999_v55 }
 0x197   : > { %2489 = vst [vmem:[%s3368_s19 + $0x190] sm:$0xff] %v2425_v46  ;;  %3006 = vpow2.f32 %v1329_v8  ;;  %v1704_v31 = vadd.f32 %v4321_v10, %v1703_v62  ;;  %v2189_v53 = vand.u32 2147483647, %v4334_v20  ;;  %v2191_v60 = vand.u32 2147483648, %v4334_v20 }
 0x198   : > { %3008 = vpow2.f32 %v1267_v22  ;;  %v2182_v5 = vsub.f32 1.0, %v2181_v58  ;;  %vm2185_vm12 = vweird.f32 %v4334_v20  ;;  %v1006_v6 = vmul.f32 %v3259_v2, %v866_v25 }
 0x199   : > { %v1708_v37 = vsel %vm1707_vm11, %v4321_v10, %v1704_v31  ;;  %v944_v7 = vmul.f32 %v3259_v2, %v788_v26  ;;  %vm2186_vm13 = vweird.f32 %v4369_v44  ;;  %v937_v45 = vmul.f32 %v3271_v23, %v612_v1 }
 0x19a   : > { %v1713_v11 = vsel %vm4401_vm10, %v1712_v63, %v1708_v37  ;;  %v2183_v42 = vmul.f32 %v4369_v44, %v2182_v5  ;;  %vm4423_vm14 = vcmp.eq.f32.partialorder %v2189_v53, 8.507059e+37  ;;  %v1140_v16 = vadd.f32 %v3261_v3, %v1006_v6  ;;  %vm2187_vm0 = vmor %vm2185_vm12, %vm2186_vm13  ;;  %v694_v5 = vpop.f32.mrf.mxu2 }
 0x19b   : > { %v4421_v47 = vpop.eup %3002  ;;  %v2394_v54 = vmul.f32 %v1713_v11, %v1069_v36  ;;  %v1078_v4 = vadd.f32 %v3261_v3, %v944_v7  ;;  %v2192_v27 = vor.u32 1.1754944e-38, %v2191_v60  ;;  %v1716_v12 = vmul.f32 %v4377_v15, %v4338_v57 }
 0x19c   : > { %v4429_v18 = vpop.eup %3004  ;;  %v2184_v40 = vadd.f32 %v4369_v44, %v2183_v42  ;;  %vm1720_vm15 = vweird.f32 %v4338_v57  ;;  %v1213_v56 = vsub.f32 0.0, %v1140_v16  ;;  %v1724_v28 = vand.u32 2147483647, %v4338_v57 }
 0x19d   : > { %v3007_v9 = vpop.eup %3006  ;;  %2458 = vst [vmem:[%s3368_s19 + $0x98] sm:$0xff] %v2394_v54  ;;  %v1182_v24 = vsub.f32 0.0, %v1078_v4  ;;  %v1726_v48 = vand.u32 2147483648, %v4338_v57  ;;  %v1717_v32 = vsub.f32 1.0, %v1716_v12  ;;  %v1001_v41 = vmul.f32 %v3271_v23, %v692_v13 }
 0x19e   : > { %v3009_v50 = vpop.eup %3008  ;;  %v4442_v30 = vadd.f32 1.0, %v3007_v9  ;;  %v2188_v29 = vsel %vm2187_vm0, %v4369_v44, %v2184_v40  ;;  %v1331_v36 = vmul.f32 1.442695, %v1213_v56  ;;  %vm1721_vm1 = vweird.f32 %v4377_v15 }
 0x19f   : > { %v4446_v0 = vadd.f32 1.0, %v3009_v50  ;;  %v2193_v20 = vsel %vm4423_vm14, %v2192_v27, %v2188_v29  ;;  %v1269_v33 = vmul.f32 1.442695, %v1182_v24  ;;  %v1718_v19 = vmul.f32 %v4377_v15, %v1717_v32  ;;  %vm1722_vm3 = vmor %vm1720_vm15, %vm1721_vm1  ;;  %v871_v50 = vpop.f32.mrf.mxu3  ;;  %v793_v29 = vpop.f32.mrf.mxu1 }
 0x1a0   : > { %3010 = vrcp.f32 %v4442_v30  ;;  %v2426_v21 = vmul.f32 %v2193_v20, %v1133_v59  ;;  %v1071_v44 = vadd.f32 %v3280_v34, %v937_v45  ;;  %vm4455_vm2 = vcmp.eq.f32.partialorder %v1724_v28, 8.507059e+37 }
 0x1a1   : > { %3012 = vrcp.f32 %v4446_v0  ;;  %v2196_v14 = vmul.f32 %v4421_v47, %v4388_v52  ;;  %v1719_v51 = vadd.f32 %v4377_v15, %v1718_v19  ;;  %v1727_v55 = vor.u32 1.1754944e-38, %v1726_v48 }
 0x1a2   : > { %2490 = vst [vmem:[%s3368_s19 + $0x198] sm:$0xff] %v2426_v21  ;;  %3014 = vpow2.f32 %v1331_v36  ;;  %v1135_v17 = vadd.f32 %v3280_v34, %v1001_v41  ;;  %v2204_v22 = vand.u32 2147483647, %v4388_v52  ;;  %v2206_v46 = vand.u32 2147483648, %v4388_v52  ;;  %v617_v36 = vpop.f32.mrf.mxu0 }
 0x1a3   : > { %3016 = vpow2.f32 %v1269_v33  ;;  %v2197_v8 = vsub.f32 1.0, %v2196_v14  ;;  %v1723_v62 = vsel %vm1722_vm3, %v4377_v15, %v1719_v51  ;;  %v1008_v61 = vmul.f32 %v3259_v2, %v868_v39 }
 0x1a4   : > { %v946_v58 = vmul.f32 %v3259_v2, %v791_v43  ;;  %v939_v25 = vmul.f32 %v3271_v23, %v614_v35  ;;  %v1728_v26 = vsel %vm4455_vm2, %v1727_v55, %v1723_v62  ;;  %vm2200_vm4 = vweird.f32 %v4388_v52 }
 0x1a5   : > { %v2198_v57 = vmul.f32 %v4421_v47, %v2197_v8  ;;  %vm2201_vm5 = vweird.f32 %v4421_v47  ;;  %v2395_v63 = vmul.f32 %v1728_v26, %v1071_v44  ;;  %vm4479_vm6 = vcmp.eq.f32.partialorder %v2204_v22, 8.507059e+37 }
 0x1a6   : > { %v4477_v31 = vpop.eup %3010  ;;  %v1142_v59 = vadd.f32 %v3261_v3, %v1008_v61  ;;  %v1080_v1 = vadd.f32 %v3261_v3, %v946_v58  ;;  %v2207_v37 = vor.u32 1.1754944e-38, %v2206_v46  ;;  %v1073_v6 = vadd.f32 %v3280_v34, %v939_v25  ;;  %vm2202_vm7 = vmor %vm2200_vm4, %vm2201_vm5  ;;  %v697_v61 = vpop.f32.mrf.mxu2 }
 0x1a7   : > { %v4485_v53 = vpop.eup %3012  ;;  %v2199_v60 = vadd.f32 %v4421_v47, %v2198_v57  ;;  %v1731_v7 = vmul.f32 %v4429_v18, %v4392_v38  ;;  %2459 = vst [vmem:[%s3368_s19 + $0xa0] sm:$0xff] %v2395_v63  ;;  %v1739_v54 = vand.u32 2147483647, %v4392_v38  ;;  %v1741_v10 = vand.u32 2147483648, %v4392_v38 }
 0x1a8   : > { %v3015_v11 = vpop.eup %3014  ;;  %v1214_v42 = vsub.f32 0.0, %v1142_v59  ;;  %v1183_v45 = vsub.f32 0.0, %v1080_v1  ;;  %v1003_v12 = vmul.f32 %v3271_v23, %v694_v5  ;;  %vm1736_vm8 = vweird.f32 %v4429_v18 }
 0x1a9   : > { %v3017_v16 = vpop.eup %3016  ;;  %v4496_v4 = vadd.f32 1.0, %v3015_v11  ;;  %v2203_v40 = vsel %vm2202_vm7, %v4421_v47, %v2199_v60  ;;  %v1732_v27 = vsub.f32 1.0, %v1731_v7  ;;  %vm1735_vm9 = vweird.f32 %v4392_v38 }
 0x1aa   : > { %v4500_v13 = vadd.f32 1.0, %v3017_v16  ;;  %v2208_v52 = vsel %vm4479_vm6, %v2207_v37, %v2203_v40  ;;  %v1333_v9 = vmul.f32 1.442695, %v1214_v42  ;;  %v1271_v56 = vmul.f32 1.442695, %v1183_v45  ;;  %vm1737_vm11 = vmor %vm1735_vm9, %vm1736_vm8  ;;  %v873_v45 = vpop.f32.mrf.mxu3  ;;  %v796_v16 = vpop.f32.mrf.mxu1 }
 0x1ab   : > { %3018 = vrcp.f32 %v4496_v4  ;;  %v2427_v24 = vmul.f32 %v2208_v52, %v1135_v17  ;;  %v1733_v28 = vmul.f32 %v4429_v18, %v1732_v27  ;;  %vm4509_vm10 = vcmp.eq.f32.partialorder %v1739_v54, 8.507059e+37  ;;  %v619_v40 = vpop.f32.mrf.mxu0 }
 0x1ac   : > { %3020 = vrcp.f32 %v4500_v13  ;;  %v2211_v48 = vmul.f32 %v4477_v31, %v4442_v30  ;;  %v1742_v41 = vor.u32 1.1754944e-38, %v1741_v10  ;;  %v1137_v20 = vadd.f32 %v3280_v34, %v1003_v12 }
 0x1ad   : > { %2491 = vst [vmem:[%s3368_s19 + $0x1a0] sm:$0xff] %v2427_v24  ;;  %3022 = vpow2.f32 %v1333_v9  ;;  %v1734_v32 = vadd.f32 %v4429_v18, %v1733_v28  ;;  %v2219_v33 = vand.u32 2147483647, %v4442_v30  ;;  %v2221_v21 = vand.u32 2147483648, %v4442_v30 }
 0x1ae   : > { %3024 = vpow2.f32 %v1271_v56  ;;  %v2212_v38 = vsub.f32 1.0, %v2211_v48  ;;  %vm2215_vm12 = vweird.f32 %v4442_v30  ;;  %v1010_v39 = vmul.f32 %v3259_v2, %v871_v50 }
 0x1af   : > { %v1738_v19 = vsel %vm1737_vm11, %v4429_v18, %v1734_v32  ;;  %v948_v44 = vmul.f32 %v3259_v2, %v793_v29  ;;  %vm2216_vm13 = vweird.f32 %v4477_v31  ;;  %v941_v43 = vmul.f32 %v3271_v23, %v617_v36 }
 0x1b0   : > { %v1743_v49 = vsel %vm4509_vm10, %v1742_v41, %v1738_v19  ;;  %v2213_v14 = vmul.f32 %v4477_v31, %v2212_v38  ;;  %vm4531_vm14 = vcmp.eq.f32.partialorder %v2219_v33, 8.507059e+37  ;;  %v1144_v55 = vadd.f32 %v3261_v3, %v1010_v39  ;;  %vm2217_vm0 = vmor %vm2215_vm12, %vm2216_vm13  ;;  %v699_v38 = vpop.f32.mrf.mxu2 }
 0x1b1   : > { %v4529_v35 = vpop.eup %3018  ;;  %v2396_v51 = vmul.f32 %v1743_v49, %v1073_v6  ;;  %v1082_v17 = vadd.f32 %v3261_v3, %v948_v44  ;;  %v2222_v46 = vor.u32 1.1754944e-38, %v2221_v21  ;;  %v1746_v62 = vmul.f32 %v4485_v53, %v4446_v0 }
 0x1b2   : > { %v4537_v8 = vpop.eup %3020  ;;  %v2214_v22 = vadd.f32 %v4477_v31, %v2213_v14  ;;  %vm1750_vm15 = vweird.f32 %v4446_v0  ;;  %v1215_v25 = vsub.f32 0.0, %v1144_v55  ;;  %v1754_v57 = vand.u32 2147483647, %v4446_v0 }
 0x1b3   : > { %v3023_v58 = vpop.eup %3022  ;;  %2460 = vst [vmem:[%s3368_s19 + $0xa8] sm:$0xff] %v2396_v51  ;;  %v1184_v26 = vsub.f32 0.0, %v1082_v17  ;;  %v1756_v63 = vand.u32 2147483648, %v4446_v0  ;;  %v1747_v5 = vsub.f32 1.0, %v1746_v62  ;;  %v1005_v60 = vmul.f32 %v3271_v23, %v697_v61 }
 0x1b4   : > { %v3025_v15 = vpop.eup %3024  ;;  %v4550_v59 = vadd.f32 1.0, %v3023_v58  ;;  %v2218_v1 = vsel %vm2217_vm0, %v4477_v31, %v2214_v22  ;;  %v1335_v6 = vmul.f32 1.442695, %v1215_v25  ;;  %vm1751_vm1 = vweird.f32 %v4485_v53 }
 0x1b5   : > { %v4554_v37 = vadd.f32 1.0, %v3025_v15  ;;  %v2223_v30 = vsel %vm4531_vm14, %v2222_v46, %v2218_v1  ;;  %v1273_v7 = vmul.f32 1.442695, %v1184_v26  ;;  %v1748_v42 = vmul.f32 %v4485_v53, %v1747_v5  ;;  %vm1752_vm3 = vmor %vm1750_vm15, %vm1751_vm1  ;;  %v876_v15 = vpop.f32.mrf.mxu3  ;;  %v798_v1 = vpop.f32.mrf.mxu1 }
 0x1b6   : > { %3026 = vrcp.f32 %v4550_v59  ;;  %v2428_v11 = vmul.f32 %v2223_v30, %v1137_v20  ;;  %v1075_v31 = vadd.f32 %v3280_v34, %v941_v43  ;;  %vm4563_vm2 = vcmp.eq.f32.partialorder %v1754_v57, 8.507059e+37 }
 0x1b7   : > { %3028 = vrcp.f32 %v4554_v37  ;;  %v2226_v10 = vmul.f32 %v4529_v35, %v4496_v4  ;;  %v1749_v27 = vadd.f32 %v4485_v53, %v1748_v42  ;;  %v1757_v12 = vor.u32 1.1754944e-38, %v1756_v63 }
 0x1b8   : > { %2492 = vst [vmem:[%s3368_s19 + $0x1a8] sm:$0xff] %v2428_v11  ;;  %3030 = vpow2.f32 %v1335_v6  ;;  %v1139_v52 = vadd.f32 %v3280_v34, %v1005_v60  ;;  %v2234_v56 = vand.u32 2147483647, %v4496_v4  ;;  %v2236_v24 = vand.u32 2147483648, %v4496_v4  ;;  %v622_v6 = vpop.f32.mrf.mxu0 }
 0x1b9   : > { %3032 = vpow2.f32 %v1273_v7  ;;  %v2227_v9 = vsub.f32 1.0, %v2226_v10  ;;  %v1753_v28 = vsel %vm1752_vm3, %v4485_v53, %v1749_v27  ;;  %v1012_v47 = vmul.f32 %v3259_v2, %v873_v45 }
 0x1ba   : > { %v950_v48 = vmul.f32 %v3259_v2, %v796_v16  ;;  %v943_v50 = vmul.f32 %v3271_v23, %v619_v40  ;;  %v1758_v29 = vsel %vm4563_vm2, %v1757_v12, %v1753_v28  ;;  %vm2230_vm4 = vweird.f32 %v4496_v4 }
 0x1bb   : > { %v2228_v0 = vmul.f32 %v4529_v35, %v2227_v9  ;;  %vm2231_vm5 = vweird.f32 %v4529_v35  ;;  %v2397_v41 = vmul.f32 %v1758_v29, %v1075_v31  ;;  %vm4587_vm6 = vcmp.eq.f32.partialorder %v2234_v56, 8.507059e+37 }
 0x1bc   : > { %v4585_v32 = vpop.eup %3026  ;;  %v1146_v20 = vadd.f32 %v3261_v3, %v1012_v47  ;;  %v1084_v36 = vadd.f32 %v3261_v3, %v950_v48  ;;  %v2237_v19 = vor.u32 1.1754944e-38, %v2236_v24  ;;  %v1077_v39 = vadd.f32 %v3280_v34, %v943_v50  ;;  %vm2232_vm7 = vmor %vm2230_vm4, %vm2231_vm5  ;;  %v702_v47 = vpop.f32.mrf.mxu2 }
 0x1bd   : > { %v4593_v33 = vpop.eup %3028  ;;  %v2229_v21 = vadd.f32 %v4529_v35, %v2228_v0  ;;  %v1761_v44 = vmul.f32 %v4537_v8, %v4500_v13  ;;  %2461 = vst [vmem:[%s3368_s19 + $0xb0] sm:$0xff] %v2397_v41  ;;  %v1769_v51 = vand.u32 2147483647, %v4500_v13  ;;  %v1771_v18 = vand.u32 2147483648, %v4500_v13 }
 0x1be   : > { %v3031_v49 = vpop.eup %3030  ;;  %v1216_v14 = vsub.f32 0.0, %v1146_v20  ;;  %v1185_v43 = vsub.f32 0.0, %v1084_v36  ;;  %v1007_v62 = vmul.f32 %v3271_v23, %v699_v38  ;;  %vm1766_vm8 = vweird.f32 %v4537_v8 }
 0x1bf   : > { %v3033_v55 = vpop.eup %3032  ;;  %v4604_v17 = vadd.f32 1.0, %v3031_v49  ;;  %v2233_v22 = vsel %vm2232_vm7, %v4529_v35, %v2229_v21  ;;  %v1762_v46 = vsub.f32 1.0, %v1761_v44  ;;  %vm1765_vm9 = vweird.f32 %v4500_v13 }
 0x1c0   : > { %v4608_v61 = vadd.f32 1.0, %v3033_v55  ;;  %v2238_v4 = vsel %vm4587_vm6, %v2237_v19, %v2233_v22  ;;  %v1337_v58 = vmul.f32 1.442695, %v1216_v14  ;;  %v1275_v25 = vmul.f32 1.442695, %v1185_v43  ;;  %vm1767_vm11 = vmor %vm1765_vm9, %vm1766_vm8  ;;  %v878_v43 = vpop.f32.mrf.mxu3  ;;  %v801_v55 = vpop.f32.mrf.mxu1 }
 0x1c1   : > { %3034 = vrcp.f32 %v4604_v17  ;;  %v2429_v26 = vmul.f32 %v2238_v4, %v1139_v52  ;;  %v1763_v57 = vmul.f32 %v4537_v8, %v1762_v46  ;;  %vm4617_vm10 = vcmp.eq.f32.partialorder %v1769_v51, 8.507059e+37  ;;  %v624_v22 = vpop.f32.mrf.mxu0 }
 0x1c2   : > { %3036 = vrcp.f32 %v4608_v61  ;;  %v2241_v63 = vmul.f32 %v4585_v32, %v4550_v59  ;;  %v1772_v60 = vor.u32 1.1754944e-38, %v1771_v18  ;;  %v1141_v30 = vadd.f32 %v3280_v34, %v1007_v62 }
 0x1c3   : > { %2493 = vst [vmem:[%s3368_s19 + $0x1b0] sm:$0xff] %v2429_v26  ;;  %3038 = vpow2.f32 %v1337_v58  ;;  %v1764_v5 = vadd.f32 %v4537_v8, %v1763_v57  ;;  %v2249_v7 = vand.u32 2147483647, %v4550_v59  ;;  %v2251_v11 = vand.u32 2147483648, %v4550_v59 }
 0x1c4   : > { %3040 = vpow2.f32 %v1275_v25  ;;  %v2242_v13 = vsub.f32 1.0, %v2241_v63  ;;  %vm2245_vm12 = vweird.f32 %v4550_v59  ;;  %v1014_v45 = vmul.f32 %v3259_v2, %v876_v15 }
 0x1c5   : > { %v1768_v42 = vsel %vm1767_vm11, %v4537_v8, %v1764_v5  ;;  %v952_v31 = vmul.f32 %v3259_v2, %v798_v1  ;;  %vm2246_vm13 = vweird.f32 %v4585_v32  ;;  %v945_v16 = vmul.f32 %v3271_v23, %v622_v6 }
 0x1c6   : > { %v1773_v54 = vsel %vm4617_vm10, %v1772_v60, %v1768_v42  ;;  %v2243_v10 = vmul.f32 %v4585_v32, %v2242_v13  ;;  %vm4639_vm14 = vcmp.eq.f32.partialorder %v2249_v7, 8.507059e+37  ;;  %v1148_v12 = vadd.f32 %v3261_v3, %v1014_v45  ;;  %vm2247_vm0 = vmor %vm2245_vm12, %vm2246_vm13  ;;  %v704_v13 = vpop.f32.mrf.mxu2 }
 0x1c7   : > { %v4637_v40 = vpop.eup %3034  ;;  %v2398_v27 = vmul.f32 %v1773_v54, %v1077_v39  ;;  %v1086_v52 = vadd.f32 %v3261_v3, %v952_v31  ;;  %v2252_v24 = vor.u32 1.1754944e-38, %v2251_v11  ;;  %v1776_v28 = vmul.f32 %v4593_v33, %v4554_v37 }
 0x1c8   : > { %v4645_v9 = vpop.eup %3036  ;;  %v2244_v56 = vadd.f32 %v4585_v32, %v2243_v10  ;;  %vm1780_vm15 = vweird.f32 %v4554_v37  ;;  %v1217_v50 = vsub.f32 0.0, %v1148_v12  ;;  %v1784_v0 = vand.u32 2147483647, %v4554_v37 }
 0x1c9   : > { %v3039_v48 = vpop.eup %3038  ;;  %2462 = vst [vmem:[%s3368_s19 + $0xb8] sm:$0xff] %v2398_v27  ;;  %v1186_v29 = vsub.f32 0.0, %v1086_v52  ;;  %v1786_v41 = vand.u32 2147483648, %v4554_v37  ;;  %v1777_v38 = vsub.f32 1.0, %v1776_v28  ;;  %v1009_v21 = vmul.f32 %v3271_v23, %v702_v47 }
 0x1ca   : > { %v3041_v53 = vpop.eup %3040  ;;  %v4658_v20 = vadd.f32 1.0, %v3039_v48  ;;  %v2248_v36 = vsel %vm2247_vm0, %v4585_v32, %v2244_v56  ;;  %v1339_v39 = vmul.f32 1.442695, %v1217_v50  ;;  %vm1781_vm1 = vweird.f32 %v4593_v33 }
 0x1cb   : > { %v4662_v19 = vadd.f32 1.0, %v3041_v53  ;;  %v2253_v59 = vsel %vm4639_vm14, %v2252_v24, %v2248_v36  ;;  %v1277_v44 = vmul.f32 1.442695, %v1186_v29  ;;  %v1778_v14 = vmul.f32 %v4593_v33, %v1777_v38  ;;  %vm1782_vm3 = vmor %vm1780_vm15, %vm1781_vm1  ;;  %v881_v53 = vpop.f32.mrf.mxu3  ;;  %v803_v36 = vpop.f32.mrf.mxu1 }
 0x1cc   : > { %3042 = vrcp.f32 %v4658_v20  ;;  %v2430_v49 = vmul.f32 %v2253_v59, %v1141_v30  ;;  %v1079_v32 = vadd.f32 %v3280_v34, %v945_v16  ;;  %vm4671_vm2 = vcmp.eq.f32.partialorder %v1784_v0, 8.507059e+37 }
 0x1cd   : > { %3044 = vrcp.f32 %v4662_v19  ;;  %v2256_v18 = vmul.f32 %v4637_v40, %v4604_v17  ;;  %v1779_v46 = vadd.f32 %v4593_v33, %v1778_v14  ;;  %v1787_v62 = vor.u32 1.1754944e-38, %v1786_v41 }
 0x1ce   : > { %2494 = vst [vmem:[%s3368_s19 + $0x1b8] sm:$0xff] %v2430_v49  ;;  %3046 = vpow2.f32 %v1339_v39  ;;  %v1143_v4 = vadd.f32 %v3280_v34, %v1009_v21  ;;  %v2264_v25 = vand.u32 2147483647, %v4604_v17  ;;  %v2266_v26 = vand.u32 2147483648, %v4604_v17  ;;  %v627_v39 = vpop.f32.mrf.mxu0 }
 0x1cf   : > { %3048 = vpow2.f32 %v1277_v44  ;;  %v2257_v58 = vsub.f32 1.0, %v2256_v18  ;;  %v1783_v57 = vsel %vm1782_vm3, %v4593_v33, %v1779_v46  ;;  %v1016_v35 = vmul.f32 %v3259_v2, %v878_v43 }
 0x1d0   : > { %v954_v63 = vmul.f32 %v3259_v2, %v801_v55  ;;  %v947_v15 = vmul.f32 %v3271_v23, %v624_v22  ;;  %v1788_v1 = vsel %vm4671_vm2, %v1787_v62, %v1783_v57  ;;  %vm2260_vm4 = vweird.f32 %v4604_v17 }
 0x1d1   : > { %v2258_v37 = vmul.f32 %v4637_v40, %v2257_v58  ;;  %vm2261_vm5 = vweird.f32 %v4637_v40  ;;  %v2399_v60 = vmul.f32 %v1788_v1, %v1079_v32  ;;  %vm4695_vm6 = vcmp.eq.f32.partialorder %v2264_v25, 8.507059e+37 }
 0x1d2   : > { %v4693_v5 = vpop.eup %3042  ;;  %v1150_v30 = vadd.f32 %v3261_v3, %v1016_v35  ;;  %v1088_v6 = vadd.f32 %v3261_v3, %v954_v63  ;;  %v2267_v42 = vor.u32 1.1754944e-38, %v2266_v26  ;;  %v1081_v45 = vadd.f32 %v3280_v34, %v947_v15  ;;  %vm2262_vm7 = vmor %vm2260_vm4, %vm2261_vm5  ;;  %v707_v35 = vpop.f32.mrf.mxu2 }
 0x1d3   : > { %v4701_v7 = vpop.eup %3044  ;;  %v2259_v11 = vadd.f32 %v4637_v40, %v2258_v37  ;;  %v1791_v31 = vmul.f32 %v4645_v9, %v4608_v61  ;;  %2463 = vst [vmem:[%s3368_s19 + $0xc0] sm:$0xff] %v2399_v60  ;;  %v1799_v27 = vand.u32 2147483647, %v4608_v61  ;;  %v1801_v8 = vand.u32 2147483648, %v4608_v61 }
 0x1d4   : > { %v3047_v54 = vpop.eup %3046  ;;  %v1218_v10 = vsub.f32 0.0, %v1150_v30  ;;  %v1187_v16 = vsub.f32 0.0, %v1088_v6  ;;  %v1011_v28 = vmul.f32 %v3271_v23, %v704_v13  ;;  %vm1796_vm8 = vweird.f32 %v4645_v9 }
 0x1d5   : > { %v3049_v12 = vpop.eup %3048  ;;  %v4712_v52 = vadd.f32 1.0, %v3047_v54  ;;  %v2263_v56 = vsel %vm2262_vm7, %v4637_v40, %v2259_v11  ;;  %v1792_v24 = vsub.f32 1.0, %v1791_v31  ;;  %vm1795_vm9 = vweird.f32 %v4608_v61 }
 0x1d6   : > { %v4716_v47 = vadd.f32 1.0, %v3049_v12  ;;  %v2268_v17 = vsel %vm4695_vm6, %v2267_v42, %v2263_v56  ;;  %v1341_v48 = vmul.f32 1.442695, %v1218_v10  ;;  %v1279_v50 = vmul.f32 1.442695, %v1187_v16  ;;  %vm1797_vm11 = vmor %vm1795_vm9, %vm1796_vm8  ;;  %v883_v16 = vpop.f32.mrf.mxu3  ;;  %v806_v12 = vpop.f32.mrf.mxu1 }
 0x1d7   : > { %3050 = vrcp.f32 %v4712_v52  ;;  %v2431_v29 = vmul.f32 %v2268_v17, %v1143_v4  ;;  %v1793_v0 = vmul.f32 %v4645_v9, %v1792_v24  ;;  %vm4725_vm10 = vcmp.eq.f32.partialorder %v1799_v27, 8.507059e+37  ;;  %v629_v56 = vpop.f32.mrf.mxu0 }
 0x1d8   : > { %3052 = vrcp.f32 %v4716_v47  ;;  %v2271_v41 = vmul.f32 %v4693_v5, %v4658_v20  ;;  %v1802_v21 = vor.u32 1.1754944e-38, %v1801_v8  ;;  %v1145_v59 = vadd.f32 %v3280_v34, %v1011_v28 }
 0x1d9   : > { %2495 = vst [vmem:[%s3368_s19 + $0x1c0] sm:$0xff] %v2431_v29  ;;  %3054 = vpow2.f32 %v1341_v48  ;;  %v1794_v38 = vadd.f32 %v4645_v9, %v1793_v0  ;;  %v2279_v44 = vand.u32 2147483647, %v4658_v20  ;;  %v2281_v49 = vand.u32 2147483648, %v4658_v20 }
 0x1da   : > { %3056 = vpow2.f32 %v1279_v50  ;;  %v2272_v61 = vsub.f32 1.0, %v2271_v41  ;;  %vm2275_vm12 = vweird.f32 %v4658_v20  ;;  %v1018_v43 = vmul.f32 %v3259_v2, %v881_v53 }
 0x1db   : > { %v1798_v14 = vsel %vm1797_vm11, %v4645_v9, %v1794_v38  ;;  %v956_v32 = vmul.f32 %v3259_v2, %v803_v36  ;;  %vm2276_vm13 = vweird.f32 %v4693_v5  ;;  %v949_v55 = vmul.f32 %v3271_v23, %v627_v39 }
 0x1dc   : > { %v1803_v51 = vsel %vm4725_vm10, %v1802_v21, %v1798_v14  ;;  %v2273_v18 = vmul.f32 %v4693_v5, %v2272_v61  ;;  %vm4747_vm14 = vcmp.eq.f32.partialorder %v2279_v44, 8.507059e+37  ;;  %v1152_v62 = vadd.f32 %v3261_v3, %v1018_v43  ;;  %vm2277_vm0 = vmor %vm2275_vm12, %vm2276_vm13  ;;  %v709_v61 = vpop.f32.mrf.mxu2 }
 0x1dd   : > { %v4745_v22 = vpop.eup %3050  ;;  %v2400_v46 = vmul.f32 %v1803_v51, %v1081_v45  ;;  %v1090_v4 = vadd.f32 %v3261_v3, %v956_v32  ;;  %v2282_v26 = vor.u32 1.1754944e-38, %v2281_v49  ;;  %v1806_v57 = vmul.f32 %v4701_v7, %v4662_v19 }
 0x1de   : > { %v4753_v58 = vpop.eup %3052  ;;  %v2274_v25 = vadd.f32 %v4693_v5, %v2273_v18  ;;  %vm1810_vm15 = vweird.f32 %v4662_v19  ;;  %v1219_v15 = vsub.f32 0.0, %v1152_v62  ;;  %v1814_v37 = vand.u32 2147483647, %v4662_v19 }
 0x1df   : > { %v3055_v63 = vpop.eup %3054  ;;  %2464 = vst [vmem:[%s3368_s19 + $0xc8] sm:$0xff] %v2400_v46  ;;  %v1188_v1 = vsub.f32 0.0, %v1090_v4  ;;  %v1816_v60 = vand.u32 2147483648, %v4662_v19  ;;  %v1807_v13 = vsub.f32 1.0, %v1806_v57  ;;  %v1013_v11 = vmul.f32 %v3271_v23, %v707_v35 }
 0x1e0   : > { %v3057_v33 = vpop.eup %3056  ;;  %v4766_v30 = vadd.f32 1.0, %v3055_v63  ;;  %v2278_v6 = vsel %vm2277_vm0, %v4693_v5, %v2274_v25  ;;  %v1343_v45 = vmul.f32 1.442695, %v1219_v15  ;;  %vm1811_vm1 = vweird.f32 %v4701_v7 }
 0x1e1   : > { %v4770_v42 = vadd.f32 1.0, %v3057_v33  ;;  %v2283_v20 = vsel %vm4747_vm14, %v2282_v26, %v2278_v6  ;;  %v1281_v31 = vmul.f32 1.442695, %v1188_v1  ;;  %v1808_v10 = vmul.f32 %v4701_v7, %v1807_v13  ;;  %vm1812_vm3 = vmor %vm1810_vm15, %vm1811_vm1  ;;  %v808_v6 = vpop.f32.mrf.mxu1  ;;  %v632_v13 = vpop.f32.mrf.mxu0 }
 0x1e2   : > { %3058 = vrcp.f32 %v4766_v30  ;;  %v2432_v54 = vmul.f32 %v2283_v20, %v1145_v59  ;;  %v1083_v5 = vadd.f32 %v3280_v34, %v949_v55  ;;  %vm4779_vm2 = vcmp.eq.f32.partialorder %v1814_v37, 8.507059e+37 }
 0x1e3   : > { %3060 = vrcp.f32 %v4770_v42  ;;  %v2286_v8 = vmul.f32 %v4745_v22, %v4712_v52  ;;  %v1809_v24 = vadd.f32 %v4701_v7, %v1808_v10  ;;  %v1817_v28 = vor.u32 1.1754944e-38, %v1816_v60  ;;  %v886_v60 = vpop.f32.mrf.mxu3 }
 0x1e4   : > { %2496 = vst [vmem:[%s3368_s19 + $0x1c8] sm:$0xff] %v2432_v54  ;;  %3062 = vpow2.f32 %v1343_v45  ;;  %v1147_v17 = vadd.f32 %v3280_v34, %v1013_v11  ;;  %v2294_v50 = vand.u32 2147483647, %v4712_v52  ;;  %v2296_v29 = vand.u32 2147483648, %v4712_v52 }
 0x1e5   : > { %3064 = vpow2.f32 %v1281_v31  ;;  %v2287_v48 = vsub.f32 1.0, %v2286_v8  ;;  %v1813_v0 = vsel %vm1812_vm3, %v4701_v7, %v1809_v24  ;;  %v1020_v40 = vmul.f32 %v3259_v2, %v883_v16 }
 0x1e6   : > { %v958_v41 = vmul.f32 %v3259_v2, %v806_v12  ;;  %v951_v53 = vmul.f32 %v3271_v23, %v629_v56  ;;  %v1818_v36 = vsel %vm4779_vm2, %v1817_v28, %v1813_v0  ;;  %vm2290_vm4 = vweird.f32 %v4712_v52 }
 0x1e7   : > { %v2288_v19 = vmul.f32 %v4745_v22, %v2287_v48  ;;  %vm2291_vm5 = vweird.f32 %v4745_v22  ;;  %v2401_v21 = vmul.f32 %v1818_v36, %v1083_v5  ;;  %vm4803_vm6 = vcmp.eq.f32.partialorder %v2294_v50, 8.507059e+37 }
 0x1e8   : > { %v4801_v38 = vpop.eup %3058  ;;  %v1154_v59 = vadd.f32 %v3261_v3, %v1020_v40  ;;  %v1092_v39 = vadd.f32 %v3261_v3, %v958_v41  ;;  %v2297_v14 = vor.u32 1.1754944e-38, %v2296_v29  ;;  %v1085_v43 = vadd.f32 %v3280_v34, %v951_v53  ;;  %vm2292_vm7 = vmor %vm2290_vm4, %vm2291_vm5 }
 0x1e9   : > { %v4809_v44 = vpop.eup %3060  ;;  %v2289_v49 = vadd.f32 %v4745_v22, %v2288_v19  ;;  %v1821_v32 = vmul.f32 %v4753_v58, %v4716_v47  ;;  %2465 = vst [vmem:[%s3368_s19 + $0xd0] sm:$0xff] %v2401_v21  ;;  %v1829_v46 = vand.u32 2147483647, %v4716_v47  ;;  %v1831_v9 = vand.u32 2147483648, %v4716_v47  ;;  %v712_v21 = vpop.f32.mrf.mxu2 }
 0x1ea   : > { %v3063_v51 = vpop.eup %3062  ;;  %v1220_v18 = vsub.f32 0.0, %v1154_v59  ;;  %v1189_v55 = vsub.f32 0.0, %v1092_v39  ;;  %v1015_v57 = vmul.f32 %v3271_v23, %v709_v61  ;;  %vm1826_vm8 = vweird.f32 %v4753_v58 }
 0x1eb   : > { %v3065_v62 = vpop.eup %3064  ;;  %v4820_v4 = vadd.f32 1.0, %v3063_v51  ;;  %v2293_v25 = vsel %vm2292_vm7, %v4745_v22, %v2289_v49  ;;  %v1822_v26 = vsub.f32 1.0, %v1821_v32  ;;  %vm1825_vm9 = vweird.f32 %v4716_v47 }
 0x1ec   : > { %v4824_v35 = vadd.f32 1.0, %v3065_v62  ;;  %v2298_v52 = vsel %vm4803_vm6, %v2297_v14, %v2293_v25  ;;  %v1345_v63 = vmul.f32 1.442695, %v1220_v18  ;;  %v1283_v15 = vmul.f32 1.442695, %v1189_v55  ;;  %vm1827_vm11 = vmor %vm1825_vm9, %vm1826_vm8  ;;  %v634_v55 = vpop.f32.mrf.mxu0  ;;  %v888_v62 = vpop.f32.mrf.mxu3 }
 0x1ed   : > { %3066 = vrcp.f32 %v4820_v4  ;;  %v2433_v1 = vmul.f32 %v2298_v52, %v1147_v17  ;;  %v1823_v37 = vmul.f32 %v4753_v58, %v1822_v26  ;;  %vm4833_vm10 = vcmp.eq.f32.partialorder %v1829_v46, 8.507059e+37 }
 0x1ee   : > { %3068 = vrcp.f32 %v4824_v35  ;;  %v2301_v33 = vmul.f32 %v4801_v38, %v4766_v30  ;;  %v1832_v20 = vor.u32 1.1754944e-38, %v1831_v9  ;;  %v1149_v45 = vadd.f32 %v3280_v34, %v1015_v57 }
 0x1ef   : > { %2497 = vst [vmem:[%s3368_s19 + $0x1d0] sm:$0xff] %v2433_v1  ;;  %3070 = vpow2.f32 %v1345_v63  ;;  %v1824_v11 = vadd.f32 %v4753_v58, %v1823_v37  ;;  %v2309_v47 = vand.u32 2147483647, %v4766_v30  ;;  %v2311_v54 = vand.u32 2147483648, %v4766_v30 }
 0x1f0   : > { %3072 = vpow2.f32 %v1283_v15  ;;  %v2302_v31 = vsub.f32 1.0, %v2301_v33  ;;  %vm2305_vm12 = vweird.f32 %v4766_v30  ;;  %v1022_v16 = vmul.f32 %v3259_v2, %v886_v60 }
 0x1f1   : > { %v1828_v10 = vsel %vm1827_vm11, %v4753_v58, %v1824_v11  ;;  %v960_v5 = vmul.f32 %v3259_v2, %v808_v6  ;;  %vm2306_vm13 = vweird.f32 %v4801_v38  ;;  %v953_v12 = vmul.f32 %v3271_v23, %v632_v13 }
 0x1f2   : > { %v1833_v27 = vsel %vm4833_vm10, %v1832_v20, %v1828_v10  ;;  %v2303_v8 = vmul.f32 %v4801_v38, %v2302_v31  ;;  %vm4855_vm14 = vcmp.eq.f32.partialorder %v2309_v47, 8.507059e+37  ;;  %v1156_v28 = vadd.f32 %v3261_v3, %v1022_v16  ;;  %vm2307_vm0 = vmor %vm2305_vm12, %vm2306_vm13 }
 0x1f3   : > { %v4853_v56 = vpop.eup %3066  ;;  %v2402_v24 = vmul.f32 %v1833_v27, %v1085_v43  ;;  %v1094_v17 = vadd.f32 %v3261_v3, %v960_v5  ;;  %v2312_v29 = vor.u32 1.1754944e-38, %v2311_v54  ;;  %v1836_v0 = vmul.f32 %v4809_v44, %v4770_v42  ;;  %v714_v5 = vpop.f32.mrf.mxu2 }
 0x1f4   : > { %v4861_v48 = vpop.eup %3068  ;;  %v2304_v50 = vadd.f32 %v4801_v38, %v2303_v8  ;;  %vm1840_vm15 = vweird.f32 %v4770_v42  ;;  %v1221_v41 = vsub.f32 0.0, %v1156_v28  ;;  %v1844_v36 = vand.u32 2147483647, %v4770_v42 }
 0x1f5   : > { %v3071_v40 = vpop.eup %3070  ;;  %2466 = vst [vmem:[%s3368_s19 + $0xd8] sm:$0xff] %v2402_v24  ;;  %v1190_v53 = vsub.f32 0.0, %v1094_v17  ;;  %v1846_v19 = vand.u32 2147483648, %v4770_v42  ;;  %v1837_v61 = vsub.f32 1.0, %v1836_v0  ;;  %v1017_v49 = vmul.f32 %v3271_v23, %v712_v21 }
 0x1f6   : > { %v3073_v7 = vpop.eup %3072  ;;  %v4872_v59 = vadd.f32 1.0, %v3071_v40  ;;  %v2308_v39 = vsel %vm2307_vm0, %v4801_v38, %v2304_v50  ;;  %v1347_v43 = vmul.f32 1.442695, %v1221_v41  ;;  %vm1841_vm1 = vweird.f32 %v4809_v44 }
 0x1f7   : > { %v4876_v14 = vadd.f32 1.0, %v3073_v7  ;;  %v2313_v30 = vsel %vm4855_vm14, %v2312_v29, %v2308_v39  ;;  %v1285_v32 = vmul.f32 1.442695, %v1190_v53  ;;  %v1838_v18 = vmul.f32 %v4809_v44, %v1837_v61  ;;  %vm1842_vm3 = vmor %vm1840_vm15, %vm1841_vm1  ;;  %v637_v29 = vpop.f32.mrf.mxu0 }
 0x1f8   : > { %3074 = vrcp.f32 %v4872_v59  ;;  %v2434_v51 = vmul.f32 %v2313_v30, %v1149_v45  ;;  %v1087_v38 = vadd.f32 %v3280_v34, %v953_v12  ;;  %vm4885_vm2 = vcmp.eq.f32.partialorder %v1844_v36, 8.507059e+37 }
 0x1f9   : > { %3076 = vrcp.f32 %v4876_v14  ;;  %v2316_v9 = vmul.f32 %v4853_v56, %v4820_v4  ;;  %v1839_v25 = vadd.f32 %v4809_v44, %v1838_v18  ;;  %v1847_v26 = vor.u32 1.1754944e-38, %v1846_v19 }
 0x1fa   : > { %2498 = vst [vmem:[%s3368_s19 + $0x1d8] sm:$0xff] %v2434_v51  ;;  %3078 = vpow2.f32 %v1347_v43  ;;  %v1151_v57 = vadd.f32 %v3280_v34, %v1017_v49  ;;  %v2324_v63 = vand.u32 2147483647, %v4820_v4  ;;  %v2326_v15 = vand.u32 2147483648, %v4820_v4 }
 0x1fb   : > { %3080 = vpow2.f32 %v1285_v32  ;;  %v2317_v52 = vsub.f32 1.0, %v2316_v9  ;;  %v1843_v1 = vsel %vm1842_vm3, %v4809_v44, %v1839_v25  ;;  %v1024_v37 = vmul.f32 %v3259_v2, %v888_v62  ;;  %v717_v9 = vpop.f32.mrf.mxu2 }
 0x1fc   : > { %v955_v60 = vmul.f32 %v3271_v23, %v634_v55  ;;  %v1851_v22 = vmul.f32 %v4861_v48, %v4824_v35  ;;  %v1848_v33 = vsel %vm4885_vm2, %v1847_v26, %v1843_v1  ;;  %vm2320_vm4 = vweird.f32 %v4820_v4 }
 0x1fd   : > { %v2318_v42 = vmul.f32 %v4853_v56, %v2317_v52  ;;  %vm2321_vm5 = vweird.f32 %v4853_v56  ;;  %v2403_v44 = vmul.f32 %v1848_v33, %v1087_v38  ;;  %vm4910_vm6 = vcmp.eq.f32.partialorder %v2324_v63, 8.507059e+37 }
 0x1fe   : > { %v4908_v6 = vpop.eup %3074  ;;  %v1158_v13 = vadd.f32 %v3261_v3, %v1024_v37  ;;  %v1852_v11 = vsub.f32 1.0, %v1851_v22  ;;  %v2327_v31 = vor.u32 1.1754944e-38, %v2326_v15  ;;  %v1089_v47 = vadd.f32 %v3280_v34, %v955_v60  ;;  %vm2322_vm8 = vmor %vm2320_vm4, %vm2321_vm5 }
 0x1ff   : > { %v4915_v20 = vpop.eup %3076  ;;  %v2319_v45 = vadd.f32 %v4853_v56, %v2318_v42  ;;  %vm1856_vm7 = vweird.f32 %v4861_v48  ;;  %2467 = vst [vmem:[%s3368_s19 + $0xe0] sm:$0xff] %v2403_v44  ;;  %v1859_v16 = vand.u32 2147483647, %v4824_v35  ;;  %v1861_v3 = vand.u32 2147483648, %v4824_v35  ;;  %v639_v37 = vpop.f32.mrf.mxu0 }
 0x200   : > { %v3079_v4 = vpop.eup %3078  ;;  %v1222_v54 = vsub.f32 0.0, %v1158_v13  ;;  %v1853_v10 = vmul.f32 %v4861_v48, %v1852_v11  ;;  %vm1855_vm9 = vweird.f32 %v4824_v35  ;;  %v2331_v24 = vmul.f32 %v4908_v6, %v4872_v59 }
 0x201   : > { %v3081_v27 = vpop.eup %3080  ;;  %v4924_v8 = vadd.f32 1.0, %v3079_v4  ;;  %v2323_v12 = vsel %vm2322_vm8, %v4853_v56, %v2319_v45  ;;  %vm1857_vm10 = vmor %vm1855_vm9, %vm1856_vm7  ;;  %v1862_v35 = vor.u32 1.1754944e-38, %v1861_v3  ;;  %v1019_v56 = vmul.f32 %v3271_v23, %v714_v5 }
 0x202   : > { %v4930_v58 = vadd.f32 1.0, %v3081_v27  ;;  %v2328_v28 = vsel %vm4910_vm6, %v2327_v31, %v2323_v12  ;;  %v1349_v17 = vmul.f32 1.442695, %v1222_v54  ;;  %v1854_v50 = vadd.f32 %v4861_v48, %v1853_v10 }
 0x203   : > { %3082 = vrcp.f32 %v4924_v8  ;;  %v2435_v0 = vmul.f32 %v2328_v28, %v1151_v57  ;;  %vm1860_vm11 = vcmp.eq.f32.partialorder %v1859_v16, 8.507059e+37  ;;  %v2332_v41 = vsub.f32 1.0, %v2331_v24 }
 0x204   : > { %3084 = vrcp.f32 %v4930_v58  ;;  %v1858_v40 = vsel %vm1857_vm10, %v4861_v48, %v1854_v50  ;;  %vm2336_vm12 = vweird.f32 %v4908_v6  ;;  %v2339_v36 = vand.u32 2147483647, %v4872_v59 }
 0x205   : > { %2499 = vst [vmem:[%s3368_s19 + $0x1e0] sm:$0xff] %v2435_v0  ;;  %3086 = vpow2.f32 %v1349_v17  ;;  %v1863_v53 = vsel %vm1860_vm11, %v1862_v35, %v1858_v40  ;;  %v2333_v21 = vmul.f32 %v4908_v6, %v2332_v41  ;;  %v2341_v7 = vand.u32 2147483648, %v4872_v59 }
 0x206   : > { %v2404_v19 = vmul.f32 %v1863_v53, %v1089_v47  ;;  %v957_v39 = vmul.f32 %v3271_v23, %v637_v29  ;;  %v1153_v61 = vadd.f32 %v3280_v34, %v1019_v56  ;;  %v1866_v48 = vmul.f32 %v4915_v20, %v4876_v14  ;;  %v719_v29 = vpop.f32.mrf.mxu2 }
 0x207   : > { %v2334_v49 = vadd.f32 %v4908_v6, %v2333_v21  ;;  %vm2335_vm13 = vweird.f32 %v4872_v59  ;;  %vm2340_vm14 = vcmp.eq.f32.partialorder %v2339_v36, 8.507059e+37  ;;  %v1874_v30 = vand.u32 2147483647, %v4876_v14 }
 0x208   : > { %2468 = vst [vmem:[%s3368_s19 + $0xe8] sm:$0xff] %v2404_v19  ;;  %vm2337_vm15 = vmor %vm2335_vm13, %vm2336_vm12  ;;  %v2342_v32 = vor.u32 1.1754944e-38, %v2341_v7  ;;  %v1867_v51 = vsub.f32 1.0, %v1866_v48  ;;  %vm1870_vm0 = vweird.f32 %v4876_v14  ;;  %vm1871_vm1 = vweird.f32 %v4915_v20 }
 0x209   : > { %v3083_v43 = vpop.eup %3082  ;;  %v2338_v55 = vsel %vm2337_vm15, %v4908_v6, %v2334_v49  ;;  %v1091_v38 = vadd.f32 %v3280_v34, %v957_v39  ;;  %v1876_v46 = vand.u32 2147483648, %v4876_v14  ;;  %v1021_v57 = vmul.f32 %v3271_v23, %v717_v9  ;;  %vm1872_vm5 = vmor %vm1870_vm0, %vm1871_vm1 }
 0x20a   : > { %v3085_v18 = vpop.eup %3084  ;;  %v2346_v59 = vmul.f32 %v3083_v43, %v4924_v8  ;;  %v2343_v25 = vsel %vm2340_vm14, %v2342_v32, %v2338_v55  ;;  %v1868_v26 = vmul.f32 %v4915_v20, %v1867_v51  ;;  %vm2350_vm2 = vweird.f32 %v4924_v8 }
 0x20b   : > { %v3087_v62 = vpop.eup %3086  ;;  %v2436_v63 = vmul.f32 %v2343_v25, %v1153_v61  ;;  %vm4963_vm3 = vcmp.eq.f32.partialorder %v1874_v30, 8.507059e+37  ;;  %vm2351_vm4 = vweird.f32 %v3083_v43  ;;  %v2356_v22 = vand.u32 2147483648, %v4924_v8 }
 0x20c   : > { %v1414_v52 = vadd.f32 1.0, %v3087_v62  ;;  %v2347_v1 = vsub.f32 1.0, %v2346_v59  ;;  %v1869_v60 = vadd.f32 %v4915_v20, %v1868_v26  ;;  %v1881_v33 = vmul.f32 %v3085_v18, %v4930_v58  ;;  %vm2352_vm7 = vmor %vm2350_vm2, %vm2351_vm4 }
 0x20d   : > { %2500 = vst [vmem:[%s3368_s19 + $0x1e8] sm:$0xff] %v2436_v63  ;;  %v1877_v42 = vor.u32 1.1754944e-38, %v1876_v46  ;;  %v2354_v44 = vand.u32 2147483647, %v4924_v8  ;;  %v1155_v13 = vadd.f32 %v3280_v34, %v1021_v57  ;;  %v959_v11 = vmul.f32 %v3271_v23, %v639_v37 }
 0x20e   : > { %3088 = vrcp.f32 %v1414_v52  ;;  %v2348_v6 = vmul.f32 %v3083_v43, %v2347_v1  ;;  %v1873_v2 = vsel %vm1872_vm5, %v4915_v20, %v1869_v60  ;;  %v1882_v45 = vsub.f32 1.0, %v1881_v33 }
 0x20f   : > { %v1878_v31 = vsel %vm4963_vm3, %v1877_v42, %v1873_v2  ;;  %v2357_v4 = vor.u32 1.1754944e-38, %v2356_v22  ;;  %vm1886_vm6 = vweird.f32 %v3085_v18  ;;  %v1889_v10 = vand.u32 2147483647, %v4930_v58 }
 0x210   : > { %v2349_v47 = vadd.f32 %v3083_v43, %v2348_v6  ;;  %v2405_v14 = vmul.f32 %v1878_v31, %v1091_v38  ;;  %v1883_v54 = vmul.f32 %v3085_v18, %v1882_v45  ;;  %v1891_v20 = vand.u32 2147483648, %v4930_v58 }
 0x211   : > { %vm2355_vm8 = vcmp.eq.f32.partialorder %v2354_v44, 8.507059e+37  ;;  %vm1885_vm9 = vweird.f32 %v4930_v58  ;;  %v1093_v8 = vadd.f32 %v3280_v34, %v959_v11  ;;  %vm1890_vm11 = vcmp.eq.f32.partialorder %v1889_v10, 8.507059e+37 }
 0x212   : > { %v2353_v16 = vsel %vm2352_vm7, %v3083_v43, %v2349_v47  ;;  %2469 = vst [vmem:[%s3368_s19 + $0xf0] sm:$0xff] %v2405_v14  ;;  %v1884_v5 = vadd.f32 %v3085_v18, %v1883_v54  ;;  %vm1887_vm10 = vmor %vm1885_vm9, %vm1886_vm6  ;;  %v1892_v24 = vor.u32 1.1754944e-38, %v1891_v20  ;;  %v2371_v56 = vand.u32 2147483648, %v1414_v52 }
 0x213   : > { %v2358_v3 = vsel %vm2355_vm8, %v2357_v4, %v2353_v16  ;;  %v1023_v40 = vmul.f32 %v3271_v23, %v719_v29  ;;  %v2369_v41 = vand.u32 2147483647, %v1414_v52  ;;  %vm2365_vm13 = vweird.f32 %v1414_v52 }
 0x214   : > { %v3089_v27 = vpop.eup %3088  ;;  %v2437_v12 = vmul.f32 %v2358_v3, %v1155_v13  ;;  %v1888_v28 = vsel %vm1887_vm10, %v3085_v18, %v1884_v5  ;;  %v2372_v36 = vor.u32 1.1754944e-38, %v2371_v56 }
 0x215   : > { %v2361_v17 = vmul.f32 %v3089_v27, %v1414_v52  ;;  %v1893_v50 = vsel %vm1890_vm11, %v1892_v24, %v1888_v28  ;;  %vm2366_vm12 = vweird.f32 %v3089_v27  ;;  %v1157_v19 = vadd.f32 %v3280_v34, %v1023_v40 }
 0x216   : > { %2501 = vst [vmem:[%s3368_s19 + $0x1f0] sm:$0xff] %v2437_v12  ;;  %v2406_v0 = vmul.f32 %v1893_v50, %v1093_v8  ;;  %vm2367_vm14 = vmor %vm2365_vm13, %vm2366_vm12  ;;  %vm2370_vm15 = vcmp.eq.f32.partialorder %v2369_v41, 8.507059e+37 }
 0x217   : > { %v2362_v35 = vsub.f32 1.0, %v2361_v17 }
 0x218   : > { %2470 = vst [vmem:[%s3368_s19 + $0xf8] sm:$0xff] %v2406_v0 }
 0x219   : > { %v2363_v58 = vmul.f32 %v3089_v27, %v2362_v35 }
 0x21b   : > { %v2364_v53 = vadd.f32 %v3089_v27, %v2363_v58 }
 0x21d   : > { %v2368_v21 = vsel %vm2367_vm14, %v3089_v27, %v2364_v53 }
 0x21e   : > { %v2373_v7 = vsel %vm2370_vm15, %v2372_v36, %v2368_v21 }
 0x21f   : > { %v2438_v39 = vmul.f32 %v2373_v7, %v1157_v19 }
 0x221   : > { %2502 = vst [vmem:[%s3368_s19 + $0x1f8] sm:$0xff] %v2438_v39 }
 0x222 PF: > { %s14_s15 = sadd.s32 1, %s3096_s15  }
 0x223   : > { %p11_p4 = scmp.ge.s32.totalorder %s14_s15, 6  }
 0x225   :  { %13 = sbr.rel (!%p11_p4) target bundleno = 1 (0x1), region = 66 }

</bundles_post_ra>
